<compile_context>
chip_gen: v5e
topology: v5e:2x2
jax: 0.10.0
libtpu: 0.0.40
codegen_flags: <defaults>
</compile_context>

<pallas_src>
import functools
from typing import NamedTuple

import jax
import jax.numpy as jnp
from jax.experimental import pallas as pl
from jax.experimental.pallas import tpu as pltpu


VMEM_LIMIT_BYTES = 32 * 1024 * 1024  # safe on every TPU generation (v7x physical = 64 MiB)


# ---------------- Pallas fused linear kernel: y = act(x @ w + b) ----------------

def _linear_kernel(x_ref, w_ref, b_ref, o_ref, acc_ref, *, activation):
    k = pl.program_id(2)

    @pl.when(k == 0)
    def _():
        acc_ref[...] = jnp.zeros_like(acc_ref)

    acc_ref[...] += jnp.dot(x_ref[...], w_ref[...], preferred_element_type=jnp.float32)

    @pl.when(k == pl.num_programs(2) - 1)
    def _():
        r = acc_ref[...] + b_ref[...]
        if activation == "relu":
            r = jnp.maximum(r, 0.0)
        elif activation == "leaky_relu":          # nn.LeakyReLU() default slope 0.01
            r = jnp.where(r >= 0, r, 0.01 * r)
        o_ref[...] = r.astype(o_ref.dtype)


def _rup(a, m):
    return ((a + m - 1) // m) * m


def _pick_tile(padded, tmax):
    """Largest multiple of 128 <= tmax that divides `padded` (padded is a mult of 128)."""
    for cand in range(min(padded, tmax), 127, -128):
        if padded % cand == 0:
            return cand
    return 128


class PackedLinear(NamedTuple):
    wp: jax.Array     # (Kp, Np) pre-padded weight (f32 or bf16)
    bp: jax.Array     # (1, Np) pre-padded bias (f32)
    K: int
    N: int
    tk: int
    tn: int


def pack_linear(w, b, *, dtype=jnp.float32, tk_max=1024, tn_max=1024):
    """Pre-pad weights/bias once (at init) so pallas_linear never re-pads them."""
    K, N = w.shape
    Kp, Np = _rup(K, 128), _rup(N, 128)
    tk, tn = _pick_tile(Kp, tk_max), _pick_tile(Np, tn_max)
    wp = jnp.pad(w.astype(dtype), ((0, Kp - K), (0, Np - N)))
    bp = jnp.pad(b.astype(jnp.float32), (0, Np - N)).reshape(1, Np)
    return PackedLinear(wp=wp, bp=bp, K=K, N=N, tk=tk, tn=tn)


def pallas_linear(x, packed: PackedLinear, activation="none"):
    """act(x @ W + b) with pre-padded weights. Grid (M, N, K); K innermost accumulates."""
    wp, bp = packed.wp, packed.bp
    K, N, tk, tn = packed.K, packed.N, packed.tk, packed.tn
    Kp, Np = wp.shape
    M = x.shape[0]
    tm = 256 if M > 256 else _rup(M, 8)
    Mp = _rup(M, tm)
    xp = jnp.pad(x.astype(wp.dtype), ((0, Mp - M), (0, Kp - K)))

    kernel = functools.partial(_linear_kernel, activation=activation)
    out = pl.pallas_call(
        kernel,
        out_shape=jax.ShapeDtypeStruct((Mp, Np), jnp.float32),
        grid_spec=pltpu.PrefetchScalarGridSpec(
            num_scalar_prefetch=0,
            grid=(Mp // tm, Np // tn, Kp // tk),
            in_specs=[
                pl.BlockSpec((tm, tk), lambda i, j, k: (i, k)),
                pl.BlockSpec((tk, tn), lambda i, j, k: (k, j)),
                pl.BlockSpec((1, tn), lambda i, j, k: (0, j)),
            ],
            out_specs=pl.BlockSpec((tm, tn), lambda i, j, k: (i, j)),
            scratch_shapes=[pltpu.VMEM((tm, tn), jnp.float32)],
        ),
        compiler_params=pltpu.CompilerParams(
            dimension_semantics=("parallel", "parallel", "arbitrary"),
            vmem_limit_bytes=VMEM_LIMIT_BYTES,
        ),
    )(xp, wp, bp)
    return out[:M, :N]


# ---------------- Conv3d(k=3, s=2, p=1) + ReLU via channels-last im2col + Pallas matmul ----
# TODO(synk): the 27-tap im2col expansion is still materialized by XLA; fusing it into the
# matmul grid would save a few MB of HBM traffic on the 32^3 encoder volumes.

def _im2col_3d_cl(x, k=3, stride=2, pad=1):
    """Channels-last im2col. x: (N, D, H, W, C) -> rows (N*Do*Ho*Wo, k^3*C), tap-major."""
    N, D, H, W, C = x.shape
    xp = jnp.pad(x, ((0, 0), (pad, pad), (pad, pad), (pad, pad), (0, 0)))
    Do = (D + 2 * pad - k) // stride + 1
    Ho = (H + 2 * pad - k) // stride + 1
    Wo = (W + 2 * pad - k) // stride + 1
    cols = []
    for kd in range(k):
        for kh in range(k):
            for kw in range(k):
                cols.append(xp[:,
                               kd:kd + stride * Do:stride,
                               kh:kh + stride * Ho:stride,
                               kw:kw + stride * Wo:stride, :])
    patches = jnp.stack(cols, axis=4)                  # (N, Do, Ho, Wo, 27, C)
    patches = patches.reshape(N * Do * Ho * Wo, k * k * k * C)
    return patches, (N, Do, Ho, Wo)


def pallas_conv3d_s2_relu(x_cl, packed_w):
    patches, (N, Do, Ho, Wo) = _im2col_3d_cl(x_cl)
    y = pallas_linear(patches, packed_w, activation="relu")
    return y.reshape(N, Do, Ho, Wo, -1)


# ---------------- Small dense layers (M == 1): leave to XLA ----------------

def dense(x, w, b, activation="none"):
    y = jnp.dot(x.astype(jnp.float32), w) + b
    if activation == "relu":
        y = jnp.maximum(y, 0.0)
    elif activation == "leaky_relu":
        y = jnp.where(y >= 0, y, 0.01 * y)
    return y


# ---------------- Point-feature helpers ----------------

def _sample_upsampled_points(src_dhwc, out_shape, idx):
    """Value of F.interpolate(src, size=out_shape, trilinear, align_corners=False)
    evaluated only at integer voxel positions `idx` of the upsampled grid."""
    d, h, w, _ = src_dhwc.shape
    scale = jnp.array([d / out_shape[0], h / out_shape[1], w / out_shape[2]], jnp.float32)
    src = (idx.astype(jnp.float32) + 0.5) * scale - 0.5
    src = jnp.maximum(src, 0.0)                               # PyTorch clamps negative to 0
    i0 = jnp.floor(src).astype(jnp.int32)
    max_i = jnp.array([d - 1, h - 1, w - 1], jnp.int32)
    i0 = jnp.minimum(i0, max_i)
    i1 = jnp.minimum(i0 + 1, max_i)
    t = src - i0.astype(jnp.float32)
    td, th, tw = t[:, 0:1], t[:, 1:2], t[:, 2:3]
    out = 0.0
    for dd, wd in ((i0[:, 0], 1.0 - td), (i1[:, 0], td)):
        for hh, wh in ((i0[:, 1], 1.0 - th), (i1[:, 1], th)):
            for ww, wwt in ((i0[:, 2], 1.0 - tw), (i1[:, 2], tw)):
                out = out + src_dhwc[dd, hh, ww] * (wd * wh * wwt)
    return out


def extract_concat_features(dec_dhwc, src_dhwc, center_points):
    """Equivalent of extract_features_with_padding(cat([dec, upsample(src)], ch).permute(DHWC),
    center_points) without materializing the upsampled volume. Returns (P,3,3,3,Cdec+Csrc)."""
    n_pts = center_points.shape[0]
    out_shape = dec_dhwc.shape[:3]
    rel = jnp.arange(-1, 2)
    rel_grid = jnp.stack(jnp.meshgrid(rel, rel, rel, indexing="ij"), axis=-1).reshape(-1, 3)
    idx = (jnp.round(center_points).astype(jnp.int32)[:, None, :] + rel_grid[None]).reshape(-1, 3)
    max_idx = jnp.array(out_shape, jnp.int32) - 1
    idx = jnp.clip(idx, 0, max_idx)
    dec_vals = dec_dhwc[idx[:, 0], idx[:, 1], idx[:, 2]]                 # (P*27, Cdec)
    src_vals = _sample_upsampled_points(src_dhwc, out_shape, idx)        # (P*27, Csrc)
    feat = jnp.concatenate([dec_vals, src_vals], axis=-1)
    return feat.reshape(n_pts, 3, 3, 3, -1)


def calculate_batch_value_at_points(extracted_feature, target_points):
    # Inverse-distance weighted reduction over the 3x3x3 grid — VPU-trivial, one einsum.
    n_pts = extracted_feature.shape[0]
    C = extracted_feature.shape[-1]
    gx, gy, gz = jnp.meshgrid(jnp.arange(3.0), jnp.arange(3.0), jnp.arange(3.0), indexing="ij")
    grid_points = jnp.stack([gx, gy, gz], axis=-1).reshape(1, 27, 3)
    d = jnp.sqrt(((grid_points - target_points[:, None, :]) ** 2).sum(-1))
    w = 1.0 / (d + 1e-6)
    w = w / w.sum(axis=1, keepdims=True)
    vals = extracted_feature.reshape(n_pts, 27, C)
    return jnp.einsum("pk,pkc->pc", w, vals)


# ---------------- Deterministic parameter init ----------------

def _init_linear(key, fan_in, fan_out):
    kw, kb = jax.random.split(key)
    bound = 1.0 / jnp.sqrt(fan_in)
    w = jax.random.uniform(kw, (fan_in, fan_out), jnp.float32, -bound, bound)
    b = jax.random.uniform(kb, (fan_out,), jnp.float32, -bound, bound)
    return w, b


def _init_conv(key, cin, cout, k=3):
    kw, kb = jax.random.split(key)
    fan_in = cin * k ** 3
    bound = 1.0 / jnp.sqrt(fan_in)
    w = jax.random.uniform(kw, (cout, cin, k, k, k), jnp.float32, -bound, bound)
    b = jax.random.uniform(kb, (cout,), jnp.float32, -bound, bound)
    return w, b


def init_params(key, img_size=(32, 32, 32), feature_size=16):
    keys = jax.random.split(key, 32)
    p = {}

    def conv_pack(k, cin, cout):
        w, b = _init_conv(k, cin, cout)
        # channels-last im2col is tap-major -> weight layout (kd,kh,kw,cin,cout)
        w_cl = jnp.transpose(w, (2, 3, 4, 1, 0)).reshape(cin * 27, cout)
        return pack_linear(w_cl, b)                         # padded once at init

    p["fix_encoder_0"] = conv_pack(keys[0], 1, 8)
    p["fix_encoder_1"] = conv_pack(keys[1], 8, 16)
    p["fix_encoder_2"] = conv_pack(keys[2], 16, 32)
    p["fix_encoder_0_tom"] = conv_pack(keys[3], 6, 8)
    p["fix_encoder_1_tom"] = conv_pack(keys[4], 8, 16)
    p["fix_encoder_2_tom"] = conv_pack(keys[5], 16, 32)

    p["real_feature_3"] = _init_linear(keys[6], 64 + 64, 64)
    p["real_feature_2"] = _init_linear(keys[7], 32 + 64, 64)
    p["real_feature_1"] = _init_linear(keys[8], 16 + 32, 128)
    p["real_feature_3_next"] = _init_linear(keys[9], 64 + 64, 64)
    p["real_feature_2_next"] = _init_linear(keys[10], 32 + 64, 64)
    p["real_feature_1_next"] = _init_linear(keys[11], 16 + 32, 128)
    p["encoder_direction_theta_pre"] = _init_linear(keys[12], 6, 128)
    p["encoder_direction_phi_pre"] = _init_linear(keys[13], 6, 128)
    p["position_encoding"] = _init_linear(keys[14], 5, 64)

    # Fused big FC: theta-pre and phi-pre share the same (1, 8864) input -> concat along N,
    # stored bf16 (weight-stream bound), padded once.
    wt, bt = _init_linear(keys[15], 8864, 1024)
    wp_, bp_ = _init_linear(keys[17], 8864, 1024)
    p["fc_pre_fused"] = pack_linear(jnp.concatenate([wt, wp_], axis=1),
                                    jnp.concatenate([bt, bp_], axis=0),
                                    dtype=jnp.bfloat16)
    p["fc_theta"] = _init_linear(keys[16], 1024, 1)
    p["fc_phi"] = _init_linear(keys[18], 1024, 1)

    # TODO(synk): ViT / UnetrBasicBlock / UnetrPrUpBlock / UnetrUpBlock (MONAI) class
    # definitions are not provided with the module, so the UNETR backbone is replaced by
    # deterministic stand-in feature maps with the exact (channels-last) shapes its
    # decoders produce.
    D, H, W = img_size
    p["standin_dec2"] = 0.1 * jax.random.normal(keys[19], (D // 4, H // 4, W // 4, feature_size * 4), jnp.float32)
    p["standin_dec1"] = 0.1 * jax.random.normal(keys[20], (D // 2, H // 2, W // 2, feature_size * 2), jnp.float32)
    p["standin_out"] = 0.1 * jax.random.normal(keys[21], (D, H, W, feature_size), jnp.float32)
    return p


# ---------------- Forward pass (mirrors Model.forward) ----------------

def forward(params, x_in, point, pre_theta, pre_phi, next_point, position_vector, seg, fix_0, fix_1):
    bs = point.shape[0]

    # Encoder towers: Conv3d(k3,s2,p1)+ReLU, channels-last, each lowered to a Pallas matmul.
    seg_cl = jnp.transpose(seg, (0, 2, 3, 4, 1))
    tom_cl = jnp.transpose(jnp.concatenate([fix_0, fix_1], axis=1), (0, 2, 3, 4, 1))

    t0 = pallas_conv3d_s2_relu(tom_cl, params["fix_encoder_0_tom"])
    tom_feature = pallas_conv3d_s2_relu(t0, params["fix_encoder_1_tom"])
    tom_feature_real = pallas_conv3d_s2_relu(tom_feature, params["fix_encoder_2_tom"])

    f0 = pallas_conv3d_s2_relu(seg_cl, params["fix_encoder_0"])
    fix_feature = pallas_conv3d_s2_relu(f0, params["fix_encoder_1"])
    seg_feature = pallas_conv3d_s2_relu(fix_feature, params["fix_encoder_2"])

    fix_grid = jnp.concatenate([fix_feature, tom_feature], axis=-1)[0]       # (D/4,...,32)
    seg_grid = jnp.concatenate([seg_feature, tom_feature_real], axis=-1)[0]  # (D/8,...,64)

    # TODO(synk): backbone (ViT + UNETR encoder/decoder blocks) replaced by stand-ins.
    dec2_grid = params["standin_dec2"]   # (D/4, H/4, W/4, 64)
    dec1_grid = params["standin_dec1"]   # (D/2, H/2, W/2, 32)
    out_grid = params["standin_out"]     # (D,   H,   W,   16)

    def extract_all(pts):
        # /4 resolution: dec2 (direct gather) + seg_feature (point-wise trilinear upsample)
        p32 = pts / 4.0
        feat_32 = extract_concat_features(dec2_grid, seg_grid, p32)
        rp32 = p32 - jnp.floor(p32) + 1.0
        rf32 = calculate_batch_value_at_points(feat_32, rp32)
        f32c = feat_32[:, 1, 1, 1, :].reshape(pts.shape[0], -1)
        # /2 resolution
        p31 = pts / 2.0
        feat_31 = extract_concat_features(dec1_grid, seg_grid, p31)
        rp31 = p31 - jnp.floor(p31) + 1.0
        rf31 = calculate_batch_value_at_points(feat_31, rp31)
        f31c = feat_31.reshape(pts.shape[0], -1)
        # full resolution
        feat_30 = extract_concat_features(out_grid, fix_grid, pts)
        rp30 = pts - jnp.floor(pts) + 1.0
        rf30 = calculate_batch_value_at_points(feat_30, rp30)
        f30c = feat_30.reshape(pts.shape[0], -1)
        return f32c, f31c, f30c, rf32, rf31, rf30

    # point and next_point share one gather pass.
    all_pts = jnp.concatenate([point, next_point], axis=0)
    f32a, f31a, f30a, rf32a, rf31a, rf30a = extract_all(all_pts)
    f32, f32n = f32a[:bs], f32a[bs:]
    f31, f31n = f31a[:bs], f31a[bs:]
    f30, f30n = f30a[:bs], f30a[bs:]

    rf32 = dense(rf32a[:bs], *params["real_feature_3"])
    rf31 = dense(rf31a[:bs], *params["real_feature_2"])
    rf30 = dense(rf30a[:bs], *params["real_feature_1"])
    rf32n = dense(rf32a[bs:], *params["real_feature_3_next"])
    rf31n = dense(rf31a[bs:], *params["real_feature_2_next"])
    rf30n = dense(rf30a[bs:], *params["real_feature_1_next"])

    direct_feats_theta = dense(pre_theta, *params["encoder_direction_theta_pre"], activation="relu")
    direct_feats_phi = dense(pre_phi, *params["encoder_direction_phi_pre"], activation="relu")
    position_feature = dense(position_vector, *params["position_encoding"])

    feats_thetaphi = jnp.concatenate([
        f32, f31, f30, rf32, rf31, rf30,
        f32n, f31n, f30n, rf32n, rf31n, rf30n,
        direct_feats_theta, direct_feats_phi, position_feature], axis=1)       # (bs, 8864)

    # Fused theta/phi pre-FC: one bf16-weight Pallas matmul, leaky ReLU, N split over cores.
    h = pallas_linear(feats_thetaphi, params["fc_pre_fused"], activation="leaky_relu")  # (bs, 2048)
    h_theta, h_phi = h[:, :1024], h[:, 1024:]
    theta = dense(h_theta, *params["fc_theta"])
    phi = dense(h_phi, *params["fc_phi"])
    return theta, phi


if __name__ == "__main__":
    key = jax.random.PRNGKey(0)
    k = jax.random.split(key, 12)
    img_size = (32, 32, 32)       # small multiple of the 16^3 patch size
    params = init_params(k[0], img_size=img_size)

    x_in = jax.random.normal(k[1], (1, 1) + img_size, jnp.float32)
    point = jax.random.uniform(k[2], (1, 3), jnp.float32, 2.0, 29.0)
    next_point = jax.random.uniform(k[3], (1, 3), jnp.float32, 2.0, 29.0)
    pre_theta = jax.random.normal(k[4], (1, 6), jnp.float32)
    pre_phi = jax.random.normal(k[5], (1, 6), jnp.float32)
    position_vector = jax.random.normal(k[6], (1, 5), jnp.float32)
    seg = jax.random.normal(k[7], (1, 1) + img_size, jnp.float32)
    fix_0 = jax.random.normal(k[8], (1, 3) + img_size, jnp.float32)
    fix_1 = jax.random.normal(k[9], (1, 3) + img_size, jnp.float32)

    # Close over params so tile sizes / padded weights stay static under jit.
    fwd = jax.jit(lambda *a: forward(params, *a))
    theta, phi = fwd(x_in, point, pre_theta, pre_phi, next_point,
                     position_vector, seg, fix_0, fix_1)
    jax.block_until_ready((theta, phi))
    assert theta.shape == (1, 1) and phi.shape == (1, 1)
    print("KERNEL_OK")
</pallas_src>

<mosaic_0001>
module attributes {stable_mosaic.version = 11 : i64} {
  func.func @_linear_kernel(%arg0: i32, %arg1: i32, %arg2: i32, %arg3: memref<256x256xf32, #tpu.memory_space<vmem>>, %arg4: memref<256x128xf32, #tpu.memory_space<vmem>>, %arg5: memref<1x128xf32, #tpu.memory_space<vmem>>, %arg6: memref<256x128xf32, #tpu.memory_space<vmem>>, %arg7: memref<256x128xf32, #tpu.memory_space<vmem>>) attributes {dimension_semantics = [#tpu.dimension_semantics<parallel>, #tpu.dimension_semantics<parallel>, #tpu.dimension_semantics<arbitrary>], iteration_bounds = array<i64: 16, 1, 1>, scalar_prefetch = 0 : i64, scratch_operands = 1 : i64, tpu.core_type = #tpu.core_type<tc>, window_params = [{transform_indices = @transform_0, window_bounds = array<i64: 256, 256>}, {transform_indices = @transform_1, window_bounds = array<i64: 256, 128>}, {transform_indices = @transform_2, window_bounds = array<i64: 1, 128>}, {transform_indices = @transform_3, window_bounds = array<i64: 256, 128>}]} {
    %c0_i32 = arith.constant 0 : i32
    %0 = arith.cmpi eq, %arg2, %c0_i32 : i32
    %1 = arith.extui %0 : i1 to i32
    %c0_i32_0 = arith.constant 0 : i32
    %2 = arith.cmpi ne, %1, %c0_i32_0 : i32
    scf.if %2 {
      %cst_10 = arith.constant 0.000000e+00 : f32
      %12 = vector.broadcast %cst_10 : f32 to vector<256x128xf32>
      %c0_11 = arith.constant 0 : index
      %c0_12 = arith.constant 0 : index
      %13 = vector.load %arg7[%c0_11, %c0_12] : memref<256x128xf32, #tpu.memory_space<vmem>>, vector<256x128xf32>
      tpu.vector_store %arg7[%c0_11, %c0_12], %12 {strides = array<i32>} : memref<256x128xf32, #tpu.memory_space<vmem>>, vector<256x128xf32>,
    } else {
    }
    %c0 = arith.constant 0 : index
    %c0_1 = arith.constant 0 : index
    %3 = vector.load %arg7[%c0, %c0_1] : memref<256x128xf32, #tpu.memory_space<vmem>>, vector<256x128xf32>
    %c0_2 = arith.constant 0 : index
    %c0_3 = arith.constant 0 : index
    %4 = vector.load %arg3[%c0_2, %c0_3] : memref<256x256xf32, #tpu.memory_space<vmem>>, vector<256x256xf32>
    %c0_4 = arith.constant 0 : index
    %c0_5 = arith.constant 0 : index
    %5 = vector.load %arg4[%c0_4, %c0_5] : memref<256x128xf32, #tpu.memory_space<vmem>>, vector<256x128xf32>
    %cst = arith.constant dense<0.000000e+00> : vector<256x128xf32>
    %6 = tpu.matmul %4, %5, %cst {dimension_numbers = #tpu.dot_dimension_numbers<[1], [0], [0], [1], [0, 0, 1, 1], [], []>} : vector<256x256xf32>, vector<256x128xf32>, vector<256x128xf32> -> vector<256x128xf32>
    %7 = arith.addf %3, %6 : vector<256x128xf32>
    %c0_6 = arith.constant 0 : index
    %c0_7 = arith.constant 0 : index
    %8 = vector.load %arg7[%c0_6, %c0_7] : memref<256x128xf32, #tpu.memory_space<vmem>>, vector<256x128xf32>
    tpu.vector_store %arg7[%c0_6, %c0_7], %7 {strides = array<i32>} : memref<256x128xf32, #tpu.memory_space<vmem>>, vector<256x128xf32>,
    %c0_i32_8 = arith.constant 0 : i32
    %9 = arith.cmpi eq, %arg2, %c0_i32_8 : i32
    %10 = arith.extui %9 : i1 to i32
    %c0_i32_9 = arith.constant 0 : i32
    %11 = arith.cmpi ne, %10, %c0_i32_9 : i32
    scf.if %11 {
      %c0_10 = arith.constant 0 : index
      %c0_11 = arith.constant 0 : index
      %12 = vector.load %arg7[%c0_10, %c0_11] : memref<256x128xf32, #tpu.memory_space<vmem>>, vector<256x128xf32>
      %c0_12 = arith.constant 0 : index
      %c0_13 = arith.constant 0 : index
      %13 = vector.load %arg5[%c0_12, %c0_13] : memref<1x128xf32, #tpu.memory_space<vmem>>, vector<1x128xf32>
      %14 = vector.broadcast %13 : vector<1x128xf32> to vector<256x128xf32>
      %15 = arith.addf %12, %14 : vector<256x128xf32>
      %cst_14 = arith.constant 0.000000e+00 : f32
      %16 = vector.broadcast %cst_14 : f32 to vector<256x128xf32>
      %17 = arith.maximumf %15, %16 : vector<256x128xf32>
      %c0_15 = arith.constant 0 : index
      %c0_16 = arith.constant 0 : index
      %18 = vector.load %arg6[%c0_15, %c0_16] : memref<256x128xf32, #tpu.memory_space<vmem>>, vector<256x128xf32>
      tpu.vector_store %arg6[%c0_15, %c0_16], %17 {strides = array<i32>} : memref<256x128xf32, #tpu.memory_space<vmem>>, vector<256x128xf32>,
    } else {
    }
    return
  }
  func.func @transform_0(%arg0: i32, %arg1: i32, %arg2: i32) -> (i32, i32) {
    %c0_i32 = arith.constant 0 : i32
    return %arg0, %arg2 : i32, i32
  }
  func.func @transform_1(%arg0: i32, %arg1: i32, %arg2: i32) -> (i32, i32) {
    %c0_i32 = arith.constant 0 : i32
    return %arg2, %arg1 : i32, i32
  }
  func.func @transform_2(%arg0: i32, %arg1: i32, %arg2: i32) -> (i32, i32) {
    %c0_i32 = arith.constant 0 : i32
    %c0_i32_0 = arith.constant 0 : i32
    return %c0_i32, %arg1 : i32, i32
  }
  func.func @transform_3(%arg0: i32, %arg1: i32, %arg2: i32) -> (i32, i32) {
    %c0_i32 = arith.constant 0 : i32
    return %arg0, %arg1 : i32, i32
  }
}

module attributes {stable_mosaic.version = 11 : i64} {
  func.func @_linear_kernel(%arg0: i32, %arg1: i32, %arg2: i32, %arg3: memref<256x256xf32, #tpu.memory_space<vmem>>, %arg4: memref<256x128xf32, #tpu.memory_space<vmem>>, %arg5: memref<1x128xf32, #tpu.memory_space<vmem>>, %arg6: memref<256x128xf32, #tpu.memory_space<vmem>>, %arg7: memref<256x128xf32, #tpu.memory_space<vmem>>) attributes {dimension_semantics = [#tpu.dimension_semantics<parallel>, #tpu.dimension_semantics<parallel>, #tpu.dimension_semantics<arbitrary>], iteration_bounds = array<i64: 2, 1, 1>, scalar_prefetch = 0 : i64, scratch_operands = 1 : i64, tpu.core_type = #tpu.core_type<tc>, window_params = [{transform_indices = @transform_0, window_bounds = array<i64: 256, 256>}, {transform_indices = @transform_1, window_bounds = array<i64: 256, 128>}, {transform_indices = @transform_2, window_bounds = array<i64: 1, 128>}, {transform_indices = @transform_3, window_bounds = array<i64: 256, 128>}]} {
    %c0_i32 = arith.constant 0 : i32
    %0 = arith.cmpi eq, %arg2, %c0_i32 : i32
    %1 = arith.extui %0 : i1 to i32
    %c0_i32_0 = arith.constant 0 : i32
    %2 = arith.cmpi ne, %1, %c0_i32_0 : i32
    scf.if %2 {
      %cst_10 = arith.constant 0.000000e+00 : f32
      %12 = vector.broadcast %cst_10 : f32 to vector<256x128xf32>
      %c0_11 = arith.constant 0 : index
      %c0_12 = arith.constant 0 : index
      %13 = vector.load %arg7[%c0_11, %c0_12] : memref<256x128xf32, #tpu.memory_space<vmem>>, vector<256x128xf32>
      tpu.vector_store %arg7[%c0_11, %c0_12], %12 {strides = array<i32>} : memref<256x128xf32, #tpu.memory_space<vmem>>, vector<256x128xf32>,
    } else {
    }
    %c0 = arith.constant 0 : index
    %c0_1 = arith.constant 0 : index
    %3 = vector.load %arg7[%c0, %c0_1] : memref<256x128xf32, #tpu.memory_space<vmem>>, vector<256x128xf32>
    %c0_2 = arith.constant 0 : index
    %c0_3 = arith.constant 0 : index
    %4 = vector.load %arg3[%c0_2, %c0_3] : memref<256x256xf32, #tpu.memory_space<vmem>>, vector<256x256xf32>
    %c0_4 = arith.constant 0 : index
    %c0_5 = arith.constant 0 : index
    %5 = vector.load %arg4[%c0_4, %c0_5] : memref<256x128xf32, #tpu.memory_space<vmem>>, vector<256x128xf32>
    %cst = arith.constant dense<0.000000e+00> : vector<256x128xf32>
    %6 = tpu.matmul %4, %5, %cst {dimension_numbers = #tpu.dot_dimension_numbers<[1], [0], [0], [1], [0, 0, 1, 1], [], []>} : vector<256x256xf32>, vector<256x128xf32>, vector<256x128xf32> -> vector<256x128xf32>
    %7 = arith.addf %3, %6 : vector<256x128xf32>
    %c0_6 = arith.constant 0 : index
    %c0_7 = arith.constant 0 : index
    %8 = vector.load %arg7[%c0_6, %c0_7] : memref<256x128xf32, #tpu.memory_space<vmem>>, vector<256x128xf32>
    tpu.vector_store %arg7[%c0_6, %c0_7], %7 {strides = array<i32>} : memref<256x128xf32, #tpu.memory_space<vmem>>, vector<256x128xf32>,
    %c0_i32_8 = arith.constant 0 : i32
    %9 = arith.cmpi eq, %arg2, %c0_i32_8 : i32
    %10 = arith.extui %9 : i1 to i32
    %c0_i32_9 = arith.constant 0 : i32
    %11 = arith.cmpi ne, %10, %c0_i32_9 : i32
    scf.if %11 {
      %c0_10 = arith.constant 0 : index
      %c0_11 = arith.constant 0 : index
      %12 = vector.load %arg7[%c0_10, %c0_11] : memref<256x128xf32, #tpu.memory_space<vmem>>, vector<256x128xf32>
      %c0_12 = arith.constant 0 : index
      %c0_13 = arith.constant 0 : index
      %13 = vector.load %arg5[%c0_12, %c0_13] : memref<1x128xf32, #tpu.memory_space<vmem>>, vector<1x128xf32>
      %14 = vector.broadcast %13 : vector<1x128xf32> to vector<256x128xf32>
      %15 = arith.addf %12, %14 : vector<256x128xf32>
      %cst_14 = arith.constant 0.000000e+00 : f32
      %16 = vector.broadcast %cst_14 : f32 to vector<256x128xf32>
      %17 = arith.maximumf %15, %16 : vector<256x128xf32>
      %c0_15 = arith.constant 0 : index
      %c0_16 = arith.constant 0 : index
      %18 = vector.load %arg6[%c0_15, %c0_16] : memref<256x128xf32, #tpu.memory_space<vmem>>, vector<256x128xf32>
      tpu.vector_store %arg6[%c0_15, %c0_16], %17 {strides = array<i32>} : memref<256x128xf32, #tpu.memory_space<vmem>>, vector<256x128xf32>,
    } else {
    }
    return
  }
  func.func @transform_0(%arg0: i32, %arg1: i32, %arg2: i32) -> (i32, i32) {
    %c0_i32 = arith.constant 0 : i32
    return %arg0, %arg2 : i32, i32
  }
  func.func @transform_1(%arg0: i32, %arg1: i32, %arg2: i32) -> (i32, i32) {
    %c0_i32 = arith.constant 0 : i32
    return %arg2, %arg1 : i32, i32
  }
  func.func @transform_2(%arg0: i32, %arg1: i32, %arg2: i32) -> (i32, i32) {
    %c0_i32 = arith.constant 0 : i32
    %c0_i32_0 = arith.constant 0 : i32
    return %c0_i32, %arg1 : i32, i32
  }
  func.func @transform_3(%arg0: i32, %arg1: i32, %arg2: i32) -> (i32, i32) {
    %c0_i32 = arith.constant 0 : i32
    return %arg0, %arg1 : i32, i32
  }
}

module attributes {stable_mosaic.version = 11 : i64} {
  func.func @_linear_kernel(%arg0: i32, %arg1: i32, %arg2: i32, %arg3: memref<64x512xf32, #tpu.memory_space<vmem>>, %arg4: memref<512x128xf32, #tpu.memory_space<vmem>>, %arg5: memref<1x128xf32, #tpu.memory_space<vmem>>, %arg6: memref<64x128xf32, #tpu.memory_space<vmem>>, %arg7: memref<64x128xf32, #tpu.memory_space<vmem>>) attributes {dimension_semantics = [#tpu.dimension_semantics<parallel>, #tpu.dimension_semantics<parallel>, #tpu.dimension_semantics<arbitrary>], iteration_bounds = array<i64: 1, 1, 1>, scalar_prefetch = 0 : i64, scratch_operands = 1 : i64, tpu.core_type = #tpu.core_type<tc>, window_params = [{transform_indices = @transform_0, window_bounds = array<i64: 64, 512>}, {transform_indices = @transform_1, window_bounds = array<i64: 512, 128>}, {transform_indices = @transform_2, window_bounds = array<i64: 1, 128>}, {transform_indices = @transform_3, window_bounds = array<i64: 64, 128>}]} {
    %c0_i32 = arith.constant 0 : i32
    %0 = arith.cmpi eq, %arg2, %c0_i32 : i32
    %1 = arith.extui %0 : i1 to i32
    %c0_i32_0 = arith.constant 0 : i32
    %2 = arith.cmpi ne, %1, %c0_i32_0 : i32
    scf.if %2 {
      %cst_10 = arith.constant 0.000000e+00 : f32
      %12 = vector.broadcast %cst_10 : f32 to vector<64x128xf32>
      %c0_11 = arith.constant 0 : index
      %c0_12 = arith.constant 0 : index
      %13 = vector.load %arg7[%c0_11, %c0_12] : memref<64x128xf32, #tpu.memory_space<vmem>>, vector<64x128xf32>
      tpu.vector_store %arg7[%c0_11, %c0_12], %12 {strides = array<i32>} : memref<64x128xf32, #tpu.memory_space<vmem>>, vector<64x128xf32>,
    } else {
    }
    %c0 = arith.constant 0 : index
    %c0_1 = arith.constant 0 : index
    %3 = vector.load %arg7[%c0, %c0_1] : memref<64x128xf32, #tpu.memory_space<vmem>>, vector<64x128xf32>
    %c0_2 = arith.constant 0 : index
    %c0_3 = arith.constant 0 : index
    %4 = vector.load %arg3[%c0_2, %c0_3] : memref<64x512xf32, #tpu.memory_space<vmem>>, vector<64x512xf32>
    %c0_4 = arith.constant 0 : index
    %c0_5 = arith.constant 0 : index
    %5 = vector.load %arg4[%c0_4, %c0_5] : memref<512x128xf32, #tpu.memory_space<vmem>>, vector<512x128xf32>
    %cst = arith.constant dense<0.000000e+00> : vector<64x128xf32>
    %6 = tpu.matmul %4, %5, %cst {dimension_numbers = #tpu.dot_dimension_numbers<[1], [0], [0], [1], [0, 0, 1, 1], [], []>} : vector<64x512xf32>, vector<512x128xf32>, vector<64x128xf32> -> vector<64x128xf32>
    %7 = arith.addf %3, %6 : vector<64x128xf32>
    %c0_6 = arith.constant 0 : index
    %c0_7 = arith.constant 0 : index
    %8 = vector.load %arg7[%c0_6, %c0_7] : memref<64x128xf32, #tpu.memory_space<vmem>>, vector<64x128xf32>
    tpu.vector_store %arg7[%c0_6, %c0_7], %7 {strides = array<i32>} : memref<64x128xf32, #tpu.memory_space<vmem>>, vector<64x128xf32>,
    %c0_i32_8 = arith.constant 0 : i32
    %9 = arith.cmpi eq, %arg2, %c0_i32_8 : i32
    %10 = arith.extui %9 : i1 to i32
    %c0_i32_9 = arith.constant 0 : i32
    %11 = arith.cmpi ne, %10, %c0_i32_9 : i32
    scf.if %11 {
      %c0_10 = arith.constant 0 : index
      %c0_11 = arith.constant 0 : index
      %12 = vector.load %arg7[%c0_10, %c0_11] : memref<64x128xf32, #tpu.memory_space<vmem>>, vector<64x128xf32>
      %c0_12 = arith.constant 0 : index
      %c0_13 = arith.constant 0 : index
      %13 = vector.load %arg5[%c0_12, %c0_13] : memref<1x128xf32, #tpu.memory_space<vmem>>, vector<1x128xf32>
      %14 = vector.broadcast %13 : vector<1x128xf32> to vector<64x128xf32>
      %15 = arith.addf %12, %14 : vector<64x128xf32>
      %cst_14 = arith.constant 0.000000e+00 : f32
      %16 = vector.broadcast %cst_14 : f32 to vector<64x128xf32>
      %17 = arith.maximumf %15, %16 : vector<64x128xf32>
      %c0_15 = arith.constant 0 : index
      %c0_16 = arith.constant 0 : index
      %18 = vector.load %arg6[%c0_15, %c0_16] : memref<64x128xf32, #tpu.memory_space<vmem>>, vector<64x128xf32>
      tpu.vector_store %arg6[%c0_15, %c0_16], %17 {strides = array<i32>} : memref<64x128xf32, #tpu.memory_space<vmem>>, vector<64x128xf32>,
    } else {
    }
    return
  }
  func.func @transform_0(%arg0: i32, %arg1: i32, %arg2: i32) -> (i32, i32) {
    %c0_i32 = arith.constant 0 : i32
    return %arg0, %arg2 : i32, i32
  }
  func.func @transform_1(%arg0: i32, %arg1: i32, %arg2: i32) -> (i32, i32) {
    %c0_i32 = arith.constant 0 : i32
    return %arg2, %arg1 : i32, i32
  }
  func.func @transform_2(%arg0: i32, %arg1: i32, %arg2: i32) -> (i32, i32) {
    %c0_i32 = arith.constant 0 : i32
    %c0_i32_0 = arith.constant 0 : i32
    return %c0_i32, %arg1 : i32, i32
  }
  func.func @transform_3(%arg0: i32, %arg1: i32, %arg2: i32) -> (i32, i32) {
    %c0_i32 = arith.constant 0 : i32
    return %arg0, %arg1 : i32, i32
  }
}

module attributes {stable_mosaic.version = 11 : i64} {
  func.func @_linear_kernel(%arg0: i32, %arg1: i32, %arg2: i32, %arg3: memref<256x128xf32, #tpu.memory_space<vmem>>, %arg4: memref<128x128xf32, #tpu.memory_space<vmem>>, %arg5: memref<1x128xf32, #tpu.memory_space<vmem>>, %arg6: memref<256x128xf32, #tpu.memory_space<vmem>>, %arg7: memref<256x128xf32, #tpu.memory_space<vmem>>) attributes {dimension_semantics = [#tpu.dimension_semantics<parallel>, #tpu.dimension_semantics<parallel>, #tpu.dimension_semantics<arbitrary>], iteration_bounds = array<i64: 16, 1, 1>, scalar_prefetch = 0 : i64, scratch_operands = 1 : i64, tpu.core_type = #tpu.core_type<tc>, window_params = [{transform_indices = @transform_0, window_bounds = array<i64: 256, 128>}, {transform_indices = @transform_1, window_bounds = array<i64: 128, 128>}, {transform_indices = @transform_2, window_bounds = array<i64: 1, 128>}, {transform_indices = @transform_3, window_bounds = array<i64: 256, 128>}]} {
    %c0_i32 = arith.constant 0 : i32
    %0 = arith.cmpi eq, %arg2, %c0_i32 : i32
    %1 = arith.extui %0 : i1 to i32
    %c0_i32_0 = arith.constant 0 : i32
    %2 = arith.cmpi ne, %1, %c0_i32_0 : i32
    scf.if %2 {
      %cst_10 = arith.constant 0.000000e+00 : f32
      %12 = vector.broadcast %cst_10 : f32 to vector<256x128xf32>
      %c0_11 = arith.constant 0 : index
      %c0_12 = arith.constant 0 : index
      %13 = vector.load %arg7[%c0_11, %c0_12] : memref<256x128xf32, #tpu.memory_space<vmem>>, vector<256x128xf32>
      tpu.vector_store %arg7[%c0_11, %c0_12], %12 {strides = array<i32>} : memref<256x128xf32, #tpu.memory_space<vmem>>, vector<256x128xf32>,
    } else {
    }
    %c0 = arith.constant 0 : index
    %c0_1 = arith.constant 0 : index
    %3 = vector.load %arg7[%c0, %c0_1] : memref<256x128xf32, #tpu.memory_space<vmem>>, vector<256x128xf32>
    %c0_2 = arith.constant 0 : index
    %c0_3 = arith.constant 0 : index
    %4 = vector.load %arg3[%c0_2, %c0_3] : memref<256x128xf32, #tpu.memory_space<vmem>>, vector<256x128xf32>
    %c0_4 = arith.constant 0 : index
    %c0_5 = arith.constant 0 : index
    %5 = vector.load %arg4[%c0_4, %c0_5] : memref<128x128xf32, #tpu.memory_space<vmem>>, vector<128x128xf32>
    %cst = arith.constant dense<0.000000e+00> : vector<256x128xf32>
    %6 = tpu.matmul %4, %5, %cst {dimension_numbers = #tpu.dot_dimension_numbers<[1], [0], [0], [1], [0, 0, 1, 1], [], []>} : vector<256x128xf32>, vector<128x128xf32>, vector<256x128xf32> -> vector<256x128xf32>
    %7 = arith.addf %3, %6 : vector<256x128xf32>
    %c0_6 = arith.constant 0 : index
    %c0_7 = arith.constant 0 : index
    %8 = vector.load %arg7[%c0_6, %c0_7] : memref<256x128xf32, #tpu.memory_space<vmem>>, vector<256x128xf32>
    tpu.vector_store %arg7[%c0_6, %c0_7], %7 {strides = array<i32>} : memref<256x128xf32, #tpu.memory_space<vmem>>, vector<256x128xf32>,
    %c0_i32_8 = arith.constant 0 : i32
    %9 = arith.cmpi eq, %arg2, %c0_i32_8 : i32
    %10 = arith.extui %9 : i1 to i32
    %c0_i32_9 = arith.constant 0 : i32
    %11 = arith.cmpi ne, %10, %c0_i32_9 : i32
    scf.if %11 {
      %c0_10 = arith.constant 0 : index
      %c0_11 = arith.constant 0 : index
      %12 = vector.load %arg7[%c0_10, %c0_11] : memref<256x128xf32, #tpu.memory_space<vmem>>, vector<256x128xf32>
      %c0_12 = arith.constant 0 : index
      %c0_13 = arith.constant 0 : index
      %13 = vector.load %arg5[%c0_12, %c0_13] : memref<1x128xf32, #tpu.memory_space<vmem>>, vector<1x128xf32>
      %14 = vector.broadcast %13 : vector<1x128xf32> to vector<256x128xf32>
      %15 = arith.addf %12, %14 : vector<256x128xf32>
      %cst_14 = arith.constant 0.000000e+00 : f32
      %16 = vector.broadcast %cst_14 : f32 to vector<256x128xf32>
      %17 = arith.maximumf %15, %16 : vector<256x128xf32>
      %c0_15 = arith.constant 0 : index
      %c0_16 = arith.constant 0 : index
      %18 = vector.load %arg6[%c0_15, %c0_16] : memref<256x128xf32, #tpu.memory_space<vmem>>, vector<256x128xf32>
      tpu.vector_store %arg6[%c0_15, %c0_16], %17 {strides = array<i32>} : memref<256x128xf32, #tpu.memory_space<vmem>>, vector<256x128xf32>,
    } else {
    }
    return
  }
  func.func @transform_0(%arg0: i32, %arg1: i32, %arg2: i32) -> (i32, i32) {
    %c0_i32 = arith.constant 0 : i32
    return %arg0, %arg2 : i32, i32
  }
  func.func @transform_1(%arg0: i32, %arg1: i32, %arg2: i32) -> (i32, i32) {
    %c0_i32 = arith.constant 0 : i32
    return %arg2, %arg1 : i32, i32
  }
  func.func @transform_2(%arg0: i32, %arg1: i32, %arg2: i32) -> (i32, i32) {
    %c0_i32 = arith.constant 0 : i32
    %c0_i32_0 = arith.constant 0 : i32
    return %c0_i32, %arg1 : i32, i32
  }
  func.func @transform_3(%arg0: i32, %arg1: i32, %arg2: i32) -> (i32, i32) {
    %c0_i32 = arith.constant 0 : i32
    return %arg0, %arg1 : i32, i32
  }
}

module attributes {stable_mosaic.version = 11 : i64} {
  func.func @_linear_kernel(%arg0: i32, %arg1: i32, %arg2: i32, %arg3: memref<8x896xbf16, #tpu.memory_space<vmem>>, %arg4: memref<896x1024xbf16, #tpu.memory_space<vmem>>, %arg5: memref<1x1024xf32, #tpu.memory_space<vmem>>, %arg6: memref<8x1024xf32, #tpu.memory_space<vmem>>, %arg7: memref<8x1024xf32, #tpu.memory_space<vmem>>) attributes {dimension_semantics = [#tpu.dimension_semantics<parallel>, #tpu.dimension_semantics<parallel>, #tpu.dimension_semantics<arbitrary>], iteration_bounds = array<i64: 1, 2, 10>, scalar_prefetch = 0 : i64, scratch_operands = 1 : i64, tpu.core_type = #tpu.core_type<tc>, window_params = [{transform_indices = @transform_0, window_bounds = array<i64: 8, 896>}, {transform_indices = @transform_1, window_bounds = array<i64: 896, 1024>}, {transform_indices = @transform_2, window_bounds = array<i64: 1, 1024>}, {transform_indices = @transform_3, window_bounds = array<i64: 8, 1024>}]} {
    %c0_i32 = arith.constant 0 : i32
    %0 = arith.cmpi eq, %arg2, %c0_i32 : i32
    %1 = arith.extui %0 : i1 to i32
    %c0_i32_0 = arith.constant 0 : i32
    %2 = arith.cmpi ne, %1, %c0_i32_0 : i32
    scf.if %2 {
      %cst_9 = arith.constant 0.000000e+00 : f32
      %12 = vector.broadcast %cst_9 : f32 to vector<8x1024xf32>
      %c0_10 = arith.constant 0 : index
      %c0_11 = arith.constant 0 : index
      %13 = vector.load %arg7[%c0_10, %c0_11] : memref<8x1024xf32, #tpu.memory_space<vmem>>, vector<8x1024xf32>
      tpu.vector_store %arg7[%c0_10, %c0_11], %12 {strides = array<i32>} : memref<8x1024xf32, #tpu.memory_space<vmem>>, vector<8x1024xf32>,
    } else {
    }
    %c0 = arith.constant 0 : index
    %c0_1 = arith.constant 0 : index
    %3 = vector.load %arg7[%c0, %c0_1] : memref<8x1024xf32, #tpu.memory_space<vmem>>, vector<8x1024xf32>
    %c0_2 = arith.constant 0 : index
    %c0_3 = arith.constant 0 : index
    %4 = vector.load %arg3[%c0_2, %c0_3] : memref<8x896xbf16, #tpu.memory_space<vmem>>, vector<8x896xbf16>
    %c0_4 = arith.constant 0 : index
    %c0_5 = arith.constant 0 : index
    %5 = vector.load %arg4[%c0_4, %c0_5] : memref<896x1024xbf16, #tpu.memory_space<vmem>>, vector<896x1024xbf16>
    %cst = arith.constant dense<0.000000e+00> : vector<8x1024xf32>
    %6 = tpu.matmul %4, %5, %cst {dimension_numbers = #tpu.dot_dimension_numbers<[1], [0], [0], [1], [0, 0, 1, 1], [], []>} : vector<8x896xbf16>, vector<896x1024xbf16>, vector<8x1024xf32> -> vector<8x1024xf32>
    %7 = arith.addf %3, %6 : vector<8x1024xf32>
    %c0_6 = arith.constant 0 : index
    %c0_7 = arith.constant 0 : index
    %8 = vector.load %arg7[%c0_6, %c0_7] : memref<8x1024xf32, #tpu.memory_space<vmem>>, vector<8x1024xf32>
    tpu.vector_store %arg7[%c0_6, %c0_7], %7 {strides = array<i32>} : memref<8x1024xf32, #tpu.memory_space<vmem>>, vector<8x1024xf32>,
    %c9_i32 = arith.constant 9 : i32
    %9 = arith.cmpi eq, %arg2, %c9_i32 : i32
    %10 = arith.extui %9 : i1 to i32
    %c0_i32_8 = arith.constant 0 : i32
    %11 = arith.cmpi ne, %10, %c0_i32_8 : i32
    scf.if %11 {
      %c0_9 = arith.constant 0 : index
      %c0_10 = arith.constant 0 : index
      %12 = vector.load %arg7[%c0_9, %c0_10] : memref<8x1024xf32, #tpu.memory_space<vmem>>, vector<8x1024xf32>
      %c0_11 = arith.constant 0 : index
      %c0_12 = arith.constant 0 : index
      %13 = vector.load %arg5[%c0_11, %c0_12] : memref<1x1024xf32, #tpu.memory_space<vmem>>, vector<1x1024xf32>
      %14 = vector.broadcast %13 : vector<1x1024xf32> to vector<8x1024xf32>
      %15 = arith.addf %12, %14 : vector<8x1024xf32>
      %cst_13 = arith.constant 0.000000e+00 : f32
      %16 = vector.broadcast %cst_13 : f32 to vector<8x1024xf32>
      %17 = arith.cmpf oge, %15, %16 : vector<8x1024xf32>
      %cst_14 = arith.constant 0.00999999977 : f32
      %18 = vector.broadcast %cst_14 : f32 to vector<8x1024xf32>
      %19 = arith.mulf %18, %15 : vector<8x1024xf32>
      %20 = arith.select %17, %15, %19 : vector<8x1024xi1>, vector<8x1024xf32>
      %c0_15 = arith.constant 0 : index
      %c0_16 = arith.constant 0 : index
      %21 = vector.load %arg6[%c0_15, %c0_16] : memref<8x1024xf32, #tpu.memory_space<vmem>>, vector<8x1024xf32>
      tpu.vector_store %arg6[%c0_15, %c0_16], %20 {strides = array<i32>} : memref<8x1024xf32, #tpu.memory_space<vmem>>, vector<8x1024xf32>,
    } else {
    }
    return
  }
  func.func @transform_0(%arg0: i32, %arg1: i32, %arg2: i32) -> (i32, i32) {
    %c0_i32 = arith.constant 0 : i32
    return %arg0, %arg2 : i32, i32
  }
  func.func @transform_1(%arg0: i32, %arg1: i32, %arg2: i32) -> (i32, i32) {
    %c0_i32 = arith.constant 0 : i32
    return %arg2, %arg1 : i32, i32
  }
  func.func @transform_2(%arg0: i32, %arg1: i32, %arg2: i32) -> (i32, i32) {
    %c0_i32 = arith.constant 0 : i32
    %c0_i32_0 = arith.constant 0 : i32
    return %c0_i32, %arg1 : i32, i32
  }
  func.func @transform_3(%arg0: i32, %arg1: i32, %arg2: i32) -> (i32, i32) {
    %c0_i32 = arith.constant 0 : i32
    return %arg0, %arg1 : i32, i32
  }
}

</mosaic_0001>

<bundles_post_ra>
// kernel: _lambda_.7
= control target key start
LH: loop header
LB: loop body
LE: loop exit
PB: predicated region body
PF: predicated region fallthrough
CT: control target
= control target key end

     0   :  { %s1086_s12 = smov 0   ;;  %s1088_s13 = smov 0   ;;  %s1359_s0 = inlined_call_operand.vmem [shape: f32[4096,256], index: 0, kind: input, shape index: {}]   ;;  %s1360_s1 = inlined_call_operand.vmem [shape: f32[256,128], index: 1, kind: input, shape index: {}]   ;;  %s1361_s2 = inlined_call_operand.vmem [shape: f32[1,128], index: 2, kind: input, shape index: {}]   ;;  %s1362_s3 = inlined_call_operand.vmem [shape: f32[4096,128], index: 3, kind: output, shape index: {}]  }
   0x1   :  { %s1090_s14 = smov 0  }
   0x2 LB: > { %s32_s15 = sadd.s32 1, %s1060_s13  ;;  %p976_p0 = scmp.ge.s32.totalorder %s1064_s14, 1  ;;  %s1064_s14 = sphi %s1090_s14, %s13_s14   ;;  %s1060_s13 = sphi %s1088_s13, %s1364_s13   ;;  %s1056_s12 = sphi %s1086_s12, %s1363_s12  }
   0x3   : > { %p34_p1 = scmp.ge.s32.totalorder %s32_s15, 16  ;;  %p191_p2 = scmp.lt.s32.totalorder %s1064_s14, 17 }
   0x5   : > { %s1366_s15 = smov (%p34_p1, %s32_s15), 0  ;;  %p192_p3 = pnand %p976_p0, %p191_p2 }
   0x6   : > { %s977_s25 = sshll.u32 (!%p192_p3), %s1056_s12, 5 }
   0x7   : > { %195 = sbr.rel (%p192_p3) target bundleno = 304 (0x130), region = 32  ;;  %p236_p4 = scmp.lt.s32.totalorder (!%p192_p3), %s977_s25, 511 }
   0xc   : > { %v414_v0 = vld [vmem:[%s1360_s1 + $0x78] sm:$0xff]  ;;  %v413_v2 = vld [vmem:[%s1360_s1 + $0x70] sm:$0xff]  ;;  %v412_v4 = vld [vmem:[%s1360_s1 + $0x68] sm:$0xff]  ;;  %s1368_s25 = smov (!%p236_p4, %s977_s25), 511 }
   0xd   : > { %v430_v1 = vld [vmem:[%s1360_s1 + $0xf8] sm:$0xff]  ;;  %985 = vmatpush.msra.mxu2 %v414_v0  ;;  %v429_v3 = vld [vmem:[%s1360_s1 + $0xf0] sm:$0xff]  ;;  %v428_v5 = vld [vmem:[%s1360_s1 + $0xe8] sm:$0xff]  ;;  %431 = vmatpush.msra.mxu0 %v414_v0  ;;  %s984_s22 = sshll.u32 %s1368_s25, 4  ;;  %s981_s17 = sshll.u32 %s1368_s25, 3 }
   0xe   : > { %1001 = vmatpush.msra.mxu3 %v430_v1  ;;  %544 = vmatpush.msra.mxu1 %v430_v1  ;;  %v411_v6 = vld [vmem:[%s1360_s1 + $0x60] sm:$0xff]  ;;  %v410_v8 = vld [vmem:[%s1360_s1 + $0x58] sm:$0xff]  ;;  %v409_v10 = vld [vmem:[%s1360_s1 + $0x50] sm:$0xff]  ;;  %s1203_s6 = scalar_lea.vmem %s1359_s0, %s984_s22  ;;  %s1285_s20 = scalar_lea.vmem %s1362_s3, %s981_s17 }
   0xf   : > { %986 = vmatpush.msra.mxu2 %v413_v2  ;;  %v427_v7 = vld [vmem:[%s1360_s1 + $0xe0] sm:$0xff]  ;;  %432 = vmatpush.msra.mxu0 %v413_v2  ;;  %v426_v9 = vld [vmem:[%s1360_s1 + $0xd8] sm:$0xff]  ;;  %v425_v11 = vld [vmem:[%s1360_s1 + $0xd0] sm:$0xff] }
  0x10   : > { %1002 = vmatpush.msra.mxu3 %v429_v3  ;;  %545 = vmatpush.msra.mxu1 %v429_v3  ;;  %v408_v12 = vld [vmem:[%s1360_s1 + $0x48] sm:$0xff]  ;;  %v407_v14 = vld [vmem:[%s1360_s1 + $0x40] sm:$0xff]  ;;  %v406_v16 = vld [vmem:[%s1360_s1 + $0x38] sm:$0xff] }
  0x11   : > { %987 = vmatpush.msra.mxu2 %v412_v4  ;;  %433 = vmatpush.msra.mxu0 %v412_v4  ;;  %v424_v13 = vld [vmem:[%s1360_s1 + $0xc8] sm:$0xff]  ;;  %v423_v15 = vld [vmem:[%s1360_s1 + $0xc0] sm:$0xff]  ;;  %v422_v17 = vld [vmem:[%s1360_s1 + $0xb8] sm:$0xff] }
  0x12   : > { %1003 = vmatpush.msra.mxu3 %v428_v5  ;;  %546 = vmatpush.msra.mxu1 %v428_v5  ;;  %v405_v18 = vld [vmem:[%s1360_s1 + $0x30] sm:$0xff]  ;;  %v404_v20 = vld [vmem:[%s1360_s1 + $0x28] sm:$0xff]  ;;  %v403_v22 = vld [vmem:[%s1360_s1 + $0x20] sm:$0xff] }
  0x13   : > { %988 = vmatpush.msra.mxu2 %v411_v6  ;;  %434 = vmatpush.msra.mxu0 %v411_v6  ;;  %v421_v19 = vld [vmem:[%s1360_s1 + $0xb0] sm:$0xff]  ;;  %v420_v21 = vld [vmem:[%s1360_s1 + $0xa8] sm:$0xff]  ;;  %v419_v23 = vld [vmem:[%s1360_s1 + $0xa0] sm:$0xff] }
  0x14   : > { %1004 = vmatpush.msra.mxu3 %v427_v7  ;;  %547 = vmatpush.msra.mxu1 %v427_v7  ;;  %v402_v24 = vld [vmem:[%s1360_s1 + $0x18] sm:$0xff]  ;;  %v401_v26 = vld [vmem:[%s1360_s1 + $0x10] sm:$0xff]  ;;  %v400_v28 = vld [vmem:[%s1360_s1 + $0x8] sm:$0xff] }
  0x15   : > { %989 = vmatpush.msra.mxu2 %v410_v8  ;;  %435 = vmatpush.msra.mxu0 %v410_v8  ;;  %v418_v25 = vld [vmem:[%s1360_s1 + $0x98] sm:$0xff]  ;;  %v417_v27 = vld [vmem:[%s1360_s1 + $0x90] sm:$0xff]  ;;  %v416_v29 = vld [vmem:[%s1360_s1 + $0x88] sm:$0xff] }
  0x16   : > { %1005 = vmatpush.msra.mxu3 %v426_v9  ;;  %548 = vmatpush.msra.mxu1 %v426_v9  ;;  %v399_v30 = vld [vmem:[%s1360_s1] sm:$0xff]  ;;  %v368_v33 = vld [vmem:[%s1203_s6 + $0x108] sm:$0xff]  ;;  %v369_v36 = vld [vmem:[%s1203_s6 + $0x110] sm:$0xff] }
  0x17   : > { %990 = vmatpush.msra.mxu2 %v409_v10  ;;  %436 = vmatpush.msra.mxu0 %v409_v10  ;;  %v415_v31 = vld [vmem:[%s1360_s1 + $0x80] sm:$0xff]  ;;  %v336_v35 = vld [vmem:[%s1203_s6 + $0x8] sm:$0xff]  ;;  %v370_v37 = vld [vmem:[%s1203_s6 + $0x118] sm:$0xff] }
  0x18   : > { %1006 = vmatpush.msra.mxu3 %v425_v11  ;;  %549 = vmatpush.msra.mxu1 %v425_v11  ;;  %v367_v32 = vld [vmem:[%s1203_s6 + $0x100] sm:$0xff]  ;;  %v337_v38 = vld [vmem:[%s1203_s6 + $0x10] sm:$0xff]  ;;  %v338_v39 = vld [vmem:[%s1203_s6 + $0x18] sm:$0xff] }
  0x19   : > { %991 = vmatpush.msra.mxu2 %v408_v12  ;;  %437 = vmatpush.msra.mxu0 %v408_v12  ;;  %v335_v34 = vld [vmem:[%s1203_s6] sm:$0xff]  ;;  %v372_v41 = vld [vmem:[%s1203_s6 + $0x128] sm:$0xff]  ;;  %v373_v44 = vld [vmem:[%s1203_s6 + $0x130] sm:$0xff] }
  0x1a   : > { %1007 = vmatpush.msra.mxu3 %v424_v13  ;;  %550 = vmatpush.msra.mxu1 %v424_v13  ;;  %v371_v40 = vld [vmem:[%s1203_s6 + $0x120] sm:$0xff]  ;;  %v340_v43 = vld [vmem:[%s1203_s6 + $0x28] sm:$0xff]  ;;  %v374_v45 = vld [vmem:[%s1203_s6 + $0x138] sm:$0xff] }
  0x1b   : > { %992 = vmatpush.msra.mxu2 %v407_v14  ;;  %438 = vmatpush.msra.mxu0 %v407_v14  ;;  %v339_v42 = vld [vmem:[%s1203_s6 + $0x20] sm:$0xff]  ;;  %v341_v46 = vld [vmem:[%s1203_s6 + $0x30] sm:$0xff]  ;;  %v342_v47 = vld [vmem:[%s1203_s6 + $0x38] sm:$0xff] }
  0x1c   : > { %1008 = vmatpush.msra.mxu3 %v423_v15  ;;  %551 = vmatpush.msra.mxu1 %v423_v15  ;;  %v375_v48 = vld [vmem:[%s1203_s6 + $0x140] sm:$0xff]  ;;  %v376_v49 = vld [vmem:[%s1203_s6 + $0x148] sm:$0xff]  ;;  %v377_v52 = vld [vmem:[%s1203_s6 + $0x150] sm:$0xff] }
  0x1d   : > { %993 = vmatpush.msra.mxu2 %v406_v16  ;;  %439 = vmatpush.msra.mxu0 %v406_v16  ;;  %v343_v50 = vld [vmem:[%s1203_s6 + $0x40] sm:$0xff]  ;;  %v344_v51 = vld [vmem:[%s1203_s6 + $0x48] sm:$0xff]  ;;  %v378_v53 = vld [vmem:[%s1203_s6 + $0x158] sm:$0xff] }
  0x1e   : > { %1009 = vmatpush.msra.mxu3 %v422_v17  ;;  %552 = vmatpush.msra.mxu1 %v422_v17  ;;  %v345_v54 = vld [vmem:[%s1203_s6 + $0x50] sm:$0xff]  ;;  %v346_v55 = vld [vmem:[%s1203_s6 + $0x58] sm:$0xff]  ;;  %v379_v56 = vld [vmem:[%s1203_s6 + $0x160] sm:$0xff] }
  0x1f   : > { %994 = vmatpush.msra.mxu2 %v405_v18  ;;  %440 = vmatpush.msra.mxu0 %v405_v18  ;;  %v380_v57 = vld [vmem:[%s1203_s6 + $0x168] sm:$0xff]  ;;  %v347_v58 = vld [vmem:[%s1203_s6 + $0x60] sm:$0xff]  ;;  %v381_v60 = vld [vmem:[%s1203_s6 + $0x170] sm:$0xff] }
  0x20   : > { %1010 = vmatpush.msra.mxu3 %v421_v19  ;;  %553 = vmatpush.msra.mxu1 %v421_v19  ;;  %v348_v59 = vld [vmem:[%s1203_s6 + $0x68] sm:$0xff]  ;;  %v382_v61 = vld [vmem:[%s1203_s6 + $0x178] sm:$0xff]  ;;  %v349_v62 = vld [vmem:[%s1203_s6 + $0x70] sm:$0xff] }
  0x21   : > { %995 = vmatpush.msra.mxu2 %v404_v20  ;;  %441 = vmatpush.msra.mxu0 %v404_v20  ;;  %v350_v63 = vld [vmem:[%s1203_s6 + $0x78] sm:$0xff]  ;;  %v383_v0 = vld [vmem:[%s1203_s6 + $0x180] sm:$0xff]  ;;  %v384_v1 = vld [vmem:[%s1203_s6 + $0x188] sm:$0xff] }
  0x22   : > { %1011 = vmatpush.msra.mxu3 %v420_v21  ;;  %554 = vmatpush.msra.mxu1 %v420_v21  ;;  %v351_v2 = vld [vmem:[%s1203_s6 + $0x80] sm:$0xff]  ;;  %v352_v3 = vld [vmem:[%s1203_s6 + $0x88] sm:$0xff]  ;;  %v385_v4 = vld [vmem:[%s1203_s6 + $0x190] sm:$0xff] }
  0x23   : > { %996 = vmatpush.msra.mxu2 %v403_v22  ;;  %442 = vmatpush.msra.mxu0 %v403_v22  ;;  %v386_v5 = vld [vmem:[%s1203_s6 + $0x198] sm:$0xff]  ;;  %v353_v6 = vld [vmem:[%s1203_s6 + $0x90] sm:$0xff]  ;;  %v387_v8 = vld [vmem:[%s1203_s6 + $0x1a0] sm:$0xff] }
  0x24   : > { %1012 = vmatpush.msra.mxu3 %v419_v23  ;;  %555 = vmatpush.msra.mxu1 %v419_v23  ;;  %v354_v7 = vld [vmem:[%s1203_s6 + $0x98] sm:$0xff]  ;;  %v388_v9 = vld [vmem:[%s1203_s6 + $0x1a8] sm:$0xff]  ;;  %v355_v10 = vld [vmem:[%s1203_s6 + $0xa0] sm:$0xff] }
  0x25   : > { %997 = vmatpush.msra.mxu2 %v402_v24  ;;  %443 = vmatpush.msra.mxu0 %v402_v24  ;;  %v356_v11 = vld [vmem:[%s1203_s6 + $0xa8] sm:$0xff]  ;;  %v389_v12 = vld [vmem:[%s1203_s6 + $0x1b0] sm:$0xff]  ;;  %v390_v13 = vld [vmem:[%s1203_s6 + $0x1b8] sm:$0xff] }
  0x26   : > { %1013 = vmatpush.msra.mxu3 %v418_v25  ;;  %556 = vmatpush.msra.mxu1 %v418_v25  ;;  %v357_v14 = vld [vmem:[%s1203_s6 + $0xb0] sm:$0xff]  ;;  %v358_v15 = vld [vmem:[%s1203_s6 + $0xb8] sm:$0xff]  ;;  %v391_v16 = vld [vmem:[%s1203_s6 + $0x1c0] sm:$0xff] }
  0x27   : > { %998 = vmatpush.msra.mxu2 %v401_v26  ;;  %444 = vmatpush.msra.mxu0 %v401_v26  ;;  %v392_v17 = vld [vmem:[%s1203_s6 + $0x1c8] sm:$0xff]  ;;  %v359_v18 = vld [vmem:[%s1203_s6 + $0xc0] sm:$0xff]  ;;  %v393_v20 = vld [vmem:[%s1203_s6 + $0x1d0] sm:$0xff] }
  0x28   : > { %1014 = vmatpush.msra.mxu3 %v417_v27  ;;  %557 = vmatpush.msra.mxu1 %v417_v27  ;;  %v360_v19 = vld [vmem:[%s1203_s6 + $0xc8] sm:$0xff]  ;;  %v394_v21 = vld [vmem:[%s1203_s6 + $0x1d8] sm:$0xff]  ;;  %v361_v22 = vld [vmem:[%s1203_s6 + $0xd0] sm:$0xff] }
  0x29   : > { %999 = vmatpush.msra.mxu2 %v400_v28  ;;  %445 = vmatpush.msra.mxu0 %v400_v28  ;;  %v362_v23 = vld [vmem:[%s1203_s6 + $0xd8] sm:$0xff]  ;;  %v395_v24 = vld [vmem:[%s1203_s6 + $0x1e0] sm:$0xff]  ;;  %v396_v25 = vld [vmem:[%s1203_s6 + $0x1e8] sm:$0xff] }
  0x2a   : > { %1015 = vmatpush.msra.mxu3 %v416_v29  ;;  %558 = vmatpush.msra.mxu1 %v416_v29  ;;  %v363_v26 = vld [vmem:[%s1203_s6 + $0xe0] sm:$0xff]  ;;  %v364_v27 = vld [vmem:[%s1203_s6 + $0xe8] sm:$0xff]  ;;  %v397_v28 = vld [vmem:[%s1203_s6 + $0x1f0] sm:$0xff] }
  0x2b   : > { %1000 = vmatpush.msra.mxu2 %v399_v30  ;;  %446 = vmatpush.msra.mxu0 %v399_v30  ;;  %v398_v29 = vld [vmem:[%s1203_s6 + $0x1f8] sm:$0xff]  ;;  %v365_v30 = vld [vmem:[%s1203_s6 + $0xf0] sm:$0xff] }
  0x2c   : > { %1016 = vmatpush.msra.mxu3 %v415_v31  ;;  %495 = vmatmul.f32.vlgmr.msra.gmra.mxu2 %v367_v32  ;;  %v1278_v32 = vld [vmem:[%s1361_s2] ss:$0 sm:$0xff] }
  0x2d   : > { %608 = vmatmul.f32.vlgmr.msra.gmra.mxu3 %v368_v33  ;;  %559 = vmatpush.msra.mxu1 %v415_v31  ;;  %v366_v31 = vld [vmem:[%s1203_s6 + $0xf8] sm:$0xff] }
  0x2e   : > { %447 = vmatmul.f32.vlgmr.msra.gmra.mxu0 %v335_v34  ;;  %560 = vmatmul.f32.vlgmr.msra.gmra.mxu1 %v336_v35 }
  0x34   : > { %498 = vmatmul.f32.gmra.mxu2 %v369_v36 }
  0x35   : > { %611 = vmatmul.f32.gmra.mxu3 %v370_v37 }
  0x36   : > { %450 = vmatmul.f32.gmra.mxu0 %v337_v38  ;;  %563 = vmatmul.f32.gmra.mxu1 %v338_v39 }
  0x3c   : > { %501 = vmatmul.f32.gmra.mxu2 %v371_v40 }
  0x3d   : > { %614 = vmatmul.f32.gmra.mxu3 %v372_v41 }
  0x3e   : > { %453 = vmatmul.f32.gmra.mxu0 %v339_v42  ;;  %566 = vmatmul.f32.gmra.mxu1 %v340_v43 }
  0x44   : > { %504 = vmatmul.f32.gmra.mxu2 %v373_v44 }
  0x45   : > { %617 = vmatmul.f32.gmra.mxu3 %v374_v45 }
  0x46   : > { %456 = vmatmul.f32.gmra.mxu0 %v341_v46  ;;  %569 = vmatmul.f32.gmra.mxu1 %v342_v47 }
  0x4c   : > { %507 = vmatmul.f32.gmra.mxu2 %v375_v48 }
  0x4d   : > { %620 = vmatmul.f32.gmra.mxu3 %v376_v49 }
  0x4e   : > { %459 = vmatmul.f32.gmra.mxu0 %v343_v50  ;;  %572 = vmatmul.f32.gmra.mxu1 %v344_v51 }
  0x54   : > { %510 = vmatmul.f32.gmra.mxu2 %v377_v52 }
  0x55   : > { %623 = vmatmul.f32.gmra.mxu3 %v378_v53 }
  0x56   : > { %462 = vmatmul.f32.gmra.mxu0 %v345_v54  ;;  %575 = vmatmul.f32.gmra.mxu1 %v346_v55 }
  0x5c   : > { %513 = vmatmul.f32.gmra.mxu2 %v379_v56 }
  0x5d   : > { %626 = vmatmul.f32.gmra.mxu3 %v380_v57 }
  0x5e   : > { %465 = vmatmul.f32.gmra.mxu0 %v347_v58  ;;  %578 = vmatmul.f32.gmra.mxu1 %v348_v59 }
  0x64   : > { %516 = vmatmul.f32.gmra.mxu2 %v381_v60 }
  0x65   : > { %629 = vmatmul.f32.gmra.mxu3 %v382_v61 }
  0x66   : > { %468 = vmatmul.f32.gmra.mxu0 %v349_v62  ;;  %581 = vmatmul.f32.gmra.mxu1 %v350_v63 }
  0x6c   : > { %519 = vmatmul.f32.gmra.mxu2 %v383_v0 }
  0x6d   : > { %632 = vmatmul.f32.gmra.mxu3 %v384_v1 }
  0x6e   : > { %471 = vmatmul.f32.gmra.mxu0 %v351_v2  ;;  %584 = vmatmul.f32.gmra.mxu1 %v352_v3 }
  0x74   : > { %522 = vmatmul.f32.gmra.mxu2 %v385_v4 }
  0x75   : > { %635 = vmatmul.f32.gmra.mxu3 %v386_v5 }
  0x76   : > { %474 = vmatmul.f32.gmra.mxu0 %v353_v6  ;;  %587 = vmatmul.f32.gmra.mxu1 %v354_v7 }
  0x7c   : > { %525 = vmatmul.f32.gmra.mxu2 %v387_v8 }
  0x7d   : > { %638 = vmatmul.f32.gmra.mxu3 %v388_v9 }
  0x7e   : > { %477 = vmatmul.f32.gmra.mxu0 %v355_v10  ;;  %590 = vmatmul.f32.gmra.mxu1 %v356_v11 }
  0x84   : > { %528 = vmatmul.f32.gmra.mxu2 %v389_v12 }
  0x85   : > { %641 = vmatmul.f32.gmra.mxu3 %v390_v13 }
  0x86   : > { %480 = vmatmul.f32.gmra.mxu0 %v357_v14  ;;  %593 = vmatmul.f32.gmra.mxu1 %v358_v15 }
  0x8c   : > { %531 = vmatmul.f32.gmra.mxu2 %v391_v16 }
  0x8d   : > { %644 = vmatmul.f32.gmra.mxu3 %v392_v17 }
  0x8e   : > { %483 = vmatmul.f32.gmra.mxu0 %v359_v18  ;;  %596 = vmatmul.f32.gmra.mxu1 %v360_v19 }
  0x94   : > { %534 = vmatmul.f32.gmra.mxu2 %v393_v20 }
  0x95   : > { %647 = vmatmul.f32.gmra.mxu3 %v394_v21 }
  0x96   : > { %486 = vmatmul.f32.gmra.mxu0 %v361_v22  ;;  %599 = vmatmul.f32.gmra.mxu1 %v362_v23 }
  0x9c   : > { %537 = vmatmul.f32.gmra.mxu2 %v395_v24 }
  0x9d   : > { %650 = vmatmul.f32.gmra.mxu3 %v396_v25 }
  0x9e   : > { %489 = vmatmul.f32.gmra.mxu0 %v363_v26  ;;  %602 = vmatmul.f32.gmra.mxu1 %v364_v27 }
  0xa4   : > { %540 = vmatmul.f32.gmra.mxu2 %v397_v28 }
  0xa5   : > { %653 = vmatmul.f32.gmra.mxu3 %v398_v29 }
  0xa6   : > { %492 = vmatmul.f32.gmra.mxu0 %v365_v30  ;;  %605 = vmatmul.f32.gmra.mxu1 %v366_v31 }
  0xab   : > { %v448_v33 = vpop.f32.mrf.mxu0  ;;  %v561_v34 = vpop.f32.mrf.mxu1 }
  0xac   : > { %v562_v35 = vadd.f32 %v561_v34, %v448_v33 }
  0xae   : > { %v760_v36 = vadd.f32 %v1278_v32, %v562_v35 }
  0xaf   : > { %v496_v37 = vpop.f32.mrf.mxu2 }
  0xb0   : > { %v609_v38 = vpop.f32.mrf.mxu3  ;;  %v792_v39 = vmax.f32 %v760_v36, 0.0 }
  0xb1   : > { %v610_v40 = vadd.f32 %v609_v38, %v496_v37 }
  0xb2   : > { %824 = vst [vmem:[%s1285_s20] sm:$0xff] %v792_v39 }
  0xb3   : > { %v776_v41 = vadd.f32 %v1278_v32, %v610_v40  ;;  %v451_v42 = vpop.f32.mrf.mxu0  ;;  %v564_v43 = vpop.f32.mrf.mxu1 }
  0xb4   : > { %v565_v45 = vadd.f32 %v564_v43, %v451_v42 }
  0xb5   : > { %v808_v44 = vmax.f32 %v776_v41, 0.0 }
  0xb6   : > { %v761_v46 = vadd.f32 %v1278_v32, %v565_v45 }
  0xb7   : > { %840 = vst [vmem:[%s1285_s20 + $0x80] sm:$0xff] %v808_v44  ;;  %v499_v47 = vpop.f32.mrf.mxu2 }
  0xb8   : > { %v612_v48 = vpop.f32.mrf.mxu3  ;;  %v793_v49 = vmax.f32 %v761_v46, 0.0 }
  0xb9   : > { %v613_v50 = vadd.f32 %v612_v48, %v499_v47 }
  0xba   : > { %825 = vst [vmem:[%s1285_s20 + $0x8] sm:$0xff] %v793_v49 }
  0xbb   : > { %v777_v51 = vadd.f32 %v1278_v32, %v613_v50  ;;  %v454_v52 = vpop.f32.mrf.mxu0  ;;  %v567_v53 = vpop.f32.mrf.mxu1 }
  0xbc   : > { %v568_v55 = vadd.f32 %v567_v53, %v454_v52 }
  0xbd   : > { %v809_v54 = vmax.f32 %v777_v51, 0.0 }
  0xbe   : > { %v762_v56 = vadd.f32 %v1278_v32, %v568_v55 }
  0xbf   : > { %841 = vst [vmem:[%s1285_s20 + $0x88] sm:$0xff] %v809_v54  ;;  %v502_v57 = vpop.f32.mrf.mxu2 }
  0xc0   : > { %v615_v58 = vpop.f32.mrf.mxu3  ;;  %v794_v59 = vmax.f32 %v762_v56, 0.0 }
  0xc1   : > { %v616_v60 = vadd.f32 %v615_v58, %v502_v57 }
  0xc2   : > { %826 = vst [vmem:[%s1285_s20 + $0x10] sm:$0xff] %v794_v59 }
  0xc3   : > { %v778_v61 = vadd.f32 %v1278_v32, %v616_v60  ;;  %v457_v62 = vpop.f32.mrf.mxu0  ;;  %v570_v63 = vpop.f32.mrf.mxu1 }
  0xc4   : > { %v571_v1 = vadd.f32 %v570_v63, %v457_v62 }
  0xc5   : > { %v810_v0 = vmax.f32 %v778_v61, 0.0 }
  0xc6   : > { %v763_v2 = vadd.f32 %v1278_v32, %v571_v1 }
  0xc7   : > { %842 = vst [vmem:[%s1285_s20 + $0x90] sm:$0xff] %v810_v0  ;;  %v505_v3 = vpop.f32.mrf.mxu2 }
  0xc8   : > { %v618_v4 = vpop.f32.mrf.mxu3  ;;  %v795_v5 = vmax.f32 %v763_v2, 0.0 }
  0xc9   : > { %v619_v6 = vadd.f32 %v618_v4, %v505_v3 }
  0xca   : > { %827 = vst [vmem:[%s1285_s20 + $0x18] sm:$0xff] %v795_v5 }
  0xcb   : > { %v779_v7 = vadd.f32 %v1278_v32, %v619_v6  ;;  %v460_v8 = vpop.f32.mrf.mxu0  ;;  %v573_v9 = vpop.f32.mrf.mxu1 }
  0xcc   : > { %v574_v11 = vadd.f32 %v573_v9, %v460_v8 }
  0xcd   : > { %v811_v10 = vmax.f32 %v779_v7, 0.0 }
  0xce   : > { %v764_v12 = vadd.f32 %v1278_v32, %v574_v11 }
  0xcf   : > { %843 = vst [vmem:[%s1285_s20 + $0x98] sm:$0xff] %v811_v10  ;;  %v508_v13 = vpop.f32.mrf.mxu2 }
  0xd0   : > { %v621_v14 = vpop.f32.mrf.mxu3  ;;  %v796_v15 = vmax.f32 %v764_v12, 0.0 }
  0xd1   : > { %v622_v16 = vadd.f32 %v621_v14, %v508_v13 }
  0xd2   : > { %828 = vst [vmem:[%s1285_s20 + $0x20] sm:$0xff] %v796_v15 }
  0xd3   : > { %v780_v17 = vadd.f32 %v1278_v32, %v622_v16  ;;  %v463_v18 = vpop.f32.mrf.mxu0  ;;  %v576_v19 = vpop.f32.mrf.mxu1 }
  0xd4   : > { %v577_v21 = vadd.f32 %v576_v19, %v463_v18 }
  0xd5   : > { %v812_v20 = vmax.f32 %v780_v17, 0.0 }
  0xd6   : > { %v765_v22 = vadd.f32 %v1278_v32, %v577_v21 }
  0xd7   : > { %844 = vst [vmem:[%s1285_s20 + $0xa0] sm:$0xff] %v812_v20  ;;  %v511_v23 = vpop.f32.mrf.mxu2 }
  0xd8   : > { %v624_v24 = vpop.f32.mrf.mxu3  ;;  %v797_v25 = vmax.f32 %v765_v22, 0.0 }
  0xd9   : > { %v625_v26 = vadd.f32 %v624_v24, %v511_v23 }
  0xda   : > { %829 = vst [vmem:[%s1285_s20 + $0x28] sm:$0xff] %v797_v25 }
  0xdb   : > { %v781_v27 = vadd.f32 %v1278_v32, %v625_v26  ;;  %v466_v28 = vpop.f32.mrf.mxu0  ;;  %v579_v29 = vpop.f32.mrf.mxu1 }
  0xdc   : > { %v580_v31 = vadd.f32 %v579_v29, %v466_v28 }
  0xdd   : > { %v813_v30 = vmax.f32 %v781_v27, 0.0 }
  0xde   : > { %v766_v33 = vadd.f32 %v1278_v32, %v580_v31 }
  0xdf   : > { %845 = vst [vmem:[%s1285_s20 + $0xa8] sm:$0xff] %v813_v30  ;;  %v514_v34 = vpop.f32.mrf.mxu2 }
  0xe0   : > { %v627_v35 = vpop.f32.mrf.mxu3  ;;  %v798_v36 = vmax.f32 %v766_v33, 0.0 }
  0xe1   : > { %v628_v37 = vadd.f32 %v627_v35, %v514_v34 }
  0xe2   : > { %830 = vst [vmem:[%s1285_s20 + $0x30] sm:$0xff] %v798_v36 }
  0xe3   : > { %v782_v38 = vadd.f32 %v1278_v32, %v628_v37  ;;  %v469_v39 = vpop.f32.mrf.mxu0  ;;  %v582_v40 = vpop.f32.mrf.mxu1 }
  0xe4   : > { %v583_v42 = vadd.f32 %v582_v40, %v469_v39 }
  0xe5   : > { %v814_v41 = vmax.f32 %v782_v38, 0.0 }
  0xe6   : > { %v767_v43 = vadd.f32 %v1278_v32, %v583_v42 }
  0xe7   : > { %846 = vst [vmem:[%s1285_s20 + $0xb0] sm:$0xff] %v814_v41  ;;  %v517_v44 = vpop.f32.mrf.mxu2 }
  0xe8   : > { %v630_v45 = vpop.f32.mrf.mxu3  ;;  %v799_v46 = vmax.f32 %v767_v43, 0.0 }
  0xe9   : > { %v631_v47 = vadd.f32 %v630_v45, %v517_v44 }
  0xea   : > { %831 = vst [vmem:[%s1285_s20 + $0x38] sm:$0xff] %v799_v46 }
  0xeb   : > { %v783_v48 = vadd.f32 %v1278_v32, %v631_v47  ;;  %v472_v49 = vpop.f32.mrf.mxu0  ;;  %v585_v50 = vpop.f32.mrf.mxu1 }
  0xec   : > { %v586_v52 = vadd.f32 %v585_v50, %v472_v49 }
  0xed   : > { %v815_v51 = vmax.f32 %v783_v48, 0.0 }
  0xee   : > { %v768_v53 = vadd.f32 %v1278_v32, %v586_v52 }
  0xef   : > { %847 = vst [vmem:[%s1285_s20 + $0xb8] sm:$0xff] %v815_v51  ;;  %v520_v54 = vpop.f32.mrf.mxu2 }
  0xf0   : > { %v633_v55 = vpop.f32.mrf.mxu3  ;;  %v800_v56 = vmax.f32 %v768_v53, 0.0 }
  0xf1   : > { %v634_v57 = vadd.f32 %v633_v55, %v520_v54 }
  0xf2   : > { %832 = vst [vmem:[%s1285_s20 + $0x40] sm:$0xff] %v800_v56 }
  0xf3   : > { %v784_v58 = vadd.f32 %v1278_v32, %v634_v57  ;;  %v475_v59 = vpop.f32.mrf.mxu0  ;;  %v588_v60 = vpop.f32.mrf.mxu1 }
  0xf4   : > { %v589_v62 = vadd.f32 %v588_v60, %v475_v59 }
  0xf5   : > { %v816_v61 = vmax.f32 %v784_v58, 0.0 }
  0xf6   : > { %v769_v63 = vadd.f32 %v1278_v32, %v589_v62 }
  0xf7   : > { %848 = vst [vmem:[%s1285_s20 + $0xc0] sm:$0xff] %v816_v61  ;;  %v523_v0 = vpop.f32.mrf.mxu2 }
  0xf8   : > { %v636_v1 = vpop.f32.mrf.mxu3  ;;  %v801_v2 = vmax.f32 %v769_v63, 0.0 }
  0xf9   : > { %v637_v3 = vadd.f32 %v636_v1, %v523_v0 }
  0xfa   : > { %833 = vst [vmem:[%s1285_s20 + $0x48] sm:$0xff] %v801_v2 }
  0xfb   : > { %v785_v4 = vadd.f32 %v1278_v32, %v637_v3  ;;  %v478_v5 = vpop.f32.mrf.mxu0  ;;  %v591_v6 = vpop.f32.mrf.mxu1 }
  0xfc   : > { %v592_v8 = vadd.f32 %v591_v6, %v478_v5 }
  0xfd   : > { %v817_v7 = vmax.f32 %v785_v4, 0.0 }
  0xfe   : > { %v770_v9 = vadd.f32 %v1278_v32, %v592_v8 }
  0xff   : > { %849 = vst [vmem:[%s1285_s20 + $0xc8] sm:$0xff] %v817_v7  ;;  %v526_v10 = vpop.f32.mrf.mxu2 }
 0x100   : > { %v639_v11 = vpop.f32.mrf.mxu3  ;;  %v802_v12 = vmax.f32 %v770_v9, 0.0 }
 0x101   : > { %v640_v13 = vadd.f32 %v639_v11, %v526_v10 }
 0x102   : > { %834 = vst [vmem:[%s1285_s20 + $0x50] sm:$0xff] %v802_v12 }
 0x103   : > { %v786_v14 = vadd.f32 %v1278_v32, %v640_v13  ;;  %v481_v15 = vpop.f32.mrf.mxu0  ;;  %v594_v16 = vpop.f32.mrf.mxu1 }
 0x104   : > { %v595_v18 = vadd.f32 %v594_v16, %v481_v15 }
 0x105   : > { %v818_v17 = vmax.f32 %v786_v14, 0.0 }
 0x106   : > { %v771_v19 = vadd.f32 %v1278_v32, %v595_v18 }
 0x107   : > { %850 = vst [vmem:[%s1285_s20 + $0xd0] sm:$0xff] %v818_v17  ;;  %v529_v20 = vpop.f32.mrf.mxu2 }
 0x108   : > { %v642_v21 = vpop.f32.mrf.mxu3  ;;  %v803_v22 = vmax.f32 %v771_v19, 0.0 }
 0x109   : > { %v643_v23 = vadd.f32 %v642_v21, %v529_v20 }
 0x10a   : > { %835 = vst [vmem:[%s1285_s20 + $0x58] sm:$0xff] %v803_v22 }
 0x10b   : > { %v787_v24 = vadd.f32 %v1278_v32, %v643_v23  ;;  %v484_v25 = vpop.f32.mrf.mxu0  ;;  %v597_v26 = vpop.f32.mrf.mxu1 }
 0x10c   : > { %v598_v28 = vadd.f32 %v597_v26, %v484_v25 }
 0x10d   : > { %v819_v27 = vmax.f32 %v787_v24, 0.0 }
 0x10e   : > { %v772_v29 = vadd.f32 %v1278_v32, %v598_v28 }
 0x10f   : > { %851 = vst [vmem:[%s1285_s20 + $0xd8] sm:$0xff] %v819_v27  ;;  %v532_v30 = vpop.f32.mrf.mxu2 }
 0x110   : > { %v645_v31 = vpop.f32.mrf.mxu3  ;;  %v804_v33 = vmax.f32 %v772_v29, 0.0 }
 0x111   : > { %v646_v34 = vadd.f32 %v645_v31, %v532_v30 }
 0x112   : > { %836 = vst [vmem:[%s1285_s20 + $0x60] sm:$0xff] %v804_v33 }
 0x113   : > { %v788_v35 = vadd.f32 %v1278_v32, %v646_v34  ;;  %v487_v36 = vpop.f32.mrf.mxu0  ;;  %v600_v37 = vpop.f32.mrf.mxu1 }
 0x114   : > { %v601_v39 = vadd.f32 %v600_v37, %v487_v36 }
 0x115   : > { %v820_v38 = vmax.f32 %v788_v35, 0.0 }
 0x116   : > { %v773_v40 = vadd.f32 %v1278_v32, %v601_v39 }
 0x117   : > { %852 = vst [vmem:[%s1285_s20 + $0xe0] sm:$0xff] %v820_v38  ;;  %v535_v41 = vpop.f32.mrf.mxu2 }
 0x118   : > { %v648_v42 = vpop.f32.mrf.mxu3  ;;  %v805_v43 = vmax.f32 %v773_v40, 0.0 }
 0x119   : > { %v649_v44 = vadd.f32 %v648_v42, %v535_v41 }
 0x11a   : > { %837 = vst [vmem:[%s1285_s20 + $0x68] sm:$0xff] %v805_v43 }
 0x11b   : > { %v789_v45 = vadd.f32 %v1278_v32, %v649_v44  ;;  %v490_v46 = vpop.f32.mrf.mxu0  ;;  %v603_v47 = vpop.f32.mrf.mxu1 }
 0x11c   : > { %v604_v49 = vadd.f32 %v603_v47, %v490_v46 }
 0x11d   : > { %v821_v48 = vmax.f32 %v789_v45, 0.0 }
 0x11e   : > { %v774_v50 = vadd.f32 %v1278_v32, %v604_v49 }
 0x11f   : > { %853 = vst [vmem:[%s1285_s20 + $0xe8] sm:$0xff] %v821_v48  ;;  %v538_v51 = vpop.f32.mrf.mxu2 }
 0x120   : > { %v651_v52 = vpop.f32.mrf.mxu3  ;;  %v806_v53 = vmax.f32 %v774_v50, 0.0 }
 0x121   : > { %v652_v54 = vadd.f32 %v651_v52, %v538_v51 }
 0x122   : > { %838 = vst [vmem:[%s1285_s20 + $0x70] sm:$0xff] %v806_v53 }
 0x123   : > { %v790_v55 = vadd.f32 %v1278_v32, %v652_v54  ;;  %v493_v56 = vpop.f32.mrf.mxu0  ;;  %v606_v57 = vpop.f32.mrf.mxu1 }
 0x124   : > { %v607_v59 = vadd.f32 %v606_v57, %v493_v56 }
 0x125   : > { %v822_v58 = vmax.f32 %v790_v55, 0.0 }
 0x126   : > { %v775_v60 = vadd.f32 %v1278_v32, %v607_v59 }
 0x127   : > { %854 = vst [vmem:[%s1285_s20 + $0xf0] sm:$0xff] %v822_v58  ;;  %v541_v61 = vpop.f32.mrf.mxu2 }
 0x128   : > { %v654_v62 = vpop.f32.mrf.mxu3  ;;  %v807_v63 = vmax.f32 %v775_v60, 0.0 }
 0x129   : > { %v655_v0 = vadd.f32 %v654_v62, %v541_v61 }
 0x12a   : > { %839 = vst [vmem:[%s1285_s20 + $0x78] sm:$0xff] %v807_v63 }
 0x12b   : > { %v791_v1 = vadd.f32 %v1278_v32, %v655_v0 }
 0x12d   : > { %v823_v2 = vmax.f32 %v791_v1, 0.0 }
 0x12f   : > { %855 = vst [vmem:[%s1285_s20 + $0xf8] sm:$0xff] %v823_v2 }
 0x130 PF: > { %s13_s14 = sadd.s32 1, %s1064_s14   ;;  %s1363_s12 = smov %s1060_s13 }
 0x131   : > { %p10_p5 = scmp.ge.s32.totalorder %s13_s14, 18   ;;  %s1364_s13 = smov %s1366_s15 }
 0x133   :  { %12 = sbr.rel (!%p10_p5) target bundleno = 2 (0x2), region = 76 }

// kernel: _lambda_.8
= control target key start
LH: loop header
LB: loop body
LE: loop exit
PB: predicated region body
PF: predicated region fallthrough
CT: control target
= control target key end

     0   :  { %s1086_s12 = smov 0   ;;  %s1088_s13 = smov 0   ;;  %s1359_s0 = inlined_call_operand.vmem [shape: f32[512,256], index: 0, kind: input, shape index: {}]   ;;  %s1360_s1 = inlined_call_operand.vmem [shape: f32[256,128], index: 1, kind: input, shape index: {}]   ;;  %s1361_s2 = inlined_call_operand.vmem [shape: f32[1,128], index: 2, kind: input, shape index: {}]   ;;  %s1362_s3 = inlined_call_operand.vmem [shape: f32[512,128], index: 3, kind: output, shape index: {}]  }
   0x1   :  { %s1090_s14 = smov 0  }
   0x2 LB: > { %s32_s15 = sadd.s32 1, %s1060_s13  ;;  %p976_p0 = scmp.ge.s32.totalorder %s1064_s14, 1  ;;  %s1064_s14 = sphi %s1090_s14, %s13_s14   ;;  %s1060_s13 = sphi %s1088_s13, %s1364_s13   ;;  %s1056_s12 = sphi %s1086_s12, %s1363_s12  }
   0x3   : > { %p34_p1 = scmp.ge.s32.totalorder %s32_s15, 2  ;;  %p191_p2 = scmp.lt.s32.totalorder %s1064_s14, 3 }
   0x5   : > { %s1366_s15 = smov (%p34_p1, %s32_s15), 0  ;;  %p192_p3 = pnand %p976_p0, %p191_p2 }
   0x6   : > { %s977_s25 = sshll.u32 (!%p192_p3), %s1056_s12, 5 }
   0x7   : > { %195 = sbr.rel (%p192_p3) target bundleno = 304 (0x130), region = 32  ;;  %p236_p4 = scmp.lt.s32.totalorder (!%p192_p3), %s977_s25, 63 }
   0xc   : > { %v414_v0 = vld [vmem:[%s1360_s1 + $0x78] sm:$0xff]  ;;  %v413_v2 = vld [vmem:[%s1360_s1 + $0x70] sm:$0xff]  ;;  %v412_v4 = vld [vmem:[%s1360_s1 + $0x68] sm:$0xff]  ;;  %s1368_s25 = smov (!%p236_p4, %s977_s25), 63 }
   0xd   : > { %v430_v1 = vld [vmem:[%s1360_s1 + $0xf8] sm:$0xff]  ;;  %985 = vmatpush.msra.mxu2 %v414_v0  ;;  %v429_v3 = vld [vmem:[%s1360_s1 + $0xf0] sm:$0xff]  ;;  %v428_v5 = vld [vmem:[%s1360_s1 + $0xe8] sm:$0xff]  ;;  %431 = vmatpush.msra.mxu0 %v414_v0  ;;  %s984_s22 = sshll.u32 %s1368_s25, 4  ;;  %s981_s17 = sshll.u32 %s1368_s25, 3 }
   0xe   : > { %1001 = vmatpush.msra.mxu3 %v430_v1  ;;  %544 = vmatpush.msra.mxu1 %v430_v1  ;;  %v411_v6 = vld [vmem:[%s1360_s1 + $0x60] sm:$0xff]  ;;  %v410_v8 = vld [vmem:[%s1360_s1 + $0x58] sm:$0xff]  ;;  %v409_v10 = vld [vmem:[%s1360_s1 + $0x50] sm:$0xff]  ;;  %s1203_s6 = scalar_lea.vmem %s1359_s0, %s984_s22  ;;  %s1285_s20 = scalar_lea.vmem %s1362_s3, %s981_s17 }
   0xf   : > { %986 = vmatpush.msra.mxu2 %v413_v2  ;;  %v427_v7 = vld [vmem:[%s1360_s1 + $0xe0] sm:$0xff]  ;;  %432 = vmatpush.msra.mxu0 %v413_v2  ;;  %v426_v9 = vld [vmem:[%s1360_s1 + $0xd8] sm:$0xff]  ;;  %v425_v11 = vld [vmem:[%s1360_s1 + $0xd0] sm:$0xff] }
  0x10   : > { %1002 = vmatpush.msra.mxu3 %v429_v3  ;;  %545 = vmatpush.msra.mxu1 %v429_v3  ;;  %v408_v12 = vld [vmem:[%s1360_s1 + $0x48] sm:$0xff]  ;;  %v407_v14 = vld [vmem:[%s1360_s1 + $0x40] sm:$0xff]  ;;  %v406_v16 = vld [vmem:[%s1360_s1 + $0x38] sm:$0xff] }
  0x11   : > { %987 = vmatpush.msra.mxu2 %v412_v4  ;;  %433 = vmatpush.msra.mxu0 %v412_v4  ;;  %v424_v13 = vld [vmem:[%s1360_s1 + $0xc8] sm:$0xff]  ;;  %v423_v15 = vld [vmem:[%s1360_s1 + $0xc0] sm:$0xff]  ;;  %v422_v17 = vld [vmem:[%s1360_s1 + $0xb8] sm:$0xff] }
  0x12   : > { %1003 = vmatpush.msra.mxu3 %v428_v5  ;;  %546 = vmatpush.msra.mxu1 %v428_v5  ;;  %v405_v18 = vld [vmem:[%s1360_s1 + $0x30] sm:$0xff]  ;;  %v404_v20 = vld [vmem:[%s1360_s1 + $0x28] sm:$0xff]  ;;  %v403_v22 = vld [vmem:[%s1360_s1 + $0x20] sm:$0xff] }
  0x13   : > { %988 = vmatpush.msra.mxu2 %v411_v6  ;;  %434 = vmatpush.msra.mxu0 %v411_v6  ;;  %v421_v19 = vld [vmem:[%s1360_s1 + $0xb0] sm:$0xff]  ;;  %v420_v21 = vld [vmem:[%s1360_s1 + $0xa8] sm:$0xff]  ;;  %v419_v23 = vld [vmem:[%s1360_s1 + $0xa0] sm:$0xff] }
  0x14   : > { %1004 = vmatpush.msra.mxu3 %v427_v7  ;;  %547 = vmatpush.msra.mxu1 %v427_v7  ;;  %v402_v24 = vld [vmem:[%s1360_s1 + $0x18] sm:$0xff]  ;;  %v401_v26 = vld [vmem:[%s1360_s1 + $0x10] sm:$0xff]  ;;  %v400_v28 = vld [vmem:[%s1360_s1 + $0x8] sm:$0xff] }
  0x15   : > { %989 = vmatpush.msra.mxu2 %v410_v8  ;;  %435 = vmatpush.msra.mxu0 %v410_v8  ;;  %v418_v25 = vld [vmem:[%s1360_s1 + $0x98] sm:$0xff]  ;;  %v417_v27 = vld [vmem:[%s1360_s1 + $0x90] sm:$0xff]  ;;  %v416_v29 = vld [vmem:[%s1360_s1 + $0x88] sm:$0xff] }
  0x16   : > { %1005 = vmatpush.msra.mxu3 %v426_v9  ;;  %548 = vmatpush.msra.mxu1 %v426_v9  ;;  %v399_v30 = vld [vmem:[%s1360_s1] sm:$0xff]  ;;  %v368_v33 = vld [vmem:[%s1203_s6 + $0x108] sm:$0xff]  ;;  %v369_v36 = vld [vmem:[%s1203_s6 + $0x110] sm:$0xff] }
  0x17   : > { %990 = vmatpush.msra.mxu2 %v409_v10  ;;  %436 = vmatpush.msra.mxu0 %v409_v10  ;;  %v415_v31 = vld [vmem:[%s1360_s1 + $0x80] sm:$0xff]  ;;  %v336_v35 = vld [vmem:[%s1203_s6 + $0x8] sm:$0xff]  ;;  %v370_v37 = vld [vmem:[%s1203_s6 + $0x118] sm:$0xff] }
  0x18   : > { %1006 = vmatpush.msra.mxu3 %v425_v11  ;;  %549 = vmatpush.msra.mxu1 %v425_v11  ;;  %v367_v32 = vld [vmem:[%s1203_s6 + $0x100] sm:$0xff]  ;;  %v337_v38 = vld [vmem:[%s1203_s6 + $0x10] sm:$0xff]  ;;  %v338_v39 = vld [vmem:[%s1203_s6 + $0x18] sm:$0xff] }
  0x19   : > { %991 = vmatpush.msra.mxu2 %v408_v12  ;;  %437 = vmatpush.msra.mxu0 %v408_v12  ;;  %v335_v34 = vld [vmem:[%s1203_s6] sm:$0xff]  ;;  %v372_v41 = vld [vmem:[%s1203_s6 + $0x128] sm:$0xff]  ;;  %v373_v44 = vld [vmem:[%s1203_s6 + $0x130] sm:$0xff] }
  0x1a   : > { %1007 = vmatpush.msra.mxu3 %v424_v13  ;;  %550 = vmatpush.msra.mxu1 %v424_v13  ;;  %v371_v40 = vld [vmem:[%s1203_s6 + $0x120] sm:$0xff]  ;;  %v340_v43 = vld [vmem:[%s1203_s6 + $0x28] sm:$0xff]  ;;  %v374_v45 = vld [vmem:[%s1203_s6 + $0x138] sm:$0xff] }
  0x1b   : > { %992 = vmatpush.msra.mxu2 %v407_v14  ;;  %438 = vmatpush.msra.mxu0 %v407_v14  ;;  %v339_v42 = vld [vmem:[%s1203_s6 + $0x20] sm:$0xff]  ;;  %v341_v46 = vld [vmem:[%s1203_s6 + $0x30] sm:$0xff]  ;;  %v342_v47 = vld [vmem:[%s1203_s6 + $0x38] sm:$0xff] }
  0x1c   : > { %1008 = vmatpush.msra.mxu3 %v423_v15  ;;  %551 = vmatpush.msra.mxu1 %v423_v15  ;;  %v375_v48 = vld [vmem:[%s1203_s6 + $0x140] sm:$0xff]  ;;  %v376_v49 = vld [vmem:[%s1203_s6 + $0x148] sm:$0xff]  ;;  %v377_v52 = vld [vmem:[%s1203_s6 + $0x150] sm:$0xff] }
  0x1d   : > { %993 = vmatpush.msra.mxu2 %v406_v16  ;;  %439 = vmatpush.msra.mxu0 %v406_v16  ;;  %v343_v50 = vld [vmem:[%s1203_s6 + $0x40] sm:$0xff]  ;;  %v344_v51 = vld [vmem:[%s1203_s6 + $0x48] sm:$0xff]  ;;  %v378_v53 = vld [vmem:[%s1203_s6 + $0x158] sm:$0xff] }
  0x1e   : > { %1009 = vmatpush.msra.mxu3 %v422_v17  ;;  %552 = vmatpush.msra.mxu1 %v422_v17  ;;  %v345_v54 = vld [vmem:[%s1203_s6 + $0x50] sm:$0xff]  ;;  %v346_v55 = vld [vmem:[%s1203_s6 + $0x58] sm:$0xff]  ;;  %v379_v56 = vld [vmem:[%s1203_s6 + $0x160] sm:$0xff] }
  0x1f   : > { %994 = vmatpush.msra.mxu2 %v405_v18  ;;  %440 = vmatpush.msra.mxu0 %v405_v18  ;;  %v380_v57 = vld [vmem:[%s1203_s6 + $0x168] sm:$0xff]  ;;  %v347_v58 = vld [vmem:[%s1203_s6 + $0x60] sm:$0xff]  ;;  %v381_v60 = vld [vmem:[%s1203_s6 + $0x170] sm:$0xff] }
  0x20   : > { %1010 = vmatpush.msra.mxu3 %v421_v19  ;;  %553 = vmatpush.msra.mxu1 %v421_v19  ;;  %v348_v59 = vld [vmem:[%s1203_s6 + $0x68] sm:$0xff]  ;;  %v382_v61 = vld [vmem:[%s1203_s6 + $0x178] sm:$0xff]  ;;  %v349_v62 = vld [vmem:[%s1203_s6 + $0x70] sm:$0xff] }
  0x21   : > { %995 = vmatpush.msra.mxu2 %v404_v20  ;;  %441 = vmatpush.msra.mxu0 %v404_v20  ;;  %v350_v63 = vld [vmem:[%s1203_s6 + $0x78] sm:$0xff]  ;;  %v383_v0 = vld [vmem:[%s1203_s6 + $0x180] sm:$0xff]  ;;  %v384_v1 = vld [vmem:[%s1203_s6 + $0x188] sm:$0xff] }
  0x22   : > { %1011 = vmatpush.msra.mxu3 %v420_v21  ;;  %554 = vmatpush.msra.mxu1 %v420_v21  ;;  %v351_v2 = vld [vmem:[%s1203_s6 + $0x80] sm:$0xff]  ;;  %v352_v3 = vld [vmem:[%s1203_s6 + $0x88] sm:$0xff]  ;;  %v385_v4 = vld [vmem:[%s1203_s6 + $0x190] sm:$0xff] }
  0x23   : > { %996 = vmatpush.msra.mxu2 %v403_v22  ;;  %442 = vmatpush.msra.mxu0 %v403_v22  ;;  %v386_v5 = vld [vmem:[%s1203_s6 + $0x198] sm:$0xff]  ;;  %v353_v6 = vld [vmem:[%s1203_s6 + $0x90] sm:$0xff]  ;;  %v387_v8 = vld [vmem:[%s1203_s6 + $0x1a0] sm:$0xff] }
  0x24   : > { %1012 = vmatpush.msra.mxu3 %v419_v23  ;;  %555 = vmatpush.msra.mxu1 %v419_v23  ;;  %v354_v7 = vld [vmem:[%s1203_s6 + $0x98] sm:$0xff]  ;;  %v388_v9 = vld [vmem:[%s1203_s6 + $0x1a8] sm:$0xff]  ;;  %v355_v10 = vld [vmem:[%s1203_s6 + $0xa0] sm:$0xff] }
  0x25   : > { %997 = vmatpush.msra.mxu2 %v402_v24  ;;  %443 = vmatpush.msra.mxu0 %v402_v24  ;;  %v356_v11 = vld [vmem:[%s1203_s6 + $0xa8] sm:$0xff]  ;;  %v389_v12 = vld [vmem:[%s1203_s6 + $0x1b0] sm:$0xff]  ;;  %v390_v13 = vld [vmem:[%s1203_s6 + $0x1b8] sm:$0xff] }
  0x26   : > { %1013 = vmatpush.msra.mxu3 %v418_v25  ;;  %556 = vmatpush.msra.mxu1 %v418_v25  ;;  %v357_v14 = vld [vmem:[%s1203_s6 + $0xb0] sm:$0xff]  ;;  %v358_v15 = vld [vmem:[%s1203_s6 + $0xb8] sm:$0xff]  ;;  %v391_v16 = vld [vmem:[%s1203_s6 + $0x1c0] sm:$0xff] }
  0x27   : > { %998 = vmatpush.msra.mxu2 %v401_v26  ;;  %444 = vmatpush.msra.mxu0 %v401_v26  ;;  %v392_v17 = vld [vmem:[%s1203_s6 + $0x1c8] sm:$0xff]  ;;  %v359_v18 = vld [vmem:[%s1203_s6 + $0xc0] sm:$0xff]  ;;  %v393_v20 = vld [vmem:[%s1203_s6 + $0x1d0] sm:$0xff] }
  0x28   : > { %1014 = vmatpush.msra.mxu3 %v417_v27  ;;  %557 = vmatpush.msra.mxu1 %v417_v27  ;;  %v360_v19 = vld [vmem:[%s1203_s6 + $0xc8] sm:$0xff]  ;;  %v394_v21 = vld [vmem:[%s1203_s6 + $0x1d8] sm:$0xff]  ;;  %v361_v22 = vld [vmem:[%s1203_s6 + $0xd0] sm:$0xff] }
  0x29   : > { %999 = vmatpush.msra.mxu2 %v400_v28  ;;  %445 = vmatpush.msra.mxu0 %v400_v28  ;;  %v362_v23 = vld [vmem:[%s1203_s6 + $0xd8] sm:$0xff]  ;;  %v395_v24 = vld [vmem:[%s1203_s6 + $0x1e0] sm:$0xff]  ;;  %v396_v25 = vld [vmem:[%s1203_s6 + $0x1e8] sm:$0xff] }
  0x2a   : > { %1015 = vmatpush.msra.mxu3 %v416_v29  ;;  %558 = vmatpush.msra.mxu1 %v416_v29  ;;  %v363_v26 = vld [vmem:[%s1203_s6 + $0xe0] sm:$0xff]  ;;  %v364_v27 = vld [vmem:[%s1203_s6 + $0xe8] sm:$0xff]  ;;  %v397_v28 = vld [vmem:[%s1203_s6 + $0x1f0] sm:$0xff] }
  0x2b   : > { %1000 = vmatpush.msra.mxu2 %v399_v30  ;;  %446 = vmatpush.msra.mxu0 %v399_v30  ;;  %v398_v29 = vld [vmem:[%s1203_s6 + $0x1f8] sm:$0xff]  ;;  %v365_v30 = vld [vmem:[%s1203_s6 + $0xf0] sm:$0xff] }
  0x2c   : > { %1016 = vmatpush.msra.mxu3 %v415_v31  ;;  %495 = vmatmul.f32.vlgmr.msra.gmra.mxu2 %v367_v32  ;;  %v1278_v32 = vld [vmem:[%s1361_s2] ss:$0 sm:$0xff] }
  0x2d   : > { %608 = vmatmul.f32.vlgmr.msra.gmra.mxu3 %v368_v33  ;;  %559 = vmatpush.msra.mxu1 %v415_v31  ;;  %v366_v31 = vld [vmem:[%s1203_s6 + $0xf8] sm:$0xff] }
  0x2e   : > { %447 = vmatmul.f32.vlgmr.msra.gmra.mxu0 %v335_v34  ;;  %560 = vmatmul.f32.vlgmr.msra.gmra.mxu1 %v336_v35 }
  0x34   : > { %498 = vmatmul.f32.gmra.mxu2 %v369_v36 }
  0x35   : > { %611 = vmatmul.f32.gmra.mxu3 %v370_v37 }
  0x36   : > { %450 = vmatmul.f32.gmra.mxu0 %v337_v38  ;;  %563 = vmatmul.f32.gmra.mxu1 %v338_v39 }
  0x3c   : > { %501 = vmatmul.f32.gmra.mxu2 %v371_v40 }
  0x3d   : > { %614 = vmatmul.f32.gmra.mxu3 %v372_v41 }
  0x3e   : > { %453 = vmatmul.f32.gmra.mxu0 %v339_v42  ;;  %566 = vmatmul.f32.gmra.mxu1 %v340_v43 }
  0x44   : > { %504 = vmatmul.f32.gmra.mxu2 %v373_v44 }
  0x45   : > { %617 = vmatmul.f32.gmra.mxu3 %v374_v45 }
  0x46   : > { %456 = vmatmul.f32.gmra.mxu0 %v341_v46  ;;  %569 = vmatmul.f32.gmra.mxu1 %v342_v47 }
  0x4c   : > { %507 = vmatmul.f32.gmra.mxu2 %v375_v48 }
  0x4d   : > { %620 = vmatmul.f32.gmra.mxu3 %v376_v49 }
  0x4e   : > { %459 = vmatmul.f32.gmra.mxu0 %v343_v50  ;;  %572 = vmatmul.f32.gmra.mxu1 %v344_v51 }
  0x54   : > { %510 = vmatmul.f32.gmra.mxu2 %v377_v52 }
  0x55   : > { %623 = vmatmul.f32.gmra.mxu3 %v378_v53 }
  0x56   : > { %462 = vmatmul.f32.gmra.mxu0 %v345_v54  ;;  %575 = vmatmul.f32.gmra.mxu1 %v346_v55 }
  0x5c   : > { %513 = vmatmul.f32.gmra.mxu2 %v379_v56 }
  0x5d   : > { %626 = vmatmul.f32.gmra.mxu3 %v380_v57 }
  0x5e   : > { %465 = vmatmul.f32.gmra.mxu0 %v347_v58  ;;  %578 = vmatmul.f32.gmra.mxu1 %v348_v59 }
  0x64   : > { %516 = vmatmul.f32.gmra.mxu2 %v381_v60 }
  0x65   : > { %629 = vmatmul.f32.gmra.mxu3 %v382_v61 }
  0x66   : > { %468 = vmatmul.f32.gmra.mxu0 %v349_v62  ;;  %581 = vmatmul.f32.gmra.mxu1 %v350_v63 }
  0x6c   : > { %519 = vmatmul.f32.gmra.mxu2 %v383_v0 }
  0x6d   : > { %632 = vmatmul.f32.gmra.mxu3 %v384_v1 }
  0x6e   : > { %471 = vmatmul.f32.gmra.mxu0 %v351_v2  ;;  %584 = vmatmul.f32.gmra.mxu1 %v352_v3 }
  0x74   : > { %522 = vmatmul.f32.gmra.mxu2 %v385_v4 }
  0x75   : > { %635 = vmatmul.f32.gmra.mxu3 %v386_v5 }
  0x76   : > { %474 = vmatmul.f32.gmra.mxu0 %v353_v6  ;;  %587 = vmatmul.f32.gmra.mxu1 %v354_v7 }
  0x7c   : > { %525 = vmatmul.f32.gmra.mxu2 %v387_v8 }
  0x7d   : > { %638 = vmatmul.f32.gmra.mxu3 %v388_v9 }
  0x7e   : > { %477 = vmatmul.f32.gmra.mxu0 %v355_v10  ;;  %590 = vmatmul.f32.gmra.mxu1 %v356_v11 }
  0x84   : > { %528 = vmatmul.f32.gmra.mxu2 %v389_v12 }
  0x85   : > { %641 = vmatmul.f32.gmra.mxu3 %v390_v13 }
  0x86   : > { %480 = vmatmul.f32.gmra.mxu0 %v357_v14  ;;  %593 = vmatmul.f32.gmra.mxu1 %v358_v15 }
  0x8c   : > { %531 = vmatmul.f32.gmra.mxu2 %v391_v16 }
  0x8d   : > { %644 = vmatmul.f32.gmra.mxu3 %v392_v17 }
  0x8e   : > { %483 = vmatmul.f32.gmra.mxu0 %v359_v18  ;;  %596 = vmatmul.f32.gmra.mxu1 %v360_v19 }
  0x94   : > { %534 = vmatmul.f32.gmra.mxu2 %v393_v20 }
  0x95   : > { %647 = vmatmul.f32.gmra.mxu3 %v394_v21 }
  0x96   : > { %486 = vmatmul.f32.gmra.mxu0 %v361_v22  ;;  %599 = vmatmul.f32.gmra.mxu1 %v362_v23 }
  0x9c   : > { %537 = vmatmul.f32.gmra.mxu2 %v395_v24 }
  0x9d   : > { %650 = vmatmul.f32.gmra.mxu3 %v396_v25 }
  0x9e   : > { %489 = vmatmul.f32.gmra.mxu0 %v363_v26  ;;  %602 = vmatmul.f32.gmra.mxu1 %v364_v27 }
  0xa4   : > { %540 = vmatmul.f32.gmra.mxu2 %v397_v28 }
  0xa5   : > { %653 = vmatmul.f32.gmra.mxu3 %v398_v29 }
  0xa6   : > { %492 = vmatmul.f32.gmra.mxu0 %v365_v30  ;;  %605 = vmatmul.f32.gmra.mxu1 %v366_v31 }
  0xab   : > { %v448_v33 = vpop.f32.mrf.mxu0  ;;  %v561_v34 = vpop.f32.mrf.mxu1 }
  0xac   : > { %v562_v35 = vadd.f32 %v561_v34, %v448_v33 }
  0xae   : > { %v760_v36 = vadd.f32 %v1278_v32, %v562_v35 }
  0xaf   : > { %v496_v37 = vpop.f32.mrf.mxu2 }
  0xb0   : > { %v609_v38 = vpop.f32.mrf.mxu3  ;;  %v792_v39 = vmax.f32 %v760_v36, 0.0 }
  0xb1   : > { %v610_v40 = vadd.f32 %v609_v38, %v496_v37 }
  0xb2   : > { %824 = vst [vmem:[%s1285_s20] sm:$0xff] %v792_v39 }
  0xb3   : > { %v776_v41 = vadd.f32 %v1278_v32, %v610_v40  ;;  %v451_v42 = vpop.f32.mrf.mxu0  ;;  %v564_v43 = vpop.f32.mrf.mxu1 }
  0xb4   : > { %v565_v45 = vadd.f32 %v564_v43, %v451_v42 }
  0xb5   : > { %v808_v44 = vmax.f32 %v776_v41, 0.0 }
  0xb6   : > { %v761_v46 = vadd.f32 %v1278_v32, %v565_v45 }
  0xb7   : > { %840 = vst [vmem:[%s1285_s20 + $0x80] sm:$0xff] %v808_v44  ;;  %v499_v47 = vpop.f32.mrf.mxu2 }
  0xb8   : > { %v612_v48 = vpop.f32.mrf.mxu3  ;;  %v793_v49 = vmax.f32 %v761_v46, 0.0 }
  0xb9   : > { %v613_v50 = vadd.f32 %v612_v48, %v499_v47 }
  0xba   : > { %825 = vst [vmem:[%s1285_s20 + $0x8] sm:$0xff] %v793_v49 }
  0xbb   : > { %v777_v51 = vadd.f32 %v1278_v32, %v613_v50  ;;  %v454_v52 = vpop.f32.mrf.mxu0  ;;  %v567_v53 = vpop.f32.mrf.mxu1 }
  0xbc   : > { %v568_v55 = vadd.f32 %v567_v53, %v454_v52 }
  0xbd   : > { %v809_v54 = vmax.f32 %v777_v51, 0.0 }
  0xbe   : > { %v762_v56 = vadd.f32 %v1278_v32, %v568_v55 }
  0xbf   : > { %841 = vst [vmem:[%s1285_s20 + $0x88] sm:$0xff] %v809_v54  ;;  %v502_v57 = vpop.f32.mrf.mxu2 }
  0xc0   : > { %v615_v58 = vpop.f32.mrf.mxu3  ;;  %v794_v59 = vmax.f32 %v762_v56, 0.0 }
  0xc1   : > { %v616_v60 = vadd.f32 %v615_v58, %v502_v57 }
  0xc2   : > { %826 = vst [vmem:[%s1285_s20 + $0x10] sm:$0xff] %v794_v59 }
  0xc3   : > { %v778_v61 = vadd.f32 %v1278_v32, %v616_v60  ;;  %v457_v62 = vpop.f32.mrf.mxu0  ;;  %v570_v63 = vpop.f32.mrf.mxu1 }
  0xc4   : > { %v571_v1 = vadd.f32 %v570_v63, %v457_v62 }
  0xc5   : > { %v810_v0 = vmax.f32 %v778_v61, 0.0 }
  0xc6   : > { %v763_v2 = vadd.f32 %v1278_v32, %v571_v1 }
  0xc7   : > { %842 = vst [vmem:[%s1285_s20 + $0x90] sm:$0xff] %v810_v0  ;;  %v505_v3 = vpop.f32.mrf.mxu2 }
  0xc8   : > { %v618_v4 = vpop.f32.mrf.mxu3  ;;  %v795_v5 = vmax.f32 %v763_v2, 0.0 }
  0xc9   : > { %v619_v6 = vadd.f32 %v618_v4, %v505_v3 }
  0xca   : > { %827 = vst [vmem:[%s1285_s20 + $0x18] sm:$0xff] %v795_v5 }
  0xcb   : > { %v779_v7 = vadd.f32 %v1278_v32, %v619_v6  ;;  %v460_v8 = vpop.f32.mrf.mxu0  ;;  %v573_v9 = vpop.f32.mrf.mxu1 }
  0xcc   : > { %v574_v11 = vadd.f32 %v573_v9, %v460_v8 }
  0xcd   : > { %v811_v10 = vmax.f32 %v779_v7, 0.0 }
  0xce   : > { %v764_v12 = vadd.f32 %v1278_v32, %v574_v11 }
  0xcf   : > { %843 = vst [vmem:[%s1285_s20 + $0x98] sm:$0xff] %v811_v10  ;;  %v508_v13 = vpop.f32.mrf.mxu2 }
  0xd0   : > { %v621_v14 = vpop.f32.mrf.mxu3  ;;  %v796_v15 = vmax.f32 %v764_v12, 0.0 }
  0xd1   : > { %v622_v16 = vadd.f32 %v621_v14, %v508_v13 }
  0xd2   : > { %828 = vst [vmem:[%s1285_s20 + $0x20] sm:$0xff] %v796_v15 }
  0xd3   : > { %v780_v17 = vadd.f32 %v1278_v32, %v622_v16  ;;  %v463_v18 = vpop.f32.mrf.mxu0  ;;  %v576_v19 = vpop.f32.mrf.mxu1 }
  0xd4   : > { %v577_v21 = vadd.f32 %v576_v19, %v463_v18 }
  0xd5   : > { %v812_v20 = vmax.f32 %v780_v17, 0.0 }
  0xd6   : > { %v765_v22 = vadd.f32 %v1278_v32, %v577_v21 }
  0xd7   : > { %844 = vst [vmem:[%s1285_s20 + $0xa0] sm:$0xff] %v812_v20  ;;  %v511_v23 = vpop.f32.mrf.mxu2 }
  0xd8   : > { %v624_v24 = vpop.f32.mrf.mxu3  ;;  %v797_v25 = vmax.f32 %v765_v22, 0.0 }
  0xd9   : > { %v625_v26 = vadd.f32 %v624_v24, %v511_v23 }
  0xda   : > { %829 = vst [vmem:[%s1285_s20 + $0x28] sm:$0xff] %v797_v25 }
  0xdb   : > { %v781_v27 = vadd.f32 %v1278_v32, %v625_v26  ;;  %v466_v28 = vpop.f32.mrf.mxu0  ;;  %v579_v29 = vpop.f32.mrf.mxu1 }
  0xdc   : > { %v580_v31 = vadd.f32 %v579_v29, %v466_v28 }
  0xdd   : > { %v813_v30 = vmax.f32 %v781_v27, 0.0 }
  0xde   : > { %v766_v33 = vadd.f32 %v1278_v32, %v580_v31 }
  0xdf   : > { %845 = vst [vmem:[%s1285_s20 + $0xa8] sm:$0xff] %v813_v30  ;;  %v514_v34 = vpop.f32.mrf.mxu2 }
  0xe0   : > { %v627_v35 = vpop.f32.mrf.mxu3  ;;  %v798_v36 = vmax.f32 %v766_v33, 0.0 }
  0xe1   : > { %v628_v37 = vadd.f32 %v627_v35, %v514_v34 }
  0xe2   : > { %830 = vst [vmem:[%s1285_s20 + $0x30] sm:$0xff] %v798_v36 }
  0xe3   : > { %v782_v38 = vadd.f32 %v1278_v32, %v628_v37  ;;  %v469_v39 = vpop.f32.mrf.mxu0  ;;  %v582_v40 = vpop.f32.mrf.mxu1 }
  0xe4   : > { %v583_v42 = vadd.f32 %v582_v40, %v469_v39 }
  0xe5   : > { %v814_v41 = vmax.f32 %v782_v38, 0.0 }
  0xe6   : > { %v767_v43 = vadd.f32 %v1278_v32, %v583_v42 }
  0xe7   : > { %846 = vst [vmem:[%s1285_s20 + $0xb0] sm:$0xff] %v814_v41  ;;  %v517_v44 = vpop.f32.mrf.mxu2 }
  0xe8   : > { %v630_v45 = vpop.f32.mrf.mxu3  ;;  %v799_v46 = vmax.f32 %v767_v43, 0.0 }
  0xe9   : > { %v631_v47 = vadd.f32 %v630_v45, %v517_v44 }
  0xea   : > { %831 = vst [vmem:[%s1285_s20 + $0x38] sm:$0xff] %v799_v46 }
  0xeb   : > { %v783_v48 = vadd.f32 %v1278_v32, %v631_v47  ;;  %v472_v49 = vpop.f32.mrf.mxu0  ;;  %v585_v50 = vpop.f32.mrf.mxu1 }
  0xec   : > { %v586_v52 = vadd.f32 %v585_v50, %v472_v49 }
  0xed   : > { %v815_v51 = vmax.f32 %v783_v48, 0.0 }
  0xee   : > { %v768_v53 = vadd.f32 %v1278_v32, %v586_v52 }
  0xef   : > { %847 = vst [vmem:[%s1285_s20 + $0xb8] sm:$0xff] %v815_v51  ;;  %v520_v54 = vpop.f32.mrf.mxu2 }
  0xf0   : > { %v633_v55 = vpop.f32.mrf.mxu3  ;;  %v800_v56 = vmax.f32 %v768_v53, 0.0 }
  0xf1   : > { %v634_v57 = vadd.f32 %v633_v55, %v520_v54 }
  0xf2   : > { %832 = vst [vmem:[%s1285_s20 + $0x40] sm:$0xff] %v800_v56 }
  0xf3   : > { %v784_v58 = vadd.f32 %v1278_v32, %v634_v57  ;;  %v475_v59 = vpop.f32.mrf.mxu0  ;;  %v588_v60 = vpop.f32.mrf.mxu1 }
  0xf4   : > { %v589_v62 = vadd.f32 %v588_v60, %v475_v59 }
  0xf5   : > { %v816_v61 = vmax.f32 %v784_v58, 0.0 }
  0xf6   : > { %v769_v63 = vadd.f32 %v1278_v32, %v589_v62 }
  0xf7   : > { %848 = vst [vmem:[%s1285_s20 + $0xc0] sm:$0xff] %v816_v61  ;;  %v523_v0 = vpop.f32.mrf.mxu2 }
  0xf8   : > { %v636_v1 = vpop.f32.mrf.mxu3  ;;  %v801_v2 = vmax.f32 %v769_v63, 0.0 }
  0xf9   : > { %v637_v3 = vadd.f32 %v636_v1, %v523_v0 }
  0xfa   : > { %833 = vst [vmem:[%s1285_s20 + $0x48] sm:$0xff] %v801_v2 }
  0xfb   : > { %v785_v4 = vadd.f32 %v1278_v32, %v637_v3  ;;  %v478_v5 = vpop.f32.mrf.mxu0  ;;  %v591_v6 = vpop.f32.mrf.mxu1 }
  0xfc   : > { %v592_v8 = vadd.f32 %v591_v6, %v478_v5 }
  0xfd   : > { %v817_v7 = vmax.f32 %v785_v4, 0.0 }
  0xfe   : > { %v770_v9 = vadd.f32 %v1278_v32, %v592_v8 }
  0xff   : > { %849 = vst [vmem:[%s1285_s20 + $0xc8] sm:$0xff] %v817_v7  ;;  %v526_v10 = vpop.f32.mrf.mxu2 }
 0x100   : > { %v639_v11 = vpop.f32.mrf.mxu3  ;;  %v802_v12 = vmax.f32 %v770_v9, 0.0 }
 0x101   : > { %v640_v13 = vadd.f32 %v639_v11, %v526_v10 }
 0x102   : > { %834 = vst [vmem:[%s1285_s20 + $0x50] sm:$0xff] %v802_v12 }
 0x103   : > { %v786_v14 = vadd.f32 %v1278_v32, %v640_v13  ;;  %v481_v15 = vpop.f32.mrf.mxu0  ;;  %v594_v16 = vpop.f32.mrf.mxu1 }
 0x104   : > { %v595_v18 = vadd.f32 %v594_v16, %v481_v15 }
 0x105   : > { %v818_v17 = vmax.f32 %v786_v14, 0.0 }
 0x106   : > { %v771_v19 = vadd.f32 %v1278_v32, %v595_v18 }
 0x107   : > { %850 = vst [vmem:[%s1285_s20 + $0xd0] sm:$0xff] %v818_v17  ;;  %v529_v20 = vpop.f32.mrf.mxu2 }
 0x108   : > { %v642_v21 = vpop.f32.mrf.mxu3  ;;  %v803_v22 = vmax.f32 %v771_v19, 0.0 }
 0x109   : > { %v643_v23 = vadd.f32 %v642_v21, %v529_v20 }
 0x10a   : > { %835 = vst [vmem:[%s1285_s20 + $0x58] sm:$0xff] %v803_v22 }
 0x10b   : > { %v787_v24 = vadd.f32 %v1278_v32, %v643_v23  ;;  %v484_v25 = vpop.f32.mrf.mxu0  ;;  %v597_v26 = vpop.f32.mrf.mxu1 }
 0x10c   : > { %v598_v28 = vadd.f32 %v597_v26, %v484_v25 }
 0x10d   : > { %v819_v27 = vmax.f32 %v787_v24, 0.0 }
 0x10e   : > { %v772_v29 = vadd.f32 %v1278_v32, %v598_v28 }
 0x10f   : > { %851 = vst [vmem:[%s1285_s20 + $0xd8] sm:$0xff] %v819_v27  ;;  %v532_v30 = vpop.f32.mrf.mxu2 }
 0x110   : > { %v645_v31 = vpop.f32.mrf.mxu3  ;;  %v804_v33 = vmax.f32 %v772_v29, 0.0 }
 0x111   : > { %v646_v34 = vadd.f32 %v645_v31, %v532_v30 }
 0x112   : > { %836 = vst [vmem:[%s1285_s20 + $0x60] sm:$0xff] %v804_v33 }
 0x113   : > { %v788_v35 = vadd.f32 %v1278_v32, %v646_v34  ;;  %v487_v36 = vpop.f32.mrf.mxu0  ;;  %v600_v37 = vpop.f32.mrf.mxu1 }
 0x114   : > { %v601_v39 = vadd.f32 %v600_v37, %v487_v36 }
 0x115   : > { %v820_v38 = vmax.f32 %v788_v35, 0.0 }
 0x116   : > { %v773_v40 = vadd.f32 %v1278_v32, %v601_v39 }
 0x117   : > { %852 = vst [vmem:[%s1285_s20 + $0xe0] sm:$0xff] %v820_v38  ;;  %v535_v41 = vpop.f32.mrf.mxu2 }
 0x118   : > { %v648_v42 = vpop.f32.mrf.mxu3  ;;  %v805_v43 = vmax.f32 %v773_v40, 0.0 }
 0x119   : > { %v649_v44 = vadd.f32 %v648_v42, %v535_v41 }
 0x11a   : > { %837 = vst [vmem:[%s1285_s20 + $0x68] sm:$0xff] %v805_v43 }
 0x11b   : > { %v789_v45 = vadd.f32 %v1278_v32, %v649_v44  ;;  %v490_v46 = vpop.f32.mrf.mxu0  ;;  %v603_v47 = vpop.f32.mrf.mxu1 }
 0x11c   : > { %v604_v49 = vadd.f32 %v603_v47, %v490_v46 }
 0x11d   : > { %v821_v48 = vmax.f32 %v789_v45, 0.0 }
 0x11e   : > { %v774_v50 = vadd.f32 %v1278_v32, %v604_v49 }
 0x11f   : > { %853 = vst [vmem:[%s1285_s20 + $0xe8] sm:$0xff] %v821_v48  ;;  %v538_v51 = vpop.f32.mrf.mxu2 }
 0x120   : > { %v651_v52 = vpop.f32.mrf.mxu3  ;;  %v806_v53 = vmax.f32 %v774_v50, 0.0 }
 0x121   : > { %v652_v54 = vadd.f32 %v651_v52, %v538_v51 }
 0x122   : > { %838 = vst [vmem:[%s1285_s20 + $0x70] sm:$0xff] %v806_v53 }
 0x123   : > { %v790_v55 = vadd.f32 %v1278_v32, %v652_v54  ;;  %v493_v56 = vpop.f32.mrf.mxu0  ;;  %v606_v57 = vpop.f32.mrf.mxu1 }
 0x124   : > { %v607_v59 = vadd.f32 %v606_v57, %v493_v56 }
 0x125   : > { %v822_v58 = vmax.f32 %v790_v55, 0.0 }
 0x126   : > { %v775_v60 = vadd.f32 %v1278_v32, %v607_v59 }
 0x127   : > { %854 = vst [vmem:[%s1285_s20 + $0xf0] sm:$0xff] %v822_v58  ;;  %v541_v61 = vpop.f32.mrf.mxu2 }
 0x128   : > { %v654_v62 = vpop.f32.mrf.mxu3  ;;  %v807_v63 = vmax.f32 %v775_v60, 0.0 }
 0x129   : > { %v655_v0 = vadd.f32 %v654_v62, %v541_v61 }
 0x12a   : > { %839 = vst [vmem:[%s1285_s20 + $0x78] sm:$0xff] %v807_v63 }
 0x12b   : > { %v791_v1 = vadd.f32 %v1278_v32, %v655_v0 }
 0x12d   : > { %v823_v2 = vmax.f32 %v791_v1, 0.0 }
 0x12f   : > { %855 = vst [vmem:[%s1285_s20 + $0xf8] sm:$0xff] %v823_v2 }
 0x130 PF: > { %s13_s14 = sadd.s32 1, %s1064_s14   ;;  %s1363_s12 = smov %s1060_s13 }
 0x131   : > { %p10_p5 = scmp.ge.s32.totalorder %s13_s14, 4   ;;  %s1364_s13 = smov %s1366_s15 }
 0x133   :  { %12 = sbr.rel (!%p10_p5) target bundleno = 2 (0x2), region = 76 }

// kernel: _lambda_.9
= control target key start
LH: loop header
LB: loop body
LE: loop exit
PB: predicated region body
PF: predicated region fallthrough
CT: control target
= control target key end

     0   :  { %s699_s1 = inlined_call_operand.vmem [shape: f32[512,128], index: 1, kind: input, shape index: {}]   ;;  %s700_s0 = inlined_call_operand.vmem [shape: f32[64,512], index: 0, kind: input, shape index: {}]   ;;  %s701_s2 = inlined_call_operand.vmem [shape: f32[1,128], index: 2, kind: input, shape index: {}]   ;;  %s702_s3 = inlined_call_operand.vmem [shape: f32[64,128], index: 3, kind: output, shape index: {}]  }
   0x1   :  { %v113_v0 = vld [vmem:[%s699_s1 + $0x178] sm:$0xff]  ;;  %v112_v1 = vld [vmem:[%s699_s1 + $0x170] sm:$0xff]  ;;  %v111_v5 = vld [vmem:[%s699_s1 + $0x168] sm:$0xff] }
   0x2   :  { %v129_v2 = vld [vmem:[%s699_s1 + $0x1f8] sm:$0xff]  ;;  %212 = vmatpush.msra.mxu2 %v113_v0  ;;  %v128_v6 = vld [vmem:[%s699_s1 + $0x1f0] sm:$0xff]  ;;  %v127_v9 = vld [vmem:[%s699_s1 + $0x1e8] sm:$0xff] }
   0x3   :  { %253 = vmatpush.msra.mxu3 %v129_v2  ;;  %v81_v3 = vld [vmem:[%s699_s1 + $0x78] sm:$0xff]  ;;  %v80_v7 = vld [vmem:[%s699_s1 + $0x70] sm:$0xff]  ;;  %v79_v10 = vld [vmem:[%s699_s1 + $0x68] sm:$0xff] }
   0x4   :  { %v97_v4 = vld [vmem:[%s699_s1 + $0xf8] sm:$0xff]  ;;  %130 = vmatpush.msra.mxu0 %v81_v3  ;;  %v96_v8 = vld [vmem:[%s699_s1 + $0xf0] sm:$0xff]  ;;  %213 = vmatpush.msra.mxu2 %v112_v1  ;;  %v110_v11 = vld [vmem:[%s699_s1 + $0x160] sm:$0xff] }
   0x5   :  { %171 = vmatpush.msra.mxu1 %v97_v4  ;;  %254 = vmatpush.msra.mxu3 %v128_v6  ;;  %v95_v12 = vld [vmem:[%s699_s1 + $0xe8] sm:$0xff]  ;;  %v126_v13 = vld [vmem:[%s699_s1 + $0x1e0] sm:$0xff]  ;;  %v109_v16 = vld [vmem:[%s699_s1 + $0x158] sm:$0xff] }
   0x6   :  { %131 = vmatpush.msra.mxu0 %v80_v7  ;;  %214 = vmatpush.msra.mxu2 %v111_v5  ;;  %v78_v14 = vld [vmem:[%s699_s1 + $0x60] sm:$0xff]  ;;  %v125_v17 = vld [vmem:[%s699_s1 + $0x1d8] sm:$0xff]  ;;  %v108_v20 = vld [vmem:[%s699_s1 + $0x150] sm:$0xff] }
   0x7   :  { %172 = vmatpush.msra.mxu1 %v96_v8  ;;  %255 = vmatpush.msra.mxu3 %v127_v9  ;;  %v94_v15 = vld [vmem:[%s699_s1 + $0xe0] sm:$0xff]  ;;  %v77_v18 = vld [vmem:[%s699_s1 + $0x58] sm:$0xff]  ;;  %v124_v21 = vld [vmem:[%s699_s1 + $0x1d0] sm:$0xff] }
   0x8   :  { %132 = vmatpush.msra.mxu0 %v79_v10  ;;  %215 = vmatpush.msra.mxu2 %v110_v11  ;;  %v93_v19 = vld [vmem:[%s699_s1 + $0xd8] sm:$0xff]  ;;  %v76_v22 = vld [vmem:[%s699_s1 + $0x50] sm:$0xff]  ;;  %v107_v24 = vld [vmem:[%s699_s1 + $0x148] sm:$0xff] }
   0x9   :  { %173 = vmatpush.msra.mxu1 %v95_v12  ;;  %256 = vmatpush.msra.mxu3 %v126_v13  ;;  %v92_v23 = vld [vmem:[%s699_s1 + $0xd0] sm:$0xff]  ;;  %v123_v25 = vld [vmem:[%s699_s1 + $0x1c8] sm:$0xff]  ;;  %v106_v28 = vld [vmem:[%s699_s1 + $0x140] sm:$0xff] }
   0xa   :  { %133 = vmatpush.msra.mxu0 %v78_v14  ;;  %216 = vmatpush.msra.mxu2 %v109_v16  ;;  %v75_v26 = vld [vmem:[%s699_s1 + $0x48] sm:$0xff]  ;;  %v122_v29 = vld [vmem:[%s699_s1 + $0x1c0] sm:$0xff]  ;;  %v105_v32 = vld [vmem:[%s699_s1 + $0x138] sm:$0xff] }
   0xb   :  { %174 = vmatpush.msra.mxu1 %v94_v15  ;;  %257 = vmatpush.msra.mxu3 %v125_v17  ;;  %v91_v27 = vld [vmem:[%s699_s1 + $0xc8] sm:$0xff]  ;;  %v74_v30 = vld [vmem:[%s699_s1 + $0x40] sm:$0xff]  ;;  %v121_v33 = vld [vmem:[%s699_s1 + $0x1b8] sm:$0xff] }
   0xc   :  { %134 = vmatpush.msra.mxu0 %v77_v18  ;;  %217 = vmatpush.msra.mxu2 %v108_v20  ;;  %v90_v31 = vld [vmem:[%s699_s1 + $0xc0] sm:$0xff]  ;;  %v73_v34 = vld [vmem:[%s699_s1 + $0x38] sm:$0xff]  ;;  %v104_v36 = vld [vmem:[%s699_s1 + $0x130] sm:$0xff] }
   0xd   :  { %175 = vmatpush.msra.mxu1 %v93_v19  ;;  %258 = vmatpush.msra.mxu3 %v124_v21  ;;  %v89_v35 = vld [vmem:[%s699_s1 + $0xb8] sm:$0xff]  ;;  %v120_v37 = vld [vmem:[%s699_s1 + $0x1b0] sm:$0xff]  ;;  %v103_v40 = vld [vmem:[%s699_s1 + $0x128] sm:$0xff] }
   0xe   :  { %135 = vmatpush.msra.mxu0 %v76_v22  ;;  %218 = vmatpush.msra.mxu2 %v107_v24  ;;  %v72_v38 = vld [vmem:[%s699_s1 + $0x30] sm:$0xff]  ;;  %v119_v41 = vld [vmem:[%s699_s1 + $0x1a8] sm:$0xff]  ;;  %v102_v44 = vld [vmem:[%s699_s1 + $0x120] sm:$0xff] }
   0xf   :  { %176 = vmatpush.msra.mxu1 %v92_v23  ;;  %259 = vmatpush.msra.mxu3 %v123_v25  ;;  %v88_v39 = vld [vmem:[%s699_s1 + $0xb0] sm:$0xff]  ;;  %v71_v42 = vld [vmem:[%s699_s1 + $0x28] sm:$0xff]  ;;  %v118_v45 = vld [vmem:[%s699_s1 + $0x1a0] sm:$0xff] }
  0x10   :  { %136 = vmatpush.msra.mxu0 %v75_v26  ;;  %219 = vmatpush.msra.mxu2 %v106_v28  ;;  %v87_v43 = vld [vmem:[%s699_s1 + $0xa8] sm:$0xff]  ;;  %v70_v46 = vld [vmem:[%s699_s1 + $0x20] sm:$0xff]  ;;  %v101_v48 = vld [vmem:[%s699_s1 + $0x118] sm:$0xff] }
  0x11   :  { %177 = vmatpush.msra.mxu1 %v91_v27  ;;  %260 = vmatpush.msra.mxu3 %v122_v29  ;;  %v86_v47 = vld [vmem:[%s699_s1 + $0xa0] sm:$0xff]  ;;  %v117_v49 = vld [vmem:[%s699_s1 + $0x198] sm:$0xff]  ;;  %v100_v52 = vld [vmem:[%s699_s1 + $0x110] sm:$0xff] }
  0x12   :  { %137 = vmatpush.msra.mxu0 %v74_v30  ;;  %220 = vmatpush.msra.mxu2 %v105_v32  ;;  %v69_v50 = vld [vmem:[%s699_s1 + $0x18] sm:$0xff]  ;;  %v116_v53 = vld [vmem:[%s699_s1 + $0x190] sm:$0xff]  ;;  %v99_v56 = vld [vmem:[%s699_s1 + $0x108] sm:$0xff] }
  0x13   :  { %178 = vmatpush.msra.mxu1 %v90_v31  ;;  %261 = vmatpush.msra.mxu3 %v121_v33  ;;  %v85_v51 = vld [vmem:[%s699_s1 + $0x98] sm:$0xff]  ;;  %v68_v54 = vld [vmem:[%s699_s1 + $0x10] sm:$0xff]  ;;  %v115_v57 = vld [vmem:[%s699_s1 + $0x188] sm:$0xff] }
  0x14   :  { %138 = vmatpush.msra.mxu0 %v73_v34  ;;  %221 = vmatpush.msra.mxu2 %v104_v36  ;;  %v84_v55 = vld [vmem:[%s699_s1 + $0x90] sm:$0xff]  ;;  %v67_v58 = vld [vmem:[%s699_s1 + $0x8] sm:$0xff]  ;;  %v98_v60 = vld [vmem:[%s699_s1 + $0x100] sm:$0xff] }
  0x15   :  { %179 = vmatpush.msra.mxu1 %v89_v35  ;;  %262 = vmatpush.msra.mxu3 %v120_v37  ;;  %v83_v59 = vld [vmem:[%s699_s1 + $0x88] sm:$0xff]  ;;  %v114_v61 = vld [vmem:[%s699_s1 + $0x180] sm:$0xff]  ;;  %v36_v62 = vld [vmem:[%s700_s0 + $0x10] sm:$0xff] }
  0x16   :  { %139 = vmatpush.msra.mxu0 %v72_v38  ;;  %222 = vmatpush.msra.mxu2 %v103_v40  ;;  %v37_v63 = vld [vmem:[%s700_s0 + $0x18] sm:$0xff]  ;;  %v66_v0 = vld [vmem:[%s699_s1] sm:$0xff]  ;;  %v35_v3 = vld [vmem:[%s700_s0 + $0x8] sm:$0xff] }
  0x17   :  { %180 = vmatpush.msra.mxu1 %v88_v39  ;;  %263 = vmatpush.msra.mxu3 %v119_v41  ;;  %v82_v1 = vld [vmem:[%s699_s1 + $0x80] sm:$0xff]  ;;  %v40_v4 = vld [vmem:[%s700_s0 + $0x30] sm:$0xff]  ;;  %v41_v5 = vld [vmem:[%s700_s0 + $0x38] sm:$0xff] }
  0x18   :  { %140 = vmatpush.msra.mxu0 %v71_v42  ;;  %223 = vmatpush.msra.mxu2 %v102_v44  ;;  %v34_v2 = vld [vmem:[%s700_s0] sm:$0xff]  ;;  %v39_v7 = vld [vmem:[%s700_s0 + $0x28] sm:$0xff]  ;;  %v44_v8 = vld [vmem:[%s700_s0 + $0x50] sm:$0xff] }
  0x19   :  { %181 = vmatpush.msra.mxu1 %v87_v43  ;;  %264 = vmatpush.msra.mxu3 %v118_v45  ;;  %v38_v6 = vld [vmem:[%s700_s0 + $0x20] sm:$0xff]  ;;  %v45_v9 = vld [vmem:[%s700_s0 + $0x58] sm:$0xff]  ;;  %v43_v11 = vld [vmem:[%s700_s0 + $0x48] sm:$0xff] }
  0x1a   :  { %141 = vmatpush.msra.mxu0 %v70_v46  ;;  %224 = vmatpush.msra.mxu2 %v101_v48  ;;  %v42_v10 = vld [vmem:[%s700_s0 + $0x40] sm:$0xff]  ;;  %v48_v12 = vld [vmem:[%s700_s0 + $0x70] sm:$0xff]  ;;  %v49_v13 = vld [vmem:[%s700_s0 + $0x78] sm:$0xff] }
  0x1b   :  { %182 = vmatpush.msra.mxu1 %v86_v47  ;;  %265 = vmatpush.msra.mxu3 %v117_v49  ;;  %v46_v14 = vld [vmem:[%s700_s0 + $0x60] sm:$0xff]  ;;  %v47_v15 = vld [vmem:[%s700_s0 + $0x68] sm:$0xff]  ;;  %v52_v16 = vld [vmem:[%s700_s0 + $0x90] sm:$0xff] }
  0x1c   :  { %142 = vmatpush.msra.mxu0 %v69_v50  ;;  %225 = vmatpush.msra.mxu2 %v100_v52  ;;  %v53_v17 = vld [vmem:[%s700_s0 + $0x98] sm:$0xff]  ;;  %v50_v18 = vld [vmem:[%s700_s0 + $0x80] sm:$0xff]  ;;  %v51_v19 = vld [vmem:[%s700_s0 + $0x88] sm:$0xff] }
  0x1d   :  { %183 = vmatpush.msra.mxu1 %v85_v51  ;;  %266 = vmatpush.msra.mxu3 %v116_v53  ;;  %v56_v20 = vld [vmem:[%s700_s0 + $0xb0] sm:$0xff]  ;;  %v57_v21 = vld [vmem:[%s700_s0 + $0xb8] sm:$0xff]  ;;  %v54_v22 = vld [vmem:[%s700_s0 + $0xa0] sm:$0xff] }
  0x1e   :  { %143 = vmatpush.msra.mxu0 %v68_v54  ;;  %226 = vmatpush.msra.mxu2 %v99_v56  ;;  %v55_v23 = vld [vmem:[%s700_s0 + $0xa8] sm:$0xff]  ;;  %v60_v24 = vld [vmem:[%s700_s0 + $0xd0] sm:$0xff]  ;;  %v61_v25 = vld [vmem:[%s700_s0 + $0xd8] sm:$0xff] }
  0x1f   :  { %184 = vmatpush.msra.mxu1 %v84_v55  ;;  %267 = vmatpush.msra.mxu3 %v115_v57  ;;  %v58_v26 = vld [vmem:[%s700_s0 + $0xc0] sm:$0xff]  ;;  %v59_v27 = vld [vmem:[%s700_s0 + $0xc8] sm:$0xff]  ;;  %v64_v28 = vld [vmem:[%s700_s0 + $0xf0] sm:$0xff] }
  0x20   :  { %144 = vmatpush.msra.mxu0 %v67_v58  ;;  %227 = vmatpush.msra.mxu2 %v98_v60  ;;  %v65_v29 = vld [vmem:[%s700_s0 + $0xf8] sm:$0xff]  ;;  %v62_v30 = vld [vmem:[%s700_s0 + $0xe0] sm:$0xff]  ;;  %v63_v31 = vld [vmem:[%s700_s0 + $0xe8] sm:$0xff] }
  0x21   :  { %185 = vmatpush.msra.mxu1 %v83_v59  ;;  %268 = vmatpush.msra.mxu3 %v114_v61  ;;  %v665_v38 = vld [vmem:[%s701_s2] ss:$0 sm:$0xff] }
  0x22   :  { %228 = vmatmul.f32.vlgmr.msra.gmra.mxu2 %v36_v62  ;;  %269 = vmatmul.f32.vlgmr.msra.gmra.mxu3 %v37_v63 }
  0x23   :  { %145 = vmatpush.msra.mxu0 %v66_v0  ;;  %186 = vmatpush.msra.mxu1 %v82_v1 }
  0x24   :  { %146 = vmatmul.f32.vlgmr.msra.gmra.mxu0 %v34_v2  ;;  %187 = vmatmul.f32.vlgmr.msra.gmra.mxu1 %v35_v3 }
  0x2a   :  { %231 = vmatmul.f32.gmra.mxu2 %v40_v4  ;;  %272 = vmatmul.f32.gmra.mxu3 %v41_v5 }
  0x2c   :  { %149 = vmatmul.f32.gmra.mxu0 %v38_v6  ;;  %190 = vmatmul.f32.gmra.mxu1 %v39_v7 }
  0x32   :  { %234 = vmatmul.f32.gmra.mxu2 %v44_v8  ;;  %275 = vmatmul.f32.gmra.mxu3 %v45_v9 }
  0x34   :  { %152 = vmatmul.f32.gmra.mxu0 %v42_v10  ;;  %193 = vmatmul.f32.gmra.mxu1 %v43_v11 }
  0x3a   :  { %237 = vmatmul.f32.gmra.mxu2 %v48_v12  ;;  %278 = vmatmul.f32.gmra.mxu3 %v49_v13 }
  0x3c   :  { %155 = vmatmul.f32.gmra.mxu0 %v46_v14  ;;  %196 = vmatmul.f32.gmra.mxu1 %v47_v15 }
  0x42   :  { %240 = vmatmul.f32.gmra.mxu2 %v52_v16  ;;  %281 = vmatmul.f32.gmra.mxu3 %v53_v17 }
  0x44   :  { %158 = vmatmul.f32.gmra.mxu0 %v50_v18  ;;  %199 = vmatmul.f32.gmra.mxu1 %v51_v19 }
  0x4a   :  { %243 = vmatmul.f32.gmra.mxu2 %v56_v20  ;;  %284 = vmatmul.f32.gmra.mxu3 %v57_v21 }
  0x4c   :  { %161 = vmatmul.f32.gmra.mxu0 %v54_v22  ;;  %202 = vmatmul.f32.gmra.mxu1 %v55_v23 }
  0x52   :  { %246 = vmatmul.f32.gmra.mxu2 %v60_v24  ;;  %287 = vmatmul.f32.gmra.mxu3 %v61_v25 }
  0x54   :  { %164 = vmatmul.f32.gmra.mxu0 %v58_v26  ;;  %205 = vmatmul.f32.gmra.mxu1 %v59_v27 }
  0x5a   :  { %249 = vmatmul.f32.gmra.mxu2 %v64_v28  ;;  %290 = vmatmul.f32.gmra.mxu3 %v65_v29 }
  0x5c   :  { %167 = vmatmul.f32.gmra.mxu0 %v62_v30  ;;  %208 = vmatmul.f32.gmra.mxu1 %v63_v31 }
  0xa1   :  { %v147_v32 = vpop.f32.mrf.mxu0  ;;  %v188_v33 = vpop.f32.mrf.mxu1 }
  0xa2   :  { %v189_v34 = vadd.f32 %v188_v33, %v147_v32 }
  0xa5   :  { %v229_v35 = vpop.f32.mrf.mxu2  ;;  %v270_v36 = vpop.f32.mrf.mxu3 }
  0xa6   :  { %v230_v37 = vadd.f32 %v229_v35, %v189_v34 }
  0xa8   :  { %v271_v39 = vadd.f32 %v270_v36, %v230_v37 }
  0xa9   :  { %v150_v40 = vpop.f32.mrf.mxu0  ;;  %v191_v41 = vpop.f32.mrf.mxu1 }
  0xaa   :  { %v325_v42 = vadd.f32 %v665_v38, %v271_v39  ;;  %v192_v43 = vadd.f32 %v191_v41, %v150_v40 }
  0xac   :  { %v333_v44 = vmax.f32 %v325_v42, 0.0 }
  0xad   :  { %v232_v45 = vpop.f32.mrf.mxu2  ;;  %v273_v46 = vpop.f32.mrf.mxu3 }
  0xae   :  { %341 = vst [vmem:[%s702_s3] sm:$0xff] %v333_v44  ;;  %v233_v47 = vadd.f32 %v232_v45, %v192_v43 }
  0xb0   :  { %v274_v48 = vadd.f32 %v273_v46, %v233_v47 }
  0xb1   :  { %v153_v49 = vpop.f32.mrf.mxu0  ;;  %v194_v50 = vpop.f32.mrf.mxu1 }
  0xb2   :  { %v326_v51 = vadd.f32 %v665_v38, %v274_v48  ;;  %v195_v52 = vadd.f32 %v194_v50, %v153_v49 }
  0xb4   :  { %v334_v53 = vmax.f32 %v326_v51, 0.0 }
  0xb5   :  { %v235_v54 = vpop.f32.mrf.mxu2  ;;  %v276_v55 = vpop.f32.mrf.mxu3 }
  0xb6   :  { %342 = vst [vmem:[%s702_s3 + $0x8] sm:$0xff] %v334_v53  ;;  %v236_v56 = vadd.f32 %v235_v54, %v195_v52 }
  0xb8   :  { %v277_v57 = vadd.f32 %v276_v55, %v236_v56 }
  0xb9   :  { %v156_v58 = vpop.f32.mrf.mxu0  ;;  %v197_v59 = vpop.f32.mrf.mxu1 }
  0xba   :  { %v327_v60 = vadd.f32 %v665_v38, %v277_v57  ;;  %v198_v61 = vadd.f32 %v197_v59, %v156_v58 }
  0xbc   :  { %v335_v62 = vmax.f32 %v327_v60, 0.0 }
  0xbd   :  { %v238_v63 = vpop.f32.mrf.mxu2  ;;  %v279_v0 = vpop.f32.mrf.mxu3 }
  0xbe   :  { %343 = vst [vmem:[%s702_s3 + $0x10] sm:$0xff] %v335_v62  ;;  %v239_v1 = vadd.f32 %v238_v63, %v198_v61 }
  0xc0   :  { %v280_v2 = vadd.f32 %v279_v0, %v239_v1 }
  0xc1   :  { %v159_v3 = vpop.f32.mrf.mxu0  ;;  %v200_v4 = vpop.f32.mrf.mxu1 }
  0xc2   :  { %v328_v5 = vadd.f32 %v665_v38, %v280_v2  ;;  %v201_v6 = vadd.f32 %v200_v4, %v159_v3 }
  0xc4   :  { %v336_v7 = vmax.f32 %v328_v5, 0.0 }
  0xc5   :  { %v241_v8 = vpop.f32.mrf.mxu2  ;;  %v282_v9 = vpop.f32.mrf.mxu3 }
  0xc6   :  { %344 = vst [vmem:[%s702_s3 + $0x18] sm:$0xff] %v336_v7  ;;  %v242_v10 = vadd.f32 %v241_v8, %v201_v6 }
  0xc8   :  { %v283_v11 = vadd.f32 %v282_v9, %v242_v10 }
  0xc9   :  { %v162_v12 = vpop.f32.mrf.mxu0  ;;  %v203_v13 = vpop.f32.mrf.mxu1 }
  0xca   :  { %v329_v14 = vadd.f32 %v665_v38, %v283_v11  ;;  %v204_v15 = vadd.f32 %v203_v13, %v162_v12 }
  0xcc   :  { %v337_v16 = vmax.f32 %v329_v14, 0.0 }
  0xcd   :  { %v244_v17 = vpop.f32.mrf.mxu2  ;;  %v285_v18 = vpop.f32.mrf.mxu3 }
  0xce   :  { %345 = vst [vmem:[%s702_s3 + $0x20] sm:$0xff] %v337_v16  ;;  %v245_v19 = vadd.f32 %v244_v17, %v204_v15 }
  0xd0   :  { %v286_v20 = vadd.f32 %v285_v18, %v245_v19 }
  0xd1   :  { %v165_v21 = vpop.f32.mrf.mxu0  ;;  %v206_v22 = vpop.f32.mrf.mxu1 }
  0xd2   :  { %v330_v23 = vadd.f32 %v665_v38, %v286_v20  ;;  %v207_v24 = vadd.f32 %v206_v22, %v165_v21 }
  0xd4   :  { %v338_v25 = vmax.f32 %v330_v23, 0.0 }
  0xd5   :  { %v247_v26 = vpop.f32.mrf.mxu2  ;;  %v288_v27 = vpop.f32.mrf.mxu3 }
  0xd6   :  { %346 = vst [vmem:[%s702_s3 + $0x28] sm:$0xff] %v338_v25  ;;  %v248_v28 = vadd.f32 %v247_v26, %v207_v24 }
  0xd8   :  { %v289_v29 = vadd.f32 %v288_v27, %v248_v28 }
  0xd9   :  { %v168_v30 = vpop.f32.mrf.mxu0  ;;  %v209_v31 = vpop.f32.mrf.mxu1 }
  0xda   :  { %v331_v32 = vadd.f32 %v665_v38, %v289_v29  ;;  %v210_v33 = vadd.f32 %v209_v31, %v168_v30 }
  0xdc   :  { %v339_v34 = vmax.f32 %v331_v32, 0.0 }
  0xdd   :  { %v250_v35 = vpop.f32.mrf.mxu2  ;;  %v291_v36 = vpop.f32.mrf.mxu3 }
  0xde   :  { %347 = vst [vmem:[%s702_s3 + $0x30] sm:$0xff] %v339_v34  ;;  %v251_v37 = vadd.f32 %v250_v35, %v210_v33 }
  0xe0   :  { %v292_v39 = vadd.f32 %v291_v36, %v251_v37 }
  0xe2   :  { %v332_v40 = vadd.f32 %v665_v38, %v292_v39 }
  0xe4   :  { %v340_v41 = vmax.f32 %v332_v40, 0.0 }
  0xe6   :  { %348 = vst [vmem:[%s702_s3 + $0x38] sm:$0xff] %v340_v41 }

// kernel: _lambda_.10
= control target key start
LH: loop header
LB: loop body
LE: loop exit
PB: predicated region body
PF: predicated region fallthrough
CT: control target
= control target key end

     0   :  { %s928_s12 = smov 0   ;;  %s930_s13 = smov 0   ;;  %s1124_s0 = inlined_call_operand.vmem [shape: f32[4096,128], index: 0, kind: input, shape index: {}]   ;;  %s1125_s1 = inlined_call_operand.vmem [shape: f32[128,128], index: 1, kind: input, shape index: {}]   ;;  %s1126_s2 = inlined_call_operand.vmem [shape: f32[1,128], index: 2, kind: input, shape index: {}]   ;;  %s1127_s3 = inlined_call_operand.vmem [shape: f32[4096,128], index: 3, kind: output, shape index: {}]  }
   0x1   :  { %s932_s14 = smov 0  }
   0x2 LB: > { %s32_s15 = sadd.s32 1, %s902_s13  ;;  %p804_p0 = scmp.ge.s32.totalorder %s906_s14, 1  ;;  %s906_s14 = sphi %s932_s14, %s13_s14   ;;  %s902_s13 = sphi %s930_s13, %s1129_s13   ;;  %s898_s12 = sphi %s928_s12, %s1128_s12  }
   0x3   : > { %p34_p1 = scmp.ge.s32.totalorder %s32_s15, 16  ;;  %p188_p2 = scmp.lt.s32.totalorder %s906_s14, 17 }
   0x5   : > { %s1131_s15 = smov (%p34_p1, %s32_s15), 0  ;;  %p189_p3 = pnand %p804_p0, %p188_p2 }
   0x6   : > { %s805_s5 = sshll.u32 (!%p189_p3), %s898_s12, 5 }
   0x7   : > { %192 = sbr.rel (%p189_p3) target bundleno = 238 (0xee), region = 32  ;;  %p230_p4 = scmp.lt.s32.totalorder (!%p189_p3), %s805_s5, 511 }
   0xc   : > { %v374_v0 = vld [vmem:[%s1125_s1 + $0x78] sm:$0xff]  ;;  %v373_v1 = vld [vmem:[%s1125_s1 + $0x70] sm:$0xff]  ;;  %v372_v2 = vld [vmem:[%s1125_s1 + $0x68] sm:$0xff]  ;;  %s1133_s5 = smov (!%p230_p4, %s805_s5), 511 }
   0xd   : > { %812 = vmatpush.msra.mxu2 %v374_v0  ;;  %813 = vmatpush.msra.mxu3 %v374_v0  ;;  %v371_v3 = vld [vmem:[%s1125_s1 + $0x60] sm:$0xff]  ;;  %v370_v4 = vld [vmem:[%s1125_s1 + $0x58] sm:$0xff]  ;;  %v369_v5 = vld [vmem:[%s1125_s1 + $0x50] sm:$0xff]  ;;  %s806_s19 = sshll.u32 %s1133_s5, 3 }
   0xe   : > { %375 = vmatpush.msra.mxu0 %v374_v0  ;;  %811 = vmatpush.msra.mxu1 %v374_v0  ;;  %v368_v6 = vld [vmem:[%s1125_s1 + $0x48] sm:$0xff]  ;;  %v367_v7 = vld [vmem:[%s1125_s1 + $0x40] sm:$0xff]  ;;  %v366_v8 = vld [vmem:[%s1125_s1 + $0x38] sm:$0xff]  ;;  %s1002_s26 = scalar_lea.vmem %s1124_s0, %s806_s19  ;;  %s1051_s7 = scalar_lea.vmem %s1127_s3, %s806_s19 }
   0xf   : > { %815 = vmatpush.msra.mxu2 %v373_v1  ;;  %816 = vmatpush.msra.mxu3 %v373_v1  ;;  %v365_v9 = vld [vmem:[%s1125_s1 + $0x30] sm:$0xff]  ;;  %v364_v10 = vld [vmem:[%s1125_s1 + $0x28] sm:$0xff]  ;;  %v363_v11 = vld [vmem:[%s1125_s1 + $0x20] sm:$0xff] }
  0x10   : > { %376 = vmatpush.msra.mxu0 %v373_v1  ;;  %814 = vmatpush.msra.mxu1 %v373_v1  ;;  %v362_v12 = vld [vmem:[%s1125_s1 + $0x18] sm:$0xff]  ;;  %v361_v13 = vld [vmem:[%s1125_s1 + $0x10] sm:$0xff]  ;;  %v360_v14 = vld [vmem:[%s1125_s1 + $0x8] sm:$0xff] }
  0x11   : > { %818 = vmatpush.msra.mxu2 %v372_v2  ;;  %819 = vmatpush.msra.mxu3 %v372_v2  ;;  %v359_v15 = vld [vmem:[%s1125_s1] sm:$0xff]  ;;  %v344_v20 = vld [vmem:[%s1002_s26 + $0x88] sm:$0xff]  ;;  %v345_v24 = vld [vmem:[%s1002_s26 + $0x90] sm:$0xff] }
  0x12   : > { %377 = vmatpush.msra.mxu0 %v372_v2  ;;  %817 = vmatpush.msra.mxu1 %v372_v2  ;;  %v343_v16 = vld [vmem:[%s1002_s26 + $0x80] sm:$0xff]  ;;  %v352_v21 = vld [vmem:[%s1002_s26 + $0xc8] sm:$0xff]  ;;  %v353_v25 = vld [vmem:[%s1002_s26 + $0xd0] sm:$0xff] }
  0x13   : > { %821 = vmatpush.msra.mxu2 %v371_v3  ;;  %822 = vmatpush.msra.mxu3 %v371_v3  ;;  %v351_v17 = vld [vmem:[%s1002_s26 + $0xc0] sm:$0xff]  ;;  %v328_v22 = vld [vmem:[%s1002_s26 + $0x8] sm:$0xff]  ;;  %v329_v26 = vld [vmem:[%s1002_s26 + $0x10] sm:$0xff] }
  0x14   : > { %378 = vmatpush.msra.mxu0 %v371_v3  ;;  %820 = vmatpush.msra.mxu1 %v371_v3  ;;  %v327_v18 = vld [vmem:[%s1002_s26] sm:$0xff]  ;;  %v336_v23 = vld [vmem:[%s1002_s26 + $0x48] sm:$0xff]  ;;  %v337_v27 = vld [vmem:[%s1002_s26 + $0x50] sm:$0xff] }
  0x15   : > { %824 = vmatpush.msra.mxu2 %v370_v4  ;;  %825 = vmatpush.msra.mxu3 %v370_v4  ;;  %v335_v19 = vld [vmem:[%s1002_s26 + $0x40] sm:$0xff]  ;;  %v346_v28 = vld [vmem:[%s1002_s26 + $0x98] sm:$0xff]  ;;  %v348_v36 = vld [vmem:[%s1002_s26 + $0xa8] sm:$0xff] }
  0x16   : > { %379 = vmatpush.msra.mxu0 %v370_v4  ;;  %823 = vmatpush.msra.mxu1 %v370_v4  ;;  %v354_v29 = vld [vmem:[%s1002_s26 + $0xd8] sm:$0xff]  ;;  %v347_v32 = vld [vmem:[%s1002_s26 + $0xa0] sm:$0xff]  ;;  %v356_v37 = vld [vmem:[%s1002_s26 + $0xe8] sm:$0xff] }
  0x17   : > { %827 = vmatpush.msra.mxu2 %v369_v5  ;;  %828 = vmatpush.msra.mxu3 %v369_v5  ;;  %v330_v30 = vld [vmem:[%s1002_s26 + $0x18] sm:$0xff]  ;;  %v355_v33 = vld [vmem:[%s1002_s26 + $0xe0] sm:$0xff]  ;;  %v332_v38 = vld [vmem:[%s1002_s26 + $0x28] sm:$0xff] }
  0x18   : > { %380 = vmatpush.msra.mxu0 %v369_v5  ;;  %826 = vmatpush.msra.mxu1 %v369_v5  ;;  %v338_v31 = vld [vmem:[%s1002_s26 + $0x58] sm:$0xff]  ;;  %v331_v34 = vld [vmem:[%s1002_s26 + $0x20] sm:$0xff]  ;;  %v340_v39 = vld [vmem:[%s1002_s26 + $0x68] sm:$0xff] }
  0x19   : > { %830 = vmatpush.msra.mxu2 %v368_v6  ;;  %831 = vmatpush.msra.mxu3 %v368_v6  ;;  %v339_v35 = vld [vmem:[%s1002_s26 + $0x60] sm:$0xff]  ;;  %v349_v40 = vld [vmem:[%s1002_s26 + $0xb0] sm:$0xff]  ;;  %v350_v44 = vld [vmem:[%s1002_s26 + $0xb8] sm:$0xff] }
  0x1a   : > { %381 = vmatpush.msra.mxu0 %v368_v6  ;;  %829 = vmatpush.msra.mxu1 %v368_v6  ;;  %v357_v41 = vld [vmem:[%s1002_s26 + $0xf0] sm:$0xff]  ;;  %v358_v45 = vld [vmem:[%s1002_s26 + $0xf8] sm:$0xff]  ;;  %v1042_v48 = vld [vmem:[%s1126_s2] ss:$0 sm:$0xff] }
  0x1b   : > { %833 = vmatpush.msra.mxu2 %v367_v7  ;;  %834 = vmatpush.msra.mxu3 %v367_v7  ;;  %v333_v42 = vld [vmem:[%s1002_s26 + $0x30] sm:$0xff]  ;;  %v334_v46 = vld [vmem:[%s1002_s26 + $0x38] sm:$0xff] }
  0x1c   : > { %382 = vmatpush.msra.mxu0 %v367_v7  ;;  %832 = vmatpush.msra.mxu1 %v367_v7  ;;  %v341_v43 = vld [vmem:[%s1002_s26 + $0x70] sm:$0xff]  ;;  %v342_v47 = vld [vmem:[%s1002_s26 + $0x78] sm:$0xff] }
  0x1d   : > { %836 = vmatpush.msra.mxu2 %v366_v8  ;;  %837 = vmatpush.msra.mxu3 %v366_v8 }
  0x1e   : > { %383 = vmatpush.msra.mxu0 %v366_v8  ;;  %835 = vmatpush.msra.mxu1 %v366_v8 }
  0x1f   : > { %839 = vmatpush.msra.mxu2 %v365_v9  ;;  %840 = vmatpush.msra.mxu3 %v365_v9 }
  0x20   : > { %384 = vmatpush.msra.mxu0 %v365_v9  ;;  %838 = vmatpush.msra.mxu1 %v365_v9 }
  0x21   : > { %842 = vmatpush.msra.mxu2 %v364_v10  ;;  %843 = vmatpush.msra.mxu3 %v364_v10 }
  0x22   : > { %385 = vmatpush.msra.mxu0 %v364_v10  ;;  %841 = vmatpush.msra.mxu1 %v364_v10 }
  0x23   : > { %845 = vmatpush.msra.mxu2 %v363_v11  ;;  %846 = vmatpush.msra.mxu3 %v363_v11 }
  0x24   : > { %386 = vmatpush.msra.mxu0 %v363_v11  ;;  %844 = vmatpush.msra.mxu1 %v363_v11 }
  0x25   : > { %848 = vmatpush.msra.mxu2 %v362_v12  ;;  %849 = vmatpush.msra.mxu3 %v362_v12 }
  0x26   : > { %387 = vmatpush.msra.mxu0 %v362_v12  ;;  %847 = vmatpush.msra.mxu1 %v362_v12 }
  0x27   : > { %851 = vmatpush.msra.mxu2 %v361_v13  ;;  %852 = vmatpush.msra.mxu3 %v361_v13 }
  0x28   : > { %388 = vmatpush.msra.mxu0 %v361_v13  ;;  %850 = vmatpush.msra.mxu1 %v361_v13 }
  0x29   : > { %854 = vmatpush.msra.mxu2 %v360_v14  ;;  %855 = vmatpush.msra.mxu3 %v360_v14 }
  0x2a   : > { %389 = vmatpush.msra.mxu0 %v360_v14  ;;  %853 = vmatpush.msra.mxu1 %v360_v14 }
  0x2b   : > { %857 = vmatpush.msra.mxu2 %v359_v15  ;;  %858 = vmatpush.msra.mxu3 %v359_v15 }
  0x2c   : > { %439 = vmatmul.f32.vlgmr.msra.gmra.mxu2 %v343_v16  ;;  %463 = vmatmul.f32.vlgmr.msra.gmra.mxu3 %v351_v17 }
  0x2d   : > { %390 = vmatpush.msra.mxu0 %v359_v15  ;;  %856 = vmatpush.msra.mxu1 %v359_v15 }
  0x2e   : > { %391 = vmatmul.f32.vlgmr.msra.gmra.mxu0 %v327_v18  ;;  %415 = vmatmul.f32.vlgmr.msra.gmra.mxu1 %v335_v19 }
  0x34   : > { %442 = vmatmul.f32.gmra.mxu2 %v344_v20  ;;  %466 = vmatmul.f32.gmra.mxu3 %v352_v21 }
  0x36   : > { %394 = vmatmul.f32.gmra.mxu0 %v328_v22  ;;  %418 = vmatmul.f32.gmra.mxu1 %v336_v23 }
  0x3c   : > { %445 = vmatmul.f32.gmra.mxu2 %v345_v24  ;;  %469 = vmatmul.f32.gmra.mxu3 %v353_v25 }
  0x3e   : > { %397 = vmatmul.f32.gmra.mxu0 %v329_v26  ;;  %421 = vmatmul.f32.gmra.mxu1 %v337_v27 }
  0x44   : > { %448 = vmatmul.f32.gmra.mxu2 %v346_v28  ;;  %472 = vmatmul.f32.gmra.mxu3 %v354_v29 }
  0x46   : > { %400 = vmatmul.f32.gmra.mxu0 %v330_v30  ;;  %424 = vmatmul.f32.gmra.mxu1 %v338_v31 }
  0x4c   : > { %451 = vmatmul.f32.gmra.mxu2 %v347_v32  ;;  %475 = vmatmul.f32.gmra.mxu3 %v355_v33 }
  0x4e   : > { %403 = vmatmul.f32.gmra.mxu0 %v331_v34  ;;  %427 = vmatmul.f32.gmra.mxu1 %v339_v35 }
  0x54   : > { %454 = vmatmul.f32.gmra.mxu2 %v348_v36  ;;  %478 = vmatmul.f32.gmra.mxu3 %v356_v37 }
  0x56   : > { %406 = vmatmul.f32.gmra.mxu0 %v332_v38  ;;  %430 = vmatmul.f32.gmra.mxu1 %v340_v39 }
  0x5c   : > { %457 = vmatmul.f32.gmra.mxu2 %v349_v40  ;;  %481 = vmatmul.f32.gmra.mxu3 %v357_v41 }
  0x5e   : > { %409 = vmatmul.f32.gmra.mxu0 %v333_v42  ;;  %433 = vmatmul.f32.gmra.mxu1 %v341_v43 }
  0x64   : > { %460 = vmatmul.f32.gmra.mxu2 %v350_v44  ;;  %484 = vmatmul.f32.gmra.mxu3 %v358_v45 }
  0x66   : > { %412 = vmatmul.f32.gmra.mxu0 %v334_v46  ;;  %436 = vmatmul.f32.gmra.mxu1 %v342_v47 }
  0xab   : > { %v392_v49 = vpop.f32.mrf.mxu0  ;;  %v416_v50 = vpop.f32.mrf.mxu1 }
  0xac   : > { %v591_v51 = vadd.f32 %v1042_v48, %v392_v49  ;;  %v599_v52 = vadd.f32 %v1042_v48, %v416_v50 }
  0xae   : > { %v623_v53 = vmax.f32 %v591_v51, 0.0  ;;  %v631_v54 = vmax.f32 %v599_v52, 0.0 }
  0xaf   : > { %v440_v55 = vpop.f32.mrf.mxu2  ;;  %v464_v56 = vpop.f32.mrf.mxu3 }
  0xb0   : > { %655 = vst [vmem:[%s1051_s7] sm:$0xff] %v623_v53  ;;  %v607_v57 = vadd.f32 %v1042_v48, %v440_v55  ;;  %v615_v58 = vadd.f32 %v1042_v48, %v464_v56 }
  0xb1   : > { %663 = vst [vmem:[%s1051_s7 + $0x40] sm:$0xff] %v631_v54 }
  0xb2   : > { %v639_v59 = vmax.f32 %v607_v57, 0.0  ;;  %v647_v60 = vmax.f32 %v615_v58, 0.0 }
  0xb3   : > { %v395_v61 = vpop.f32.mrf.mxu0  ;;  %v419_v62 = vpop.f32.mrf.mxu1 }
  0xb4   : > { %671 = vst [vmem:[%s1051_s7 + $0x80] sm:$0xff] %v639_v59  ;;  %v592_v63 = vadd.f32 %v1042_v48, %v395_v61  ;;  %v600_v0 = vadd.f32 %v1042_v48, %v419_v62 }
  0xb5   : > { %679 = vst [vmem:[%s1051_s7 + $0xc0] sm:$0xff] %v647_v60 }
  0xb6   : > { %v624_v1 = vmax.f32 %v592_v63, 0.0  ;;  %v632_v2 = vmax.f32 %v600_v0, 0.0 }
  0xb7   : > { %v443_v3 = vpop.f32.mrf.mxu2  ;;  %v467_v4 = vpop.f32.mrf.mxu3 }
  0xb8   : > { %656 = vst [vmem:[%s1051_s7 + $0x8] sm:$0xff] %v624_v1  ;;  %v608_v5 = vadd.f32 %v1042_v48, %v443_v3  ;;  %v616_v6 = vadd.f32 %v1042_v48, %v467_v4 }
  0xb9   : > { %664 = vst [vmem:[%s1051_s7 + $0x48] sm:$0xff] %v632_v2 }
  0xba   : > { %v640_v7 = vmax.f32 %v608_v5, 0.0  ;;  %v648_v8 = vmax.f32 %v616_v6, 0.0 }
  0xbb   : > { %v398_v9 = vpop.f32.mrf.mxu0  ;;  %v422_v10 = vpop.f32.mrf.mxu1 }
  0xbc   : > { %672 = vst [vmem:[%s1051_s7 + $0x88] sm:$0xff] %v640_v7  ;;  %v593_v11 = vadd.f32 %v1042_v48, %v398_v9  ;;  %v601_v12 = vadd.f32 %v1042_v48, %v422_v10 }
  0xbd   : > { %680 = vst [vmem:[%s1051_s7 + $0xc8] sm:$0xff] %v648_v8 }
  0xbe   : > { %v625_v13 = vmax.f32 %v593_v11, 0.0  ;;  %v633_v14 = vmax.f32 %v601_v12, 0.0 }
  0xbf   : > { %v446_v15 = vpop.f32.mrf.mxu2  ;;  %v470_v16 = vpop.f32.mrf.mxu3 }
  0xc0   : > { %657 = vst [vmem:[%s1051_s7 + $0x10] sm:$0xff] %v625_v13  ;;  %v609_v17 = vadd.f32 %v1042_v48, %v446_v15  ;;  %v617_v18 = vadd.f32 %v1042_v48, %v470_v16 }
  0xc1   : > { %665 = vst [vmem:[%s1051_s7 + $0x50] sm:$0xff] %v633_v14 }
  0xc2   : > { %v641_v19 = vmax.f32 %v609_v17, 0.0  ;;  %v649_v20 = vmax.f32 %v617_v18, 0.0 }
  0xc3   : > { %v401_v21 = vpop.f32.mrf.mxu0  ;;  %v425_v22 = vpop.f32.mrf.mxu1 }
  0xc4   : > { %673 = vst [vmem:[%s1051_s7 + $0x90] sm:$0xff] %v641_v19  ;;  %v594_v23 = vadd.f32 %v1042_v48, %v401_v21  ;;  %v602_v24 = vadd.f32 %v1042_v48, %v425_v22 }
  0xc5   : > { %681 = vst [vmem:[%s1051_s7 + $0xd0] sm:$0xff] %v649_v20 }
  0xc6   : > { %v626_v25 = vmax.f32 %v594_v23, 0.0  ;;  %v634_v26 = vmax.f32 %v602_v24, 0.0 }
  0xc7   : > { %v449_v27 = vpop.f32.mrf.mxu2  ;;  %v473_v28 = vpop.f32.mrf.mxu3 }
  0xc8   : > { %658 = vst [vmem:[%s1051_s7 + $0x18] sm:$0xff] %v626_v25  ;;  %v610_v29 = vadd.f32 %v1042_v48, %v449_v27  ;;  %v618_v30 = vadd.f32 %v1042_v48, %v473_v28 }
  0xc9   : > { %666 = vst [vmem:[%s1051_s7 + $0x58] sm:$0xff] %v634_v26 }
  0xca   : > { %v642_v31 = vmax.f32 %v610_v29, 0.0  ;;  %v650_v32 = vmax.f32 %v618_v30, 0.0 }
  0xcb   : > { %v404_v33 = vpop.f32.mrf.mxu0  ;;  %v428_v34 = vpop.f32.mrf.mxu1 }
  0xcc   : > { %674 = vst [vmem:[%s1051_s7 + $0x98] sm:$0xff] %v642_v31  ;;  %v595_v35 = vadd.f32 %v1042_v48, %v404_v33  ;;  %v603_v36 = vadd.f32 %v1042_v48, %v428_v34 }
  0xcd   : > { %682 = vst [vmem:[%s1051_s7 + $0xd8] sm:$0xff] %v650_v32 }
  0xce   : > { %v627_v37 = vmax.f32 %v595_v35, 0.0  ;;  %v635_v38 = vmax.f32 %v603_v36, 0.0 }
  0xcf   : > { %v452_v39 = vpop.f32.mrf.mxu2  ;;  %v476_v40 = vpop.f32.mrf.mxu3 }
  0xd0   : > { %659 = vst [vmem:[%s1051_s7 + $0x20] sm:$0xff] %v627_v37  ;;  %v611_v41 = vadd.f32 %v1042_v48, %v452_v39  ;;  %v619_v42 = vadd.f32 %v1042_v48, %v476_v40 }
  0xd1   : > { %667 = vst [vmem:[%s1051_s7 + $0x60] sm:$0xff] %v635_v38 }
  0xd2   : > { %v643_v43 = vmax.f32 %v611_v41, 0.0  ;;  %v651_v44 = vmax.f32 %v619_v42, 0.0 }
  0xd3   : > { %v407_v45 = vpop.f32.mrf.mxu0  ;;  %v431_v46 = vpop.f32.mrf.mxu1 }
  0xd4   : > { %675 = vst [vmem:[%s1051_s7 + $0xa0] sm:$0xff] %v643_v43  ;;  %v596_v47 = vadd.f32 %v1042_v48, %v407_v45  ;;  %v604_v49 = vadd.f32 %v1042_v48, %v431_v46 }
  0xd5   : > { %683 = vst [vmem:[%s1051_s7 + $0xe0] sm:$0xff] %v651_v44 }
  0xd6   : > { %v628_v50 = vmax.f32 %v596_v47, 0.0  ;;  %v636_v51 = vmax.f32 %v604_v49, 0.0 }
  0xd7   : > { %v455_v52 = vpop.f32.mrf.mxu2  ;;  %v479_v53 = vpop.f32.mrf.mxu3 }
  0xd8   : > { %660 = vst [vmem:[%s1051_s7 + $0x28] sm:$0xff] %v628_v50  ;;  %v612_v54 = vadd.f32 %v1042_v48, %v455_v52  ;;  %v620_v55 = vadd.f32 %v1042_v48, %v479_v53 }
  0xd9   : > { %668 = vst [vmem:[%s1051_s7 + $0x68] sm:$0xff] %v636_v51 }
  0xda   : > { %v644_v56 = vmax.f32 %v612_v54, 0.0  ;;  %v652_v57 = vmax.f32 %v620_v55, 0.0 }
  0xdb   : > { %v410_v58 = vpop.f32.mrf.mxu0  ;;  %v434_v59 = vpop.f32.mrf.mxu1 }
  0xdc   : > { %676 = vst [vmem:[%s1051_s7 + $0xa8] sm:$0xff] %v644_v56  ;;  %v597_v60 = vadd.f32 %v1042_v48, %v410_v58  ;;  %v605_v61 = vadd.f32 %v1042_v48, %v434_v59 }
  0xdd   : > { %684 = vst [vmem:[%s1051_s7 + $0xe8] sm:$0xff] %v652_v57 }
  0xde   : > { %v629_v62 = vmax.f32 %v597_v60, 0.0  ;;  %v637_v63 = vmax.f32 %v605_v61, 0.0 }
  0xdf   : > { %v458_v0 = vpop.f32.mrf.mxu2  ;;  %v482_v1 = vpop.f32.mrf.mxu3 }
  0xe0   : > { %661 = vst [vmem:[%s1051_s7 + $0x30] sm:$0xff] %v629_v62  ;;  %v613_v2 = vadd.f32 %v1042_v48, %v458_v0  ;;  %v621_v3 = vadd.f32 %v1042_v48, %v482_v1 }
  0xe1   : > { %669 = vst [vmem:[%s1051_s7 + $0x70] sm:$0xff] %v637_v63 }
  0xe2   : > { %v645_v4 = vmax.f32 %v613_v2, 0.0  ;;  %v653_v5 = vmax.f32 %v621_v3, 0.0 }
  0xe3   : > { %v413_v6 = vpop.f32.mrf.mxu0  ;;  %v437_v7 = vpop.f32.mrf.mxu1 }
  0xe4   : > { %677 = vst [vmem:[%s1051_s7 + $0xb0] sm:$0xff] %v645_v4  ;;  %v598_v8 = vadd.f32 %v1042_v48, %v413_v6  ;;  %v606_v9 = vadd.f32 %v1042_v48, %v437_v7 }
  0xe5   : > { %685 = vst [vmem:[%s1051_s7 + $0xf0] sm:$0xff] %v653_v5 }
  0xe6   : > { %v630_v10 = vmax.f32 %v598_v8, 0.0  ;;  %v638_v11 = vmax.f32 %v606_v9, 0.0 }
  0xe7   : > { %v461_v12 = vpop.f32.mrf.mxu2  ;;  %v485_v13 = vpop.f32.mrf.mxu3 }
  0xe8   : > { %662 = vst [vmem:[%s1051_s7 + $0x38] sm:$0xff] %v630_v10  ;;  %v614_v14 = vadd.f32 %v1042_v48, %v461_v12  ;;  %v622_v15 = vadd.f32 %v1042_v48, %v485_v13 }
  0xe9   : > { %670 = vst [vmem:[%s1051_s7 + $0x78] sm:$0xff] %v638_v11 }
  0xea   : > { %v646_v16 = vmax.f32 %v614_v14, 0.0  ;;  %v654_v17 = vmax.f32 %v622_v15, 0.0 }
  0xec   : > { %678 = vst [vmem:[%s1051_s7 + $0xb8] sm:$0xff] %v646_v16 }
  0xed   : > { %686 = vst [vmem:[%s1051_s7 + $0xf8] sm:$0xff] %v654_v17 }
  0xee PF: > { %s13_s14 = sadd.s32 1, %s906_s14   ;;  %s1128_s12 = smov %s902_s13 }
  0xef   : > { %p10_p5 = scmp.ge.s32.totalorder %s13_s14, 18   ;;  %s1129_s13 = smov %s1131_s15 }
  0xf1   :  { %12 = sbr.rel (!%p10_p5) target bundleno = 2 (0x2), region = 76 }

// kernel: sub.62
= control target key start
LH: loop header
LB: loop body
LE: loop exit
PB: predicated region body
PF: predicated region fallthrough
CT: control target
= control target key end

     0   :  { %s112_s24 = smov 18   ;;  %s113_s25 = smov 12   ;;  %vm39_vm0 = vcmask 23552   ;;  %vm45_vm1 = vcmask 220352   ;;  %vm51_vm2 = vcmask 195752   ;;  %vm57_vm3 = vcmask 171152   ;;  %s159_s0 = inlined_call_operand.vmem [shape: f32[3,3,3,3], index: 0, kind: input, shape index: {}]   ;;  %s160_s1 = inlined_call_operand.vmem [shape: f32[27,3], index: 1, kind: output, shape index: {}]  }
   0x1   :  { %v95_v0 = vld [vmem:[%s159_s0 + $0x20] sm:$0xf]  ;;  %v98_v1 = vld [vmem:[%s159_s0 + $0x14] sm:$0xf]  ;;  %v101_v2 = vld [vmem:[%s159_s0 + $0x8] sm:$0xf] }
   0x2   :  { %7 = vst [vmem:[#allocation1 + $0x40] sm:$0xf] %v95_v0  ;;  %v96_v3 = vld [vmem:[%s159_s0 + $0x1c] sm:$0xf]  ;;  %v99_v4 = vld [vmem:[%s159_s0 + $0x10] sm:$0xf] }
   0x3   :  { %19 = vst [vmem:[#allocation1 + $0x28] sm:$0xf] %v98_v1  ;;  %v102_v5 = vld [vmem:[%s159_s0 + $0x4] sm:$0xf]  ;;  %v97_v6 = vld [vmem:[%s159_s0 + $0x18] sm:$0xf] }
   0x4   :  { %31 = vst [vmem:[#allocation1 + $0x10] sm:$0xf] %v101_v2  ;;  %v100_v7 = vld [vmem:[%s159_s0 + $0xc] sm:$0xf]  ;;  %v36_v8 = vld [vmem:[%s159_s0] sm:$0xf] }
   0x5   :  { %11 = vst [vmem:[#allocation1 + $0x38] sm:$0xf] %v96_v3  ;;  %s111_s0 = smov 24   ;;  %s114_s26 = smov 21   ;;  %vm63_vm4 = vcmask 146552   ;;  %vm69_vm5 = vcmask 121952  }
   0x6   :  { %23 = vst [vmem:[#allocation1 + $0x20] sm:$0xf] %v99_v4  ;;  %s115_s27 = smov 15   ;;  %s116_s28 = smov 9   ;;  %vm75_vm6 = vcmask 97352   ;;  %vm81_vm7 = vcmask 72752  }
   0x7   :  { %35 = vst [vmem:[#allocation1 + $0x8] sm:$0xf] %v102_v5  ;;  %s117_s29 = smov 6   ;;  %s118_s30 = smov 3   ;;  %vm87_vm8 = vcmask 48152  }
   0x8   :  { %15 = vst [vmem:[#allocation1 + $0x30] sm:$0xf] %v97_v6 }
   0x9   :  { %27 = vst [vmem:[#allocation1 + $0x18] sm:$0xf] %v100_v7 }
   0xa   :  { %37 = vst [vmem:[#allocation1] sm:$0xf] %v36_v8 }
   0xb   :  { %v42_v9 = vld [vmem:[#allocation1 + $0x12] ss:$24 sm:$0x7]   ;;  %v54_v10 = vld [vmem:[#allocation1 + $0x10] ss:$24 sm:$0x7]  }
   0xc   :  { %43 = vrot.lane.b32.xlu0 %v42_v9, %s111_s0  ;;  %55 = vrot.lane.b32.xlu1 %v54_v10, %s112_s24  ;;  %v48_v12 = vld [vmem:[#allocation1 + $0x11] ss:$24 sm:$0x7]  }
   0xe   :  { %v66_v11 = vld [vmem:[#allocation1 + $0x9] ss:$24 sm:$0x7]   ;;  %v60_v13 = vld [vmem:[#allocation1 + $0xa] ss:$24 sm:$0x7]  }
   0xf   :  { %67 = vrot.lane.b32.xlu2 %v66_v11, %s113_s25  ;;  %v72_v15 = vld [vmem:[#allocation1 + $0x8] ss:$24 sm:$0x7]  }
  0x11   :  { %v38_v14 = vld [vmem:[#allocation1] ss:$24 sm:$0x7]   ;;  %v78_v16 = vld [vmem:[#allocation1 + $0x2] ss:$24 sm:$0x7]  }
  0x12   :  { %40 = vst.msk [vmem:[#allocation0] sm:$0x7] %vm39_vm0, %v38_v14   ;;  %v84_v17 = vld [vmem:[#allocation1 + $0x1] ss:$24 sm:$0x7]  }
  0x14   :  { %49 = vrot.lane.b32.xlu0 %v48_v12, %s114_s26  ;;  %61 = vrot.lane.b32.xlu1 %v60_v13, %s115_s27 }
  0x17   :  { %73 = vrot.lane.b32.xlu2 %v72_v15, %s116_s28 }
  0x1c   :  { %79 = vrot.lane.b32.xlu0 %v78_v16, %s117_s29  ;;  %85 = vrot.lane.b32.xlu1 %v84_v17, %s118_s30 }
  0x69   :  { %v68_v18 = vpop.permute.xlu2 %67  }
  0x71   :  { %v74_v19 = vpop.permute.xlu2 %73  }
  0x7e   :  { %v44_v20 = vpop.permute.xlu0 %43   ;;  %v56_v21 = vpop.permute.xlu1 %55  }
  0x7f   :  { %46 = vst.msk [vmem:[#allocation0] sm:$0x7] %vm45_vm1, %v44_v20  }
  0x86   :  { %v50_v22 = vpop.permute.xlu0 %49   ;;  %v62_v23 = vpop.permute.xlu1 %61  }
  0x87   :  { %52 = vst.msk [vmem:[#allocation0] sm:$0x7] %vm51_vm2, %v50_v22  }
  0x88   :  { %58 = vst.msk [vmem:[#allocation0] sm:$0x7] %vm57_vm3, %v56_v21  }
  0x89   :  { %64 = vst.msk [vmem:[#allocation0] sm:$0x7] %vm63_vm4, %v62_v23  }
  0x8a   :  { %70 = vst.msk [vmem:[#allocation0] sm:$0x7] %vm69_vm5, %v68_v18  }
  0x8b   :  { %76 = vst.msk [vmem:[#allocation0] sm:$0x7] %vm75_vm6, %v74_v19  }
  0x8e   :  { %v80_v24 = vpop.permute.xlu0 %79   ;;  %v86_v25 = vpop.permute.xlu1 %85  }
  0x8f   :  { %82 = vst.msk [vmem:[#allocation0] sm:$0x7] %vm81_vm7, %v80_v24  }
  0x90   :  { %88 = vst.msk [vmem:[#allocation0] sm:$0x7] %vm87_vm8, %v86_v25  }
  0x97   :  { %v91_v26 = vld [vmem:[#allocation0] sm:$0xf] }
  0x98   :  { %94 = vst [vmem:[%s160_s1] sm:$0xf] %v91_v26 }

// kernel: _lambda_.13
= control target key start
LH: loop header
LB: loop body
LE: loop exit
PB: predicated region body
PF: predicated region fallthrough
CT: control target
= control target key end

     0   :  { %s7244_s12 = smov 0   ;;  %s7246_s13 = smov 0   ;;  %s9297_s0 = inlined_call_operand.vmem [shape: bf16[8,8960], index: 0, kind: input, shape index: {}]   ;;  %s9298_s1 = inlined_call_operand.vmem [shape: bf16[8960,2048], index: 1, kind: input, shape index: {}]   ;;  %s9299_s2 = inlined_call_operand.vmem [shape: f32[1,2048], index: 2, kind: input, shape index: {}]   ;;  %s9300_s3 = inlined_call_operand.vmem [shape: f32[8,2048], index: 3, kind: output, shape index: {}]  }
   0x1   :  { %s7248_s14 = smov 0   ;;  %s7250_s15 = smov 0  }
   0x2   :  { %s7252_s16 = smov 0   ;;  %s7254_s17 = smov 0  }
   0x3   :  { %s7256_s18 = smov 0  }
   0x4 LB: > { %s25_s19 = sadd.s32 1, %s7213_s16  ;;  %s28_s20 = sadd.s32 1, %s7217_s17  ;;  %s7221_s18 = sphi %s7256_s18, %s13_s18   ;;  %s7217_s17 = sphi %s7254_s17, %s9306_s17   ;;  %s7213_s16 = sphi %s7252_s16, %s9305_s16   ;;  %s7209_s15 = sphi %s7250_s15, %s9304_s15   ;;  %s7205_s14 = sphi %s7248_s14, %s9303_s14   ;;  %s7201_s13 = sphi %s7246_s13, %s9302_s13   ;;  %s7197_s12 = sphi %s7244_s12, %s9301_s12  }
   0x5   : > { %p26_p0 = scmp.ge.s32.totalorder %s25_s19, 10  ;;  %p76_p1 = scmp.ne.s32.totalorder %s7201_s13, %s7197_s12 }
   0x6   : > { %p77_p2 = scmp.eq.s32.totalorder %s7221_s18, 0  ;;  %s69_s24 = sadd.s32 1, %s7201_s13 }
   0x7   : > { %s9308_s19 = smov (%p26_p0, %s25_s19), 0  ;;  %s9310_s20 = smov (!%p26_p0, %s28_s20), %s7217_s17 }
   0x8   : > { %p78_p3 = por %p77_p2, %p76_p1  ;;  %p30_p4 = scmp.ge.s32.totalorder %s9310_s20, 2 }
   0x9   : > { %s64_s21 = ssub.s32 %s7213_s16, %s9308_s19  ;;  %p4854_p6 = scmp.ge.s32.totalorder %s7221_s18, 20 }
   0xa   : > { %s9312_s20 = smov (%p30_p4, %s9310_s20), 0 }
   0xb   : > { %s65_s22 = ssub.s32 %s7217_s17, %s9312_s20  ;;  %156 = sbr.rel (%p4854_p6) target bundleno = 472 (0x1d8), region = 16 }
   0xc   : > { %s66_s23 = sor.u32 %s65_s22, %s64_s21 }
   0xd   : > { %p67_p5 = scmp.eq.s32.totalorder %s66_s23, 0 }
   0xf   : > { %s7295_s25 = scalar_select %p67_p5, %s7201_s13, %s69_s24  }
  0x10   : > { %172 = sbr.rel (!%p78_p3) target bundleno = 472 (0x1d8), region = 24  ;;  %s174_s26 = sand.u32 (%p78_p3), 1, %s7201_s13  }
  0x11   : > { %s7108_s27 = smul.u32 (%p78_p3), 3584, %s174_s26  ;;  %s4855_s28 = sshll.u32 (%p78_p3), %s7217_s17, 3 }
  0x12   : > { %s6659_s29 = smul.u32 (%p78_p3), 1792, %s7213_s16 }
  0x13   : > { %s7309_s8 = scalar_lea.vmem (%p78_p3), [#allocation3], %s7108_s27 }
  0x14   : > { %s180_s30 = sadd.s32 (%p78_p3), %s6659_s29, %s4855_s28 }
  0x15   : > { %s4857_s4 = sshll.u32 %s180_s30, 2 }
  0x16   : > { %s7304_s7 = scalar_lea.vmem %s9298_s1, %s4857_s4 }
  0x17   : > { %v195_v0 = vld [vmem:[%s7304_s7] sm:$0xff]  ;;  %v197_v1 = vld [vmem:[%s7304_s7 + $0x8] sm:$0xff]  ;;  %v199_v2 = vld [vmem:[%s7304_s7 + $0x10] sm:$0xff] }
  0x18   : > { %196 = vst [vmem:[%s7309_s8] sm:$0xff] %v195_v0  ;;  %v201_v3 = vld [vmem:[%s7304_s7 + $0x18] sm:$0xff]  ;;  %v203_v4 = vld [vmem:[%s7304_s7 + $0x40] sm:$0xff]  ;;  %v205_v5 = vld [vmem:[%s7304_s7 + $0x48] sm:$0xff] }
  0x19   : > { %198 = vst [vmem:[%s7309_s8 + $0x8] sm:$0xff] %v197_v1  ;;  %v207_v6 = vld [vmem:[%s7304_s7 + $0x50] sm:$0xff]  ;;  %v209_v7 = vld [vmem:[%s7304_s7 + $0x58] sm:$0xff]  ;;  %v211_v8 = vld [vmem:[%s7304_s7 + $0x80] sm:$0xff] }
  0x1a   : > { %200 = vst [vmem:[%s7309_s8 + $0x10] sm:$0xff] %v199_v2  ;;  %v213_v9 = vld [vmem:[%s7304_s7 + $0x88] sm:$0xff]  ;;  %v215_v10 = vld [vmem:[%s7304_s7 + $0x90] sm:$0xff]  ;;  %v217_v11 = vld [vmem:[%s7304_s7 + $0x98] sm:$0xff] }
  0x1b   : > { %202 = vst [vmem:[%s7309_s8 + $0x18] sm:$0xff] %v201_v3  ;;  %v219_v12 = vld [vmem:[%s7304_s7 + $0xc0] sm:$0xff]  ;;  %v221_v13 = vld [vmem:[%s7304_s7 + $0xc8] sm:$0xff]  ;;  %v223_v14 = vld [vmem:[%s7304_s7 + $0xd0] sm:$0xff] }
  0x1c   : > { %204 = vst [vmem:[%s7309_s8 + $0x20] sm:$0xff] %v203_v4  ;;  %v225_v15 = vld [vmem:[%s7304_s7 + $0xd8] sm:$0xff]  ;;  %v227_v16 = vld [vmem:[%s7304_s7 + $0x100] sm:$0xff]  ;;  %v229_v17 = vld [vmem:[%s7304_s7 + $0x108] sm:$0xff] }
  0x1d   : > { %206 = vst [vmem:[%s7309_s8 + $0x28] sm:$0xff] %v205_v5  ;;  %v231_v18 = vld [vmem:[%s7304_s7 + $0x110] sm:$0xff]  ;;  %v233_v19 = vld [vmem:[%s7304_s7 + $0x118] sm:$0xff]  ;;  %v235_v20 = vld [vmem:[%s7304_s7 + $0x140] sm:$0xff] }
  0x1e   : > { %208 = vst [vmem:[%s7309_s8 + $0x30] sm:$0xff] %v207_v6  ;;  %v237_v21 = vld [vmem:[%s7304_s7 + $0x148] sm:$0xff]  ;;  %v239_v22 = vld [vmem:[%s7304_s7 + $0x150] sm:$0xff]  ;;  %v241_v23 = vld [vmem:[%s7304_s7 + $0x158] sm:$0xff] }
  0x1f   : > { %210 = vst [vmem:[%s7309_s8 + $0x38] sm:$0xff] %v209_v7  ;;  %v243_v24 = vld [vmem:[%s7304_s7 + $0x180] sm:$0xff]  ;;  %v245_v25 = vld [vmem:[%s7304_s7 + $0x188] sm:$0xff]  ;;  %v247_v26 = vld [vmem:[%s7304_s7 + $0x190] sm:$0xff] }
  0x20   : > { %212 = vst [vmem:[%s7309_s8 + $0x40] sm:$0xff] %v211_v8  ;;  %v249_v27 = vld [vmem:[%s7304_s7 + $0x198] sm:$0xff]  ;;  %v251_v28 = vld [vmem:[%s7304_s7 + $0x1c0] sm:$0xff]  ;;  %v253_v29 = vld [vmem:[%s7304_s7 + $0x1c8] sm:$0xff] }
  0x21   : > { %214 = vst [vmem:[%s7309_s8 + $0x48] sm:$0xff] %v213_v9  ;;  %v255_v30 = vld [vmem:[%s7304_s7 + $0x1d0] sm:$0xff]  ;;  %v257_v31 = vld [vmem:[%s7304_s7 + $0x1d8] sm:$0xff]  ;;  %v259_v32 = vld [vmem:[%s7304_s7 + $0x200] sm:$0xff] }
  0x22   : > { %216 = vst [vmem:[%s7309_s8 + $0x50] sm:$0xff] %v215_v10  ;;  %v261_v33 = vld [vmem:[%s7304_s7 + $0x208] sm:$0xff]  ;;  %v263_v34 = vld [vmem:[%s7304_s7 + $0x210] sm:$0xff]  ;;  %v265_v35 = vld [vmem:[%s7304_s7 + $0x218] sm:$0xff] }
  0x23   : > { %218 = vst [vmem:[%s7309_s8 + $0x58] sm:$0xff] %v217_v11  ;;  %v267_v36 = vld [vmem:[%s7304_s7 + $0x240] sm:$0xff]  ;;  %v269_v37 = vld [vmem:[%s7304_s7 + $0x248] sm:$0xff]  ;;  %v271_v38 = vld [vmem:[%s7304_s7 + $0x250] sm:$0xff] }
  0x24   : > { %220 = vst [vmem:[%s7309_s8 + $0x60] sm:$0xff] %v219_v12  ;;  %v273_v39 = vld [vmem:[%s7304_s7 + $0x258] sm:$0xff]  ;;  %v275_v40 = vld [vmem:[%s7304_s7 + $0x280] sm:$0xff]  ;;  %v277_v41 = vld [vmem:[%s7304_s7 + $0x288] sm:$0xff] }
  0x25   : > { %222 = vst [vmem:[%s7309_s8 + $0x68] sm:$0xff] %v221_v13  ;;  %v279_v42 = vld [vmem:[%s7304_s7 + $0x290] sm:$0xff]  ;;  %v281_v43 = vld [vmem:[%s7304_s7 + $0x298] sm:$0xff]  ;;  %v283_v44 = vld [vmem:[%s7304_s7 + $0x2c0] sm:$0xff] }
  0x26   : > { %224 = vst [vmem:[%s7309_s8 + $0x70] sm:$0xff] %v223_v14  ;;  %v285_v45 = vld [vmem:[%s7304_s7 + $0x2c8] sm:$0xff]  ;;  %v287_v46 = vld [vmem:[%s7304_s7 + $0x2d0] sm:$0xff]  ;;  %v289_v47 = vld [vmem:[%s7304_s7 + $0x2d8] sm:$0xff] }
  0x27   : > { %226 = vst [vmem:[%s7309_s8 + $0x78] sm:$0xff] %v225_v15  ;;  %v291_v48 = vld [vmem:[%s7304_s7 + $0x300] sm:$0xff]  ;;  %v293_v49 = vld [vmem:[%s7304_s7 + $0x308] sm:$0xff]  ;;  %v295_v50 = vld [vmem:[%s7304_s7 + $0x310] sm:$0xff] }
  0x28   : > { %228 = vst [vmem:[%s7309_s8 + $0x80] sm:$0xff] %v227_v16  ;;  %v297_v51 = vld [vmem:[%s7304_s7 + $0x318] sm:$0xff]  ;;  %v299_v52 = vld [vmem:[%s7304_s7 + $0x340] sm:$0xff]  ;;  %v301_v53 = vld [vmem:[%s7304_s7 + $0x348] sm:$0xff] }
  0x29   : > { %230 = vst [vmem:[%s7309_s8 + $0x88] sm:$0xff] %v229_v17  ;;  %v303_v54 = vld [vmem:[%s7304_s7 + $0x350] sm:$0xff]  ;;  %v305_v55 = vld [vmem:[%s7304_s7 + $0x358] sm:$0xff]  ;;  %v307_v56 = vld [vmem:[%s7304_s7 + $0x380] sm:$0xff] }
  0x2a   : > { %232 = vst [vmem:[%s7309_s8 + $0x90] sm:$0xff] %v231_v18  ;;  %v309_v57 = vld [vmem:[%s7304_s7 + $0x388] sm:$0xff]  ;;  %v311_v58 = vld [vmem:[%s7304_s7 + $0x390] sm:$0xff]  ;;  %v313_v59 = vld [vmem:[%s7304_s7 + $0x398] sm:$0xff] }
  0x2b   : > { %234 = vst [vmem:[%s7309_s8 + $0x98] sm:$0xff] %v233_v19  ;;  %v315_v60 = vld [vmem:[%s7304_s7 + $0x3c0] sm:$0xff]  ;;  %v317_v61 = vld [vmem:[%s7304_s7 + $0x3c8] sm:$0xff]  ;;  %v319_v62 = vld [vmem:[%s7304_s7 + $0x3d0] sm:$0xff] }
  0x2c   : > { %236 = vst [vmem:[%s7309_s8 + $0xa0] sm:$0xff] %v235_v20  ;;  %v321_v63 = vld [vmem:[%s7304_s7 + $0x3d8] sm:$0xff]  ;;  %v323_v0 = vld [vmem:[%s7304_s7 + $0x400] sm:$0xff]  ;;  %v325_v1 = vld [vmem:[%s7304_s7 + $0x408] sm:$0xff] }
  0x2d   : > { %238 = vst [vmem:[%s7309_s8 + $0xa8] sm:$0xff] %v237_v21  ;;  %v327_v2 = vld [vmem:[%s7304_s7 + $0x410] sm:$0xff]  ;;  %v329_v3 = vld [vmem:[%s7304_s7 + $0x418] sm:$0xff]  ;;  %v331_v4 = vld [vmem:[%s7304_s7 + $0x440] sm:$0xff] }
  0x2e   : > { %240 = vst [vmem:[%s7309_s8 + $0xb0] sm:$0xff] %v239_v22  ;;  %v333_v5 = vld [vmem:[%s7304_s7 + $0x448] sm:$0xff]  ;;  %v335_v6 = vld [vmem:[%s7304_s7 + $0x450] sm:$0xff]  ;;  %v337_v7 = vld [vmem:[%s7304_s7 + $0x458] sm:$0xff] }
  0x2f   : > { %242 = vst [vmem:[%s7309_s8 + $0xb8] sm:$0xff] %v241_v23  ;;  %v339_v8 = vld [vmem:[%s7304_s7 + $0x480] sm:$0xff]  ;;  %v341_v9 = vld [vmem:[%s7304_s7 + $0x488] sm:$0xff]  ;;  %v343_v10 = vld [vmem:[%s7304_s7 + $0x490] sm:$0xff] }
  0x30   : > { %244 = vst [vmem:[%s7309_s8 + $0xc0] sm:$0xff] %v243_v24  ;;  %v345_v11 = vld [vmem:[%s7304_s7 + $0x498] sm:$0xff]  ;;  %v347_v12 = vld [vmem:[%s7304_s7 + $0x4c0] sm:$0xff]  ;;  %v349_v13 = vld [vmem:[%s7304_s7 + $0x4c8] sm:$0xff] }
  0x31   : > { %246 = vst [vmem:[%s7309_s8 + $0xc8] sm:$0xff] %v245_v25  ;;  %v351_v14 = vld [vmem:[%s7304_s7 + $0x4d0] sm:$0xff]  ;;  %v353_v15 = vld [vmem:[%s7304_s7 + $0x4d8] sm:$0xff]  ;;  %v355_v16 = vld [vmem:[%s7304_s7 + $0x500] sm:$0xff] }
  0x32   : > { %248 = vst [vmem:[%s7309_s8 + $0xd0] sm:$0xff] %v247_v26  ;;  %v357_v17 = vld [vmem:[%s7304_s7 + $0x508] sm:$0xff]  ;;  %v359_v18 = vld [vmem:[%s7304_s7 + $0x510] sm:$0xff]  ;;  %v361_v19 = vld [vmem:[%s7304_s7 + $0x518] sm:$0xff] }
  0x33   : > { %250 = vst [vmem:[%s7309_s8 + $0xd8] sm:$0xff] %v249_v27  ;;  %v363_v20 = vld [vmem:[%s7304_s7 + $0x540] sm:$0xff]  ;;  %v365_v21 = vld [vmem:[%s7304_s7 + $0x548] sm:$0xff]  ;;  %v367_v22 = vld [vmem:[%s7304_s7 + $0x550] sm:$0xff] }
  0x34   : > { %252 = vst [vmem:[%s7309_s8 + $0xe0] sm:$0xff] %v251_v28  ;;  %v369_v23 = vld [vmem:[%s7304_s7 + $0x558] sm:$0xff]  ;;  %v371_v24 = vld [vmem:[%s7304_s7 + $0x580] sm:$0xff]  ;;  %v373_v25 = vld [vmem:[%s7304_s7 + $0x588] sm:$0xff] }
  0x35   : > { %254 = vst [vmem:[%s7309_s8 + $0xe8] sm:$0xff] %v253_v29  ;;  %v375_v26 = vld [vmem:[%s7304_s7 + $0x590] sm:$0xff]  ;;  %v377_v27 = vld [vmem:[%s7304_s7 + $0x598] sm:$0xff]  ;;  %v379_v28 = vld [vmem:[%s7304_s7 + $0x5c0] sm:$0xff] }
  0x36   : > { %256 = vst [vmem:[%s7309_s8 + $0xf0] sm:$0xff] %v255_v30  ;;  %v381_v29 = vld [vmem:[%s7304_s7 + $0x5c8] sm:$0xff]  ;;  %v383_v30 = vld [vmem:[%s7304_s7 + $0x5d0] sm:$0xff] }
  0x37   : > { %258 = vst [vmem:[%s7309_s8 + $0xf8] sm:$0xff] %v257_v31  ;;  %v385_v31 = vld [vmem:[%s7304_s7 + $0x5d8] sm:$0xff] }
  0x38   : > { %260 = vst [vmem:[%s7309_s8 + $0x100] sm:$0xff] %v259_v32  ;;  %v387_v32 = vld [vmem:[%s7304_s7 + $0x600] sm:$0xff] }
  0x39   : > { %262 = vst [vmem:[%s7309_s8 + $0x108] sm:$0xff] %v261_v33  ;;  %v389_v33 = vld [vmem:[%s7304_s7 + $0x608] sm:$0xff] }
  0x3a   : > { %264 = vst [vmem:[%s7309_s8 + $0x110] sm:$0xff] %v263_v34  ;;  %v391_v34 = vld [vmem:[%s7304_s7 + $0x610] sm:$0xff] }
  0x3b   : > { %266 = vst [vmem:[%s7309_s8 + $0x118] sm:$0xff] %v265_v35  ;;  %v393_v35 = vld [vmem:[%s7304_s7 + $0x618] sm:$0xff] }
  0x3c   : > { %268 = vst [vmem:[%s7309_s8 + $0x120] sm:$0xff] %v267_v36  ;;  %v395_v36 = vld [vmem:[%s7304_s7 + $0x640] sm:$0xff] }
  0x3d   : > { %270 = vst [vmem:[%s7309_s8 + $0x128] sm:$0xff] %v269_v37  ;;  %v397_v37 = vld [vmem:[%s7304_s7 + $0x648] sm:$0xff] }
  0x3e   : > { %272 = vst [vmem:[%s7309_s8 + $0x130] sm:$0xff] %v271_v38  ;;  %v399_v38 = vld [vmem:[%s7304_s7 + $0x650] sm:$0xff] }
  0x3f   : > { %274 = vst [vmem:[%s7309_s8 + $0x138] sm:$0xff] %v273_v39  ;;  %v401_v39 = vld [vmem:[%s7304_s7 + $0x658] sm:$0xff] }
  0x40   : > { %276 = vst [vmem:[%s7309_s8 + $0x140] sm:$0xff] %v275_v40  ;;  %v403_v40 = vld [vmem:[%s7304_s7 + $0x680] sm:$0xff] }
  0x41   : > { %278 = vst [vmem:[%s7309_s8 + $0x148] sm:$0xff] %v277_v41  ;;  %v405_v41 = vld [vmem:[%s7304_s7 + $0x688] sm:$0xff] }
  0x42   : > { %280 = vst [vmem:[%s7309_s8 + $0x150] sm:$0xff] %v279_v42  ;;  %v407_v42 = vld [vmem:[%s7304_s7 + $0x690] sm:$0xff] }
  0x43   : > { %282 = vst [vmem:[%s7309_s8 + $0x158] sm:$0xff] %v281_v43  ;;  %v409_v43 = vld [vmem:[%s7304_s7 + $0x698] sm:$0xff] }
  0x44   : > { %284 = vst [vmem:[%s7309_s8 + $0x160] sm:$0xff] %v283_v44  ;;  %v411_v44 = vld [vmem:[%s7304_s7 + $0x6c0] sm:$0xff] }
  0x45   : > { %286 = vst [vmem:[%s7309_s8 + $0x168] sm:$0xff] %v285_v45  ;;  %v413_v45 = vld [vmem:[%s7304_s7 + $0x6c8] sm:$0xff] }
  0x46   : > { %288 = vst [vmem:[%s7309_s8 + $0x170] sm:$0xff] %v287_v46  ;;  %v415_v46 = vld [vmem:[%s7304_s7 + $0x6d0] sm:$0xff] }
  0x47   : > { %290 = vst [vmem:[%s7309_s8 + $0x178] sm:$0xff] %v289_v47  ;;  %v417_v47 = vld [vmem:[%s7304_s7 + $0x6d8] sm:$0xff] }
  0x48   : > { %292 = vst [vmem:[%s7309_s8 + $0x180] sm:$0xff] %v291_v48  ;;  %v419_v48 = vld [vmem:[%s7304_s7 + $0x700] sm:$0xff] }
  0x49   : > { %294 = vst [vmem:[%s7309_s8 + $0x188] sm:$0xff] %v293_v49  ;;  %v421_v49 = vld [vmem:[%s7304_s7 + $0x708] sm:$0xff] }
  0x4a   : > { %296 = vst [vmem:[%s7309_s8 + $0x190] sm:$0xff] %v295_v50  ;;  %v423_v50 = vld [vmem:[%s7304_s7 + $0x710] sm:$0xff] }
  0x4b   : > { %298 = vst [vmem:[%s7309_s8 + $0x198] sm:$0xff] %v297_v51  ;;  %v425_v51 = vld [vmem:[%s7304_s7 + $0x718] sm:$0xff] }
  0x4c   : > { %300 = vst [vmem:[%s7309_s8 + $0x1a0] sm:$0xff] %v299_v52  ;;  %v427_v52 = vld [vmem:[%s7304_s7 + $0x740] sm:$0xff] }
  0x4d   : > { %302 = vst [vmem:[%s7309_s8 + $0x1a8] sm:$0xff] %v301_v53  ;;  %v429_v53 = vld [vmem:[%s7304_s7 + $0x748] sm:$0xff] }
  0x4e   : > { %304 = vst [vmem:[%s7309_s8 + $0x1b0] sm:$0xff] %v303_v54  ;;  %v431_v54 = vld [vmem:[%s7304_s7 + $0x750] sm:$0xff] }
  0x4f   : > { %306 = vst [vmem:[%s7309_s8 + $0x1b8] sm:$0xff] %v305_v55  ;;  %v433_v55 = vld [vmem:[%s7304_s7 + $0x758] sm:$0xff] }
  0x50   : > { %308 = vst [vmem:[%s7309_s8 + $0x1c0] sm:$0xff] %v307_v56  ;;  %v435_v56 = vld [vmem:[%s7304_s7 + $0x780] sm:$0xff] }
  0x51   : > { %310 = vst [vmem:[%s7309_s8 + $0x1c8] sm:$0xff] %v309_v57  ;;  %v437_v57 = vld [vmem:[%s7304_s7 + $0x788] sm:$0xff] }
  0x52   : > { %312 = vst [vmem:[%s7309_s8 + $0x1d0] sm:$0xff] %v311_v58  ;;  %v439_v58 = vld [vmem:[%s7304_s7 + $0x790] sm:$0xff] }
  0x53   : > { %314 = vst [vmem:[%s7309_s8 + $0x1d8] sm:$0xff] %v313_v59  ;;  %v441_v59 = vld [vmem:[%s7304_s7 + $0x798] sm:$0xff] }
  0x54   : > { %316 = vst [vmem:[%s7309_s8 + $0x1e0] sm:$0xff] %v315_v60  ;;  %v443_v60 = vld [vmem:[%s7304_s7 + $0x7c0] sm:$0xff] }
  0x55   : > { %318 = vst [vmem:[%s7309_s8 + $0x1e8] sm:$0xff] %v317_v61  ;;  %v445_v61 = vld [vmem:[%s7304_s7 + $0x7c8] sm:$0xff] }
  0x56   : > { %320 = vst [vmem:[%s7309_s8 + $0x1f0] sm:$0xff] %v319_v62  ;;  %v447_v62 = vld [vmem:[%s7304_s7 + $0x7d0] sm:$0xff] }
  0x57   : > { %322 = vst [vmem:[%s7309_s8 + $0x1f8] sm:$0xff] %v321_v63  ;;  %v449_v63 = vld [vmem:[%s7304_s7 + $0x7d8] sm:$0xff] }
  0x58   : > { %324 = vst [vmem:[%s7309_s8 + $0x200] sm:$0xff] %v323_v0  ;;  %v451_v0 = vld [vmem:[%s7304_s7 + $0x800] sm:$0xff] }
  0x59   : > { %326 = vst [vmem:[%s7309_s8 + $0x208] sm:$0xff] %v325_v1  ;;  %v453_v1 = vld [vmem:[%s7304_s7 + $0x808] sm:$0xff] }
  0x5a   : > { %328 = vst [vmem:[%s7309_s8 + $0x210] sm:$0xff] %v327_v2  ;;  %v455_v2 = vld [vmem:[%s7304_s7 + $0x810] sm:$0xff] }
  0x5b   : > { %330 = vst [vmem:[%s7309_s8 + $0x218] sm:$0xff] %v329_v3  ;;  %v457_v3 = vld [vmem:[%s7304_s7 + $0x818] sm:$0xff] }
  0x5c   : > { %332 = vst [vmem:[%s7309_s8 + $0x220] sm:$0xff] %v331_v4  ;;  %v459_v4 = vld [vmem:[%s7304_s7 + $0x840] sm:$0xff] }
  0x5d   : > { %334 = vst [vmem:[%s7309_s8 + $0x228] sm:$0xff] %v333_v5  ;;  %v461_v5 = vld [vmem:[%s7304_s7 + $0x848] sm:$0xff] }
  0x5e   : > { %336 = vst [vmem:[%s7309_s8 + $0x230] sm:$0xff] %v335_v6  ;;  %v463_v6 = vld [vmem:[%s7304_s7 + $0x850] sm:$0xff] }
  0x5f   : > { %338 = vst [vmem:[%s7309_s8 + $0x238] sm:$0xff] %v337_v7  ;;  %v465_v7 = vld [vmem:[%s7304_s7 + $0x858] sm:$0xff] }
  0x60   : > { %340 = vst [vmem:[%s7309_s8 + $0x240] sm:$0xff] %v339_v8  ;;  %v467_v8 = vld [vmem:[%s7304_s7 + $0x880] sm:$0xff] }
  0x61   : > { %342 = vst [vmem:[%s7309_s8 + $0x248] sm:$0xff] %v341_v9  ;;  %v469_v9 = vld [vmem:[%s7304_s7 + $0x888] sm:$0xff] }
  0x62   : > { %344 = vst [vmem:[%s7309_s8 + $0x250] sm:$0xff] %v343_v10  ;;  %v471_v10 = vld [vmem:[%s7304_s7 + $0x890] sm:$0xff] }
  0x63   : > { %346 = vst [vmem:[%s7309_s8 + $0x258] sm:$0xff] %v345_v11  ;;  %v473_v11 = vld [vmem:[%s7304_s7 + $0x898] sm:$0xff] }
  0x64   : > { %348 = vst [vmem:[%s7309_s8 + $0x260] sm:$0xff] %v347_v12  ;;  %v475_v12 = vld [vmem:[%s7304_s7 + $0x8c0] sm:$0xff] }
  0x65   : > { %350 = vst [vmem:[%s7309_s8 + $0x268] sm:$0xff] %v349_v13  ;;  %v477_v13 = vld [vmem:[%s7304_s7 + $0x8c8] sm:$0xff] }
  0x66   : > { %352 = vst [vmem:[%s7309_s8 + $0x270] sm:$0xff] %v351_v14  ;;  %v479_v14 = vld [vmem:[%s7304_s7 + $0x8d0] sm:$0xff] }
  0x67   : > { %354 = vst [vmem:[%s7309_s8 + $0x278] sm:$0xff] %v353_v15  ;;  %v481_v15 = vld [vmem:[%s7304_s7 + $0x8d8] sm:$0xff] }
  0x68   : > { %356 = vst [vmem:[%s7309_s8 + $0x280] sm:$0xff] %v355_v16  ;;  %v483_v16 = vld [vmem:[%s7304_s7 + $0x900] sm:$0xff] }
  0x69   : > { %358 = vst [vmem:[%s7309_s8 + $0x288] sm:$0xff] %v357_v17  ;;  %v485_v17 = vld [vmem:[%s7304_s7 + $0x908] sm:$0xff] }
  0x6a   : > { %360 = vst [vmem:[%s7309_s8 + $0x290] sm:$0xff] %v359_v18  ;;  %v487_v18 = vld [vmem:[%s7304_s7 + $0x910] sm:$0xff] }
  0x6b   : > { %362 = vst [vmem:[%s7309_s8 + $0x298] sm:$0xff] %v361_v19  ;;  %v489_v19 = vld [vmem:[%s7304_s7 + $0x918] sm:$0xff] }
  0x6c   : > { %364 = vst [vmem:[%s7309_s8 + $0x2a0] sm:$0xff] %v363_v20  ;;  %v491_v20 = vld [vmem:[%s7304_s7 + $0x940] sm:$0xff] }
  0x6d   : > { %366 = vst [vmem:[%s7309_s8 + $0x2a8] sm:$0xff] %v365_v21  ;;  %v493_v21 = vld [vmem:[%s7304_s7 + $0x948] sm:$0xff] }
  0x6e   : > { %368 = vst [vmem:[%s7309_s8 + $0x2b0] sm:$0xff] %v367_v22  ;;  %v495_v22 = vld [vmem:[%s7304_s7 + $0x950] sm:$0xff] }
  0x6f   : > { %370 = vst [vmem:[%s7309_s8 + $0x2b8] sm:$0xff] %v369_v23  ;;  %v497_v23 = vld [vmem:[%s7304_s7 + $0x958] sm:$0xff] }
  0x70   : > { %372 = vst [vmem:[%s7309_s8 + $0x2c0] sm:$0xff] %v371_v24  ;;  %v499_v24 = vld [vmem:[%s7304_s7 + $0x980] sm:$0xff] }
  0x71   : > { %374 = vst [vmem:[%s7309_s8 + $0x2c8] sm:$0xff] %v373_v25  ;;  %v501_v25 = vld [vmem:[%s7304_s7 + $0x988] sm:$0xff] }
  0x72   : > { %376 = vst [vmem:[%s7309_s8 + $0x2d0] sm:$0xff] %v375_v26  ;;  %v503_v26 = vld [vmem:[%s7304_s7 + $0x990] sm:$0xff] }
  0x73   : > { %378 = vst [vmem:[%s7309_s8 + $0x2d8] sm:$0xff] %v377_v27  ;;  %v505_v27 = vld [vmem:[%s7304_s7 + $0x998] sm:$0xff] }
  0x74   : > { %380 = vst [vmem:[%s7309_s8 + $0x2e0] sm:$0xff] %v379_v28  ;;  %v507_v28 = vld [vmem:[%s7304_s7 + $0x9c0] sm:$0xff] }
  0x75   : > { %382 = vst [vmem:[%s7309_s8 + $0x2e8] sm:$0xff] %v381_v29  ;;  %v509_v29 = vld [vmem:[%s7304_s7 + $0x9c8] sm:$0xff] }
  0x76   : > { %384 = vst [vmem:[%s7309_s8 + $0x2f0] sm:$0xff] %v383_v30  ;;  %v511_v30 = vld [vmem:[%s7304_s7 + $0x9d0] sm:$0xff] }
  0x77   : > { %386 = vst [vmem:[%s7309_s8 + $0x2f8] sm:$0xff] %v385_v31  ;;  %v513_v31 = vld [vmem:[%s7304_s7 + $0x9d8] sm:$0xff] }
  0x78   : > { %388 = vst [vmem:[%s7309_s8 + $0x300] sm:$0xff] %v387_v32  ;;  %v515_v32 = vld [vmem:[%s7304_s7 + $0xa00] sm:$0xff] }
  0x79   : > { %390 = vst [vmem:[%s7309_s8 + $0x308] sm:$0xff] %v389_v33  ;;  %v517_v33 = vld [vmem:[%s7304_s7 + $0xa08] sm:$0xff] }
  0x7a   : > { %392 = vst [vmem:[%s7309_s8 + $0x310] sm:$0xff] %v391_v34  ;;  %v519_v34 = vld [vmem:[%s7304_s7 + $0xa10] sm:$0xff] }
  0x7b   : > { %394 = vst [vmem:[%s7309_s8 + $0x318] sm:$0xff] %v393_v35  ;;  %v521_v35 = vld [vmem:[%s7304_s7 + $0xa18] sm:$0xff] }
  0x7c   : > { %396 = vst [vmem:[%s7309_s8 + $0x320] sm:$0xff] %v395_v36  ;;  %v523_v36 = vld [vmem:[%s7304_s7 + $0xa40] sm:$0xff] }
  0x7d   : > { %398 = vst [vmem:[%s7309_s8 + $0x328] sm:$0xff] %v397_v37  ;;  %v525_v37 = vld [vmem:[%s7304_s7 + $0xa48] sm:$0xff] }
  0x7e   : > { %400 = vst [vmem:[%s7309_s8 + $0x330] sm:$0xff] %v399_v38  ;;  %v527_v38 = vld [vmem:[%s7304_s7 + $0xa50] sm:$0xff] }
  0x7f   : > { %402 = vst [vmem:[%s7309_s8 + $0x338] sm:$0xff] %v401_v39  ;;  %v529_v39 = vld [vmem:[%s7304_s7 + $0xa58] sm:$0xff] }
  0x80   : > { %404 = vst [vmem:[%s7309_s8 + $0x340] sm:$0xff] %v403_v40  ;;  %v531_v40 = vld [vmem:[%s7304_s7 + $0xa80] sm:$0xff] }
  0x81   : > { %406 = vst [vmem:[%s7309_s8 + $0x348] sm:$0xff] %v405_v41  ;;  %v533_v41 = vld [vmem:[%s7304_s7 + $0xa88] sm:$0xff] }
  0x82   : > { %408 = vst [vmem:[%s7309_s8 + $0x350] sm:$0xff] %v407_v42  ;;  %v535_v42 = vld [vmem:[%s7304_s7 + $0xa90] sm:$0xff] }
  0x83   : > { %410 = vst [vmem:[%s7309_s8 + $0x358] sm:$0xff] %v409_v43  ;;  %v537_v43 = vld [vmem:[%s7304_s7 + $0xa98] sm:$0xff] }
  0x84   : > { %412 = vst [vmem:[%s7309_s8 + $0x360] sm:$0xff] %v411_v44  ;;  %v539_v44 = vld [vmem:[%s7304_s7 + $0xac0] sm:$0xff] }
  0x85   : > { %414 = vst [vmem:[%s7309_s8 + $0x368] sm:$0xff] %v413_v45  ;;  %v541_v45 = vld [vmem:[%s7304_s7 + $0xac8] sm:$0xff] }
  0x86   : > { %416 = vst [vmem:[%s7309_s8 + $0x370] sm:$0xff] %v415_v46  ;;  %v543_v46 = vld [vmem:[%s7304_s7 + $0xad0] sm:$0xff] }
  0x87   : > { %418 = vst [vmem:[%s7309_s8 + $0x378] sm:$0xff] %v417_v47  ;;  %v545_v47 = vld [vmem:[%s7304_s7 + $0xad8] sm:$0xff] }
  0x88   : > { %420 = vst [vmem:[%s7309_s8 + $0x380] sm:$0xff] %v419_v48  ;;  %v547_v48 = vld [vmem:[%s7304_s7 + $0xb00] sm:$0xff] }
  0x89   : > { %422 = vst [vmem:[%s7309_s8 + $0x388] sm:$0xff] %v421_v49  ;;  %v549_v49 = vld [vmem:[%s7304_s7 + $0xb08] sm:$0xff] }
  0x8a   : > { %424 = vst [vmem:[%s7309_s8 + $0x390] sm:$0xff] %v423_v50  ;;  %v551_v50 = vld [vmem:[%s7304_s7 + $0xb10] sm:$0xff] }
  0x8b   : > { %426 = vst [vmem:[%s7309_s8 + $0x398] sm:$0xff] %v425_v51  ;;  %v553_v51 = vld [vmem:[%s7304_s7 + $0xb18] sm:$0xff] }
  0x8c   : > { %428 = vst [vmem:[%s7309_s8 + $0x3a0] sm:$0xff] %v427_v52  ;;  %v555_v52 = vld [vmem:[%s7304_s7 + $0xb40] sm:$0xff] }
  0x8d   : > { %430 = vst [vmem:[%s7309_s8 + $0x3a8] sm:$0xff] %v429_v53  ;;  %v557_v53 = vld [vmem:[%s7304_s7 + $0xb48] sm:$0xff] }
  0x8e   : > { %432 = vst [vmem:[%s7309_s8 + $0x3b0] sm:$0xff] %v431_v54  ;;  %v559_v54 = vld [vmem:[%s7304_s7 + $0xb50] sm:$0xff] }
  0x8f   : > { %434 = vst [vmem:[%s7309_s8 + $0x3b8] sm:$0xff] %v433_v55  ;;  %v561_v55 = vld [vmem:[%s7304_s7 + $0xb58] sm:$0xff] }
  0x90   : > { %436 = vst [vmem:[%s7309_s8 + $0x3c0] sm:$0xff] %v435_v56  ;;  %v563_v56 = vld [vmem:[%s7304_s7 + $0xb80] sm:$0xff] }
  0x91   : > { %438 = vst [vmem:[%s7309_s8 + $0x3c8] sm:$0xff] %v437_v57  ;;  %v565_v57 = vld [vmem:[%s7304_s7 + $0xb88] sm:$0xff] }
  0x92   : > { %440 = vst [vmem:[%s7309_s8 + $0x3d0] sm:$0xff] %v439_v58  ;;  %v567_v58 = vld [vmem:[%s7304_s7 + $0xb90] sm:$0xff] }
  0x93   : > { %442 = vst [vmem:[%s7309_s8 + $0x3d8] sm:$0xff] %v441_v59  ;;  %v569_v59 = vld [vmem:[%s7304_s7 + $0xb98] sm:$0xff] }
  0x94   : > { %444 = vst [vmem:[%s7309_s8 + $0x3e0] sm:$0xff] %v443_v60  ;;  %v571_v60 = vld [vmem:[%s7304_s7 + $0xbc0] sm:$0xff] }
  0x95   : > { %446 = vst [vmem:[%s7309_s8 + $0x3e8] sm:$0xff] %v445_v61  ;;  %v573_v61 = vld [vmem:[%s7304_s7 + $0xbc8] sm:$0xff] }
  0x96   : > { %448 = vst [vmem:[%s7309_s8 + $0x3f0] sm:$0xff] %v447_v62  ;;  %v575_v62 = vld [vmem:[%s7304_s7 + $0xbd0] sm:$0xff] }
  0x97   : > { %450 = vst [vmem:[%s7309_s8 + $0x3f8] sm:$0xff] %v449_v63  ;;  %v577_v63 = vld [vmem:[%s7304_s7 + $0xbd8] sm:$0xff] }
  0x98   : > { %452 = vst [vmem:[%s7309_s8 + $0x400] sm:$0xff] %v451_v0  ;;  %v579_v0 = vld [vmem:[%s7304_s7 + $0xc00] sm:$0xff] }
  0x99   : > { %454 = vst [vmem:[%s7309_s8 + $0x408] sm:$0xff] %v453_v1  ;;  %v581_v1 = vld [vmem:[%s7304_s7 + $0xc08] sm:$0xff] }
  0x9a   : > { %456 = vst [vmem:[%s7309_s8 + $0x410] sm:$0xff] %v455_v2  ;;  %v583_v2 = vld [vmem:[%s7304_s7 + $0xc10] sm:$0xff] }
  0x9b   : > { %458 = vst [vmem:[%s7309_s8 + $0x418] sm:$0xff] %v457_v3  ;;  %v585_v3 = vld [vmem:[%s7304_s7 + $0xc18] sm:$0xff] }
  0x9c   : > { %460 = vst [vmem:[%s7309_s8 + $0x420] sm:$0xff] %v459_v4  ;;  %v587_v4 = vld [vmem:[%s7304_s7 + $0xc40] sm:$0xff] }
  0x9d   : > { %462 = vst [vmem:[%s7309_s8 + $0x428] sm:$0xff] %v461_v5  ;;  %v589_v5 = vld [vmem:[%s7304_s7 + $0xc48] sm:$0xff] }
  0x9e   : > { %464 = vst [vmem:[%s7309_s8 + $0x430] sm:$0xff] %v463_v6  ;;  %v591_v6 = vld [vmem:[%s7304_s7 + $0xc50] sm:$0xff] }
  0x9f   : > { %466 = vst [vmem:[%s7309_s8 + $0x438] sm:$0xff] %v465_v7  ;;  %v593_v7 = vld [vmem:[%s7304_s7 + $0xc58] sm:$0xff] }
  0xa0   : > { %468 = vst [vmem:[%s7309_s8 + $0x440] sm:$0xff] %v467_v8  ;;  %v595_v8 = vld [vmem:[%s7304_s7 + $0xc80] sm:$0xff] }
  0xa1   : > { %470 = vst [vmem:[%s7309_s8 + $0x448] sm:$0xff] %v469_v9  ;;  %v597_v9 = vld [vmem:[%s7304_s7 + $0xc88] sm:$0xff] }
  0xa2   : > { %472 = vst [vmem:[%s7309_s8 + $0x450] sm:$0xff] %v471_v10  ;;  %v599_v10 = vld [vmem:[%s7304_s7 + $0xc90] sm:$0xff] }
  0xa3   : > { %474 = vst [vmem:[%s7309_s8 + $0x458] sm:$0xff] %v473_v11  ;;  %v601_v11 = vld [vmem:[%s7304_s7 + $0xc98] sm:$0xff] }
  0xa4   : > { %476 = vst [vmem:[%s7309_s8 + $0x460] sm:$0xff] %v475_v12  ;;  %v603_v12 = vld [vmem:[%s7304_s7 + $0xcc0] sm:$0xff] }
  0xa5   : > { %478 = vst [vmem:[%s7309_s8 + $0x468] sm:$0xff] %v477_v13  ;;  %v605_v13 = vld [vmem:[%s7304_s7 + $0xcc8] sm:$0xff] }
  0xa6   : > { %480 = vst [vmem:[%s7309_s8 + $0x470] sm:$0xff] %v479_v14  ;;  %v607_v14 = vld [vmem:[%s7304_s7 + $0xcd0] sm:$0xff] }
  0xa7   : > { %482 = vst [vmem:[%s7309_s8 + $0x478] sm:$0xff] %v481_v15  ;;  %v609_v15 = vld [vmem:[%s7304_s7 + $0xcd8] sm:$0xff] }
  0xa8   : > { %484 = vst [vmem:[%s7309_s8 + $0x480] sm:$0xff] %v483_v16  ;;  %v611_v16 = vld [vmem:[%s7304_s7 + $0xd00] sm:$0xff] }
  0xa9   : > { %486 = vst [vmem:[%s7309_s8 + $0x488] sm:$0xff] %v485_v17  ;;  %v613_v17 = vld [vmem:[%s7304_s7 + $0xd08] sm:$0xff] }
  0xaa   : > { %488 = vst [vmem:[%s7309_s8 + $0x490] sm:$0xff] %v487_v18  ;;  %v615_v18 = vld [vmem:[%s7304_s7 + $0xd10] sm:$0xff] }
  0xab   : > { %490 = vst [vmem:[%s7309_s8 + $0x498] sm:$0xff] %v489_v19  ;;  %v617_v19 = vld [vmem:[%s7304_s7 + $0xd18] sm:$0xff] }
  0xac   : > { %492 = vst [vmem:[%s7309_s8 + $0x4a0] sm:$0xff] %v491_v20  ;;  %v619_v20 = vld [vmem:[%s7304_s7 + $0xd40] sm:$0xff] }
  0xad   : > { %494 = vst [vmem:[%s7309_s8 + $0x4a8] sm:$0xff] %v493_v21  ;;  %v621_v21 = vld [vmem:[%s7304_s7 + $0xd48] sm:$0xff] }
  0xae   : > { %496 = vst [vmem:[%s7309_s8 + $0x4b0] sm:$0xff] %v495_v22  ;;  %v623_v22 = vld [vmem:[%s7304_s7 + $0xd50] sm:$0xff] }
  0xaf   : > { %498 = vst [vmem:[%s7309_s8 + $0x4b8] sm:$0xff] %v497_v23  ;;  %v625_v23 = vld [vmem:[%s7304_s7 + $0xd58] sm:$0xff] }
  0xb0   : > { %500 = vst [vmem:[%s7309_s8 + $0x4c0] sm:$0xff] %v499_v24  ;;  %v627_v24 = vld [vmem:[%s7304_s7 + $0xd80] sm:$0xff] }
  0xb1   : > { %502 = vst [vmem:[%s7309_s8 + $0x4c8] sm:$0xff] %v501_v25  ;;  %v629_v25 = vld [vmem:[%s7304_s7 + $0xd88] sm:$0xff] }
  0xb2   : > { %504 = vst [vmem:[%s7309_s8 + $0x4d0] sm:$0xff] %v503_v26  ;;  %v631_v26 = vld [vmem:[%s7304_s7 + $0xd90] sm:$0xff] }
  0xb3   : > { %506 = vst [vmem:[%s7309_s8 + $0x4d8] sm:$0xff] %v505_v27  ;;  %v633_v27 = vld [vmem:[%s7304_s7 + $0xd98] sm:$0xff] }
  0xb4   : > { %508 = vst [vmem:[%s7309_s8 + $0x4e0] sm:$0xff] %v507_v28  ;;  %v635_v28 = vld [vmem:[%s7304_s7 + $0xdc0] sm:$0xff] }
  0xb5   : > { %510 = vst [vmem:[%s7309_s8 + $0x4e8] sm:$0xff] %v509_v29  ;;  %v637_v29 = vld [vmem:[%s7304_s7 + $0xdc8] sm:$0xff] }
  0xb6   : > { %512 = vst [vmem:[%s7309_s8 + $0x4f0] sm:$0xff] %v511_v30  ;;  %v639_v30 = vld [vmem:[%s7304_s7 + $0xdd0] sm:$0xff] }
  0xb7   : > { %514 = vst [vmem:[%s7309_s8 + $0x4f8] sm:$0xff] %v513_v31  ;;  %v641_v31 = vld [vmem:[%s7304_s7 + $0xdd8] sm:$0xff] }
  0xb8   : > { %516 = vst [vmem:[%s7309_s8 + $0x500] sm:$0xff] %v515_v32  ;;  %v643_v32 = vld [vmem:[%s7304_s7 + $0xe00] sm:$0xff] }
  0xb9   : > { %518 = vst [vmem:[%s7309_s8 + $0x508] sm:$0xff] %v517_v33  ;;  %v645_v33 = vld [vmem:[%s7304_s7 + $0xe08] sm:$0xff] }
  0xba   : > { %520 = vst [vmem:[%s7309_s8 + $0x510] sm:$0xff] %v519_v34  ;;  %v647_v34 = vld [vmem:[%s7304_s7 + $0xe10] sm:$0xff] }
  0xbb   : > { %522 = vst [vmem:[%s7309_s8 + $0x518] sm:$0xff] %v521_v35  ;;  %v649_v35 = vld [vmem:[%s7304_s7 + $0xe18] sm:$0xff] }
  0xbc   : > { %524 = vst [vmem:[%s7309_s8 + $0x520] sm:$0xff] %v523_v36  ;;  %v651_v36 = vld [vmem:[%s7304_s7 + $0xe40] sm:$0xff] }
  0xbd   : > { %526 = vst [vmem:[%s7309_s8 + $0x528] sm:$0xff] %v525_v37  ;;  %v653_v37 = vld [vmem:[%s7304_s7 + $0xe48] sm:$0xff] }
  0xbe   : > { %528 = vst [vmem:[%s7309_s8 + $0x530] sm:$0xff] %v527_v38  ;;  %v655_v38 = vld [vmem:[%s7304_s7 + $0xe50] sm:$0xff] }
  0xbf   : > { %530 = vst [vmem:[%s7309_s8 + $0x538] sm:$0xff] %v529_v39  ;;  %v657_v39 = vld [vmem:[%s7304_s7 + $0xe58] sm:$0xff] }
  0xc0   : > { %532 = vst [vmem:[%s7309_s8 + $0x540] sm:$0xff] %v531_v40  ;;  %v659_v40 = vld [vmem:[%s7304_s7 + $0xe80] sm:$0xff] }
  0xc1   : > { %534 = vst [vmem:[%s7309_s8 + $0x548] sm:$0xff] %v533_v41  ;;  %v661_v41 = vld [vmem:[%s7304_s7 + $0xe88] sm:$0xff] }
  0xc2   : > { %536 = vst [vmem:[%s7309_s8 + $0x550] sm:$0xff] %v535_v42  ;;  %v663_v42 = vld [vmem:[%s7304_s7 + $0xe90] sm:$0xff] }
  0xc3   : > { %538 = vst [vmem:[%s7309_s8 + $0x558] sm:$0xff] %v537_v43  ;;  %v665_v43 = vld [vmem:[%s7304_s7 + $0xe98] sm:$0xff] }
  0xc4   : > { %540 = vst [vmem:[%s7309_s8 + $0x560] sm:$0xff] %v539_v44  ;;  %v667_v44 = vld [vmem:[%s7304_s7 + $0xec0] sm:$0xff] }
  0xc5   : > { %542 = vst [vmem:[%s7309_s8 + $0x568] sm:$0xff] %v541_v45  ;;  %v669_v45 = vld [vmem:[%s7304_s7 + $0xec8] sm:$0xff] }
  0xc6   : > { %544 = vst [vmem:[%s7309_s8 + $0x570] sm:$0xff] %v543_v46  ;;  %v671_v46 = vld [vmem:[%s7304_s7 + $0xed0] sm:$0xff] }
  0xc7   : > { %546 = vst [vmem:[%s7309_s8 + $0x578] sm:$0xff] %v545_v47  ;;  %v673_v47 = vld [vmem:[%s7304_s7 + $0xed8] sm:$0xff] }
  0xc8   : > { %548 = vst [vmem:[%s7309_s8 + $0x580] sm:$0xff] %v547_v48  ;;  %v675_v48 = vld [vmem:[%s7304_s7 + $0xf00] sm:$0xff] }
  0xc9   : > { %550 = vst [vmem:[%s7309_s8 + $0x588] sm:$0xff] %v549_v49  ;;  %v677_v49 = vld [vmem:[%s7304_s7 + $0xf08] sm:$0xff] }
  0xca   : > { %552 = vst [vmem:[%s7309_s8 + $0x590] sm:$0xff] %v551_v50  ;;  %v679_v50 = vld [vmem:[%s7304_s7 + $0xf10] sm:$0xff] }
  0xcb   : > { %554 = vst [vmem:[%s7309_s8 + $0x598] sm:$0xff] %v553_v51  ;;  %v681_v51 = vld [vmem:[%s7304_s7 + $0xf18] sm:$0xff] }
  0xcc   : > { %556 = vst [vmem:[%s7309_s8 + $0x5a0] sm:$0xff] %v555_v52  ;;  %v683_v52 = vld [vmem:[%s7304_s7 + $0xf40] sm:$0xff] }
  0xcd   : > { %558 = vst [vmem:[%s7309_s8 + $0x5a8] sm:$0xff] %v557_v53  ;;  %v685_v53 = vld [vmem:[%s7304_s7 + $0xf48] sm:$0xff] }
  0xce   : > { %560 = vst [vmem:[%s7309_s8 + $0x5b0] sm:$0xff] %v559_v54  ;;  %v687_v54 = vld [vmem:[%s7304_s7 + $0xf50] sm:$0xff] }
  0xcf   : > { %562 = vst [vmem:[%s7309_s8 + $0x5b8] sm:$0xff] %v561_v55  ;;  %v689_v55 = vld [vmem:[%s7304_s7 + $0xf58] sm:$0xff] }
  0xd0   : > { %564 = vst [vmem:[%s7309_s8 + $0x5c0] sm:$0xff] %v563_v56  ;;  %v691_v56 = vld [vmem:[%s7304_s7 + $0xf80] sm:$0xff] }
  0xd1   : > { %566 = vst [vmem:[%s7309_s8 + $0x5c8] sm:$0xff] %v565_v57  ;;  %v693_v57 = vld [vmem:[%s7304_s7 + $0xf88] sm:$0xff] }
  0xd2   : > { %568 = vst [vmem:[%s7309_s8 + $0x5d0] sm:$0xff] %v567_v58  ;;  %v695_v58 = vld [vmem:[%s7304_s7 + $0xf90] sm:$0xff] }
  0xd3   : > { %570 = vst [vmem:[%s7309_s8 + $0x5d8] sm:$0xff] %v569_v59  ;;  %v697_v59 = vld [vmem:[%s7304_s7 + $0xf98] sm:$0xff] }
  0xd4   : > { %572 = vst [vmem:[%s7309_s8 + $0x5e0] sm:$0xff] %v571_v60  ;;  %v699_v60 = vld [vmem:[%s7304_s7 + $0xfc0] sm:$0xff] }
  0xd5   : > { %574 = vst [vmem:[%s7309_s8 + $0x5e8] sm:$0xff] %v573_v61  ;;  %v701_v61 = vld [vmem:[%s7304_s7 + $0xfc8] sm:$0xff] }
  0xd6   : > { %576 = vst [vmem:[%s7309_s8 + $0x5f0] sm:$0xff] %v575_v62  ;;  %v703_v62 = vld [vmem:[%s7304_s7 + $0xfd0] sm:$0xff] }
  0xd7   : > { %578 = vst [vmem:[%s7309_s8 + $0x5f8] sm:$0xff] %v577_v63  ;;  %v705_v63 = vld [vmem:[%s7304_s7 + $0xfd8] sm:$0xff] }
  0xd8   : > { %580 = vst [vmem:[%s7309_s8 + $0x600] sm:$0xff] %v579_v0  ;;  %v707_v0 = vld [vmem:[%s7304_s7 + $0x1000] sm:$0xff] }
  0xd9   : > { %582 = vst [vmem:[%s7309_s8 + $0x608] sm:$0xff] %v581_v1  ;;  %v709_v1 = vld [vmem:[%s7304_s7 + $0x1008] sm:$0xff] }
  0xda   : > { %584 = vst [vmem:[%s7309_s8 + $0x610] sm:$0xff] %v583_v2  ;;  %v711_v2 = vld [vmem:[%s7304_s7 + $0x1010] sm:$0xff] }
  0xdb   : > { %586 = vst [vmem:[%s7309_s8 + $0x618] sm:$0xff] %v585_v3  ;;  %v713_v3 = vld [vmem:[%s7304_s7 + $0x1018] sm:$0xff] }
  0xdc   : > { %588 = vst [vmem:[%s7309_s8 + $0x620] sm:$0xff] %v587_v4  ;;  %v715_v4 = vld [vmem:[%s7304_s7 + $0x1040] sm:$0xff] }
  0xdd   : > { %590 = vst [vmem:[%s7309_s8 + $0x628] sm:$0xff] %v589_v5  ;;  %v717_v5 = vld [vmem:[%s7304_s7 + $0x1048] sm:$0xff] }
  0xde   : > { %592 = vst [vmem:[%s7309_s8 + $0x630] sm:$0xff] %v591_v6  ;;  %v719_v6 = vld [vmem:[%s7304_s7 + $0x1050] sm:$0xff] }
  0xdf   : > { %594 = vst [vmem:[%s7309_s8 + $0x638] sm:$0xff] %v593_v7  ;;  %v721_v7 = vld [vmem:[%s7304_s7 + $0x1058] sm:$0xff] }
  0xe0   : > { %596 = vst [vmem:[%s7309_s8 + $0x640] sm:$0xff] %v595_v8  ;;  %v723_v8 = vld [vmem:[%s7304_s7 + $0x1080] sm:$0xff] }
  0xe1   : > { %598 = vst [vmem:[%s7309_s8 + $0x648] sm:$0xff] %v597_v9  ;;  %v725_v9 = vld [vmem:[%s7304_s7 + $0x1088] sm:$0xff] }
  0xe2   : > { %600 = vst [vmem:[%s7309_s8 + $0x650] sm:$0xff] %v599_v10  ;;  %v727_v10 = vld [vmem:[%s7304_s7 + $0x1090] sm:$0xff] }
  0xe3   : > { %602 = vst [vmem:[%s7309_s8 + $0x658] sm:$0xff] %v601_v11  ;;  %v729_v11 = vld [vmem:[%s7304_s7 + $0x1098] sm:$0xff] }
  0xe4   : > { %604 = vst [vmem:[%s7309_s8 + $0x660] sm:$0xff] %v603_v12  ;;  %v731_v12 = vld [vmem:[%s7304_s7 + $0x10c0] sm:$0xff] }
  0xe5   : > { %606 = vst [vmem:[%s7309_s8 + $0x668] sm:$0xff] %v605_v13  ;;  %v733_v13 = vld [vmem:[%s7304_s7 + $0x10c8] sm:$0xff] }
  0xe6   : > { %608 = vst [vmem:[%s7309_s8 + $0x670] sm:$0xff] %v607_v14  ;;  %v735_v14 = vld [vmem:[%s7304_s7 + $0x10d0] sm:$0xff] }
  0xe7   : > { %610 = vst [vmem:[%s7309_s8 + $0x678] sm:$0xff] %v609_v15  ;;  %v737_v15 = vld [vmem:[%s7304_s7 + $0x10d8] sm:$0xff] }
  0xe8   : > { %612 = vst [vmem:[%s7309_s8 + $0x680] sm:$0xff] %v611_v16  ;;  %v739_v16 = vld [vmem:[%s7304_s7 + $0x1100] sm:$0xff] }
  0xe9   : > { %614 = vst [vmem:[%s7309_s8 + $0x688] sm:$0xff] %v613_v17  ;;  %v741_v17 = vld [vmem:[%s7304_s7 + $0x1108] sm:$0xff] }
  0xea   : > { %616 = vst [vmem:[%s7309_s8 + $0x690] sm:$0xff] %v615_v18  ;;  %v743_v18 = vld [vmem:[%s7304_s7 + $0x1110] sm:$0xff] }
  0xeb   : > { %618 = vst [vmem:[%s7309_s8 + $0x698] sm:$0xff] %v617_v19  ;;  %v745_v19 = vld [vmem:[%s7304_s7 + $0x1118] sm:$0xff] }
  0xec   : > { %620 = vst [vmem:[%s7309_s8 + $0x6a0] sm:$0xff] %v619_v20  ;;  %v747_v20 = vld [vmem:[%s7304_s7 + $0x1140] sm:$0xff] }
  0xed   : > { %622 = vst [vmem:[%s7309_s8 + $0x6a8] sm:$0xff] %v621_v21  ;;  %v749_v21 = vld [vmem:[%s7304_s7 + $0x1148] sm:$0xff] }
  0xee   : > { %624 = vst [vmem:[%s7309_s8 + $0x6b0] sm:$0xff] %v623_v22  ;;  %v751_v22 = vld [vmem:[%s7304_s7 + $0x1150] sm:$0xff] }
  0xef   : > { %626 = vst [vmem:[%s7309_s8 + $0x6b8] sm:$0xff] %v625_v23  ;;  %v753_v23 = vld [vmem:[%s7304_s7 + $0x1158] sm:$0xff] }
  0xf0   : > { %628 = vst [vmem:[%s7309_s8 + $0x6c0] sm:$0xff] %v627_v24  ;;  %v755_v24 = vld [vmem:[%s7304_s7 + $0x1180] sm:$0xff] }
  0xf1   : > { %630 = vst [vmem:[%s7309_s8 + $0x6c8] sm:$0xff] %v629_v25  ;;  %v757_v25 = vld [vmem:[%s7304_s7 + $0x1188] sm:$0xff] }
  0xf2   : > { %632 = vst [vmem:[%s7309_s8 + $0x6d0] sm:$0xff] %v631_v26  ;;  %v759_v26 = vld [vmem:[%s7304_s7 + $0x1190] sm:$0xff] }
  0xf3   : > { %634 = vst [vmem:[%s7309_s8 + $0x6d8] sm:$0xff] %v633_v27  ;;  %v761_v27 = vld [vmem:[%s7304_s7 + $0x1198] sm:$0xff] }
  0xf4   : > { %636 = vst [vmem:[%s7309_s8 + $0x6e0] sm:$0xff] %v635_v28  ;;  %v763_v28 = vld [vmem:[%s7304_s7 + $0x11c0] sm:$0xff] }
  0xf5   : > { %638 = vst [vmem:[%s7309_s8 + $0x6e8] sm:$0xff] %v637_v29  ;;  %v765_v29 = vld [vmem:[%s7304_s7 + $0x11c8] sm:$0xff] }
  0xf6   : > { %640 = vst [vmem:[%s7309_s8 + $0x6f0] sm:$0xff] %v639_v30  ;;  %v767_v30 = vld [vmem:[%s7304_s7 + $0x11d0] sm:$0xff] }
  0xf7   : > { %642 = vst [vmem:[%s7309_s8 + $0x6f8] sm:$0xff] %v641_v31  ;;  %v769_v31 = vld [vmem:[%s7304_s7 + $0x11d8] sm:$0xff] }
  0xf8   : > { %644 = vst [vmem:[%s7309_s8 + $0x700] sm:$0xff] %v643_v32  ;;  %v771_v32 = vld [vmem:[%s7304_s7 + $0x1200] sm:$0xff] }
  0xf9   : > { %646 = vst [vmem:[%s7309_s8 + $0x708] sm:$0xff] %v645_v33  ;;  %v773_v33 = vld [vmem:[%s7304_s7 + $0x1208] sm:$0xff] }
  0xfa   : > { %648 = vst [vmem:[%s7309_s8 + $0x710] sm:$0xff] %v647_v34  ;;  %v775_v34 = vld [vmem:[%s7304_s7 + $0x1210] sm:$0xff] }
  0xfb   : > { %650 = vst [vmem:[%s7309_s8 + $0x718] sm:$0xff] %v649_v35  ;;  %v777_v35 = vld [vmem:[%s7304_s7 + $0x1218] sm:$0xff] }
  0xfc   : > { %652 = vst [vmem:[%s7309_s8 + $0x720] sm:$0xff] %v651_v36  ;;  %v779_v36 = vld [vmem:[%s7304_s7 + $0x1240] sm:$0xff] }
  0xfd   : > { %654 = vst [vmem:[%s7309_s8 + $0x728] sm:$0xff] %v653_v37  ;;  %v781_v37 = vld [vmem:[%s7304_s7 + $0x1248] sm:$0xff] }
  0xfe   : > { %656 = vst [vmem:[%s7309_s8 + $0x730] sm:$0xff] %v655_v38  ;;  %v783_v38 = vld [vmem:[%s7304_s7 + $0x1250] sm:$0xff] }
  0xff   : > { %658 = vst [vmem:[%s7309_s8 + $0x738] sm:$0xff] %v657_v39  ;;  %v785_v39 = vld [vmem:[%s7304_s7 + $0x1258] sm:$0xff] }
 0x100   : > { %660 = vst [vmem:[%s7309_s8 + $0x740] sm:$0xff] %v659_v40  ;;  %v787_v40 = vld [vmem:[%s7304_s7 + $0x1280] sm:$0xff] }
 0x101   : > { %662 = vst [vmem:[%s7309_s8 + $0x748] sm:$0xff] %v661_v41  ;;  %v789_v41 = vld [vmem:[%s7304_s7 + $0x1288] sm:$0xff] }
 0x102   : > { %664 = vst [vmem:[%s7309_s8 + $0x750] sm:$0xff] %v663_v42  ;;  %v791_v42 = vld [vmem:[%s7304_s7 + $0x1290] sm:$0xff] }
 0x103   : > { %666 = vst [vmem:[%s7309_s8 + $0x758] sm:$0xff] %v665_v43  ;;  %v793_v43 = vld [vmem:[%s7304_s7 + $0x1298] sm:$0xff] }
 0x104   : > { %668 = vst [vmem:[%s7309_s8 + $0x760] sm:$0xff] %v667_v44  ;;  %v795_v44 = vld [vmem:[%s7304_s7 + $0x12c0] sm:$0xff] }
 0x105   : > { %670 = vst [vmem:[%s7309_s8 + $0x768] sm:$0xff] %v669_v45  ;;  %v797_v45 = vld [vmem:[%s7304_s7 + $0x12c8] sm:$0xff] }
 0x106   : > { %672 = vst [vmem:[%s7309_s8 + $0x770] sm:$0xff] %v671_v46  ;;  %v799_v46 = vld [vmem:[%s7304_s7 + $0x12d0] sm:$0xff] }
 0x107   : > { %674 = vst [vmem:[%s7309_s8 + $0x778] sm:$0xff] %v673_v47  ;;  %v801_v47 = vld [vmem:[%s7304_s7 + $0x12d8] sm:$0xff] }
 0x108   : > { %676 = vst [vmem:[%s7309_s8 + $0x780] sm:$0xff] %v675_v48  ;;  %v803_v48 = vld [vmem:[%s7304_s7 + $0x1300] sm:$0xff] }
 0x109   : > { %678 = vst [vmem:[%s7309_s8 + $0x788] sm:$0xff] %v677_v49  ;;  %v805_v49 = vld [vmem:[%s7304_s7 + $0x1308] sm:$0xff] }
 0x10a   : > { %680 = vst [vmem:[%s7309_s8 + $0x790] sm:$0xff] %v679_v50  ;;  %v807_v50 = vld [vmem:[%s7304_s7 + $0x1310] sm:$0xff] }
 0x10b   : > { %682 = vst [vmem:[%s7309_s8 + $0x798] sm:$0xff] %v681_v51  ;;  %v809_v51 = vld [vmem:[%s7304_s7 + $0x1318] sm:$0xff] }
 0x10c   : > { %684 = vst [vmem:[%s7309_s8 + $0x7a0] sm:$0xff] %v683_v52  ;;  %v811_v52 = vld [vmem:[%s7304_s7 + $0x1340] sm:$0xff] }
 0x10d   : > { %686 = vst [vmem:[%s7309_s8 + $0x7a8] sm:$0xff] %v685_v53  ;;  %v813_v53 = vld [vmem:[%s7304_s7 + $0x1348] sm:$0xff] }
 0x10e   : > { %688 = vst [vmem:[%s7309_s8 + $0x7b0] sm:$0xff] %v687_v54  ;;  %v815_v54 = vld [vmem:[%s7304_s7 + $0x1350] sm:$0xff] }
 0x10f   : > { %690 = vst [vmem:[%s7309_s8 + $0x7b8] sm:$0xff] %v689_v55  ;;  %v817_v55 = vld [vmem:[%s7304_s7 + $0x1358] sm:$0xff] }
 0x110   : > { %692 = vst [vmem:[%s7309_s8 + $0x7c0] sm:$0xff] %v691_v56  ;;  %v819_v56 = vld [vmem:[%s7304_s7 + $0x1380] sm:$0xff] }
 0x111   : > { %694 = vst [vmem:[%s7309_s8 + $0x7c8] sm:$0xff] %v693_v57  ;;  %v821_v57 = vld [vmem:[%s7304_s7 + $0x1388] sm:$0xff] }
 0x112   : > { %696 = vst [vmem:[%s7309_s8 + $0x7d0] sm:$0xff] %v695_v58  ;;  %v823_v58 = vld [vmem:[%s7304_s7 + $0x1390] sm:$0xff] }
 0x113   : > { %698 = vst [vmem:[%s7309_s8 + $0x7d8] sm:$0xff] %v697_v59  ;;  %v825_v59 = vld [vmem:[%s7304_s7 + $0x1398] sm:$0xff] }
 0x114   : > { %700 = vst [vmem:[%s7309_s8 + $0x7e0] sm:$0xff] %v699_v60  ;;  %v827_v60 = vld [vmem:[%s7304_s7 + $0x13c0] sm:$0xff] }
 0x115   : > { %702 = vst [vmem:[%s7309_s8 + $0x7e8] sm:$0xff] %v701_v61  ;;  %v829_v61 = vld [vmem:[%s7304_s7 + $0x13c8] sm:$0xff] }
 0x116   : > { %704 = vst [vmem:[%s7309_s8 + $0x7f0] sm:$0xff] %v703_v62  ;;  %v831_v62 = vld [vmem:[%s7304_s7 + $0x13d0] sm:$0xff] }
 0x117   : > { %706 = vst [vmem:[%s7309_s8 + $0x7f8] sm:$0xff] %v705_v63  ;;  %v833_v63 = vld [vmem:[%s7304_s7 + $0x13d8] sm:$0xff] }
 0x118   : > { %708 = vst [vmem:[%s7309_s8 + $0x800] sm:$0xff] %v707_v0  ;;  %v835_v0 = vld [vmem:[%s7304_s7 + $0x1400] sm:$0xff] }
 0x119   : > { %710 = vst [vmem:[%s7309_s8 + $0x808] sm:$0xff] %v709_v1  ;;  %v837_v1 = vld [vmem:[%s7304_s7 + $0x1408] sm:$0xff] }
 0x11a   : > { %712 = vst [vmem:[%s7309_s8 + $0x810] sm:$0xff] %v711_v2  ;;  %v839_v2 = vld [vmem:[%s7304_s7 + $0x1410] sm:$0xff] }
 0x11b   : > { %714 = vst [vmem:[%s7309_s8 + $0x818] sm:$0xff] %v713_v3  ;;  %v841_v3 = vld [vmem:[%s7304_s7 + $0x1418] sm:$0xff] }
 0x11c   : > { %716 = vst [vmem:[%s7309_s8 + $0x820] sm:$0xff] %v715_v4  ;;  %v843_v4 = vld [vmem:[%s7304_s7 + $0x1440] sm:$0xff] }
 0x11d   : > { %718 = vst [vmem:[%s7309_s8 + $0x828] sm:$0xff] %v717_v5  ;;  %v845_v5 = vld [vmem:[%s7304_s7 + $0x1448] sm:$0xff] }
 0x11e   : > { %720 = vst [vmem:[%s7309_s8 + $0x830] sm:$0xff] %v719_v6  ;;  %v847_v6 = vld [vmem:[%s7304_s7 + $0x1450] sm:$0xff] }
 0x11f   : > { %722 = vst [vmem:[%s7309_s8 + $0x838] sm:$0xff] %v721_v7  ;;  %v849_v7 = vld [vmem:[%s7304_s7 + $0x1458] sm:$0xff] }
 0x120   : > { %724 = vst [vmem:[%s7309_s8 + $0x840] sm:$0xff] %v723_v8  ;;  %v851_v8 = vld [vmem:[%s7304_s7 + $0x1480] sm:$0xff] }
 0x121   : > { %726 = vst [vmem:[%s7309_s8 + $0x848] sm:$0xff] %v725_v9  ;;  %v853_v9 = vld [vmem:[%s7304_s7 + $0x1488] sm:$0xff] }
 0x122   : > { %728 = vst [vmem:[%s7309_s8 + $0x850] sm:$0xff] %v727_v10  ;;  %v855_v10 = vld [vmem:[%s7304_s7 + $0x1490] sm:$0xff] }
 0x123   : > { %730 = vst [vmem:[%s7309_s8 + $0x858] sm:$0xff] %v729_v11  ;;  %v857_v11 = vld [vmem:[%s7304_s7 + $0x1498] sm:$0xff] }
 0x124   : > { %732 = vst [vmem:[%s7309_s8 + $0x860] sm:$0xff] %v731_v12  ;;  %v859_v12 = vld [vmem:[%s7304_s7 + $0x14c0] sm:$0xff] }
 0x125   : > { %734 = vst [vmem:[%s7309_s8 + $0x868] sm:$0xff] %v733_v13  ;;  %v861_v13 = vld [vmem:[%s7304_s7 + $0x14c8] sm:$0xff] }
 0x126   : > { %736 = vst [vmem:[%s7309_s8 + $0x870] sm:$0xff] %v735_v14  ;;  %v863_v14 = vld [vmem:[%s7304_s7 + $0x14d0] sm:$0xff] }
 0x127   : > { %738 = vst [vmem:[%s7309_s8 + $0x878] sm:$0xff] %v737_v15  ;;  %v865_v15 = vld [vmem:[%s7304_s7 + $0x14d8] sm:$0xff] }
 0x128   : > { %740 = vst [vmem:[%s7309_s8 + $0x880] sm:$0xff] %v739_v16  ;;  %v867_v16 = vld [vmem:[%s7304_s7 + $0x1500] sm:$0xff] }
 0x129   : > { %742 = vst [vmem:[%s7309_s8 + $0x888] sm:$0xff] %v741_v17  ;;  %v869_v17 = vld [vmem:[%s7304_s7 + $0x1508] sm:$0xff] }
 0x12a   : > { %744 = vst [vmem:[%s7309_s8 + $0x890] sm:$0xff] %v743_v18  ;;  %v871_v18 = vld [vmem:[%s7304_s7 + $0x1510] sm:$0xff] }
 0x12b   : > { %746 = vst [vmem:[%s7309_s8 + $0x898] sm:$0xff] %v745_v19  ;;  %v873_v19 = vld [vmem:[%s7304_s7 + $0x1518] sm:$0xff] }
 0x12c   : > { %748 = vst [vmem:[%s7309_s8 + $0x8a0] sm:$0xff] %v747_v20  ;;  %v875_v20 = vld [vmem:[%s7304_s7 + $0x1540] sm:$0xff] }
 0x12d   : > { %750 = vst [vmem:[%s7309_s8 + $0x8a8] sm:$0xff] %v749_v21  ;;  %v877_v21 = vld [vmem:[%s7304_s7 + $0x1548] sm:$0xff] }
 0x12e   : > { %752 = vst [vmem:[%s7309_s8 + $0x8b0] sm:$0xff] %v751_v22  ;;  %v879_v22 = vld [vmem:[%s7304_s7 + $0x1550] sm:$0xff] }
 0x12f   : > { %754 = vst [vmem:[%s7309_s8 + $0x8b8] sm:$0xff] %v753_v23  ;;  %v881_v23 = vld [vmem:[%s7304_s7 + $0x1558] sm:$0xff] }
 0x130   : > { %756 = vst [vmem:[%s7309_s8 + $0x8c0] sm:$0xff] %v755_v24  ;;  %v883_v24 = vld [vmem:[%s7304_s7 + $0x1580] sm:$0xff] }
 0x131   : > { %758 = vst [vmem:[%s7309_s8 + $0x8c8] sm:$0xff] %v757_v25  ;;  %v885_v25 = vld [vmem:[%s7304_s7 + $0x1588] sm:$0xff] }
 0x132   : > { %760 = vst [vmem:[%s7309_s8 + $0x8d0] sm:$0xff] %v759_v26  ;;  %v887_v26 = vld [vmem:[%s7304_s7 + $0x1590] sm:$0xff] }
 0x133   : > { %762 = vst [vmem:[%s7309_s8 + $0x8d8] sm:$0xff] %v761_v27  ;;  %v889_v27 = vld [vmem:[%s7304_s7 + $0x1598] sm:$0xff] }
 0x134   : > { %764 = vst [vmem:[%s7309_s8 + $0x8e0] sm:$0xff] %v763_v28  ;;  %v891_v28 = vld [vmem:[%s7304_s7 + $0x15c0] sm:$0xff] }
 0x135   : > { %766 = vst [vmem:[%s7309_s8 + $0x8e8] sm:$0xff] %v765_v29  ;;  %v893_v29 = vld [vmem:[%s7304_s7 + $0x15c8] sm:$0xff] }
 0x136   : > { %768 = vst [vmem:[%s7309_s8 + $0x8f0] sm:$0xff] %v767_v30  ;;  %v895_v30 = vld [vmem:[%s7304_s7 + $0x15d0] sm:$0xff] }
 0x137   : > { %770 = vst [vmem:[%s7309_s8 + $0x8f8] sm:$0xff] %v769_v31  ;;  %v897_v31 = vld [vmem:[%s7304_s7 + $0x15d8] sm:$0xff] }
 0x138   : > { %772 = vst [vmem:[%s7309_s8 + $0x900] sm:$0xff] %v771_v32  ;;  %v899_v32 = vld [vmem:[%s7304_s7 + $0x1600] sm:$0xff] }
 0x139   : > { %774 = vst [vmem:[%s7309_s8 + $0x908] sm:$0xff] %v773_v33  ;;  %v901_v33 = vld [vmem:[%s7304_s7 + $0x1608] sm:$0xff] }
 0x13a   : > { %776 = vst [vmem:[%s7309_s8 + $0x910] sm:$0xff] %v775_v34  ;;  %v903_v34 = vld [vmem:[%s7304_s7 + $0x1610] sm:$0xff] }
 0x13b   : > { %778 = vst [vmem:[%s7309_s8 + $0x918] sm:$0xff] %v777_v35  ;;  %v905_v35 = vld [vmem:[%s7304_s7 + $0x1618] sm:$0xff] }
 0x13c   : > { %780 = vst [vmem:[%s7309_s8 + $0x920] sm:$0xff] %v779_v36  ;;  %v907_v36 = vld [vmem:[%s7304_s7 + $0x1640] sm:$0xff] }
 0x13d   : > { %782 = vst [vmem:[%s7309_s8 + $0x928] sm:$0xff] %v781_v37  ;;  %v909_v37 = vld [vmem:[%s7304_s7 + $0x1648] sm:$0xff] }
 0x13e   : > { %784 = vst [vmem:[%s7309_s8 + $0x930] sm:$0xff] %v783_v38  ;;  %v911_v38 = vld [vmem:[%s7304_s7 + $0x1650] sm:$0xff] }
 0x13f   : > { %786 = vst [vmem:[%s7309_s8 + $0x938] sm:$0xff] %v785_v39  ;;  %v913_v39 = vld [vmem:[%s7304_s7 + $0x1658] sm:$0xff] }
 0x140   : > { %788 = vst [vmem:[%s7309_s8 + $0x940] sm:$0xff] %v787_v40  ;;  %v915_v40 = vld [vmem:[%s7304_s7 + $0x1680] sm:$0xff] }
 0x141   : > { %790 = vst [vmem:[%s7309_s8 + $0x948] sm:$0xff] %v789_v41  ;;  %v917_v41 = vld [vmem:[%s7304_s7 + $0x1688] sm:$0xff] }
 0x142   : > { %792 = vst [vmem:[%s7309_s8 + $0x950] sm:$0xff] %v791_v42  ;;  %v919_v42 = vld [vmem:[%s7304_s7 + $0x1690] sm:$0xff] }
 0x143   : > { %794 = vst [vmem:[%s7309_s8 + $0x958] sm:$0xff] %v793_v43  ;;  %v921_v43 = vld [vmem:[%s7304_s7 + $0x1698] sm:$0xff] }
 0x144   : > { %796 = vst [vmem:[%s7309_s8 + $0x960] sm:$0xff] %v795_v44  ;;  %v923_v44 = vld [vmem:[%s7304_s7 + $0x16c0] sm:$0xff] }
 0x145   : > { %798 = vst [vmem:[%s7309_s8 + $0x968] sm:$0xff] %v797_v45  ;;  %v925_v45 = vld [vmem:[%s7304_s7 + $0x16c8] sm:$0xff] }
 0x146   : > { %800 = vst [vmem:[%s7309_s8 + $0x970] sm:$0xff] %v799_v46  ;;  %v927_v46 = vld [vmem:[%s7304_s7 + $0x16d0] sm:$0xff] }
 0x147   : > { %802 = vst [vmem:[%s7309_s8 + $0x978] sm:$0xff] %v801_v47  ;;  %v929_v47 = vld [vmem:[%s7304_s7 + $0x16d8] sm:$0xff] }
 0x148   : > { %804 = vst [vmem:[%s7309_s8 + $0x980] sm:$0xff] %v803_v48  ;;  %v931_v48 = vld [vmem:[%s7304_s7 + $0x1700] sm:$0xff] }
 0x149   : > { %806 = vst [vmem:[%s7309_s8 + $0x988] sm:$0xff] %v805_v49  ;;  %v933_v49 = vld [vmem:[%s7304_s7 + $0x1708] sm:$0xff] }
 0x14a   : > { %808 = vst [vmem:[%s7309_s8 + $0x990] sm:$0xff] %v807_v50  ;;  %v935_v50 = vld [vmem:[%s7304_s7 + $0x1710] sm:$0xff] }
 0x14b   : > { %810 = vst [vmem:[%s7309_s8 + $0x998] sm:$0xff] %v809_v51  ;;  %v937_v51 = vld [vmem:[%s7304_s7 + $0x1718] sm:$0xff] }
 0x14c   : > { %812 = vst [vmem:[%s7309_s8 + $0x9a0] sm:$0xff] %v811_v52  ;;  %v939_v52 = vld [vmem:[%s7304_s7 + $0x1740] sm:$0xff] }
 0x14d   : > { %814 = vst [vmem:[%s7309_s8 + $0x9a8] sm:$0xff] %v813_v53  ;;  %v941_v53 = vld [vmem:[%s7304_s7 + $0x1748] sm:$0xff] }
 0x14e   : > { %816 = vst [vmem:[%s7309_s8 + $0x9b0] sm:$0xff] %v815_v54  ;;  %v943_v54 = vld [vmem:[%s7304_s7 + $0x1750] sm:$0xff] }
 0x14f   : > { %818 = vst [vmem:[%s7309_s8 + $0x9b8] sm:$0xff] %v817_v55  ;;  %v945_v55 = vld [vmem:[%s7304_s7 + $0x1758] sm:$0xff] }
 0x150   : > { %820 = vst [vmem:[%s7309_s8 + $0x9c0] sm:$0xff] %v819_v56  ;;  %v947_v56 = vld [vmem:[%s7304_s7 + $0x1780] sm:$0xff] }
 0x151   : > { %822 = vst [vmem:[%s7309_s8 + $0x9c8] sm:$0xff] %v821_v57  ;;  %v949_v57 = vld [vmem:[%s7304_s7 + $0x1788] sm:$0xff] }
 0x152   : > { %824 = vst [vmem:[%s7309_s8 + $0x9d0] sm:$0xff] %v823_v58  ;;  %v951_v58 = vld [vmem:[%s7304_s7 + $0x1790] sm:$0xff] }
 0x153   : > { %826 = vst [vmem:[%s7309_s8 + $0x9d8] sm:$0xff] %v825_v59  ;;  %v953_v59 = vld [vmem:[%s7304_s7 + $0x1798] sm:$0xff] }
 0x154   : > { %828 = vst [vmem:[%s7309_s8 + $0x9e0] sm:$0xff] %v827_v60  ;;  %v955_v60 = vld [vmem:[%s7304_s7 + $0x17c0] sm:$0xff] }
 0x155   : > { %830 = vst [vmem:[%s7309_s8 + $0x9e8] sm:$0xff] %v829_v61  ;;  %v957_v61 = vld [vmem:[%s7304_s7 + $0x17c8] sm:$0xff] }
 0x156   : > { %832 = vst [vmem:[%s7309_s8 + $0x9f0] sm:$0xff] %v831_v62  ;;  %v959_v62 = vld [vmem:[%s7304_s7 + $0x17d0] sm:$0xff] }
 0x157   : > { %834 = vst [vmem:[%s7309_s8 + $0x9f8] sm:$0xff] %v833_v63  ;;  %v961_v63 = vld [vmem:[%s7304_s7 + $0x17d8] sm:$0xff] }
 0x158   : > { %836 = vst [vmem:[%s7309_s8 + $0xa00] sm:$0xff] %v835_v0  ;;  %v963_v0 = vld [vmem:[%s7304_s7 + $0x1800] sm:$0xff] }
 0x159   : > { %838 = vst [vmem:[%s7309_s8 + $0xa08] sm:$0xff] %v837_v1  ;;  %v965_v1 = vld [vmem:[%s7304_s7 + $0x1808] sm:$0xff] }
 0x15a   : > { %840 = vst [vmem:[%s7309_s8 + $0xa10] sm:$0xff] %v839_v2  ;;  %v967_v2 = vld [vmem:[%s7304_s7 + $0x1810] sm:$0xff] }
 0x15b   : > { %842 = vst [vmem:[%s7309_s8 + $0xa18] sm:$0xff] %v841_v3  ;;  %v969_v3 = vld [vmem:[%s7304_s7 + $0x1818] sm:$0xff] }
 0x15c   : > { %844 = vst [vmem:[%s7309_s8 + $0xa20] sm:$0xff] %v843_v4  ;;  %v971_v4 = vld [vmem:[%s7304_s7 + $0x1840] sm:$0xff] }
 0x15d   : > { %846 = vst [vmem:[%s7309_s8 + $0xa28] sm:$0xff] %v845_v5  ;;  %v973_v5 = vld [vmem:[%s7304_s7 + $0x1848] sm:$0xff] }
 0x15e   : > { %848 = vst [vmem:[%s7309_s8 + $0xa30] sm:$0xff] %v847_v6  ;;  %v975_v6 = vld [vmem:[%s7304_s7 + $0x1850] sm:$0xff] }
 0x15f   : > { %850 = vst [vmem:[%s7309_s8 + $0xa38] sm:$0xff] %v849_v7  ;;  %v977_v7 = vld [vmem:[%s7304_s7 + $0x1858] sm:$0xff] }
 0x160   : > { %852 = vst [vmem:[%s7309_s8 + $0xa40] sm:$0xff] %v851_v8  ;;  %v979_v8 = vld [vmem:[%s7304_s7 + $0x1880] sm:$0xff] }
 0x161   : > { %854 = vst [vmem:[%s7309_s8 + $0xa48] sm:$0xff] %v853_v9  ;;  %v981_v9 = vld [vmem:[%s7304_s7 + $0x1888] sm:$0xff] }
 0x162   : > { %856 = vst [vmem:[%s7309_s8 + $0xa50] sm:$0xff] %v855_v10  ;;  %v983_v10 = vld [vmem:[%s7304_s7 + $0x1890] sm:$0xff] }
 0x163   : > { %858 = vst [vmem:[%s7309_s8 + $0xa58] sm:$0xff] %v857_v11  ;;  %v985_v11 = vld [vmem:[%s7304_s7 + $0x1898] sm:$0xff] }
 0x164   : > { %860 = vst [vmem:[%s7309_s8 + $0xa60] sm:$0xff] %v859_v12  ;;  %v987_v12 = vld [vmem:[%s7304_s7 + $0x18c0] sm:$0xff] }
 0x165   : > { %862 = vst [vmem:[%s7309_s8 + $0xa68] sm:$0xff] %v861_v13  ;;  %v989_v13 = vld [vmem:[%s7304_s7 + $0x18c8] sm:$0xff] }
 0x166   : > { %864 = vst [vmem:[%s7309_s8 + $0xa70] sm:$0xff] %v863_v14  ;;  %v991_v14 = vld [vmem:[%s7304_s7 + $0x18d0] sm:$0xff] }
 0x167   : > { %866 = vst [vmem:[%s7309_s8 + $0xa78] sm:$0xff] %v865_v15  ;;  %v993_v15 = vld [vmem:[%s7304_s7 + $0x18d8] sm:$0xff] }
 0x168   : > { %868 = vst [vmem:[%s7309_s8 + $0xa80] sm:$0xff] %v867_v16  ;;  %v995_v16 = vld [vmem:[%s7304_s7 + $0x1900] sm:$0xff] }
 0x169   : > { %870 = vst [vmem:[%s7309_s8 + $0xa88] sm:$0xff] %v869_v17  ;;  %v997_v17 = vld [vmem:[%s7304_s7 + $0x1908] sm:$0xff] }
 0x16a   : > { %872 = vst [vmem:[%s7309_s8 + $0xa90] sm:$0xff] %v871_v18  ;;  %v999_v18 = vld [vmem:[%s7304_s7 + $0x1910] sm:$0xff] }
 0x16b   : > { %874 = vst [vmem:[%s7309_s8 + $0xa98] sm:$0xff] %v873_v19  ;;  %v1001_v19 = vld [vmem:[%s7304_s7 + $0x1918] sm:$0xff] }
 0x16c   : > { %876 = vst [vmem:[%s7309_s8 + $0xaa0] sm:$0xff] %v875_v20  ;;  %v1003_v20 = vld [vmem:[%s7304_s7 + $0x1940] sm:$0xff] }
 0x16d   : > { %878 = vst [vmem:[%s7309_s8 + $0xaa8] sm:$0xff] %v877_v21  ;;  %v1005_v21 = vld [vmem:[%s7304_s7 + $0x1948] sm:$0xff] }
 0x16e   : > { %880 = vst [vmem:[%s7309_s8 + $0xab0] sm:$0xff] %v879_v22  ;;  %v1007_v22 = vld [vmem:[%s7304_s7 + $0x1950] sm:$0xff] }
 0x16f   : > { %882 = vst [vmem:[%s7309_s8 + $0xab8] sm:$0xff] %v881_v23  ;;  %v1009_v23 = vld [vmem:[%s7304_s7 + $0x1958] sm:$0xff] }
 0x170   : > { %884 = vst [vmem:[%s7309_s8 + $0xac0] sm:$0xff] %v883_v24  ;;  %v1011_v24 = vld [vmem:[%s7304_s7 + $0x1980] sm:$0xff] }
 0x171   : > { %886 = vst [vmem:[%s7309_s8 + $0xac8] sm:$0xff] %v885_v25  ;;  %v1013_v25 = vld [vmem:[%s7304_s7 + $0x1988] sm:$0xff] }
 0x172   : > { %888 = vst [vmem:[%s7309_s8 + $0xad0] sm:$0xff] %v887_v26  ;;  %v1015_v26 = vld [vmem:[%s7304_s7 + $0x1990] sm:$0xff] }
 0x173   : > { %890 = vst [vmem:[%s7309_s8 + $0xad8] sm:$0xff] %v889_v27  ;;  %v1017_v27 = vld [vmem:[%s7304_s7 + $0x1998] sm:$0xff] }
 0x174   : > { %892 = vst [vmem:[%s7309_s8 + $0xae0] sm:$0xff] %v891_v28  ;;  %v1019_v28 = vld [vmem:[%s7304_s7 + $0x19c0] sm:$0xff] }
 0x175   : > { %894 = vst [vmem:[%s7309_s8 + $0xae8] sm:$0xff] %v893_v29  ;;  %v1021_v29 = vld [vmem:[%s7304_s7 + $0x19c8] sm:$0xff] }
 0x176   : > { %896 = vst [vmem:[%s7309_s8 + $0xaf0] sm:$0xff] %v895_v30  ;;  %v1023_v30 = vld [vmem:[%s7304_s7 + $0x19d0] sm:$0xff] }
 0x177   : > { %898 = vst [vmem:[%s7309_s8 + $0xaf8] sm:$0xff] %v897_v31  ;;  %v1025_v31 = vld [vmem:[%s7304_s7 + $0x19d8] sm:$0xff] }
 0x178   : > { %900 = vst [vmem:[%s7309_s8 + $0xb00] sm:$0xff] %v899_v32  ;;  %v1027_v32 = vld [vmem:[%s7304_s7 + $0x1a00] sm:$0xff] }
 0x179   : > { %902 = vst [vmem:[%s7309_s8 + $0xb08] sm:$0xff] %v901_v33  ;;  %v1029_v33 = vld [vmem:[%s7304_s7 + $0x1a08] sm:$0xff] }
 0x17a   : > { %904 = vst [vmem:[%s7309_s8 + $0xb10] sm:$0xff] %v903_v34  ;;  %v1031_v34 = vld [vmem:[%s7304_s7 + $0x1a10] sm:$0xff] }
 0x17b   : > { %906 = vst [vmem:[%s7309_s8 + $0xb18] sm:$0xff] %v905_v35  ;;  %v1033_v35 = vld [vmem:[%s7304_s7 + $0x1a18] sm:$0xff] }
 0x17c   : > { %908 = vst [vmem:[%s7309_s8 + $0xb20] sm:$0xff] %v907_v36  ;;  %v1035_v36 = vld [vmem:[%s7304_s7 + $0x1a40] sm:$0xff] }
 0x17d   : > { %910 = vst [vmem:[%s7309_s8 + $0xb28] sm:$0xff] %v909_v37  ;;  %v1037_v37 = vld [vmem:[%s7304_s7 + $0x1a48] sm:$0xff] }
 0x17e   : > { %912 = vst [vmem:[%s7309_s8 + $0xb30] sm:$0xff] %v911_v38  ;;  %v1039_v38 = vld [vmem:[%s7304_s7 + $0x1a50] sm:$0xff] }
 0x17f   : > { %914 = vst [vmem:[%s7309_s8 + $0xb38] sm:$0xff] %v913_v39  ;;  %v1041_v39 = vld [vmem:[%s7304_s7 + $0x1a58] sm:$0xff] }
 0x180   : > { %916 = vst [vmem:[%s7309_s8 + $0xb40] sm:$0xff] %v915_v40  ;;  %v1043_v40 = vld [vmem:[%s7304_s7 + $0x1a80] sm:$0xff] }
 0x181   : > { %918 = vst [vmem:[%s7309_s8 + $0xb48] sm:$0xff] %v917_v41  ;;  %v1045_v41 = vld [vmem:[%s7304_s7 + $0x1a88] sm:$0xff] }
 0x182   : > { %920 = vst [vmem:[%s7309_s8 + $0xb50] sm:$0xff] %v919_v42  ;;  %v1047_v42 = vld [vmem:[%s7304_s7 + $0x1a90] sm:$0xff] }
 0x183   : > { %922 = vst [vmem:[%s7309_s8 + $0xb58] sm:$0xff] %v921_v43  ;;  %v1049_v43 = vld [vmem:[%s7304_s7 + $0x1a98] sm:$0xff] }
 0x184   : > { %924 = vst [vmem:[%s7309_s8 + $0xb60] sm:$0xff] %v923_v44  ;;  %v1051_v44 = vld [vmem:[%s7304_s7 + $0x1ac0] sm:$0xff] }
 0x185   : > { %926 = vst [vmem:[%s7309_s8 + $0xb68] sm:$0xff] %v925_v45  ;;  %v1053_v45 = vld [vmem:[%s7304_s7 + $0x1ac8] sm:$0xff] }
 0x186   : > { %928 = vst [vmem:[%s7309_s8 + $0xb70] sm:$0xff] %v927_v46  ;;  %v1055_v46 = vld [vmem:[%s7304_s7 + $0x1ad0] sm:$0xff] }
 0x187   : > { %930 = vst [vmem:[%s7309_s8 + $0xb78] sm:$0xff] %v929_v47  ;;  %v1057_v47 = vld [vmem:[%s7304_s7 + $0x1ad8] sm:$0xff] }
 0x188   : > { %932 = vst [vmem:[%s7309_s8 + $0xb80] sm:$0xff] %v931_v48  ;;  %v1059_v48 = vld [vmem:[%s7304_s7 + $0x1b00] sm:$0xff] }
 0x189   : > { %934 = vst [vmem:[%s7309_s8 + $0xb88] sm:$0xff] %v933_v49  ;;  %v1061_v49 = vld [vmem:[%s7304_s7 + $0x1b08] sm:$0xff] }
 0x18a   : > { %936 = vst [vmem:[%s7309_s8 + $0xb90] sm:$0xff] %v935_v50  ;;  %v1063_v50 = vld [vmem:[%s7304_s7 + $0x1b10] sm:$0xff] }
 0x18b   : > { %938 = vst [vmem:[%s7309_s8 + $0xb98] sm:$0xff] %v937_v51  ;;  %v1065_v51 = vld [vmem:[%s7304_s7 + $0x1b18] sm:$0xff] }
 0x18c   : > { %940 = vst [vmem:[%s7309_s8 + $0xba0] sm:$0xff] %v939_v52  ;;  %v1067_v52 = vld [vmem:[%s7304_s7 + $0x1b40] sm:$0xff] }
 0x18d   : > { %942 = vst [vmem:[%s7309_s8 + $0xba8] sm:$0xff] %v941_v53  ;;  %v1069_v53 = vld [vmem:[%s7304_s7 + $0x1b48] sm:$0xff] }
 0x18e   : > { %944 = vst [vmem:[%s7309_s8 + $0xbb0] sm:$0xff] %v943_v54  ;;  %v1071_v54 = vld [vmem:[%s7304_s7 + $0x1b50] sm:$0xff] }
 0x18f   : > { %946 = vst [vmem:[%s7309_s8 + $0xbb8] sm:$0xff] %v945_v55  ;;  %v1073_v55 = vld [vmem:[%s7304_s7 + $0x1b58] sm:$0xff] }
 0x190   : > { %948 = vst [vmem:[%s7309_s8 + $0xbc0] sm:$0xff] %v947_v56  ;;  %v1075_v56 = vld [vmem:[%s7304_s7 + $0x1b80] sm:$0xff] }
 0x191   : > { %950 = vst [vmem:[%s7309_s8 + $0xbc8] sm:$0xff] %v949_v57  ;;  %v1077_v57 = vld [vmem:[%s7304_s7 + $0x1b88] sm:$0xff] }
 0x192   : > { %952 = vst [vmem:[%s7309_s8 + $0xbd0] sm:$0xff] %v951_v58  ;;  %v1079_v58 = vld [vmem:[%s7304_s7 + $0x1b90] sm:$0xff] }
 0x193   : > { %954 = vst [vmem:[%s7309_s8 + $0xbd8] sm:$0xff] %v953_v59  ;;  %v1081_v59 = vld [vmem:[%s7304_s7 + $0x1b98] sm:$0xff] }
 0x194   : > { %956 = vst [vmem:[%s7309_s8 + $0xbe0] sm:$0xff] %v955_v60  ;;  %v1083_v60 = vld [vmem:[%s7304_s7 + $0x1bc0] sm:$0xff] }
 0x195   : > { %958 = vst [vmem:[%s7309_s8 + $0xbe8] sm:$0xff] %v957_v61  ;;  %v1085_v61 = vld [vmem:[%s7304_s7 + $0x1bc8] sm:$0xff] }
 0x196   : > { %960 = vst [vmem:[%s7309_s8 + $0xbf0] sm:$0xff] %v959_v62  ;;  %v1087_v62 = vld [vmem:[%s7304_s7 + $0x1bd0] sm:$0xff] }
 0x197   : > { %962 = vst [vmem:[%s7309_s8 + $0xbf8] sm:$0xff] %v961_v63  ;;  %v1089_v63 = vld [vmem:[%s7304_s7 + $0x1bd8] sm:$0xff] }
 0x198   : > { %964 = vst [vmem:[%s7309_s8 + $0xc00] sm:$0xff] %v963_v0 }
 0x199   : > { %966 = vst [vmem:[%s7309_s8 + $0xc08] sm:$0xff] %v965_v1 }
 0x19a   : > { %968 = vst [vmem:[%s7309_s8 + $0xc10] sm:$0xff] %v967_v2 }
 0x19b   : > { %970 = vst [vmem:[%s7309_s8 + $0xc18] sm:$0xff] %v969_v3 }
 0x19c   : > { %972 = vst [vmem:[%s7309_s8 + $0xc20] sm:$0xff] %v971_v4 }
 0x19d   : > { %974 = vst [vmem:[%s7309_s8 + $0xc28] sm:$0xff] %v973_v5 }
 0x19e   : > { %976 = vst [vmem:[%s7309_s8 + $0xc30] sm:$0xff] %v975_v6 }
 0x19f   : > { %978 = vst [vmem:[%s7309_s8 + $0xc38] sm:$0xff] %v977_v7 }
 0x1a0   : > { %980 = vst [vmem:[%s7309_s8 + $0xc40] sm:$0xff] %v979_v8 }
 0x1a1   : > { %982 = vst [vmem:[%s7309_s8 + $0xc48] sm:$0xff] %v981_v9 }
 0x1a2   : > { %984 = vst [vmem:[%s7309_s8 + $0xc50] sm:$0xff] %v983_v10 }
 0x1a3   : > { %986 = vst [vmem:[%s7309_s8 + $0xc58] sm:$0xff] %v985_v11 }
 0x1a4   : > { %988 = vst [vmem:[%s7309_s8 + $0xc60] sm:$0xff] %v987_v12 }
 0x1a5   : > { %990 = vst [vmem:[%s7309_s8 + $0xc68] sm:$0xff] %v989_v13 }
 0x1a6   : > { %992 = vst [vmem:[%s7309_s8 + $0xc70] sm:$0xff] %v991_v14 }
 0x1a7   : > { %994 = vst [vmem:[%s7309_s8 + $0xc78] sm:$0xff] %v993_v15 }
 0x1a8   : > { %996 = vst [vmem:[%s7309_s8 + $0xc80] sm:$0xff] %v995_v16 }
 0x1a9   : > { %998 = vst [vmem:[%s7309_s8 + $0xc88] sm:$0xff] %v997_v17 }
 0x1aa   : > { %1000 = vst [vmem:[%s7309_s8 + $0xc90] sm:$0xff] %v999_v18 }
 0x1ab   : > { %1002 = vst [vmem:[%s7309_s8 + $0xc98] sm:$0xff] %v1001_v19 }
 0x1ac   : > { %1004 = vst [vmem:[%s7309_s8 + $0xca0] sm:$0xff] %v1003_v20 }
 0x1ad   : > { %1006 = vst [vmem:[%s7309_s8 + $0xca8] sm:$0xff] %v1005_v21 }
 0x1ae   : > { %1008 = vst [vmem:[%s7309_s8 + $0xcb0] sm:$0xff] %v1007_v22 }
 0x1af   : > { %1010 = vst [vmem:[%s7309_s8 + $0xcb8] sm:$0xff] %v1009_v23 }
 0x1b0   : > { %1012 = vst [vmem:[%s7309_s8 + $0xcc0] sm:$0xff] %v1011_v24 }
 0x1b1   : > { %1014 = vst [vmem:[%s7309_s8 + $0xcc8] sm:$0xff] %v1013_v25 }
 0x1b2   : > { %1016 = vst [vmem:[%s7309_s8 + $0xcd0] sm:$0xff] %v1015_v26 }
 0x1b3   : > { %1018 = vst [vmem:[%s7309_s8 + $0xcd8] sm:$0xff] %v1017_v27 }
 0x1b4   : > { %1020 = vst [vmem:[%s7309_s8 + $0xce0] sm:$0xff] %v1019_v28 }
 0x1b5   : > { %1022 = vst [vmem:[%s7309_s8 + $0xce8] sm:$0xff] %v1021_v29 }
 0x1b6   : > { %1024 = vst [vmem:[%s7309_s8 + $0xcf0] sm:$0xff] %v1023_v30 }
 0x1b7   : > { %1026 = vst [vmem:[%s7309_s8 + $0xcf8] sm:$0xff] %v1025_v31 }
 0x1b8   : > { %1028 = vst [vmem:[%s7309_s8 + $0xd00] sm:$0xff] %v1027_v32 }
 0x1b9   : > { %1030 = vst [vmem:[%s7309_s8 + $0xd08] sm:$0xff] %v1029_v33 }
 0x1ba   : > { %1032 = vst [vmem:[%s7309_s8 + $0xd10] sm:$0xff] %v1031_v34 }
 0x1bb   : > { %1034 = vst [vmem:[%s7309_s8 + $0xd18] sm:$0xff] %v1033_v35 }
 0x1bc   : > { %1036 = vst [vmem:[%s7309_s8 + $0xd20] sm:$0xff] %v1035_v36 }
 0x1bd   : > { %1038 = vst [vmem:[%s7309_s8 + $0xd28] sm:$0xff] %v1037_v37 }
 0x1be   : > { %1040 = vst [vmem:[%s7309_s8 + $0xd30] sm:$0xff] %v1039_v38 }
 0x1bf   : > { %1042 = vst [vmem:[%s7309_s8 + $0xd38] sm:$0xff] %v1041_v39 }
 0x1c0   : > { %1044 = vst [vmem:[%s7309_s8 + $0xd40] sm:$0xff] %v1043_v40 }
 0x1c1   : > { %1046 = vst [vmem:[%s7309_s8 + $0xd48] sm:$0xff] %v1045_v41 }
 0x1c2   : > { %1048 = vst [vmem:[%s7309_s8 + $0xd50] sm:$0xff] %v1047_v42 }
 0x1c3   : > { %1050 = vst [vmem:[%s7309_s8 + $0xd58] sm:$0xff] %v1049_v43 }
 0x1c4   : > { %1052 = vst [vmem:[%s7309_s8 + $0xd60] sm:$0xff] %v1051_v44 }
 0x1c5   : > { %1054 = vst [vmem:[%s7309_s8 + $0xd68] sm:$0xff] %v1053_v45 }
 0x1c6   : > { %1056 = vst [vmem:[%s7309_s8 + $0xd70] sm:$0xff] %v1055_v46 }
 0x1c7   : > { %1058 = vst [vmem:[%s7309_s8 + $0xd78] sm:$0xff] %v1057_v47 }
 0x1c8   : > { %1060 = vst [vmem:[%s7309_s8 + $0xd80] sm:$0xff] %v1059_v48 }
 0x1c9   : > { %1062 = vst [vmem:[%s7309_s8 + $0xd88] sm:$0xff] %v1061_v49 }
 0x1ca   : > { %1064 = vst [vmem:[%s7309_s8 + $0xd90] sm:$0xff] %v1063_v50 }
 0x1cb   : > { %1066 = vst [vmem:[%s7309_s8 + $0xd98] sm:$0xff] %v1065_v51 }
 0x1cc   : > { %1068 = vst [vmem:[%s7309_s8 + $0xda0] sm:$0xff] %v1067_v52 }
 0x1cd   : > { %1070 = vst [vmem:[%s7309_s8 + $0xda8] sm:$0xff] %v1069_v53 }
 0x1ce   : > { %1072 = vst [vmem:[%s7309_s8 + $0xdb0] sm:$0xff] %v1071_v54 }
 0x1cf   : > { %1074 = vst [vmem:[%s7309_s8 + $0xdb8] sm:$0xff] %v1073_v55 }
 0x1d0   : > { %1076 = vst [vmem:[%s7309_s8 + $0xdc0] sm:$0xff] %v1075_v56 }
 0x1d1   : > { %1078 = vst [vmem:[%s7309_s8 + $0xdc8] sm:$0xff] %v1077_v57 }
 0x1d2   : > { %1080 = vst [vmem:[%s7309_s8 + $0xdd0] sm:$0xff] %v1079_v58 }
 0x1d3   : > { %1082 = vst [vmem:[%s7309_s8 + $0xdd8] sm:$0xff] %v1081_v59 }
 0x1d4   : > { %1084 = vst [vmem:[%s7309_s8 + $0xde0] sm:$0xff] %v1083_v60 }
 0x1d5   : > { %1086 = vst [vmem:[%s7309_s8 + $0xde8] sm:$0xff] %v1085_v61 }
 0x1d6   : > { %1088 = vst [vmem:[%s7309_s8 + $0xdf0] sm:$0xff] %v1087_v62 }
 0x1d7   : > { %1090 = vst [vmem:[%s7309_s8 + $0xdf8] sm:$0xff] %v1089_v63 }
 0x1d8 PF: > { %p4858_p7 = scmp.ge.s32.totalorder %s7221_s18, 1  ;;  %p1103_p8 = scmp.lt.s32.totalorder %s7221_s18, 21 }
 0x1da   : > { %p1104_p9 = pnand %p4858_p7, %p1103_p8 }
 0x1db   : > { %s1110_s9 = sand.u32 (!%p1104_p9), 1, %s7197_s12   ;;  %s1150_s10 = smul.u32 (!%p1104_p9), 7, %s7205_s14 }
 0x1dc   : > { %1107 = sbr.rel (%p1104_p9) target bundleno = 1226 (0x4ca), region = 51  ;;  %s4860_s21 = sshll.u32 (!%p1104_p9), %s7209_s15, 3 }
 0x1dd   : > { %s7109_s11 = smul.u32 (!%p1104_p9), 3584, %s1110_s9  ;;  %p1153_p10 = scmp.lt.s32.totalorder (!%p1104_p9), %s1150_s10, 69 }
 0x1de   : > { %p1163_p11 = scmp.lt.s32.totalorder (!%p1104_p9), %s4860_s21, 15  ;;  %p4863_p12 = scmp.ne.s32.totalorder (!%p1104_p9), %s7205_s14, 0 }
 0x1df   : > { %s8226_s5 = scalar_lea.vmem (!%p1104_p9), [#allocation3], %s7109_s11 }
 0x1e1   : > { %s9314_s10 = smov (!%p1153_p10, %s1150_s10), 69  ;;  %s9316_s21 = smov (!%p1163_p11, %s4860_s21), 15 }
 0x1e2   : > { %s4859_s22 = sshll.u32 %s9314_s10, 2  ;;  %s1165_s12 = scalar_lea.vmem %s9299_s2, %s9316_s21 }
 0x1e3   : > { %s8214_s26 = scalar_lea.vmem %s9297_s0, %s4859_s22  ;;  %s4862_s29 = sshll.u32 %s9316_s21, 3 }
 0x1e4   : > { %s8224_s4 = scalar_lea.vmem %s9300_s3, %s4862_s29  ;;  %1180 = sbr.rel (%p4863_p12) target bundleno = 498 (0x1f2), region = 59 }
 0x1e9   : > { %v7223_v0 = vmov 0.0  }
 0x1ea   : > { %1181 = vst [vmem:[#allocation2 + $0x30] sm:$0xff] %v7223_v0 }
 0x1eb   : > { %1182 = vst [vmem:[#allocation2] sm:$0xff] %v7223_v0 }
 0x1ec   : > { %1183 = vst [vmem:[#allocation2 + $0x18] sm:$0xff] %v7223_v0 }
 0x1ed   : > { %1184 = vst [vmem:[#allocation2 + $0x10] sm:$0xff] %v7223_v0 }
 0x1ee   : > { %1185 = vst [vmem:[#allocation2 + $0x8] sm:$0xff] %v7223_v0 }
 0x1ef   : > { %1186 = vst [vmem:[#allocation2 + $0x20] sm:$0xff] %v7223_v0 }
 0x1f0   : > { %1187 = vst [vmem:[#allocation2 + $0x28] sm:$0xff] %v7223_v0 }
 0x1f1   : > { %1188 = vst [vmem:[#allocation2 + $0x38] sm:$0xff] %v7223_v0 }
 0x1f2 PF: > { %v5090_v1 = vld [vmem:[%s8226_s5 + $0x1c0] sm:$0xf]  ;;  %p6656_p13 = scmp.ne.s32.totalorder %s7205_s14, 9 }
 0x1f3   : > { %v6720_v2 = vld [vmem:[%s8226_s5 + $0x1dc] sm:$0xf0] }
 0x1f4   : > { %v5346_v3 = vld [vmem:[%s8226_s5 + $0x3c0] sm:$0xf]  ;;  %v5091_v4 = vor.u32 %v6720_v2, %v5090_v1 }
 0x1f5   : > { %v6784_v5 = vld [vmem:[%s8226_s5 + $0x3dc] sm:$0xf0] }
 0x1f6   : > { %v5602_v6 = vld [vmem:[%s8226_s5 + $0x5c0] sm:$0xf]  ;;  %v5347_v8 = vor.u32 %v6784_v5, %v5346_v3  ;;  %3914 = vmatpush.bf16.msra.mxu0 %v5091_v4 }
 0x1f7   : > { %v6848_v7 = vld [vmem:[%s8226_s5 + $0x5dc] sm:$0xf0] }
 0x1f8   : > { %v5603_v9 = vor.u32 %v6848_v7, %v5602_v6  ;;  %v5858_v10 = vld [vmem:[%s8226_s5 + $0x7c0] sm:$0xf]  ;;  %3927 = vmatpush.bf16.msra.mxu1 %v5347_v8 }
 0x1f9   : > { %v6912_v11 = vld [vmem:[%s8226_s5 + $0x7dc] sm:$0xf0] }
 0x1fa   : > { %v5058_v12 = vld [vmem:[%s8226_s5 + $0x180] sm:$0xf]  ;;  %v5859_v13 = vor.u32 %v6912_v11, %v5858_v10  ;;  %3940 = vmatpush.bf16.msra.mxu2 %v5603_v9 }
 0x1fb   : > { %v6712_v14 = vld [vmem:[%s8226_s5 + $0x19c] sm:$0xf0] }
 0x1fc   : > { %v5314_v15 = vld [vmem:[%s8226_s5 + $0x380] sm:$0xf]  ;;  %v5059_v17 = vor.u32 %v6712_v14, %v5058_v12  ;;  %3953 = vmatpush.bf16.msra.mxu3 %v5859_v13 }
 0x1fd   : > { %v6776_v16 = vld [vmem:[%s8226_s5 + $0x39c] sm:$0xf0] }
 0x1fe   : > { %v5315_v18 = vor.u32 %v6776_v16, %v5314_v15  ;;  %v5570_v19 = vld [vmem:[%s8226_s5 + $0x580] sm:$0xf]  ;;  %3915 = vmatpush.bf16.msra.mxu0 %v5059_v17 }
 0x1ff   : > { %v6840_v20 = vld [vmem:[%s8226_s5 + $0x59c] sm:$0xf0] }
 0x200   : > { %v5826_v21 = vld [vmem:[%s8226_s5 + $0x780] sm:$0xf]  ;;  %v5571_v22 = vor.u32 %v6840_v20, %v5570_v19  ;;  %3928 = vmatpush.bf16.msra.mxu1 %v5315_v18 }
 0x201   : > { %v6904_v23 = vld [vmem:[%s8226_s5 + $0x79c] sm:$0xf0] }
 0x202   : > { %v5026_v24 = vld [vmem:[%s8226_s5 + $0x140] sm:$0xf]  ;;  %v5827_v26 = vor.u32 %v6904_v23, %v5826_v21  ;;  %3941 = vmatpush.bf16.msra.mxu2 %v5571_v22 }
 0x203   : > { %v6704_v25 = vld [vmem:[%s8226_s5 + $0x15c] sm:$0xf0] }
 0x204   : > { %v5282_v27 = vld [vmem:[%s8226_s5 + $0x340] sm:$0xf]  ;;  %v5027_v30 = vor.u32 %v6704_v25, %v5026_v24  ;;  %3954 = vmatpush.bf16.msra.mxu3 %v5827_v26 }
 0x205   : > { %v6768_v28 = vld [vmem:[%s8226_s5 + $0x35c] sm:$0xf0] }
 0x206   : > { %v5538_v29 = vld [vmem:[%s8226_s5 + $0x540] sm:$0xf]  ;;  %v5283_v34 = vor.u32 %v6768_v28, %v5282_v27  ;;  %3916 = vmatpush.bf16.msra.mxu0 %v5027_v30 }
 0x207   : > { %v6832_v31 = vld [vmem:[%s8226_s5 + $0x55c] sm:$0xf0] }
 0x208   : > { %v5794_v32 = vld [vmem:[%s8226_s5 + $0x740] sm:$0xf]  ;;  %v5539_v35 = vor.u32 %v6832_v31, %v5538_v29  ;;  %3929 = vmatpush.bf16.msra.mxu1 %v5283_v34 }
 0x209   : > { %v6896_v33 = vld [vmem:[%s8226_s5 + $0x75c] sm:$0xf0] }
 0x20a   : > { %v4994_v36 = vld [vmem:[%s8226_s5 + $0x100] sm:$0xf]  ;;  %v5795_v39 = vor.u32 %v6896_v33, %v5794_v32  ;;  %3942 = vmatpush.bf16.msra.mxu2 %v5539_v35 }
 0x20b   : > { %v6696_v37 = vld [vmem:[%s8226_s5 + $0x11c] sm:$0xf0] }
 0x20c   : > { %v5250_v38 = vld [vmem:[%s8226_s5 + $0x300] sm:$0xf]  ;;  %v4995_v45 = vor.u32 %v6696_v37, %v4994_v36  ;;  %3955 = vmatpush.bf16.msra.mxu3 %v5795_v39  ;;  %v5092_v39 = vld [vmem:[%s8226_s5 + $0x1e0] sm:$0xf0] }
 0x20d   : > { %v6760_v40 = vld [vmem:[%s8226_s5 + $0x31c] sm:$0xf0] }
 0x20e   : > { %v5506_v41 = vld [vmem:[%s8226_s5 + $0x500] sm:$0xf]  ;;  %v5251_v46 = vor.u32 %v6760_v40, %v5250_v38  ;;  %3917 = vmatpush.bf16.msra.mxu0 %v4995_v45  ;;  %v6716_v38 = vld [vmem:[%s8226_s5 + $0x1c4] sm:$0xf] }
 0x20f   : > { %v6824_v42 = vld [vmem:[%s8226_s5 + $0x51c] sm:$0xf0] }
 0x210   : > { %v5762_v43 = vld [vmem:[%s8226_s5 + $0x700] sm:$0xf]  ;;  %v5507_v47 = vor.u32 %v6824_v42, %v5506_v41  ;;  %3930 = vmatpush.bf16.msra.mxu1 %v5251_v46 }
 0x211   : > { %v6888_v44 = vld [vmem:[%s8226_s5 + $0x71c] sm:$0xf0] }
 0x212   : > { %v4962_v48 = vld [vmem:[%s8226_s5 + $0xc0] sm:$0xf]  ;;  %v5763_v51 = vor.u32 %v6888_v44, %v5762_v43  ;;  %3943 = vmatpush.bf16.msra.mxu2 %v5507_v47  ;;  %v5095_v47 = vor.u32 %v6716_v38, %v5092_v39 }
 0x213   : > { %v6688_v49 = vld [vmem:[%s8226_s5 + $0xdc] sm:$0xf0] }
 0x214   : > { %v5218_v50 = vld [vmem:[%s8226_s5 + $0x2c0] sm:$0xf]  ;;  %v4963_v57 = vor.u32 %v6688_v49, %v4962_v48  ;;  %3956 = vmatpush.bf16.msra.mxu3 %v5763_v51  ;;  %v6708_v51 = vld [vmem:[%s8226_s5 + $0x184] sm:$0xf] }
 0x215   : > { %v6752_v52 = vld [vmem:[%s8226_s5 + $0x2dc] sm:$0xf0] }
 0x216   : > { %v5474_v53 = vld [vmem:[%s8226_s5 + $0x4c0] sm:$0xf]  ;;  %v5219_v58 = vor.u32 %v6752_v52, %v5218_v50  ;;  %3918 = vmatpush.bf16.msra.mxu0 %v4963_v57  ;;  %v5060_v52 = vld [vmem:[%s8226_s5 + $0x1a0] sm:$0xf0] }
 0x217   : > { %v6816_v54 = vld [vmem:[%s8226_s5 + $0x4dc] sm:$0xf0] }
 0x218   : > { %v5730_v55 = vld [vmem:[%s8226_s5 + $0x6c0] sm:$0xf]  ;;  %v5475_v59 = vor.u32 %v6816_v54, %v5474_v53  ;;  %3931 = vmatpush.bf16.msra.mxu1 %v5219_v58 }
 0x219   : > { %v6880_v56 = vld [vmem:[%s8226_s5 + $0x6dc] sm:$0xf0] }
 0x21a   : > { %v4930_v60 = vld [vmem:[%s8226_s5 + $0x80] sm:$0xf]  ;;  %v5731_v63 = vor.u32 %v6880_v56, %v5730_v55  ;;  %3944 = vmatpush.bf16.msra.mxu2 %v5475_v59  ;;  %v1198_v59 = vld [vmem:[%s8214_s26 + $0x8] sm:$0xff] }
 0x21b   : > { %v6680_v61 = vld [vmem:[%s8226_s5 + $0x9c] sm:$0xf0] }
 0x21c   : > { %v5186_v62 = vld [vmem:[%s8226_s5 + $0x280] sm:$0xf]  ;;  %v4931_v5 = vor.u32 %v6680_v61, %v4930_v60  ;;  %3957 = vmatpush.bf16.msra.mxu3 %v5731_v63  ;;  %v5063_v60 = vor.u32 %v6708_v51, %v5060_v52 }
 0x21d   : > { %v6744_v0 = vld [vmem:[%s8226_s5 + $0x29c] sm:$0xf0] }
 0x21e   : > { %v5442_v1 = vld [vmem:[%s8226_s5 + $0x480] sm:$0xf]  ;;  %v5187_v6 = vor.u32 %v6744_v0, %v5186_v62  ;;  %3919 = vmatpush.bf16.msra.mxu0 %v4931_v5  ;;  %v1655_v0 = vunpack.c.l.b16 %v1198_v59 }
 0x21f   : > { %v6808_v2 = vld [vmem:[%s8226_s5 + $0x49c] sm:$0xf0] }
 0x220   : > { %v5698_v3 = vld [vmem:[%s8226_s5 + $0x680] sm:$0xf]  ;;  %v5443_v7 = vor.u32 %v6808_v2, %v5442_v1  ;;  %3932 = vmatpush.bf16.msra.mxu1 %v5187_v6  ;;  %v1656_v1 = vunpack.c.h.b16 %v1198_v59  ;;  %v6700_v2 = vld [vmem:[%s8226_s5 + $0x144] sm:$0xf]  ;;  %v8318_v5 = vpack.c.b16 %v1655_v0, %v1655_v0 }
 0x221   : > { %v6872_v4 = vld [vmem:[%s8226_s5 + $0x69c] sm:$0xf0] }
 0x222   : > { %v4898_v8 = vld [vmem:[%s8226_s5 + $0x40] sm:$0xf]  ;;  %v5699_v11 = vor.u32 %v6872_v4, %v5698_v3  ;;  %3945 = vmatpush.bf16.msra.mxu2 %v5443_v7  ;;  %v5028_v3 = vld [vmem:[%s8226_s5 + $0x160] sm:$0xf0]  ;;  %v8321_v7 = vpack.c.b16 %v1656_v1, %v1656_v1 }
 0x223   : > { %v6672_v9 = vld [vmem:[%s8226_s5 + $0x5c] sm:$0xf0] }
 0x224   : > { %v5154_v10 = vld [vmem:[%s8226_s5 + $0x240] sm:$0xf]  ;;  %v4899_v17 = vor.u32 %v6672_v9, %v4898_v8  ;;  %3958 = vmatpush.bf16.msra.mxu3 %v5699_v11 }
 0x225   : > { %v6736_v12 = vld [vmem:[%s8226_s5 + $0x25c] sm:$0xf0] }
 0x226   : > { %v5410_v13 = vld [vmem:[%s8226_s5 + $0x440] sm:$0xf]  ;;  %v5155_v20 = vor.u32 %v6736_v12, %v5154_v10  ;;  %3920 = vmatpush.bf16.msra.mxu0 %v4899_v17 }
 0x227   : > { %v6800_v14 = vld [vmem:[%s8226_s5 + $0x45c] sm:$0xf0] }
 0x228   : > { %v5666_v15 = vld [vmem:[%s8226_s5 + $0x640] sm:$0xf]  ;;  %v5411_v21 = vor.u32 %v6800_v14, %v5410_v13  ;;  %3933 = vmatpush.bf16.msra.mxu1 %v5155_v20  ;;  %v4996_v20 = vld [vmem:[%s8226_s5 + $0x120] sm:$0xf0] }
 0x229   : > { %v6864_v16 = vld [vmem:[%s8226_s5 + $0x65c] sm:$0xf0] }
 0x22a   : > { %v4866_v18 = vld [vmem:[%s8226_s5] sm:$0xf]  ;;  %v5667_v25 = vor.u32 %v6864_v16, %v5666_v15  ;;  %3946 = vmatpush.bf16.msra.mxu2 %v5411_v21  ;;  %v5031_v15 = vor.u32 %v6700_v2, %v5028_v3 }
 0x22b   : > { %v6664_v19 = vld [vmem:[%s8226_s5 + $0x1c] sm:$0xf0] }
 0x22c   : > { %v5122_v22 = vld [vmem:[%s8226_s5 + $0x200] sm:$0xf]  ;;  %v4867_v32 = vor.u32 %v6664_v19, %v4866_v18  ;;  %3959 = vmatpush.bf16.msra.mxu3 %v5667_v25  ;;  %v6692_v19 = vld [vmem:[%s8226_s5 + $0x104] sm:$0xf] }
 0x22d   : > { %v6728_v23 = vld [vmem:[%s8226_s5 + $0x21c] sm:$0xf0] }
 0x22e   : > { %v5378_v24 = vld [vmem:[%s8226_s5 + $0x400] sm:$0xf]  ;;  %v5123_v36 = vor.u32 %v6728_v23, %v5122_v22  ;;  %3921 = vmatpush.bf16.msra.mxu0 %v4867_v32 }
 0x22f   : > { %v6792_v26 = vld [vmem:[%s8226_s5 + $0x41c] sm:$0xf0] }
 0x230   : > { %v5634_v27 = vld [vmem:[%s8226_s5 + $0x600] sm:$0xf]  ;;  %v5379_v37 = vor.u32 %v6792_v26, %v5378_v24  ;;  %3934 = vmatpush.bf16.msra.mxu1 %v5123_v36 }
 0x231   : > { %v6856_v28 = vld [vmem:[%s8226_s5 + $0x61c] sm:$0xf0] }
 0x232   : > { %v6114_v29 = vld [vmem:[%s8226_s5 + $0x9c0] sm:$0xf]  ;;  %v5635_v40 = vor.u32 %v6856_v28, %v5634_v27  ;;  %3947 = vmatpush.bf16.msra.mxu2 %v5379_v37 }
 0x233   : > { %v6976_v30 = vld [vmem:[%s8226_s5 + $0x9dc] sm:$0xf0] }
 0x234   : > { %v6370_v31 = vld [vmem:[%s8226_s5 + $0xbc0] sm:$0xf]  ;;  %v6115_v41 = vor.u32 %v6976_v30, %v6114_v29  ;;  %3960 = vmatpush.bf16.msra.mxu3 %v5635_v40  ;;  %v4999_v29 = vor.u32 %v6692_v19, %v4996_v20 }
 0x235   : > { %v7040_v33 = vld [vmem:[%s8226_s5 + $0xbdc] sm:$0xf0]  ;;  %3948 = vmatmul.bf16.vlgmr.msra.gmra.mxu2 %v8318_v5 }
 0x236   : > { %v6626_v34 = vld [vmem:[%s8226_s5 + $0xdc0] sm:$0xf]  ;;  %v6371_v42 = vor.u32 %v7040_v33, %v6370_v31  ;;  %3966 = vmatpush.bf16.msrb.mxu0 %v6115_v41  ;;  %v6684_v33 = vld [vmem:[%s8226_s5 + $0xc4] sm:$0xf] }
 0x237   : > { %v7104_v35 = vld [vmem:[%s8226_s5 + $0xddc] sm:$0xf0]  ;;  %3961 = vmatmul.bf16.vlgmr.msra.gmra.mxu3 %v8321_v7 }
 0x238   : > { %v6627_v43 = vor.u32 %v7104_v35, %v6626_v34  ;;  %v6082_v44 = vld [vmem:[%s8226_s5 + $0x980] sm:$0xf]  ;;  %3979 = vmatpush.bf16.msrb.mxu1 %v6371_v42  ;;  %4005 = vmatpush.bf16.msrb.mxu3 %v5095_v47  ;;  %v4964_v34 = vld [vmem:[%s8226_s5 + $0xe0] sm:$0xf0] }
 0x239   : > { %v6968_v45 = vld [vmem:[%s8226_s5 + $0x99c] sm:$0xf0]  ;;  %v4967_v41 = vor.u32 %v6684_v33, %v4964_v34  ;;  %v6836_v33 = vld [vmem:[%s8226_s5 + $0x584] sm:$0xf] }
 0x23a   : > { %v6338_v46 = vld [vmem:[%s8226_s5 + $0xb80] sm:$0xf]  ;;  %v6083_v53 = vor.u32 %v6968_v45, %v6082_v44  ;;  %3992 = vmatpush.bf16.msrb.mxu2 %v6627_v43  ;;  %v6676_v45 = vld [vmem:[%s8226_s5 + $0x84] sm:$0xf] }
 0x23b   : > { %v7032_v48 = vld [vmem:[%s8226_s5 + $0xb9c] sm:$0xf0] }
 0x23c   : > { %v6594_v49 = vld [vmem:[%s8226_s5 + $0xd80] sm:$0xf]  ;;  %v6339_v55 = vor.u32 %v7032_v48, %v6338_v46  ;;  %3967 = vmatpush.bf16.msrb.mxu0 %v6083_v53  ;;  %4006 = vmatpush.bf16.msrb.mxu3 %v5063_v60  ;;  %v4932_v46 = vld [vmem:[%s8226_s5 + $0xa0] sm:$0xf0] }
 0x23d   : > { %v7096_v50 = vld [vmem:[%s8226_s5 + $0xd9c] sm:$0xf0]  ;;  %v4935_v53 = vor.u32 %v6676_v45, %v4932_v46  ;;  %v6764_v46 = vld [vmem:[%s8226_s5 + $0x344] sm:$0xf] }
 0x23e   : > { %v6050_v54 = vld [vmem:[%s8226_s5 + $0x940] sm:$0xf]  ;;  %v6595_v56 = vor.u32 %v7096_v50, %v6594_v49  ;;  %3980 = vmatpush.bf16.msrb.mxu1 %v6339_v55 }
 0x23f   : > { %v6960_v57 = vld [vmem:[%s8226_s5 + $0x95c] sm:$0xf0] }
 0x240   : > { %v6306_v58 = vld [vmem:[%s8226_s5 + $0xb40] sm:$0xf]  ;;  %v6051_v4 = vor.u32 %v6960_v57, %v6050_v54  ;;  %3993 = vmatpush.bf16.msrb.mxu2 %v6595_v56  ;;  %4007 = vmatpush.bf16.msrb.mxu3 %v5031_v15  ;;  %v6668_v57 = vld [vmem:[%s8226_s5 + $0x44] sm:$0xf] }
 0x241   : > { %v7024_v61 = vld [vmem:[%s8226_s5 + $0xb5c] sm:$0xf0]  ;;  %v5604_v15 = vld [vmem:[%s8226_s5 + $0x5e0] sm:$0xf0] }
 0x242   : > { %v6562_v62 = vld [vmem:[%s8226_s5 + $0xd40] sm:$0xf]  ;;  %v6307_v8 = vor.u32 %v7024_v61, %v6306_v58  ;;  %3968 = vmatpush.bf16.msrb.mxu0 %v6051_v4  ;;  %v4900_v58 = vld [vmem:[%s8226_s5 + $0x60] sm:$0xf0]  ;;  %v1200_v4 = vld [vmem:[%s8214_s26 + $0x18] sm:$0xf] }
 0x243   : > { %v7088_v63 = vld [vmem:[%s8226_s5 + $0xd5c] sm:$0xf0] }
 0x244   : > { %v1197_v6 = vld [vmem:[%s8214_s26] sm:$0xff]  ;;  %v6563_v9 = vor.u32 %v7088_v63, %v6562_v62  ;;  %3981 = vmatpush.bf16.msrb.mxu1 %v6307_v8  ;;  %4008 = vmatpush.bf16.msrb.mxu3 %v4999_v29 }
 0x245   : > { %v6018_v10 = vld [vmem:[%s8226_s5 + $0x900] sm:$0xf]  ;;  %v1653_v13 = vunpack.c.l.b16 %v1197_v6  ;;  %v1654_v14 = vunpack.c.h.b16 %v1197_v6  ;;  %v4903_v6 = vor.u32 %v6668_v57, %v4900_v58  ;;  %v6660_v8 = vld [vmem:[%s8226_s5 + $0x4] sm:$0xf] }
 0x246   : > { %v6952_v11 = vld [vmem:[%s8226_s5 + $0x91c] sm:$0xf0]  ;;  %3994 = vmatpush.bf16.msrb.mxu2 %v6563_v9  ;;  %v4868_v9 = vld [vmem:[%s8226_s5 + $0x20] sm:$0xf0] }
 0x247   : > { %v6274_v12 = vld [vmem:[%s8226_s5 + $0xb00] sm:$0xf]  ;;  %v8332_v21 = vpack.c.b16 %v1653_v13, %v1653_v13  ;;  %v8335_v22 = vpack.c.b16 %v1654_v14, %v1654_v14  ;;  %v6019_v23 = vor.u32 %v6952_v11, %v6018_v10  ;;  %v1199_v10 = vld [vmem:[%s8214_s26 + $0x10] sm:$0xff]  ;;  %v6780_v11 = vld [vmem:[%s8226_s5 + $0x3c4] sm:$0xf] }
 0x248   : > { %v7016_v16 = vld [vmem:[%s8226_s5 + $0xb1c] sm:$0xf0]  ;;  %4009 = vmatpush.bf16.msrb.mxu3 %v4967_v41  ;;  %v6844_v13 = vld [vmem:[%s8226_s5 + $0x5c4] sm:$0xf] }
 0x249   : > { %v6530_v17 = vld [vmem:[%s8226_s5 + $0xd00] sm:$0xf]  ;;  %v6275_v24 = vor.u32 %v7016_v16, %v6274_v12  ;;  %3922 = vmatmul.bf16.vlgmr.msra.gmra.mxu0 %v8332_v21  ;;  %3935 = vmatmul.bf16.vlgmr.msra.gmra.mxu1 %v8335_v22  ;;  %v5348_v12 = vld [vmem:[%s8226_s5 + $0x3e0] sm:$0xf0]  ;;  %v5607_v29 = vor.u32 %v6844_v13, %v5604_v15 }
 0x24a   : > { %v7080_v18 = vld [vmem:[%s8226_s5 + $0xd1c] sm:$0xf0]  ;;  %3969 = vmatpush.bf16.msrb.mxu0 %v6019_v23  ;;  %v6908_v16 = vld [vmem:[%s8226_s5 + $0x7c4] sm:$0xf] }
 0x24b   : > { %v6531_v25 = vor.u32 %v7080_v18, %v6530_v17  ;;  %v5986_v26 = vld [vmem:[%s8226_s5 + $0x8c0] sm:$0xf]  ;;  %3982 = vmatpush.bf16.msrb.mxu1 %v6275_v24  ;;  %v5860_v17 = vld [vmem:[%s8226_s5 + $0x7e0] sm:$0xf0]  ;;  %v1659_v18 = vunpack.c.l.b16 %v1200_v4 }
 0x24c   : > { %v6944_v27 = vld [vmem:[%s8226_s5 + $0x8dc] sm:$0xf0]  ;;  %4010 = vmatpush.bf16.msrb.mxu3 %v4935_v53  ;;  %v6972_v23 = vld [vmem:[%s8226_s5 + $0x9c4] sm:$0xf] }
 0x24d   : > { %v6242_v28 = vld [vmem:[%s8226_s5 + $0xac0] sm:$0xf]  ;;  %v5987_v35 = vor.u32 %v6944_v27, %v5986_v26  ;;  %3995 = vmatpush.bf16.msrb.mxu2 %v6531_v25  ;;  %v6116_v24 = vld [vmem:[%s8226_s5 + $0x9e0] sm:$0xf0]  ;;  %v1657_v25 = vunpack.c.l.b16 %v1199_v10  ;;  %v1658_v26 = vunpack.c.h.b16 %v1199_v10  ;;  %v4871_v27 = vor.u32 %v6660_v8, %v4868_v9 }
 0x24e   : > { %v7008_v30 = vld [vmem:[%s8226_s5 + $0xadc] sm:$0xf0]  ;;  %v6119_v34 = vor.u32 %v6972_v23, %v6116_v24  ;;  %v6956_v53 = vld [vmem:[%s8226_s5 + $0x944] sm:$0xf] }
 0x24f   : > { %v6498_v31 = vld [vmem:[%s8226_s5 + $0xcc0] sm:$0xf]  ;;  %v6243_v36 = vor.u32 %v7008_v30, %v6242_v28  ;;  %3970 = vmatpush.bf16.msrb.mxu0 %v5987_v35  ;;  %v5351_v28 = vor.u32 %v6780_v11, %v5348_v12  ;;  %v5863_v30 = vor.u32 %v6908_v16, %v5860_v17  ;;  %v5572_v35 = vld [vmem:[%s8226_s5 + $0x5a0] sm:$0xf0]  ;;  %v8391_v41 = vpack.c.b16 %v1657_v25, %v1657_v25 }
 0x250   : > { %v7072_v32 = vld [vmem:[%s8226_s5 + $0xcdc] sm:$0xf0]  ;;  %4011 = vmatpush.bf16.msrb.mxu3 %v4903_v6  ;;  %v6756_v58 = vld [vmem:[%s8226_s5 + $0x304] sm:$0xf] }
 0x251   : > { %v6499_v37 = vor.u32 %v7072_v32, %v6498_v31  ;;  %v5954_v38 = vld [vmem:[%s8226_s5 + $0x880] sm:$0xf]  ;;  %3983 = vmatpush.bf16.msrb.mxu1 %v6243_v36  ;;  %v6772_v31 = vld [vmem:[%s8226_s5 + $0x384] sm:$0xf] }
 0x252   : > { %v6936_v39 = vld [vmem:[%s8226_s5 + $0x89c] sm:$0xf0]  ;;  %v5316_v32 = vld [vmem:[%s8226_s5 + $0x3a0] sm:$0xf0] }
 0x253   : > { %v6210_v40 = vld [vmem:[%s8226_s5 + $0xa80] sm:$0xf]  ;;  %v5955_v47 = vor.u32 %v6936_v39, %v5954_v38  ;;  %3996 = vmatpush.bf16.msrb.mxu2 %v6499_v37  ;;  %v6900_v36 = vld [vmem:[%s8226_s5 + $0x784] sm:$0xf]  ;;  %v8387_v38 = vpack.c.b16 %v1659_v18, %v1659_v18 }
 0x254   : > { %v7000_v42 = vld [vmem:[%s8226_s5 + $0xa9c] sm:$0xf0]  ;;  %v5828_v37 = vld [vmem:[%s8226_s5 + $0x7a0] sm:$0xf0]  ;;  %4012 = vmatpush.bf16.msrb.mxu3 %v4871_v27 }
 0x255   : > { %v6466_v43 = vld [vmem:[%s8226_s5 + $0xc80] sm:$0xf]  ;;  %v6211_v48 = vor.u32 %v7000_v42, %v6210_v40  ;;  %3971 = vmatpush.bf16.msrb.mxu0 %v5955_v47  ;;  %v6964_v39 = vld [vmem:[%s8226_s5 + $0x984] sm:$0xf]  ;;  %v8393_v42 = vpack.c.b16 %v1658_v26, %v1658_v26  ;;  %v5831_v45 = vor.u32 %v6900_v36, %v5828_v37 }
 0x256   : > { %v7064_v44 = vld [vmem:[%s8226_s5 + $0xc9c] sm:$0xf0]  ;;  %v6084_v40 = vld [vmem:[%s8226_s5 + $0x9a0] sm:$0xf0] }
 0x257   : > { %v6467_v49 = vor.u32 %v7064_v44, %v6466_v43  ;;  %v5922_v50 = vld [vmem:[%s8226_s5 + $0x840] sm:$0xf]  ;;  %3984 = vmatpush.bf16.msrb.mxu1 %v6211_v48  ;;  %v5319_v43 = vor.u32 %v6772_v31, %v5316_v32  ;;  %v5575_v44 = vor.u32 %v6836_v33, %v5572_v35  ;;  %v5284_v47 = vld [vmem:[%s8226_s5 + $0x360] sm:$0xf0]  ;;  %4013 = vmatmul.bf16.vlgmr.msrb.gmra.mxu3 %v8332_v21 }
 0x258   : > { %v6928_v51 = vld [vmem:[%s8226_s5 + $0x85c] sm:$0xf0]  ;;  %v6828_v48 = vld [vmem:[%s8226_s5 + $0x544] sm:$0xf]  ;;  %4057 = vmatpush.bf16.msra.mxu3 %v6119_v34 }
 0x259   : > { %v6178_v52 = vld [vmem:[%s8226_s5 + $0xa40] sm:$0xf]  ;;  %v5923_v60 = vor.u32 %v6928_v51, %v5922_v50  ;;  %3997 = vmatpush.bf16.msrb.mxu2 %v6467_v49  ;;  %v6087_v49 = vor.u32 %v6964_v39, %v6084_v40  ;;  %v5540_v50 = vld [vmem:[%s8226_s5 + $0x560] sm:$0xf0] }
 0x25a   : > { %v6992_v54 = vld [vmem:[%s8226_s5 + $0xa5c] sm:$0xf0]  ;;  %v6892_v51 = vld [vmem:[%s8226_s5 + $0x744] sm:$0xf] }
 0x25b   : > { %v6434_v55 = vld [vmem:[%s8226_s5 + $0xc40] sm:$0xf]  ;;  %v6179_v0 = vor.u32 %v6992_v54, %v6178_v52  ;;  %3972 = vmatpush.bf16.msrb.mxu0 %v5923_v60  ;;  %v5796_v52 = vld [vmem:[%s8226_s5 + $0x760] sm:$0xf0] }
 0x25c   : > { %v7056_v56 = vld [vmem:[%s8226_s5 + $0xc5c] sm:$0xf0]  ;;  %v6052_v54 = vld [vmem:[%s8226_s5 + $0x960] sm:$0xf0]  ;;  %v5799_v57 = vor.u32 %v6892_v51, %v5796_v52  ;;  %4058 = vmatpush.bf16.msra.mxu3 %v6087_v49 }
 0x25d   : > { %v5890_v59 = vld [vmem:[%s8226_s5 + $0x800] sm:$0xf]  ;;  %v6435_v1 = vor.u32 %v7056_v56, %v6434_v55  ;;  %3985 = vmatpush.bf16.msrb.mxu1 %v6179_v0  ;;  %v5287_v55 = vor.u32 %v6764_v46, %v5284_v47  ;;  %v5543_v56 = vor.u32 %v6828_v48, %v5540_v50  ;;  %v6820_v60 = vld [vmem:[%s8226_s5 + $0x504] sm:$0xf] }
 0x25e   : > { %v6920_v61 = vld [vmem:[%s8226_s5 + $0x81c] sm:$0xf0]  ;;  %v5764_v0 = vld [vmem:[%s8226_s5 + $0x720] sm:$0xf0] }
 0x25f   : > { %v6146_v62 = vld [vmem:[%s8226_s5 + $0xa00] sm:$0xf]  ;;  %v5891_v14 = vor.u32 %v6920_v61, %v5890_v59  ;;  %3998 = vmatpush.bf16.msrb.mxu2 %v6435_v1  ;;  %v5252_v59 = vld [vmem:[%s8226_s5 + $0x320] sm:$0xf0]  ;;  %v6055_v61 = vor.u32 %v6956_v53, %v6052_v54 }
 0x260   : > { %v6984_v63 = vld [vmem:[%s8226_s5 + $0xa1c] sm:$0xf0]  ;;  %v6948_v1 = vld [vmem:[%s8226_s5 + $0x904] sm:$0xf] }
 0x261   : > { %v6402_v2 = vld [vmem:[%s8226_s5 + $0xc00] sm:$0xf]  ;;  %v6147_v19 = vor.u32 %v6984_v63, %v6146_v62  ;;  %3973 = vmatpush.bf16.msrb.mxu0 %v5891_v14  ;;  %v5508_v62 = vld [vmem:[%s8226_s5 + $0x520] sm:$0xf0]  ;;  %4059 = vmatpush.bf16.msra.mxu3 %v6055_v61 }
 0x262   : > { %v7048_v3 = vld [vmem:[%s8226_s5 + $0xc1c] sm:$0xf0]  ;;  %v6884_v63 = vld [vmem:[%s8226_s5 + $0x704] sm:$0xf]  ;;  %v5511_v4 = vor.u32 %v6820_v60, %v5508_v62 }
 0x263   : > { %v6403_v20 = vor.u32 %v7048_v3, %v6402_v2  ;;  %3986 = vmatpush.bf16.msrb.mxu1 %v6147_v19  ;;  %v6020_v2 = vld [vmem:[%s8226_s5 + $0x920] sm:$0xf0]  ;;  %v5255_v3 = vor.u32 %v6756_v58, %v5252_v59  ;;  %v5767_v6 = vor.u32 %v6884_v63, %v5764_v0  ;;  %v5098_v63 = vld [vmem:[%s8226_s5 + $0x1c8] sm:$0xf] }
 0x264   : > { %3974 = vmatmul.bf16.vlgmr.msrb.gmra.mxu0 %v8391_v41  ;;  %v6748_v8 = vld [vmem:[%s8226_s5 + $0x2c4] sm:$0xf]  ;;  %v6023_v11 = vor.u32 %v6948_v1, %v6020_v2  ;;  %v6721_v0 = vld [vmem:[%s8226_s5 + $0x1e4] sm:$0xf0] }
 0x265   : > { %3999 = vmatpush.bf16.msrb.mxu2 %v6403_v20  ;;  %4018 = vmatpush.bf16.msra.mxu0 %v5351_v28  ;;  %v5220_v9 = vld [vmem:[%s8226_s5 + $0x2e0] sm:$0xf0] }
 0x266   : > { %3987 = vmatmul.bf16.vlgmr.msrb.gmra.mxu1 %v8393_v42  ;;  %v6812_v10 = vld [vmem:[%s8226_s5 + $0x4c4] sm:$0xf]  ;;  %v5223_v17 = vor.u32 %v6748_v8, %v5220_v9  ;;  %4060 = vmatpush.bf16.msra.mxu3 %v6023_v11 }
 0x267   : > { %4031 = vmatpush.bf16.msra.mxu1 %v5607_v29  ;;  %v5476_v12 = vld [vmem:[%s8226_s5 + $0x4e0] sm:$0xf0] }
 0x268   : > { %4000 = vmatmul.bf16.vlgmr.msrb.gmra.mxu2 %v8387_v38  ;;  %v6876_v13 = vld [vmem:[%s8226_s5 + $0x6c4] sm:$0xf]  ;;  %v5479_v18 = vor.u32 %v6812_v10, %v5476_v12  ;;  %v5099_v10 = vor.u32 %v6721_v0, %v5098_v63 }
 0x269   : > { %4044 = vmatpush.bf16.msra.mxu2 %v5863_v30  ;;  %4019 = vmatpush.bf16.msra.mxu0 %v5319_v43  ;;  %v5732_v14 = vld [vmem:[%s8226_s5 + $0x6e0] sm:$0xf0] }
 0x26a   : > { %v6940_v15 = vld [vmem:[%s8226_s5 + $0x8c4] sm:$0xf]  ;;  %v5735_v19 = vor.u32 %v6876_v13, %v5732_v14 }
 0x26b   : > { %4032 = vmatpush.bf16.msra.mxu1 %v5575_v44  ;;  %v5988_v16 = vld [vmem:[%s8226_s5 + $0x8e0] sm:$0xf0] }
 0x26c   : > { %v6740_v20 = vld [vmem:[%s8226_s5 + $0x284] sm:$0xf]  ;;  %v5991_v25 = vor.u32 %v6940_v15, %v5988_v16  ;;  %v5066_v16 = vld [vmem:[%s8226_s5 + $0x188] sm:$0xf] }
 0x26d   : > { %4045 = vmatpush.bf16.msra.mxu2 %v5831_v45  ;;  %4020 = vmatpush.bf16.msra.mxu0 %v5287_v55  ;;  %v5188_v23 = vld [vmem:[%s8226_s5 + $0x2a0] sm:$0xf0] }
 0x26e   : > { %v6804_v24 = vld [vmem:[%s8226_s5 + $0x484] sm:$0xf]  ;;  %v5191_v31 = vor.u32 %v6740_v20, %v5188_v23  ;;  %4061 = vmatpush.bf16.msra.mxu3 %v5991_v25 }
 0x26f   : > { %4033 = vmatpush.bf16.msra.mxu1 %v5543_v56  ;;  %v5444_v26 = vld [vmem:[%s8226_s5 + $0x4a0] sm:$0xf0] }
 0x270   : > { %v6868_v27 = vld [vmem:[%s8226_s5 + $0x684] sm:$0xf]  ;;  %v5447_v32 = vor.u32 %v6804_v24, %v5444_v26 }
 0x271   : > { %4046 = vmatpush.bf16.msra.mxu2 %v5799_v57  ;;  %4021 = vmatpush.bf16.msra.mxu0 %v5255_v3  ;;  %v5700_v28 = vld [vmem:[%s8226_s5 + $0x6a0] sm:$0xf0]  ;;  %v5354_v3 = vld [vmem:[%s8226_s5 + $0x3c8] sm:$0xf] }
 0x272   : > { %v6932_v29 = vld [vmem:[%s8226_s5 + $0x884] sm:$0xf]  ;;  %v5703_v33 = vor.u32 %v6868_v27, %v5700_v28 }
 0x273   : > { %4034 = vmatpush.bf16.msra.mxu1 %v5511_v4  ;;  %v5956_v30 = vld [vmem:[%s8226_s5 + $0x8a0] sm:$0xf0]  ;;  %v6785_v4 = vld [vmem:[%s8226_s5 + $0x3e4] sm:$0xf0] }
 0x274   : > { %v6732_v34 = vld [vmem:[%s8226_s5 + $0x244] sm:$0xf]  ;;  %v5959_v37 = vor.u32 %v6932_v29, %v5956_v30  ;;  %v5355_v14 = vor.u32 %v6785_v4, %v5354_v3  ;;  %v5034_v30 = vld [vmem:[%s8226_s5 + $0x148] sm:$0xf] }
 0x275   : > { %4047 = vmatpush.bf16.msra.mxu2 %v5767_v6  ;;  %4022 = vmatpush.bf16.msra.mxu0 %v5223_v17  ;;  %v5156_v35 = vld [vmem:[%s8226_s5 + $0x260] sm:$0xf0]  ;;  %v6713_v17 = vld [vmem:[%s8226_s5 + $0x1a4] sm:$0xf0] }
 0x276   : > { %v6796_v36 = vld [vmem:[%s8226_s5 + $0x444] sm:$0xf]  ;;  %v5159_v46 = vor.u32 %v6732_v34, %v5156_v35  ;;  %4062 = vmatpush.bf16.msra.mxu3 %v5959_v37  ;;  %v5067_v24 = vor.u32 %v6713_v17, %v5066_v16 }
 0x277   : > { %4035 = vmatpush.bf16.msra.mxu1 %v5479_v18  ;;  %v5412_v39 = vld [vmem:[%s8226_s5 + $0x460] sm:$0xf0]  ;;  %v5322_v18 = vld [vmem:[%s8226_s5 + $0x388] sm:$0xf] }
 0x278   : > { %v6860_v40 = vld [vmem:[%s8226_s5 + $0x644] sm:$0xf]  ;;  %v5415_v49 = vor.u32 %v6796_v36, %v5412_v39 }
 0x279   : > { %4048 = vmatpush.bf16.msra.mxu2 %v5735_v19  ;;  %v5668_v43 = vld [vmem:[%s8226_s5 + $0x660] sm:$0xf0]  ;;  %4023 = vmatpush.bf16.msra.mxu0 %v5191_v31  ;;  %v6777_v19 = vld [vmem:[%s8226_s5 + $0x3a4] sm:$0xf0] }
 0x27a   : > { %v6924_v44 = vld [vmem:[%s8226_s5 + $0x844] sm:$0xf]  ;;  %v5671_v50 = vor.u32 %v6860_v40, %v5668_v43  ;;  %v5323_v28 = vor.u32 %v6777_v19, %v5322_v18  ;;  %v6705_v31 = vld [vmem:[%s8226_s5 + $0x164] sm:$0xf0] }
 0x27b   : > { %v5924_v45 = vld [vmem:[%s8226_s5 + $0x860] sm:$0xf0]  ;;  %4036 = vmatpush.bf16.msra.mxu1 %v5447_v32  ;;  %v5290_v32 = vld [vmem:[%s8226_s5 + $0x348] sm:$0xf]  ;;  %v5035_v36 = vor.u32 %v6705_v31, %v5034_v30 }
 0x27c   : > { %v6724_v47 = vld [vmem:[%s8226_s5 + $0x204] sm:$0xf]  ;;  %v5927_v54 = vor.u32 %v6924_v44, %v5924_v45  ;;  %v5002_v45 = vld [vmem:[%s8226_s5 + $0x108] sm:$0xf] }
 0x27d   : > { %v5124_v48 = vld [vmem:[%s8226_s5 + $0x220] sm:$0xf0]  ;;  %4049 = vmatpush.bf16.msra.mxu2 %v5703_v33  ;;  %4024 = vmatpush.bf16.msra.mxu0 %v5159_v46  ;;  %v6769_v33 = vld [vmem:[%s8226_s5 + $0x364] sm:$0xf0] }
 0x27e   : > { %v6788_v51 = vld [vmem:[%s8226_s5 + $0x404] sm:$0xf]  ;;  %v5127_v61 = vor.u32 %v6724_v47, %v5124_v48  ;;  %4063 = vmatpush.bf16.msra.mxu3 %v5927_v54  ;;  %v5291_v43 = vor.u32 %v6769_v33, %v5290_v32  ;;  %v6697_v46 = vld [vmem:[%s8226_s5 + $0x124] sm:$0xf0] }
 0x27f   : > { %v5380_v52 = vld [vmem:[%s8226_s5 + $0x420] sm:$0xf0]  ;;  %4037 = vmatpush.bf16.msra.mxu1 %v5415_v49  ;;  %v5258_v47 = vld [vmem:[%s8226_s5 + $0x308] sm:$0xf] }
 0x280   : > { %v6852_v53 = vld [vmem:[%s8226_s5 + $0x604] sm:$0xf]  ;;  %v5383_v1 = vor.u32 %v6788_v51, %v5380_v52  ;;  %v6761_v48 = vld [vmem:[%s8226_s5 + $0x324] sm:$0xf0]  ;;  %v5003_v51 = vor.u32 %v6697_v46, %v5002_v45 }
 0x281   : > { %v5636_v55 = vld [vmem:[%s8226_s5 + $0x620] sm:$0xf0]  ;;  %4050 = vmatpush.bf16.msra.mxu2 %v5671_v50  ;;  %4025 = vmatpush.bf16.msra.mxu0 %v5127_v61  ;;  %v4906_v19 = vld [vmem:[%s8226_s5 + $0x48] sm:$0xf] }
 0x282   : > { %v6916_v56 = vld [vmem:[%s8226_s5 + $0x804] sm:$0xf]  ;;  %v5639_v2 = vor.u32 %v6852_v53, %v5636_v55  ;;  %v5259_v55 = vor.u32 %v6761_v48, %v5258_v47  ;;  %v4874_v32 = vld [vmem:[%s8226_s5 + $0x8] sm:$0xf] }
 0x283   : > { %v5892_v57 = vld [vmem:[%s8226_s5 + $0x820] sm:$0xf0]  ;;  %4038 = vmatpush.bf16.msra.mxu1 %v5383_v1  ;;  %v6122_v45 = vld [vmem:[%s8226_s5 + $0x9c8] sm:$0xf] }
 0x284   : > { %v7036_v58 = vld [vmem:[%s8226_s5 + $0xbc4] sm:$0xf]  ;;  %v5895_v6 = vor.u32 %v6916_v56, %v5892_v57  ;;  %4026 = vmatmul.bf16.vlgmr.msra.gmra.mxu0 %v8335_v22  ;;  %v4970_v57 = vld [vmem:[%s8226_s5 + $0xc8] sm:$0xf] }
 0x285   : > { %v6372_v59 = vld [vmem:[%s8226_s5 + $0xbe0] sm:$0xf0]  ;;  %4051 = vmatpush.bf16.msra.mxu2 %v5639_v2  ;;  %v6977_v46 = vld [vmem:[%s8226_s5 + $0x9e4] sm:$0xf0] }
 0x286   : > { %v7100_v60 = vld [vmem:[%s8226_s5 + $0xdc4] sm:$0xf]  ;;  %v6375_v8 = vor.u32 %v7036_v58, %v6372_v59  ;;  %4064 = vmatpush.bf16.msra.mxu3 %v5895_v6  ;;  %4039 = vmatmul.bf16.vlgmr.msra.gmra.mxu1 %v8318_v5  ;;  %v6689_v58 = vld [vmem:[%s8226_s5 + $0xe4] sm:$0xf0] }
 0x287   : > { %v6628_v62 = vld [vmem:[%s8226_s5 + $0xde0] sm:$0xf0]  ;;  %v5226_v59 = vld [vmem:[%s8226_s5 + $0x2c8] sm:$0xf]  ;;  %v4971_v63 = vor.u32 %v6689_v58, %v4970_v57 }
 0x288   : > { %v6631_v9 = vor.u32 %v7100_v60, %v6628_v62  ;;  %v7028_v11 = vld [vmem:[%s8226_s5 + $0xb84] sm:$0xf]  ;;  %4070 = vmatpush.bf16.msrb.mxu0 %v6375_v8  ;;  %4052 = vmatmul.bf16.vlgmr.msra.gmra.mxu2 %v8321_v7  ;;  %v6753_v60 = vld [vmem:[%s8226_s5 + $0x2e4] sm:$0xf0] }
 0x289   : > { %v6340_v12 = vld [vmem:[%s8226_s5 + $0xba0] sm:$0xf0]  ;;  %4096 = vmatpush.bf16.msrb.mxu2 %v5099_v10  ;;  %4065 = vmatmul.bf16.vlgmr.msra.gmra.mxu3 %v8391_v41  ;;  %v5227_v3 = vor.u32 %v6753_v60, %v5226_v59  ;;  %v4938_v6 = vld [vmem:[%s8226_s5 + $0x88] sm:$0xf] }
 0x28a   : > { %v7092_v13 = vld [vmem:[%s8226_s5 + $0xd84] sm:$0xf]  ;;  %v6343_v20 = vor.u32 %v7028_v11, %v6340_v12  ;;  %4083 = vmatpush.bf16.msrb.mxu1 %v6631_v9  ;;  %4109 = vmatpush.bf16.msrb.mxu3 %v5355_v14  ;;  %v6681_v8 = vld [vmem:[%s8226_s5 + $0xa4] sm:$0xf0] }
 0x28b   : > { %v6596_v15 = vld [vmem:[%s8226_s5 + $0xda0] sm:$0xf0]  ;;  %v5194_v9 = vld [vmem:[%s8226_s5 + $0x288] sm:$0xf] }
 0x28c   : > { %v6599_v23 = vor.u32 %v7092_v13, %v6596_v15  ;;  %v7020_v25 = vld [vmem:[%s8226_s5 + $0xb44] sm:$0xf]  ;;  %4071 = vmatpush.bf16.msrb.mxu0 %v6343_v20  ;;  %v6745_v10 = vld [vmem:[%s8226_s5 + $0x2a4] sm:$0xf0]  ;;  %v4939_v13 = vor.u32 %v6681_v8, %v4938_v6 }
 0x28d   : > { %v6308_v26 = vld [vmem:[%s8226_s5 + $0xb60] sm:$0xf0]  ;;  %4097 = vmatpush.bf16.msrb.mxu2 %v5067_v24  ;;  %v5195_v17 = vor.u32 %v6745_v10, %v5194_v9  ;;  %v6673_v20 = vld [vmem:[%s8226_s5 + $0x64] sm:$0xf0] }
 0x28e   : > { %v7084_v27 = vld [vmem:[%s8226_s5 + $0xd44] sm:$0xf]  ;;  %v6311_v34 = vor.u32 %v7020_v25, %v6308_v26  ;;  %4084 = vmatpush.bf16.msrb.mxu1 %v6599_v23  ;;  %4110 = vmatpush.bf16.msrb.mxu3 %v5323_v28  ;;  %v5162_v23 = vld [vmem:[%s8226_s5 + $0x248] sm:$0xf] }
 0x28f   : > { %v6564_v29 = vld [vmem:[%s8226_s5 + $0xd60] sm:$0xf0]  ;;  %v6737_v24 = vld [vmem:[%s8226_s5 + $0x264] sm:$0xf0] }
 0x290   : > { %v6567_v35 = vor.u32 %v7084_v27, %v6564_v29  ;;  %v7012_v37 = vld [vmem:[%s8226_s5 + $0xb04] sm:$0xf]  ;;  %4072 = vmatpush.bf16.msrb.mxu0 %v6311_v34  ;;  %v4907_v29 = vor.u32 %v6673_v20, %v4906_v19  ;;  %v5163_v33 = vor.u32 %v6737_v24, %v5162_v23  ;;  %v6665_v34 = vld [vmem:[%s8226_s5 + $0x24] sm:$0xf0] }
 0x291   : > { %v6276_v39 = vld [vmem:[%s8226_s5 + $0xb20] sm:$0xf0]  ;;  %4098 = vmatpush.bf16.msrb.mxu2 %v5035_v36  ;;  %v6729_v36 = vld [vmem:[%s8226_s5 + $0x224] sm:$0xf0]  ;;  %v4875_v48 = vor.u32 %v6665_v34, %v4874_v32 }
 0x292   : > { %v7076_v40 = vld [vmem:[%s8226_s5 + $0xd04] sm:$0xf]  ;;  %v6279_v49 = vor.u32 %v7012_v37, %v6276_v39  ;;  %4085 = vmatpush.bf16.msrb.mxu1 %v6567_v35  ;;  %4111 = vmatpush.bf16.msrb.mxu3 %v5291_v43  ;;  %v5130_v35 = vld [vmem:[%s8226_s5 + $0x208] sm:$0xf] }
 0x293   : > { %v6532_v44 = vld [vmem:[%s8226_s5 + $0xd20] sm:$0xf0]  ;;  %v5610_v37 = vld [vmem:[%s8226_s5 + $0x5c8] sm:$0xf] }
 0x294   : > { %v6535_v50 = vor.u32 %v7076_v40, %v6532_v44  ;;  %v7004_v52 = vld [vmem:[%s8226_s5 + $0xac4] sm:$0xf]  ;;  %4073 = vmatpush.bf16.msrb.mxu0 %v6279_v49  ;;  %v6849_v39 = vld [vmem:[%s8226_s5 + $0x5e4] sm:$0xf0] }
 0x295   : > { %v6244_v53 = vld [vmem:[%s8226_s5 + $0xae0] sm:$0xf0]  ;;  %4099 = vmatpush.bf16.msrb.mxu2 %v5003_v51  ;;  %v5866_v40 = vld [vmem:[%s8226_s5 + $0x7c8] sm:$0xf]  ;;  %v5131_v51 = vor.u32 %v6729_v36, %v5130_v35 }
 0x296   : > { %v7068_v54 = vld [vmem:[%s8226_s5 + $0xcc4] sm:$0xf]  ;;  %v6247_v61 = vor.u32 %v7004_v52, %v6244_v53  ;;  %4086 = vmatpush.bf16.msrb.mxu1 %v6535_v50  ;;  %4112 = vmatpush.bf16.msrb.mxu3 %v5259_v55  ;;  %v6913_v44 = vld [vmem:[%s8226_s5 + $0x7e4] sm:$0xf0]  ;;  %v5611_v52 = vor.u32 %v6849_v39, %v5610_v37 }
 0x297   : > { %v6500_v56 = vld [vmem:[%s8226_s5 + $0xce0] sm:$0xf0]  ;;  %v6378_v49 = vld [vmem:[%s8226_s5 + $0xbc8] sm:$0xf]  ;;  %v5867_v53 = vor.u32 %v6913_v44, %v5866_v40 }
 0x298   : > { %v6503_v62 = vor.u32 %v7068_v54, %v6500_v56  ;;  %v6996_v0 = vld [vmem:[%s8226_s5 + $0xa84] sm:$0xf]  ;;  %4074 = vmatpush.bf16.msrb.mxu0 %v6247_v61  ;;  %v7041_v50 = vld [vmem:[%s8226_s5 + $0xbe4] sm:$0xf0]  ;;  %v6123_v54 = vor.u32 %v6977_v46, %v6122_v45 }
 0x299   : > { %v6212_v1 = vld [vmem:[%s8226_s5 + $0xaa0] sm:$0xf0]  ;;  %4100 = vmatpush.bf16.msrb.mxu2 %v4971_v63  ;;  %v5578_v55 = vld [vmem:[%s8226_s5 + $0x588] sm:$0xf]  ;;  %v6379_v58 = vor.u32 %v7041_v50, %v6378_v49 }
 0x29a   : > { %v7060_v2 = vld [vmem:[%s8226_s5 + $0xc84] sm:$0xf]  ;;  %v6215_v11 = vor.u32 %v6996_v0, %v6212_v1  ;;  %4087 = vmatpush.bf16.msrb.mxu1 %v6503_v62  ;;  %4113 = vmatpush.bf16.msrb.mxu3 %v5227_v3  ;;  %v6841_v56 = vld [vmem:[%s8226_s5 + $0x5a4] sm:$0xf0] }
 0x29b   : > { %v6468_v4 = vld [vmem:[%s8226_s5 + $0xca0] sm:$0xf0]  ;;  %v5834_v57 = vld [vmem:[%s8226_s5 + $0x788] sm:$0xf]  ;;  %v5579_v0 = vor.u32 %v6841_v56, %v5578_v55 }
 0x29c   : > { %v6471_v12 = vor.u32 %v7060_v2, %v6468_v4  ;;  %v6988_v14 = vld [vmem:[%s8226_s5 + $0xa44] sm:$0xf]  ;;  %4075 = vmatpush.bf16.msrb.mxu0 %v6215_v11  ;;  %v6905_v59 = vld [vmem:[%s8226_s5 + $0x7a4] sm:$0xf0] }
 0x29d   : > { %v6180_v15 = vld [vmem:[%s8226_s5 + $0xa60] sm:$0xf0]  ;;  %4101 = vmatpush.bf16.msrb.mxu2 %v4939_v13  ;;  %v6090_v60 = vld [vmem:[%s8226_s5 + $0x988] sm:$0xf]  ;;  %v5835_v1 = vor.u32 %v6905_v59, %v5834_v57 }
 0x29e   : > { %v7052_v16 = vld [vmem:[%s8226_s5 + $0xc44] sm:$0xf]  ;;  %v6183_v25 = vor.u32 %v6988_v14, %v6180_v15  ;;  %4088 = vmatpush.bf16.msrb.mxu1 %v6471_v12  ;;  %4114 = vmatpush.bf16.msrb.mxu3 %v5195_v17  ;;  %v6969_v61 = vld [vmem:[%s8226_s5 + $0x9a4] sm:$0xf0] }
 0x29f   : > { %v6436_v18 = vld [vmem:[%s8226_s5 + $0xc60] sm:$0xf0]  ;;  %v6346_v62 = vld [vmem:[%s8226_s5 + $0xb88] sm:$0xf]  ;;  %v6091_v2 = vor.u32 %v6969_v61, %v6090_v60 }
 0x2a0   : > { %v6980_v26 = vld [vmem:[%s8226_s5 + $0xa04] sm:$0xf]  ;;  %v6439_v28 = vor.u32 %v7052_v16, %v6436_v18  ;;  %4076 = vmatpush.bf16.msrb.mxu0 %v6183_v25  ;;  %v7033_v63 = vld [vmem:[%s8226_s5 + $0xba4] sm:$0xf0] }
 0x2a1   : > { %v6148_v27 = vld [vmem:[%s8226_s5 + $0xa20] sm:$0xf0]  ;;  %4102 = vmatpush.bf16.msrb.mxu2 %v4907_v29  ;;  %v5546_v3 = vld [vmem:[%s8226_s5 + $0x548] sm:$0xf]  ;;  %v6347_v8 = vor.u32 %v7033_v63, %v6346_v62 }
 0x2a2   : > { %v7044_v30 = vld [vmem:[%s8226_s5 + $0xc04] sm:$0xf]  ;;  %v6151_v43 = vor.u32 %v6980_v26, %v6148_v27  ;;  %4089 = vmatpush.bf16.msrb.mxu1 %v6439_v28  ;;  %4115 = vmatpush.bf16.msrb.mxu3 %v5163_v33  ;;  %v6833_v4 = vld [vmem:[%s8226_s5 + $0x564] sm:$0xf0] }
 0x2a3   : > { %v6404_v31 = vld [vmem:[%s8226_s5 + $0xc20] sm:$0xf0]  ;;  %v5802_v6 = vld [vmem:[%s8226_s5 + $0x748] sm:$0xf]  ;;  %v5547_v14 = vor.u32 %v6833_v4, %v5546_v3 }
 0x2a4   : > { %v6407_v47 = vor.u32 %v7044_v30, %v6404_v31  ;;  %4077 = vmatpush.bf16.msrb.mxu0 %v6151_v43  ;;  %v6897_v9 = vld [vmem:[%s8226_s5 + $0x764] sm:$0xf0] }
 0x2a5   : > { %4103 = vmatpush.bf16.msrb.mxu2 %v4875_v48  ;;  %v6058_v10 = vld [vmem:[%s8226_s5 + $0x948] sm:$0xf]  ;;  %v5803_v15 = vor.u32 %v6897_v9, %v5802_v6 }
 0x2a6   : > { %4090 = vmatpush.bf16.msrb.mxu1 %v6407_v47  ;;  %4116 = vmatpush.bf16.msrb.mxu3 %v5131_v51  ;;  %v6961_v11 = vld [vmem:[%s8226_s5 + $0x964] sm:$0xf0] }
 0x2a7   : > { %4078 = vmatmul.bf16.vlgmr.msrb.gmra.mxu0 %v8393_v42  ;;  %v6314_v12 = vld [vmem:[%s8226_s5 + $0xb48] sm:$0xf]  ;;  %v6059_v16 = vor.u32 %v6961_v11, %v6058_v10 }
 0x2a8   : > { %4122 = vmatpush.bf16.msra.mxu0 %v5611_v52  ;;  %v7025_v13 = vld [vmem:[%s8226_s5 + $0xb64] sm:$0xf0]  ;;  %4104 = vmatmul.bf16.vlgmr.msrb.gmra.mxu2 %v8332_v21 }
 0x2a9   : > { %4148 = vmatpush.bf16.msra.mxu2 %v6123_v54  ;;  %4091 = vmatmul.bf16.vlgmr.msrb.gmra.mxu1 %v8387_v38  ;;  %v5514_v17 = vld [vmem:[%s8226_s5 + $0x508] sm:$0xf]  ;;  %v6315_v20 = vor.u32 %v7025_v13, %v6314_v12 }
 0x2aa   : > { %4135 = vmatpush.bf16.msra.mxu1 %v5867_v53  ;;  %4161 = vmatpush.bf16.msra.mxu3 %v6379_v58  ;;  %v6825_v18 = vld [vmem:[%s8226_s5 + $0x524] sm:$0xf0] }
 0x2ab   : > { %4117 = vmatmul.bf16.vlgmr.msrb.gmra.mxu3 %v8335_v22  ;;  %v5770_v19 = vld [vmem:[%s8226_s5 + $0x708] sm:$0xf]  ;;  %v5515_v28 = vor.u32 %v6825_v18, %v5514_v17 }
 0x2ac   : > { %4123 = vmatpush.bf16.msra.mxu0 %v5579_v0  ;;  %v6889_v23 = vld [vmem:[%s8226_s5 + $0x724] sm:$0xf0] }
 0x2ad   : > { %4149 = vmatpush.bf16.msra.mxu2 %v6091_v2  ;;  %v6026_v24 = vld [vmem:[%s8226_s5 + $0x908] sm:$0xf]  ;;  %v5771_v29 = vor.u32 %v6889_v23, %v5770_v19  ;;  %v6717_v19 = vld [vmem:[%s8226_s5 + $0x1cc] sm:$0xf] }
 0x2ae   : > { %4136 = vmatpush.bf16.msra.mxu1 %v5835_v1  ;;  %4162 = vmatpush.bf16.msra.mxu3 %v6347_v8  ;;  %v6953_v25 = vld [vmem:[%s8226_s5 + $0x924] sm:$0xf0]  ;;  %v5100_v23 = vld [vmem:[%s8226_s5 + $0x1e8] sm:$0xf0] }
 0x2af   : > { %v6282_v26 = vld [vmem:[%s8226_s5 + $0xb08] sm:$0xf]  ;;  %v6027_v30 = vor.u32 %v6953_v25, %v6026_v24  ;;  %v6781_v24 = vld [vmem:[%s8226_s5 + $0x3cc] sm:$0xf] }
 0x2b0   : > { %v7017_v27 = vld [vmem:[%s8226_s5 + $0xb24] sm:$0xf0]  ;;  %4124 = vmatpush.bf16.msra.mxu0 %v5547_v14  ;;  %v5356_v25 = vld [vmem:[%s8226_s5 + $0x3e8] sm:$0xf0] }
 0x2b1   : > { %4150 = vmatpush.bf16.msra.mxu2 %v6059_v16  ;;  %v5482_v31 = vld [vmem:[%s8226_s5 + $0x4c8] sm:$0xf]  ;;  %v6283_v34 = vor.u32 %v7017_v27, %v6282_v26 }
 0x2b2   : > { %4137 = vmatpush.bf16.msra.mxu1 %v5803_v15  ;;  %v6817_v32 = vld [vmem:[%s8226_s5 + $0x4e4] sm:$0xf0]  ;;  %4163 = vmatpush.bf16.msra.mxu3 %v6315_v20 }
 0x2b3   : > { %v5738_v33 = vld [vmem:[%s8226_s5 + $0x6c8] sm:$0xf]  ;;  %v5483_v43 = vor.u32 %v6817_v32, %v5482_v31  ;;  %v5103_v32 = vor.u32 %v6717_v19, %v5100_v23  ;;  %v5484_v19 = vld [vmem:[%s8226_s5 + $0x4e8] sm:$0xf0] }
 0x2b4   : > { %v6881_v35 = vld [vmem:[%s8226_s5 + $0x6e4] sm:$0xf0]  ;;  %4125 = vmatpush.bf16.msra.mxu0 %v5515_v28  ;;  %v6845_v28 = vld [vmem:[%s8226_s5 + $0x5cc] sm:$0xf] }
 0x2b5   : > { %v5994_v36 = vld [vmem:[%s8226_s5 + $0x8c8] sm:$0xf]  ;;  %4151 = vmatpush.bf16.msra.mxu2 %v6027_v30  ;;  %v5739_v44 = vor.u32 %v6881_v35, %v5738_v33  ;;  %v5359_v33 = vor.u32 %v6781_v24, %v5356_v25 }
 0x2b6   : > { %v6945_v37 = vld [vmem:[%s8226_s5 + $0x8e4] sm:$0xf0]  ;;  %4138 = vmatpush.bf16.msra.mxu1 %v5771_v29  ;;  %4164 = vmatpush.bf16.msra.mxu3 %v6283_v34  ;;  %v5612_v29 = vld [vmem:[%s8226_s5 + $0x5e8] sm:$0xf0] }
 0x2b7   : > { %v6250_v39 = vld [vmem:[%s8226_s5 + $0xac8] sm:$0xf]  ;;  %v5995_v45 = vor.u32 %v6945_v37, %v5994_v36  ;;  %v6709_v36 = vld [vmem:[%s8226_s5 + $0x18c] sm:$0xf]  ;;  %v5615_v37 = vor.u32 %v6845_v28, %v5612_v29 }
 0x2b8   : > { %v7009_v40 = vld [vmem:[%s8226_s5 + $0xae4] sm:$0xf0]  ;;  %4126 = vmatpush.bf16.msra.mxu0 %v5483_v43  ;;  %v5324_v43 = vld [vmem:[%s8226_s5 + $0x3a8] sm:$0xf0] }
 0x2b9   : > { %v5450_v46 = vld [vmem:[%s8226_s5 + $0x488] sm:$0xf]  ;;  %v6251_v49 = vor.u32 %v7009_v40, %v6250_v39  ;;  %4152 = vmatpush.bf16.msra.mxu2 %v5995_v45  ;;  %v5068_v39 = vld [vmem:[%s8226_s5 + $0x1a8] sm:$0xf0] }
 0x2ba   : > { %v6809_v47 = vld [vmem:[%s8226_s5 + $0x4a4] sm:$0xf0]  ;;  %4139 = vmatpush.bf16.msra.mxu1 %v5739_v44  ;;  %v6773_v40 = vld [vmem:[%s8226_s5 + $0x38c] sm:$0xf] }
 0x2bb   : > { %v5706_v48 = vld [vmem:[%s8226_s5 + $0x688] sm:$0xf]  ;;  %v5451_v55 = vor.u32 %v6809_v47, %v5450_v46  ;;  %4165 = vmatpush.bf16.msra.mxu3 %v6251_v49  ;;  %v6837_v44 = vld [vmem:[%s8226_s5 + $0x58c] sm:$0xf]  ;;  %v5071_v47 = vor.u32 %v6709_v36, %v5068_v39 }
 0x2bc   : > { %v6873_v50 = vld [vmem:[%s8226_s5 + $0x6a4] sm:$0xf0]  ;;  %v5580_v45 = vld [vmem:[%s8226_s5 + $0x5a8] sm:$0xf0] }
 0x2bd   : > { %v5962_v51 = vld [vmem:[%s8226_s5 + $0x888] sm:$0xf]  ;;  %v5707_v56 = vor.u32 %v6873_v50, %v5706_v48  ;;  %4127 = vmatpush.bf16.msra.mxu0 %v5451_v55  ;;  %v5327_v48 = vor.u32 %v6773_v40, %v5324_v43  ;;  %v5292_v55 = vld [vmem:[%s8226_s5 + $0x368] sm:$0xf0] }
 0x2be   : > { %v6937_v52 = vld [vmem:[%s8226_s5 + $0x8a4] sm:$0xf0]  ;;  %v4940_v29 = vld [vmem:[%s8226_s5 + $0xa8] sm:$0xf0] }
 0x2bf   : > { %v6218_v53 = vld [vmem:[%s8226_s5 + $0xa88] sm:$0xf]  ;;  %v5963_v57 = vor.u32 %v6937_v52, %v5962_v51  ;;  %4140 = vmatpush.bf16.msra.mxu1 %v5707_v56  ;;  %v6701_v51 = vld [vmem:[%s8226_s5 + $0x14c] sm:$0xf]  ;;  %v5583_v52 = vor.u32 %v6837_v44, %v5580_v45  ;;  %v8638_v45 = vpop.f32.mrf.mxu2 }
 0x2c0   : > { %v7001_v54 = vld [vmem:[%s8226_s5 + $0xaa4] sm:$0xf0]  ;;  %v6829_v56 = vld [vmem:[%s8226_s5 + $0x54c] sm:$0xf] }
 0x2c1   : > { %v5418_v58 = vld [vmem:[%s8226_s5 + $0x448] sm:$0xf]  ;;  %v6219_v61 = vor.u32 %v7001_v54, %v6218_v53  ;;  %4153 = vmatpush.bf16.msra.mxu2 %v5963_v57  ;;  %v5036_v53 = vld [vmem:[%s8226_s5 + $0x168] sm:$0xf0] }
 0x2c2   : > { %v6801_v59 = vld [vmem:[%s8226_s5 + $0x464] sm:$0xf0]  ;;  %v6765_v54 = vld [vmem:[%s8226_s5 + $0x34c] sm:$0xf] }
 0x2c3   : > { %v5674_v60 = vld [vmem:[%s8226_s5 + $0x648] sm:$0xf]  ;;  %v5419_v3 = vor.u32 %v6801_v59, %v5418_v58  ;;  %4166 = vmatpush.bf16.msra.mxu3 %v6219_v61  ;;  %v5548_v57 = vld [vmem:[%s8226_s5 + $0x568] sm:$0xf0]  ;;  %v5039_v59 = vor.u32 %v6701_v51, %v5036_v53 }
 0x2c4   : > { %v6865_v62 = vld [vmem:[%s8226_s5 + $0x664] sm:$0xf0]  ;;  %v6669_v44 = vld [vmem:[%s8226_s5 + $0x4c] sm:$0xf] }
 0x2c5   : > { %v5930_v63 = vld [vmem:[%s8226_s5 + $0x848] sm:$0xf]  ;;  %v5675_v8 = vor.u32 %v6865_v62, %v5674_v60  ;;  %4128 = vmatpush.bf16.msra.mxu0 %v5419_v3  ;;  %v5295_v60 = vor.u32 %v6765_v54, %v5292_v55  ;;  %v5260_v3 = vld [vmem:[%s8226_s5 + $0x328] sm:$0xf0] }
 0x2c6   : > { %v6929_v0 = vld [vmem:[%s8226_s5 + $0x864] sm:$0xf0]  ;;  %v3936_v36 = vpop.f32.mrf.mxu1  ;;  %v6797_v51 = vld [vmem:[%s8226_s5 + $0x44c] sm:$0xf] }
 0x2c7   : > { %v6186_v1 = vld [vmem:[%s8226_s5 + $0xa48] sm:$0xf]  ;;  %v5931_v9 = vor.u32 %v6929_v0, %v5930_v63  ;;  %4141 = vmatpush.bf16.msra.mxu1 %v5675_v8  ;;  %v6693_v63 = vld [vmem:[%s8226_s5 + $0x10c] sm:$0xf]  ;;  %v5551_v0 = vor.u32 %v6829_v56, %v5548_v57 }
 0x2c8   : > { %v6993_v2 = vld [vmem:[%s8226_s5 + $0xa64] sm:$0xf0] }
 0x2c9   : > { %v5386_v4 = vld [vmem:[%s8226_s5 + $0x408] sm:$0xf]  ;;  %v6187_v13 = vor.u32 %v6993_v2, %v6186_v1  ;;  %4154 = vmatpush.bf16.msra.mxu2 %v5931_v9  ;;  %v5004_v1 = vld [vmem:[%s8226_s5 + $0x128] sm:$0xf0] }
 0x2ca   : > { %v6793_v6 = vld [vmem:[%s8226_s5 + $0x424] sm:$0xf0]  ;;  %v6757_v2 = vld [vmem:[%s8226_s5 + $0x30c] sm:$0xf]  ;;  %v5007_v9 = vor.u32 %v6693_v63, %v5004_v1 }
 0x2cb   : > { %v5642_v10 = vld [vmem:[%s8226_s5 + $0x608] sm:$0xf]  ;;  %v5387_v20 = vor.u32 %v6793_v6, %v5386_v4  ;;  %4167 = vmatpush.bf16.msra.mxu3 %v6187_v13  ;;  %v6821_v4 = vld [vmem:[%s8226_s5 + $0x50c] sm:$0xf] }
 0x2cc   : > { %v6857_v11 = vld [vmem:[%s8226_s5 + $0x624] sm:$0xf0]  ;;  %v5516_v6 = vld [vmem:[%s8226_s5 + $0x528] sm:$0xf0] }
 0x2cd   : > { %v5898_v12 = vld [vmem:[%s8226_s5 + $0x808] sm:$0xf]  ;;  %v5643_v26 = vor.u32 %v6857_v11, %v5642_v10  ;;  %4129 = vmatpush.bf16.msra.mxu0 %v5387_v20  ;;  %v5263_v10 = vor.u32 %v6757_v2, %v5260_v3  ;;  %v6685_v13 = vld [vmem:[%s8226_s5 + $0xcc] sm:$0xf] }
 0x2ce   : > { %v6921_v14 = vld [vmem:[%s8226_s5 + $0x824] sm:$0xf0]  ;;  %v6789_v63 = vld [vmem:[%s8226_s5 + $0x40c] sm:$0xf] }
 0x2cf   : > { %v6154_v15 = vld [vmem:[%s8226_s5 + $0xa08] sm:$0xf]  ;;  %v5899_v27 = vor.u32 %v6921_v14, %v5898_v12  ;;  %4142 = vmatpush.bf16.msra.mxu1 %v5643_v26  ;;  %v5519_v14 = vor.u32 %v6821_v4, %v5516_v6  ;;  %v6909_v1 = vld [vmem:[%s8226_s5 + $0x7cc] sm:$0xf] }
 0x2d0   : > { %v6985_v16 = vld [vmem:[%s8226_s5 + $0xa24] sm:$0xf0]  ;;  %4130 = vmatmul.bf16.vlgmr.msra.gmra.mxu0 %v8318_v5  ;;  %v5868_v2 = vld [vmem:[%s8226_s5 + $0x7e8] sm:$0xf0] }
 0x2d1   : > { %v6634_v17 = vld [vmem:[%s8226_s5 + $0xdc8] sm:$0xf]  ;;  %v6155_v30 = vor.u32 %v6985_v16, %v6154_v15  ;;  %4155 = vmatpush.bf16.msra.mxu2 %v5899_v27  ;;  %v4972_v15 = vld [vmem:[%s8226_s5 + $0xe8] sm:$0xf0] }
 0x2d2   : > { %v7105_v18 = vld [vmem:[%s8226_s5 + $0xde4] sm:$0xf0]  ;;  %4143 = vmatmul.bf16.vlgmr.msra.gmra.mxu1 %v8321_v7  ;;  %v6749_v16 = vld [vmem:[%s8226_s5 + $0x2cc] sm:$0xf]  ;;  %v4975_v23 = vor.u32 %v6685_v13, %v4972_v15 }
 0x2d3   : > { %v6635_v31 = vor.u32 %v7105_v18, %v6634_v17  ;;  %v6602_v34 = vld [vmem:[%s8226_s5 + $0xd88] sm:$0xf]  ;;  %4168 = vmatpush.bf16.msra.mxu3 %v6155_v30  ;;  %4187 = vmatpush.bf16.msrb.mxu1 %v5103_v32  ;;  %v5228_v17 = vld [vmem:[%s8226_s5 + $0x2e8] sm:$0xf0] }
 0x2d4   : > { %v7097_v35 = vld [vmem:[%s8226_s5 + $0xda4] sm:$0xf0]  ;;  %4156 = vmatmul.bf16.vlgmr.msra.gmra.mxu2 %v8391_v41  ;;  %v6813_v18 = vld [vmem:[%s8226_s5 + $0x4cc] sm:$0xf]  ;;  %v5231_v24 = vor.u32 %v6749_v16, %v5228_v17  ;;  %v3951_v16 = vpop.f32.mrf.mxu2 }
 0x2d5   : > { %4174 = vmatpush.bf16.msrb.mxu0 %v6635_v31  ;;  %v6603_v46 = vor.u32 %v7097_v35, %v6602_v34  ;;  %4200 = vmatpush.bf16.msrb.mxu2 %v5359_v33  ;;  %v6570_v49 = vld [vmem:[%s8226_s5 + $0xd48] sm:$0xf]  ;;  %v6677_v27 = vld [vmem:[%s8226_s5 + $0x8c] sm:$0xf]  ;;  %v5487_v28 = vor.u32 %v6813_v18, %v5484_v19  ;;  %v3923_v34 = vpop.f32.mrf.mxu0  ;;  %v5871_v18 = vor.u32 %v6909_v1, %v5868_v2 }
 0x2d6   : > { %v7089_v50 = vld [vmem:[%s8226_s5 + $0xd64] sm:$0xf0]  ;;  %4169 = vmatmul.bf16.vlgmr.msra.gmra.mxu3 %v8393_v42  ;;  %v6741_v30 = vld [vmem:[%s8226_s5 + $0x28c] sm:$0xf] }
 0x2d7   : > { %4213 = vmatpush.bf16.msrb.mxu3 %v5615_v37  ;;  %v6571_v58 = vor.u32 %v7089_v50, %v6570_v49  ;;  %4188 = vmatpush.bf16.msrb.mxu1 %v5071_v47  ;;  %v6538_v61 = vld [vmem:[%s8226_s5 + $0xd08] sm:$0xf]  ;;  %v5196_v31 = vld [vmem:[%s8226_s5 + $0x2a8] sm:$0xf0]  ;;  %v4943_v37 = vor.u32 %v6677_v27, %v4940_v29  ;;  %v8643_v50 = vpop.f32.mrf.mxu3 }
 0x2d8   : > { %v7081_v62 = vld [vmem:[%s8226_s5 + $0xd24] sm:$0xf0]  ;;  %v6805_v32 = vld [vmem:[%s8226_s5 + $0x48c] sm:$0xf]  ;;  %v5199_v39 = vor.u32 %v6741_v30, %v5196_v31 }
 0x2d9   : > { %4175 = vmatpush.bf16.msrb.mxu0 %v6603_v46  ;;  %4201 = vmatpush.bf16.msrb.mxu2 %v5327_v48  ;;  %v6539_v8 = vor.u32 %v7081_v62, %v6538_v61  ;;  %v6506_v11 = vld [vmem:[%s8226_s5 + $0xcc8] sm:$0xf]  ;;  %v5452_v33 = vld [vmem:[%s8226_s5 + $0x4a8] sm:$0xf0] }
 0x2da   : > { %v7073_v12 = vld [vmem:[%s8226_s5 + $0xce4] sm:$0xf0]  ;;  %v5455_v46 = vor.u32 %v6805_v32, %v5452_v33  ;;  %v4908_v47 = vld [vmem:[%s8226_s5 + $0x68] sm:$0xf0] }
 0x2db   : > { %4214 = vmatpush.bf16.msrb.mxu3 %v5583_v52  ;;  %4189 = vmatpush.bf16.msrb.mxu1 %v5039_v59  ;;  %v6507_v20 = vor.u32 %v7073_v12, %v6506_v11  ;;  %v6474_v25 = vld [vmem:[%s8226_s5 + $0xc88] sm:$0xf]  ;;  %v6733_v48 = vld [vmem:[%s8226_s5 + $0x24c] sm:$0xf]  ;;  %v4911_v56 = vor.u32 %v6669_v44, %v4908_v47  ;;  %v3938_v11 = vpop.f32.mrf.mxu1 }
 0x2dc   : > { %v7065_v26 = vld [vmem:[%s8226_s5 + $0xca4] sm:$0xf0]  ;;  %v5164_v49 = vld [vmem:[%s8226_s5 + $0x268] sm:$0xf0] }
 0x2dd   : > { %4176 = vmatpush.bf16.msrb.mxu0 %v6571_v58  ;;  %4202 = vmatpush.bf16.msrb.mxu2 %v5295_v60  ;;  %v6475_v35 = vor.u32 %v7065_v26, %v6474_v25  ;;  %v6442_v40 = vld [vmem:[%s8226_s5 + $0xc48] sm:$0xf]  ;;  %v5420_v52 = vld [vmem:[%s8226_s5 + $0x468] sm:$0xf0]  ;;  %v5167_v57 = vor.u32 %v6733_v48, %v5164_v49  ;;  %v3925_v4 = vpop.f32.mrf.mxu0 }
 0x2de   : > { %v7057_v43 = vld [vmem:[%s8226_s5 + $0xc64] sm:$0xf0]  ;;  %v6661_v58 = vld [vmem:[%s8226_s5 + $0xc] sm:$0xf]  ;;  %v5423_v61 = vor.u32 %v6797_v51, %v5420_v52 }
 0x2df   : > { %4215 = vmatpush.bf16.msrb.mxu3 %v5551_v0  ;;  %4190 = vmatpush.bf16.msrb.mxu1 %v5007_v9  ;;  %v6443_v53 = vor.u32 %v7057_v43, %v6442_v40  ;;  %v6410_v54 = vld [vmem:[%s8226_s5 + $0xc08] sm:$0xf]  ;;  %v4876_v59 = vld [vmem:[%s8226_s5 + $0x28] sm:$0xf0]  ;;  %v3964_v19 = vpop.f32.mrf.mxu3 }
 0x2e0   : > { %v7049_v55 = vld [vmem:[%s8226_s5 + $0xc24] sm:$0xf0]  ;;  %v6725_v60 = vld [vmem:[%s8226_s5 + $0x20c] sm:$0xf]  ;;  %v4879_v12 = vor.u32 %v6661_v58, %v4876_v59 }
 0x2e1   : > { %4177 = vmatpush.bf16.msrb.mxu0 %v6539_v8  ;;  %4203 = vmatpush.bf16.msrb.mxu2 %v5263_v10  ;;  %v5132_v62 = vld [vmem:[%s8226_s5 + $0x228] sm:$0xf0]  ;;  %v6411_v6 = vor.u32 %v7049_v55, %v6410_v54 }
 0x2e2   : > { %v5388_v0 = vld [vmem:[%s8226_s5 + $0x428] sm:$0xf0]  ;;  %v5135_v13 = vor.u32 %v6725_v60, %v5132_v62 }
 0x2e3   : > { %4216 = vmatpush.bf16.msrb.mxu3 %v5519_v14  ;;  %4191 = vmatpush.bf16.msrb.mxu1 %v4975_v23  ;;  %v6973_v3 = vld [vmem:[%s8226_s5 + $0x9cc] sm:$0xf]  ;;  %v5391_v17 = vor.u32 %v6789_v63, %v5388_v0  ;;  %v3988_v1 = vpop.f32.mrf.mxu1 }
 0x2e4   : > { %v6124_v8 = vld [vmem:[%s8226_s5 + $0x9e8] sm:$0xf0] }
 0x2e5   : > { %4178 = vmatpush.bf16.msrb.mxu0 %v6507_v20  ;;  %4204 = vmatpush.bf16.msrb.mxu2 %v5231_v24  ;;  %v7037_v9 = vld [vmem:[%s8226_s5 + $0xbcc] sm:$0xf]  ;;  %v6127_v20 = vor.u32 %v6973_v3, %v6124_v8  ;;  %v3937_v24 = vadd.f32 %v3936_v36, %v3923_v34  ;;  %v3975_v0 = vpop.f32.mrf.mxu0 }
 0x2e6   : > { %v6380_v10 = vld [vmem:[%s8226_s5 + $0xbe8] sm:$0xf0] }
 0x2e7   : > { %4217 = vmatpush.bf16.msrb.mxu3 %v5487_v28  ;;  %4192 = vmatpush.bf16.msrb.mxu1 %v4943_v37  ;;  %v7101_v14 = vld [vmem:[%s8226_s5 + $0xdcc] sm:$0xf]  ;;  %v6383_v23 = vor.u32 %v7037_v9, %v6380_v10  ;;  %v3950_v37 = vadd.f32 %v8638_v45, %v3937_v24 }
 0x2e8   : > { %v6636_v15 = vld [vmem:[%s8226_s5 + $0xde8] sm:$0xf0] }
 0x2e9   : > { %4179 = vmatpush.bf16.msrb.mxu0 %v6475_v35  ;;  %4205 = vmatpush.bf16.msrb.mxu2 %v5199_v39  ;;  %v6901_v25 = vld [vmem:[%s8226_s5 + $0x78c] sm:$0xf]  ;;  %v6639_v28 = vor.u32 %v7101_v14, %v6636_v15  ;;  %v3963_v52 = vadd.f32 %v8643_v50, %v3950_v37 }
 0x2ea   : > { %v5836_v26 = vld [vmem:[%s8226_s5 + $0x7a8] sm:$0xf0] }
 0x2eb   : > { %4218 = vmatpush.bf16.msrb.mxu3 %v5455_v46  ;;  %4193 = vmatpush.bf16.msrb.mxu1 %v4911_v56  ;;  %v6965_v27 = vld [vmem:[%s8226_s5 + $0x98c] sm:$0xf]  ;;  %v5839_v34 = vor.u32 %v6901_v25, %v5836_v26  ;;  %v3976_v9 = vadd.f32 %v3975_v0, %v3963_v52  ;;  %v1189_v25 = vld [vmem:[#allocation2 + $0x30] sm:$0xff]  ;;  %v4001_v26 = vpop.f32.mrf.mxu2 }
 0x2ec   : > { %v6092_v29 = vld [vmem:[%s8226_s5 + $0x9a8] sm:$0xf0] }
 0x2ed   : > { %4180 = vmatpush.bf16.msrb.mxu0 %v6443_v53  ;;  %4206 = vmatpush.bf16.msrb.mxu2 %v5167_v57  ;;  %v7029_v30 = vld [vmem:[%s8226_s5 + $0xb8c] sm:$0xf]  ;;  %v6095_v35 = vor.u32 %v6965_v27, %v6092_v29  ;;  %v3989_v16 = vadd.f32 %v3988_v1, %v3976_v9  ;;  %v6786_v9 = vld [vmem:[%s8226_s5 + $0x3ec] sm:$0xf0] }
 0x2ee   : > { %v6348_v31 = vld [vmem:[%s8226_s5 + $0xba8] sm:$0xf0] }
 0x2ef   : > { %4219 = vmatpush.bf16.msrb.mxu3 %v5423_v61  ;;  %4194 = vmatpush.bf16.msrb.mxu1 %v4879_v12  ;;  %v7093_v32 = vld [vmem:[%s8226_s5 + $0xd8c] sm:$0xf]  ;;  %v6351_v36 = vor.u32 %v7029_v30, %v6348_v31  ;;  %v4002_v31 = vadd.f32 %v4001_v26, %v3989_v16  ;;  %v6778_v26 = vld [vmem:[%s8226_s5 + $0x3ac] sm:$0xf0] }
 0x2f0   : > { %v6604_v33 = vld [vmem:[%s8226_s5 + $0xda8] sm:$0xf0] }
 0x2f1   : > { %4181 = vmatpush.bf16.msrb.mxu0 %v6411_v6  ;;  %4207 = vmatpush.bf16.msrb.mxu2 %v5135_v13  ;;  %v6893_v39 = vld [vmem:[%s8226_s5 + $0x74c] sm:$0xf]  ;;  %v6607_v44 = vor.u32 %v7093_v32, %v6604_v33 }
 0x2f2   : > { %v5804_v40 = vld [vmem:[%s8226_s5 + $0x768] sm:$0xf0]  ;;  %4195 = vmatmul.bf16.vlgmr.msrb.gmra.mxu1 %v8332_v21 }
 0x2f3   : > { %4220 = vmatpush.bf16.msrb.mxu3 %v5391_v17  ;;  %4239 = vmatpush.bf16.msra.mxu1 %v6127_v20  ;;  %v6957_v43 = vld [vmem:[%s8226_s5 + $0x94c] sm:$0xf]  ;;  %v5807_v45 = vor.u32 %v6893_v39, %v5804_v40  ;;  %v3977_v39 = vpop.f32.mrf.mxu0  ;;  %v3990_v40 = vpop.f32.mrf.mxu1 }
 0x2f4   : > { %4182 = vmatmul.bf16.vlgmr.msrb.gmra.mxu0 %v8387_v38  ;;  %v6060_v46 = vld [vmem:[%s8226_s5 + $0x968] sm:$0xf0]  ;;  %4208 = vmatmul.bf16.vlgmr.msrb.gmra.mxu2 %v8335_v22  ;;  %v6770_v40 = vld [vmem:[%s8226_s5 + $0x36c] sm:$0xf0] }
 0x2f5   : > { %4226 = vmatpush.bf16.msra.mxu0 %v5871_v18  ;;  %4252 = vmatpush.bf16.msra.mxu2 %v6383_v23  ;;  %v7021_v47 = vld [vmem:[%s8226_s5 + $0xb4c] sm:$0xf]  ;;  %v6063_v53 = vor.u32 %v6957_v43, %v6060_v46 }
 0x2f6   : > { %v6316_v48 = vld [vmem:[%s8226_s5 + $0xb68] sm:$0xf0]  ;;  %4221 = vmatmul.bf16.vlgmr.msrb.gmra.mxu3 %v8318_v5 }
 0x2f7   : > { %4265 = vmatpush.bf16.msra.mxu3 %v6639_v28  ;;  %v7085_v49 = vld [vmem:[%s8226_s5 + $0xd4c] sm:$0xf]  ;;  %4240 = vmatpush.bf16.msra.mxu1 %v6095_v35  ;;  %v6319_v54 = vor.u32 %v7021_v47, %v6316_v48 }
 0x2f8   : > { %v6572_v51 = vld [vmem:[%s8226_s5 + $0xd68] sm:$0xf0] }
 0x2f9   : > { %4227 = vmatpush.bf16.msra.mxu0 %v5839_v34  ;;  %4253 = vmatpush.bf16.msra.mxu2 %v6351_v36  ;;  %v6885_v55 = vld [vmem:[%s8226_s5 + $0x70c] sm:$0xf]  ;;  %v6575_v58 = vor.u32 %v7085_v49, %v6572_v51  ;;  %v8709_v34 = vpop.f32.mrf.mxu3  ;;  %v4642_v36 = vadd.f32 %v4002_v31, %v1189_v25 }
 0x2fa   : > { %v5772_v56 = vld [vmem:[%s8226_s5 + $0x728] sm:$0xf0] }
 0x2fb   : > { %v6949_v57 = vld [vmem:[%s8226_s5 + $0x90c] sm:$0xf]  ;;  %4266 = vmatpush.bf16.msra.mxu3 %v6607_v44  ;;  %v5775_v50 = vor.u32 %v6885_v55, %v5772_v56  ;;  %4241 = vmatpush.bf16.msra.mxu1 %v6063_v53  ;;  %4650 = vst [vmem:[#allocation2 + $0x30] sm:$0xff] %v4642_v36  ;;  %v6706_v36 = vld [vmem:[%s8226_s5 + $0x16c] sm:$0xf0] }
 0x2fc   : > { %v6028_v59 = vld [vmem:[%s8226_s5 + $0x928] sm:$0xf0] }
 0x2fd   : > { %v7013_v60 = vld [vmem:[%s8226_s5 + $0xb0c] sm:$0xf]  ;;  %4228 = vmatpush.bf16.msra.mxu0 %v5807_v45  ;;  %4254 = vmatpush.bf16.msra.mxu2 %v6319_v54  ;;  %v6031_v2 = vor.u32 %v6949_v57, %v6028_v59 }
 0x2fe   : > { %v6284_v61 = vld [vmem:[%s8226_s5 + $0xb28] sm:$0xf0] }
 0x2ff   : > { %v7077_v62 = vld [vmem:[%s8226_s5 + $0xd0c] sm:$0xf]  ;;  %v6287_v3 = vor.u32 %v7013_v60, %v6284_v61  ;;  %4267 = vmatpush.bf16.msra.mxu3 %v6575_v58  ;;  %4242 = vmatpush.bf16.msra.mxu1 %v6031_v2  ;;  %v5106_v2 = vld [vmem:[%s8226_s5 + $0x1d0] sm:$0xf] }
 0x300   : > { %v6540_v63 = vld [vmem:[%s8226_s5 + $0xd28] sm:$0xf0] }
 0x301   : > { %v6877_v4 = vld [vmem:[%s8226_s5 + $0x6cc] sm:$0xf]  ;;  %v6543_v10 = vor.u32 %v7077_v62, %v6540_v63  ;;  %4229 = vmatpush.bf16.msra.mxu0 %v5775_v50  ;;  %4255 = vmatpush.bf16.msra.mxu2 %v6287_v3  ;;  %v4003_v62 = vpop.f32.mrf.mxu2  ;;  %v6722_v3 = vld [vmem:[%s8226_s5 + $0x1ec] sm:$0xf0] }
 0x302   : > { %v5740_v6 = vld [vmem:[%s8226_s5 + $0x6e8] sm:$0xf0] }
 0x303   : > { %v6941_v8 = vld [vmem:[%s8226_s5 + $0x8cc] sm:$0xf]  ;;  %v5743_v17 = vor.u32 %v6877_v4, %v5740_v6  ;;  %4268 = vmatpush.bf16.msra.mxu3 %v6543_v10  ;;  %v5362_v4 = vld [vmem:[%s8226_s5 + $0x3d0] sm:$0xf]  ;;  %v4016_v6 = vpop.f32.mrf.mxu3 }
 0x304   : > { %v5996_v11 = vld [vmem:[%s8226_s5 + $0x8e8] sm:$0xf0]  ;;  %v5618_v10 = vld [vmem:[%s8226_s5 + $0x5d0] sm:$0xf] }
 0x305   : > { %v7005_v12 = vld [vmem:[%s8226_s5 + $0xacc] sm:$0xf]  ;;  %v5999_v19 = vor.u32 %v6941_v8, %v5996_v11  ;;  %4230 = vmatpush.bf16.msra.mxu0 %v5743_v17  ;;  %v6850_v11 = vld [vmem:[%s8226_s5 + $0x5ec] sm:$0xf0]  ;;  %v5107_v17 = vor.u32 %v6722_v3, %v5106_v2  ;;  %v8768_v2 = vpop.f32.mrf.mxu1 }
 0x306   : > { %v6252_v13 = vld [vmem:[%s8226_s5 + $0xae8] sm:$0xf0]  ;;  %v5490_v6 = vld [vmem:[%s8226_s5 + $0x4d0] sm:$0xf] }
 0x307   : > { %v7069_v14 = vld [vmem:[%s8226_s5 + $0xccc] sm:$0xf]  ;;  %v6255_v20 = vor.u32 %v7005_v12, %v6252_v13  ;;  %4243 = vmatpush.bf16.msra.mxu1 %v5999_v19  ;;  %v5619_v19 = vor.u32 %v6850_v11, %v5618_v10  ;;  %v6882_v10 = vld [vmem:[%s8226_s5 + $0x6ec] sm:$0xf0] }
 0x308   : > { %v6508_v15 = vld [vmem:[%s8226_s5 + $0xce8] sm:$0xf0] }
 0x309   : > { %v6869_v18 = vld [vmem:[%s8226_s5 + $0x68c] sm:$0xf]  ;;  %v6511_v27 = vor.u32 %v7069_v14, %v6508_v15  ;;  %4256 = vmatpush.bf16.msra.mxu2 %v6255_v20  ;;  %v5874_v14 = vld [vmem:[%s8226_s5 + $0x7d0] sm:$0xf] }
 0x30a   : > { %v5708_v23 = vld [vmem:[%s8226_s5 + $0x6a8] sm:$0xf0]  ;;  %v6914_v15 = vld [vmem:[%s8226_s5 + $0x7ec] sm:$0xf0] }
 0x30b   : > { %v6933_v24 = vld [vmem:[%s8226_s5 + $0x88c] sm:$0xf]  ;;  %v5711_v35 = vor.u32 %v6869_v18, %v5708_v23  ;;  %4269 = vmatpush.bf16.msra.mxu3 %v6511_v27  ;;  %v5363_v18 = vor.u32 %v6786_v9, %v5362_v4  ;;  %v5074_v20 = vld [vmem:[%s8226_s5 + $0x190] sm:$0xf]  ;;  %v5875_v25 = vor.u32 %v6914_v15, %v5874_v14  ;;  %v8775_v14 = vpop.f32.mrf.mxu2 }
 0x30c   : > { %v5964_v28 = vld [vmem:[%s8226_s5 + $0x8a8] sm:$0xf0]  ;;  %v6714_v23 = vld [vmem:[%s8226_s5 + $0x1ac] sm:$0xf0] }
 0x30d   : > { %v6997_v29 = vld [vmem:[%s8226_s5 + $0xa8c] sm:$0xf]  ;;  %v5967_v43 = vor.u32 %v6933_v24, %v5964_v28  ;;  %4231 = vmatpush.bf16.msra.mxu0 %v5711_v35  ;;  %v5330_v24 = vld [vmem:[%s8226_s5 + $0x390] sm:$0xf]  ;;  %v5075_v31 = vor.u32 %v6714_v23, %v5074_v20 }
 0x30e   : > { %v6220_v30 = vld [vmem:[%s8226_s5 + $0xaa8] sm:$0xf0]  ;;  %v5586_v27 = vld [vmem:[%s8226_s5 + $0x590] sm:$0xf] }
 0x30f   : > { %v7061_v32 = vld [vmem:[%s8226_s5 + $0xc8c] sm:$0xf]  ;;  %v6223_v44 = vor.u32 %v6997_v29, %v6220_v30  ;;  %4244 = vmatpush.bf16.msra.mxu1 %v5967_v43  ;;  %v6842_v28 = vld [vmem:[%s8226_s5 + $0x5ac] sm:$0xf0] }
 0x310   : > { %v6476_v33 = vld [vmem:[%s8226_s5 + $0xca8] sm:$0xf0]  ;;  %v5842_v29 = vld [vmem:[%s8226_s5 + $0x790] sm:$0xf] }
 0x311   : > { %v6861_v37 = vld [vmem:[%s8226_s5 + $0x64c] sm:$0xf]  ;;  %v6479_v49 = vor.u32 %v7061_v32, %v6476_v33  ;;  %4257 = vmatpush.bf16.msra.mxu2 %v6223_v44  ;;  %v6906_v30 = vld [vmem:[%s8226_s5 + $0x7ac] sm:$0xf0]  ;;  %v5331_v32 = vor.u32 %v6778_v26, %v5330_v24  ;;  %v5587_v33 = vor.u32 %v6842_v28, %v5586_v27  ;;  %v8783_v24 = vpop.f32.mrf.mxu3 }
 0x312   : > { %v5676_v46 = vld [vmem:[%s8226_s5 + $0x668] sm:$0xf0]  ;;  %v5042_v35 = vld [vmem:[%s8226_s5 + $0x150] sm:$0xf]  ;;  %v5843_v39 = vor.u32 %v6906_v30, %v5842_v29 }
 0x313   : > { %v6925_v47 = vld [vmem:[%s8226_s5 + $0x84c] sm:$0xf]  ;;  %v5679_v54 = vor.u32 %v6861_v37, %v5676_v46  ;;  %4270 = vmatpush.bf16.msra.mxu3 %v6479_v49  ;;  %v5298_v37 = vld [vmem:[%s8226_s5 + $0x350] sm:$0xf] }
 0x314   : > { %v5932_v48 = vld [vmem:[%s8226_s5 + $0x868] sm:$0xf0]  ;;  %v5554_v43 = vld [vmem:[%s8226_s5 + $0x550] sm:$0xf]  ;;  %v5299_v49 = vor.u32 %v6770_v40, %v5298_v37 }
 0x315   : > { %v6989_v51 = vld [vmem:[%s8226_s5 + $0xa4c] sm:$0xf]  ;;  %v5935_v57 = vor.u32 %v6925_v47, %v5932_v48  ;;  %4232 = vmatpush.bf16.msra.mxu0 %v5679_v54  ;;  %v6834_v44 = vld [vmem:[%s8226_s5 + $0x56c] sm:$0xf0]  ;;  %v5043_v48 = vor.u32 %v6706_v36, %v5042_v35  ;;  %v4042_v35 = vpop.f32.mrf.mxu1 }
 0x316   : > { %v6188_v45 = vld [vmem:[%s8226_s5 + $0xa68] sm:$0xf0]  ;;  %v5810_v46 = vld [vmem:[%s8226_s5 + $0x750] sm:$0xf] }
 0x317   : > { %v7053_v52 = vld [vmem:[%s8226_s5 + $0xc4c] sm:$0xf]  ;;  %v6191_v58 = vor.u32 %v6989_v51, %v6188_v45  ;;  %4245 = vmatpush.bf16.msra.mxu1 %v5935_v57  ;;  %v6898_v47 = vld [vmem:[%s8226_s5 + $0x76c] sm:$0xf0]  ;;  %v5555_v51 = vor.u32 %v6834_v44, %v5554_v43 }
 0x318   : > { %v6444_v53 = vld [vmem:[%s8226_s5 + $0xc68] sm:$0xf0]  ;;  %v5010_v45 = vld [vmem:[%s8226_s5 + $0x110] sm:$0xf]  ;;  %v5811_v54 = vor.u32 %v6898_v47, %v5810_v46 }
 0x319   : > { %v6853_v55 = vld [vmem:[%s8226_s5 + $0x60c] sm:$0xf]  ;;  %v6447_v63 = vor.u32 %v7053_v52, %v6444_v53  ;;  %4258 = vmatpush.bf16.msra.mxu2 %v6191_v58  ;;  %v6698_v52 = vld [vmem:[%s8226_s5 + $0x12c] sm:$0xf0] }
 0x31a   : > { %v5644_v56 = vld [vmem:[%s8226_s5 + $0x628] sm:$0xf0]  ;;  %v5266_v53 = vld [vmem:[%s8226_s5 + $0x310] sm:$0xf] }
 0x31b   : > { %v6917_v59 = vld [vmem:[%s8226_s5 + $0x80c] sm:$0xf]  ;;  %v5647_v8 = vor.u32 %v6853_v55, %v5644_v56  ;;  %4271 = vmatpush.bf16.msra.mxu3 %v6447_v63  ;;  %v6762_v55 = vld [vmem:[%s8226_s5 + $0x32c] sm:$0xf0] }
 0x31c   : > { %v5900_v60 = vld [vmem:[%s8226_s5 + $0x828] sm:$0xf0]  ;;  %v5522_v56 = vld [vmem:[%s8226_s5 + $0x510] sm:$0xf]  ;;  %v5267_v62 = vor.u32 %v6762_v55, %v5266_v53 }
 0x31d   : > { %v6981_v61 = vld [vmem:[%s8226_s5 + $0xa0c] sm:$0xf]  ;;  %v5903_v12 = vor.u32 %v6917_v59, %v5900_v60  ;;  %4233 = vmatpush.bf16.msra.mxu0 %v5647_v8  ;;  %v6826_v57 = vld [vmem:[%s8226_s5 + $0x52c] sm:$0xf0]  ;;  %v5011_v60 = vor.u32 %v6698_v52, %v5010_v45 }
 0x31e   : > { %v6156_v50 = vld [vmem:[%s8226_s5 + $0xa28] sm:$0xf0]  ;;  %v5778_v58 = vld [vmem:[%s8226_s5 + $0x710] sm:$0xf]  ;;  %v5523_v63 = vor.u32 %v6826_v57, %v5522_v56 }
 0x31f   : > { %v7045_v0 = vld [vmem:[%s8226_s5 + $0xc0c] sm:$0xf]  ;;  %v6159_v13 = vor.u32 %v6981_v61, %v6156_v50  ;;  %4246 = vmatpush.bf16.msra.mxu1 %v5903_v12  ;;  %v6890_v59 = vld [vmem:[%s8226_s5 + $0x72c] sm:$0xf0]  ;;  %v8763_v61 = vpop.f32.mrf.mxu0 }
 0x320   : > { %v6412_v1 = vld [vmem:[%s8226_s5 + $0xc28] sm:$0xf0]  ;;  %4234 = vmatmul.bf16.vlgmr.msra.gmra.mxu0 %v8321_v7  ;;  %v4978_v50 = vld [vmem:[%s8226_s5 + $0xd0] sm:$0xf]  ;;  %v5779_v3 = vor.u32 %v6890_v59, %v5778_v58  ;;  %v4068_v59 = vpop.f32.mrf.mxu3 }
 0x321   : > { %v6415_v16 = vor.u32 %v7045_v0, %v6412_v1  ;;  %4259 = vmatpush.bf16.msra.mxu2 %v6159_v13  ;;  %4278 = vmatpush.bf16.msrb.mxu0 %v5107_v17  ;;  %v6690_v0 = vld [vmem:[%s8226_s5 + $0xec] sm:$0xf0]  ;;  %v1190_v59 = vld [vmem:[#allocation2] sm:$0xff] }
 0x322   : > { %4247 = vmatmul.bf16.vlgmr.msra.gmra.mxu1 %v8391_v41  ;;  %v5234_v1 = vld [vmem:[%s8226_s5 + $0x2d0] sm:$0xf]  ;;  %v4979_v11 = vor.u32 %v6690_v0, %v4978_v50  ;;  %v4028_v50 = vadd.f32 %v8763_v61, %v8709_v34 }
 0x323   : > { %4272 = vmatpush.bf16.msra.mxu3 %v6415_v16  ;;  %4291 = vmatpush.bf16.msrb.mxu1 %v5363_v18  ;;  %v6754_v4 = vld [vmem:[%s8226_s5 + $0x2ec] sm:$0xf0] }
 0x324   : > { %4260 = vmatmul.bf16.vlgmr.msra.gmra.mxu2 %v8393_v42  ;;  %v6818_v8 = vld [vmem:[%s8226_s5 + $0x4ec] sm:$0xf0]  ;;  %v5235_v12 = vor.u32 %v6754_v4, %v5234_v1 }
 0x325   : > { %4304 = vmatpush.bf16.msrb.mxu2 %v5619_v19  ;;  %4279 = vmatpush.bf16.msrb.mxu0 %v5075_v31  ;;  %v5746_v9 = vld [vmem:[%s8226_s5 + $0x6d0] sm:$0xf]  ;;  %v5491_v13 = vor.u32 %v6818_v8, %v5490_v6 }
 0x326   : > { %4273 = vmatmul.bf16.vlgmr.msra.gmra.mxu3 %v8387_v38  ;;  %v4946_v15 = vld [vmem:[%s8226_s5 + $0x90] sm:$0xf]  ;;  %v5747_v18 = vor.u32 %v6882_v10, %v5746_v9  ;;  %v6718_v9 = vld [vmem:[%s8226_s5 + $0x1d4] sm:$0xf] }
 0x327   : > { %4317 = vmatpush.bf16.msrb.mxu3 %v5875_v25  ;;  %4292 = vmatpush.bf16.msrb.mxu1 %v5331_v32  ;;  %v6682_v16 = vld [vmem:[%s8226_s5 + $0xac] sm:$0xf0]  ;;  %v4029_v28 = vpop.f32.mrf.mxu0  ;;  %v5108_v10 = vld [vmem:[%s8226_s5 + $0x1f0] sm:$0xf0] }
 0x328   : > { %v5202_v17 = vld [vmem:[%s8226_s5 + $0x290] sm:$0xf]  ;;  %v4947_v27 = vor.u32 %v6682_v16, %v4946_v15 }
 0x329   : > { %4305 = vmatpush.bf16.msrb.mxu2 %v5587_v33  ;;  %4280 = vmatpush.bf16.msrb.mxu0 %v5043_v48  ;;  %v6746_v19 = vld [vmem:[%s8226_s5 + $0x2ac] sm:$0xf0] }
 0x32a   : > { %v5458_v20 = vld [vmem:[%s8226_s5 + $0x490] sm:$0xf]  ;;  %v5203_v29 = vor.u32 %v6746_v19, %v5202_v17  ;;  %v4041_v17 = vadd.f32 %v8768_v2, %v4028_v50 }
 0x32b   : > { %4318 = vmatpush.bf16.msrb.mxu3 %v5843_v39  ;;  %4293 = vmatpush.bf16.msrb.mxu1 %v5299_v49  ;;  %v6810_v23 = vld [vmem:[%s8226_s5 + $0x4ac] sm:$0xf0] }
 0x32c   : > { %v5714_v25 = vld [vmem:[%s8226_s5 + $0x690] sm:$0xf]  ;;  %v5459_v30 = vor.u32 %v6810_v23, %v5458_v20 }
 0x32d   : > { %4306 = vmatpush.bf16.msrb.mxu2 %v5555_v51  ;;  %4281 = vmatpush.bf16.msrb.mxu0 %v5011_v60  ;;  %v6874_v26 = vld [vmem:[%s8226_s5 + $0x6ac] sm:$0xf0] }
 0x32e   : > { %v4914_v31 = vld [vmem:[%s8226_s5 + $0x50] sm:$0xf]  ;;  %v5715_v36 = vor.u32 %v6874_v26, %v5714_v25  ;;  %v6710_v25 = vld [vmem:[%s8226_s5 + $0x194] sm:$0xf] }
 0x32f   : > { %4319 = vmatpush.bf16.msrb.mxu3 %v5811_v54  ;;  %4294 = vmatpush.bf16.msrb.mxu1 %v5267_v62  ;;  %v6674_v32 = vld [vmem:[%s8226_s5 + $0x6c] sm:$0xf0]  ;;  %v4055_v54 = vpop.f32.mrf.mxu2  ;;  %v5076_v26 = vld [vmem:[%s8226_s5 + $0x1b0] sm:$0xf0] }
 0x330   : > { %v5170_v33 = vld [vmem:[%s8226_s5 + $0x250] sm:$0xf]  ;;  %v4915_v46 = vor.u32 %v6674_v32, %v4914_v31  ;;  %v4054_v32 = vadd.f32 %v8775_v14, %v4041_v17  ;;  %v4079_v54 = vpop.f32.mrf.mxu0 }
 0x331   : > { %4307 = vmatpush.bf16.msrb.mxu2 %v5523_v63  ;;  %4282 = vmatpush.bf16.msrb.mxu0 %v4979_v11  ;;  %v6738_v37 = vld [vmem:[%s8226_s5 + $0x26c] sm:$0xf0] }
 0x332   : > { %v5426_v39 = vld [vmem:[%s8226_s5 + $0x450] sm:$0xf]  ;;  %v5171_v49 = vor.u32 %v6738_v37, %v5170_v33  ;;  %v5079_v33 = vor.u32 %v6710_v25, %v5076_v26  ;;  %v6678_v25 = vld [vmem:[%s8226_s5 + $0x94] sm:$0xf] }
 0x333   : > { %4320 = vmatpush.bf16.msrb.mxu3 %v5779_v3  ;;  %4295 = vmatpush.bf16.msrb.mxu1 %v5235_v12  ;;  %v6802_v40 = vld [vmem:[%s8226_s5 + $0x46c] sm:$0xf0]  ;;  %v4948_v26 = vld [vmem:[%s8226_s5 + $0xb0] sm:$0xf0] }
 0x334   : > { %v5682_v43 = vld [vmem:[%s8226_s5 + $0x650] sm:$0xf]  ;;  %v5427_v51 = vor.u32 %v6802_v40, %v5426_v39  ;;  %v6702_v39 = vld [vmem:[%s8226_s5 + $0x154] sm:$0xf] }
 0x335   : > { %4308 = vmatpush.bf16.msrb.mxu2 %v5491_v13  ;;  %v6866_v44 = vld [vmem:[%s8226_s5 + $0x66c] sm:$0xf0]  ;;  %4283 = vmatpush.bf16.msrb.mxu0 %v4947_v27  ;;  %v5044_v40 = vld [vmem:[%s8226_s5 + $0x170] sm:$0xf0] }
 0x336   : > { %v4882_v47 = vld [vmem:[%s8226_s5 + $0x10] sm:$0xf]  ;;  %v5683_v55 = vor.u32 %v6866_v44, %v5682_v43 }
 0x337   : > { %4321 = vmatpush.bf16.msrb.mxu3 %v5747_v18  ;;  %v6666_v48 = vld [vmem:[%s8226_s5 + $0x2c] sm:$0xf0]  ;;  %4296 = vmatpush.bf16.msrb.mxu1 %v5203_v29  ;;  %v5111_v18 = vor.u32 %v6718_v9, %v5108_v10  ;;  %v6686_v9 = vld [vmem:[%s8226_s5 + $0xd4] sm:$0xf] }
 0x338   : > { %v5138_v45 = vld [vmem:[%s8226_s5 + $0x210] sm:$0xf]  ;;  %v4883_v0 = vor.u32 %v6666_v48, %v4882_v47  ;;  %v4980_v10 = vld [vmem:[%s8226_s5 + $0xf0] sm:$0xf0] }
 0x339   : > { %4309 = vmatpush.bf16.msrb.mxu2 %v5459_v30  ;;  %v6730_v52 = vld [vmem:[%s8226_s5 + $0x22c] sm:$0xf0]  ;;  %4284 = vmatpush.bf16.msrb.mxu0 %v4915_v46 }
 0x33a   : > { %v5394_v53 = vld [vmem:[%s8226_s5 + $0x410] sm:$0xf]  ;;  %v5139_v6 = vor.u32 %v6730_v52, %v5138_v45 }
 0x33b   : > { %4322 = vmatpush.bf16.msrb.mxu3 %v5715_v36  ;;  %v6794_v56 = vld [vmem:[%s8226_s5 + $0x42c] sm:$0xf0]  ;;  %4297 = vmatpush.bf16.msrb.mxu1 %v5171_v49  ;;  %v4067_v49 = vadd.f32 %v8783_v24, %v4054_v32  ;;  %v4092_v24 = vpop.f32.mrf.mxu1 }
 0x33c   : > { %v5650_v57 = vld [vmem:[%s8226_s5 + $0x610] sm:$0xf]  ;;  %v5395_v8 = vor.u32 %v6794_v56, %v5394_v53  ;;  %v5012_v56 = vld [vmem:[%s8226_s5 + $0x130] sm:$0xf0] }
 0x33d   : > { %v6858_v58 = vld [vmem:[%s8226_s5 + $0x62c] sm:$0xf0]  ;;  %4310 = vmatpush.bf16.msrb.mxu2 %v5427_v51  ;;  %4285 = vmatpush.bf16.msrb.mxu0 %v4883_v0  ;;  %v5047_v51 = vor.u32 %v6702_v39, %v5044_v40 }
 0x33e   : > { %v6130_v60 = vld [vmem:[%s8226_s5 + $0x9d0] sm:$0xf]  ;;  %v5651_v34 = vor.u32 %v6858_v58, %v5650_v57  ;;  %v4080_v57 = vadd.f32 %v4079_v54, %v4067_v49 }
 0x33f   : > { %v6978_v62 = vld [vmem:[%s8226_s5 + $0x9ec] sm:$0xf0]  ;;  %4323 = vmatpush.bf16.msrb.mxu3 %v5683_v55  ;;  %4298 = vmatpush.bf16.msrb.mxu1 %v5139_v6  ;;  %v6694_v55 = vld [vmem:[%s8226_s5 + $0x114] sm:$0xf] }
 0x340   : > { %v6386_v63 = vld [vmem:[%s8226_s5 + $0xbd0] sm:$0xf]  ;;  %v6131_v61 = vor.u32 %v6978_v62, %v6130_v60  ;;  %4286 = vmatmul.bf16.vlgmr.msrb.gmra.mxu0 %v8332_v21 }
 0x341   : > { %v7042_v1 = vld [vmem:[%s8226_s5 + $0xbec] sm:$0xf0]  ;;  %4311 = vmatpush.bf16.msrb.mxu2 %v5395_v8 }
 0x342   : > { %v6642_v3 = vld [vmem:[%s8226_s5 + $0xdd0] sm:$0xf]  ;;  %v6387_v11 = vor.u32 %v7042_v1, %v6386_v63  ;;  %4330 = vmatpush.bf16.msra.mxu0 %v6131_v61  ;;  %4299 = vmatmul.bf16.vlgmr.msrb.gmra.mxu1 %v8335_v22  ;;  %v5015_v1 = vor.u32 %v6694_v55, %v5012_v56  ;;  %v6662_v55 = vld [vmem:[%s8226_s5 + $0x14] sm:$0xf] }
 0x343   : > { %v7106_v4 = vld [vmem:[%s8226_s5 + $0xdec] sm:$0xf0]  ;;  %4324 = vmatpush.bf16.msrb.mxu3 %v5651_v34  ;;  %v4884_v56 = vld [vmem:[%s8226_s5 + $0x30] sm:$0xf0] }
 0x344   : > { %v6643_v12 = vor.u32 %v7106_v4, %v6642_v3  ;;  %v6098_v13 = vld [vmem:[%s8226_s5 + $0x990] sm:$0xf]  ;;  %4343 = vmatpush.bf16.msra.mxu1 %v6387_v11  ;;  %4312 = vmatmul.bf16.vlgmr.msrb.gmra.mxu2 %v8318_v5  ;;  %v4093_v3 = vadd.f32 %v4092_v24, %v4080_v57  ;;  %v6846_v24 = vld [vmem:[%s8226_s5 + $0x5d4] sm:$0xf] }
 0x345   : > { %v6970_v15 = vld [vmem:[%s8226_s5 + $0x9ac] sm:$0xf0] }
 0x346   : > { %v6354_v16 = vld [vmem:[%s8226_s5 + $0xb90] sm:$0xf]  ;;  %v6099_v27 = vor.u32 %v6970_v15, %v6098_v13  ;;  %4356 = vmatpush.bf16.msra.mxu2 %v6643_v12  ;;  %4325 = vmatmul.bf16.vlgmr.msrb.gmra.mxu3 %v8321_v7  ;;  %v4643_v34 = vadd.f32 %v4093_v3, %v1190_v59  ;;  %v5364_v59 = vld [vmem:[%s8226_s5 + $0x3f0] sm:$0xf0] }
 0x347   : > { %v7034_v19 = vld [vmem:[%s8226_s5 + $0xbac] sm:$0xf0]  ;;  %4369 = vmatpush.bf16.msra.mxu3 %v5111_v18  ;;  %v4983_v18 = vor.u32 %v6686_v9, %v4980_v10 }
 0x348   : > { %v6610_v20 = vld [vmem:[%s8226_s5 + $0xd90] sm:$0xf]  ;;  %v6355_v2 = vor.u32 %v7034_v19, %v6354_v16  ;;  %4331 = vmatpush.bf16.msra.mxu0 %v6099_v27  ;;  %4651 = vst [vmem:[#allocation2] sm:$0xff] %v4643_v34  ;;  %v8862_v27 = vpop.f32.mrf.mxu3 }
 0x349   : > { %v7098_v23 = vld [vmem:[%s8226_s5 + $0xdac] sm:$0xf0] }
 0x34a   : > { %v6611_v28 = vor.u32 %v7098_v23, %v6610_v20  ;;  %v6066_v29 = vld [vmem:[%s8226_s5 + $0x950] sm:$0xf]  ;;  %4344 = vmatpush.bf16.msra.mxu1 %v6355_v2  ;;  %v8858_v23 = vpop.f32.mrf.mxu2  ;;  %v4081_v2 = vpop.f32.mrf.mxu0 }
 0x34b   : > { %v6962_v30 = vld [vmem:[%s8226_s5 + $0x96c] sm:$0xf0]  ;;  %4370 = vmatpush.bf16.msra.mxu3 %v5079_v33  ;;  %v6766_v2 = vld [vmem:[%s8226_s5 + $0x354] sm:$0xf] }
 0x34c   : > { %v6322_v31 = vld [vmem:[%s8226_s5 + $0xb50] sm:$0xf]  ;;  %v6067_v14 = vor.u32 %v6962_v30, %v6066_v29  ;;  %4357 = vmatpush.bf16.msra.mxu2 %v6611_v28  ;;  %v4094_v29 = vpop.f32.mrf.mxu1 }
 0x34d   : > { %v7026_v35 = vld [vmem:[%s8226_s5 + $0xb6c] sm:$0xf0]  ;;  %v6830_v29 = vld [vmem:[%s8226_s5 + $0x554] sm:$0xf] }
 0x34e   : > { %v6578_v36 = vld [vmem:[%s8226_s5 + $0xd50] sm:$0xf]  ;;  %v6323_v43 = vor.u32 %v7026_v35, %v6322_v31  ;;  %4332 = vmatpush.bf16.msra.mxu0 %v6067_v14  ;;  %v6670_v14 = vld [vmem:[%s8226_s5 + $0x54] sm:$0xf] }
 0x34f   : > { %v7090_v37 = vld [vmem:[%s8226_s5 + $0xd6c] sm:$0xf0]  ;;  %4371 = vmatpush.bf16.msra.mxu3 %v5047_v51 }
 0x350   : > { %v6579_v44 = vor.u32 %v7090_v37, %v6578_v36  ;;  %v6034_v46 = vld [vmem:[%s8226_s5 + $0x910] sm:$0xf]  ;;  %4345 = vmatpush.bf16.msra.mxu1 %v6323_v43  ;;  %v4951_v36 = vor.u32 %v6678_v25, %v4948_v26  ;;  %v4916_v43 = vld [vmem:[%s8226_s5 + $0x70] sm:$0xf0] }
 0x351   : > { %v6954_v47 = vld [vmem:[%s8226_s5 + $0x92c] sm:$0xf0] }
 0x352   : > { %v6290_v48 = vld [vmem:[%s8226_s5 + $0xb10] sm:$0xf]  ;;  %v6035_v58 = vor.u32 %v6954_v47, %v6034_v46  ;;  %4358 = vmatpush.bf16.msra.mxu2 %v6579_v44  ;;  %v4107_v57 = vpop.f32.mrf.mxu2 }
 0x353   : > { %v7018_v45 = vld [vmem:[%s8226_s5 + $0xb2c] sm:$0xf0]  ;;  %4372 = vmatpush.bf16.msra.mxu3 %v5015_v1  ;;  %v5236_v57 = vld [vmem:[%s8226_s5 + $0x2f0] sm:$0xf0] }
 0x354   : > { %v6546_v52 = vld [vmem:[%s8226_s5 + $0xd10] sm:$0xf]  ;;  %v6291_v60 = vor.u32 %v7018_v45, %v6290_v48  ;;  %4333 = vmatpush.bf16.msra.mxu0 %v6035_v58  ;;  %v6782_v58 = vld [vmem:[%s8226_s5 + $0x3d4] sm:$0xf] }
 0x355   : > { %v7082_v53 = vld [vmem:[%s8226_s5 + $0xd2c] sm:$0xf0]  ;;  %v5367_v9 = vor.u32 %v6782_v58, %v5364_v59  ;;  %v6814_v58 = vld [vmem:[%s8226_s5 + $0x4d4] sm:$0xf]  ;;  %v8921_v59 = vpop.f32.mrf.mxu1 }
 0x356   : > { %v6547_v62 = vor.u32 %v7082_v53, %v6546_v52  ;;  %v6002_v63 = vld [vmem:[%s8226_s5 + $0x8d0] sm:$0xf]  ;;  %4346 = vmatpush.bf16.msra.mxu1 %v6291_v60  ;;  %v4919_v53 = vor.u32 %v6670_v14, %v4916_v43  ;;  %v4120_v60 = vpop.f32.mrf.mxu3  ;;  %v6758_v14 = vld [vmem:[%s8226_s5 + $0x314] sm:$0xf] }
 0x357   : > { %v6946_v50 = vld [vmem:[%s8226_s5 + $0x8ec] sm:$0xf0]  ;;  %4373 = vmatpush.bf16.msra.mxu3 %v4983_v18  ;;  %v6966_v18 = vld [vmem:[%s8226_s5 + $0x994] sm:$0xf] }
 0x358   : > { %v6258_v0 = vld [vmem:[%s8226_s5 + $0xad0] sm:$0xf]  ;;  %v6003_v61 = vor.u32 %v6946_v50, %v6002_v63  ;;  %4359 = vmatpush.bf16.msra.mxu2 %v6547_v62  ;;  %v5620_v63 = vld [vmem:[%s8226_s5 + $0x5f0] sm:$0xf0] }
 0x359   : > { %v7010_v4 = vld [vmem:[%s8226_s5 + $0xaec] sm:$0xf0]  ;;  %v6910_v50 = vld [vmem:[%s8226_s5 + $0x7d4] sm:$0xf]  ;;  %v5623_v10 = vor.u32 %v6846_v24, %v5620_v63 }
 0x35a   : > { %v6514_v6 = vld [vmem:[%s8226_s5 + $0xcd0] sm:$0xf]  ;;  %v6259_v12 = vor.u32 %v7010_v4, %v6258_v0  ;;  %4334 = vmatpush.bf16.msra.mxu0 %v6003_v61  ;;  %v5876_v0 = vld [vmem:[%s8226_s5 + $0x7f0] sm:$0xf0] }
 0x35b   : > { %v7074_v8 = vld [vmem:[%s8226_s5 + $0xcec] sm:$0xf0]  ;;  %4374 = vmatpush.bf16.msra.mxu3 %v4951_v36  ;;  %v6974_v4 = vld [vmem:[%s8226_s5 + $0x9d4] sm:$0xf]  ;;  %v5879_v34 = vor.u32 %v6910_v50, %v5876_v0 }
 0x35c   : > { %v5970_v11 = vld [vmem:[%s8226_s5 + $0x890] sm:$0xf]  ;;  %v6515_v13 = vor.u32 %v7074_v8, %v6514_v6  ;;  %4347 = vmatpush.bf16.msra.mxu1 %v6259_v12  ;;  %v6132_v6 = vld [vmem:[%s8226_s5 + $0x9f0] sm:$0xf0]  ;;  %v4887_v8 = vor.u32 %v6662_v55, %v4884_v56 }
 0x35d   : > { %v6938_v15 = vld [vmem:[%s8226_s5 + $0x8ac] sm:$0xf0]  ;;  %v6774_v61 = vld [vmem:[%s8226_s5 + $0x394] sm:$0xf] }
 0x35e   : > { %v6226_v16 = vld [vmem:[%s8226_s5 + $0xa90] sm:$0xf]  ;;  %v5971_v28 = vor.u32 %v6938_v15, %v5970_v11  ;;  %4360 = vmatpush.bf16.msra.mxu2 %v6515_v13  ;;  %v5332_v11 = vld [vmem:[%s8226_s5 + $0x3b0] sm:$0xf0]  ;;  %v6135_v13 = vor.u32 %v6974_v4, %v6132_v6 }
 0x35f   : > { %v7002_v17 = vld [vmem:[%s8226_s5 + $0xaac] sm:$0xf0]  ;;  %4375 = vmatpush.bf16.msra.mxu3 %v4919_v53  ;;  %v6838_v12 = vld [vmem:[%s8226_s5 + $0x594] sm:$0xf]  ;;  %v8916_v53 = vpop.f32.mrf.mxu0 }
 0x360   : > { %v6482_v19 = vld [vmem:[%s8226_s5 + $0xc90] sm:$0xf]  ;;  %v6227_v30 = vor.u32 %v7002_v17, %v6226_v16  ;;  %4335 = vmatpush.bf16.msra.mxu0 %v5971_v28  ;;  %v5588_v15 = vld [vmem:[%s8226_s5 + $0x5b0] sm:$0xf0] }
 0x361   : > { %v7066_v20 = vld [vmem:[%s8226_s5 + $0xcac] sm:$0xf0]  ;;  %v6902_v16 = vld [vmem:[%s8226_s5 + $0x794] sm:$0xf]  ;;  %v5591_v25 = vor.u32 %v6838_v12, %v5588_v15 }
 0x362   : > { %v6483_v31 = vor.u32 %v7066_v20, %v6482_v19  ;;  %v5938_v32 = vld [vmem:[%s8226_s5 + $0x850] sm:$0xf]  ;;  %4348 = vmatpush.bf16.msra.mxu1 %v6227_v30  ;;  %v5844_v17 = vld [vmem:[%s8226_s5 + $0x7b0] sm:$0xf0]  ;;  %v5335_v20 = vor.u32 %v6774_v61, %v5332_v11 }
 0x363   : > { %v6930_v33 = vld [vmem:[%s8226_s5 + $0x86c] sm:$0xf0]  ;;  %v6100_v19 = vld [vmem:[%s8226_s5 + $0x9b0] sm:$0xf0]  ;;  %4376 = vmatpush.bf16.msra.mxu3 %v4887_v8  ;;  %v5847_v26 = vor.u32 %v6902_v16, %v5844_v17 }
 0x364   : > { %v6194_v35 = vld [vmem:[%s8226_s5 + $0xa50] sm:$0xf]  ;;  %v5939_v44 = vor.u32 %v6930_v33, %v5938_v32  ;;  %4361 = vmatpush.bf16.msra.mxu2 %v6483_v31  ;;  %v5300_v28 = vld [vmem:[%s8226_s5 + $0x370] sm:$0xf0]  ;;  %v6103_v30 = vor.u32 %v6966_v18, %v6100_v19 }
 0x365   : > { %v6994_v37 = vld [vmem:[%s8226_s5 + $0xa6c] sm:$0xf0]  ;;  %v5556_v31 = vld [vmem:[%s8226_s5 + $0x570] sm:$0xf0] }
 0x366   : > { %v6450_v39 = vld [vmem:[%s8226_s5 + $0xc50] sm:$0xf]  ;;  %v6195_v48 = vor.u32 %v6994_v37, %v6194_v35  ;;  %4336 = vmatpush.bf16.msra.mxu0 %v5939_v44  ;;  %v6894_v32 = vld [vmem:[%s8226_s5 + $0x754] sm:$0xf]  ;;  %v5303_v37 = vor.u32 %v6766_v2, %v5300_v28  ;;  %4377 = vmatmul.bf16.vlgmr.msra.gmra.mxu3 %v8332_v21  ;;  %v4146_v28 = vpop.f32.mrf.mxu1 }
 0x367   : > { %v7058_v40 = vld [vmem:[%s8226_s5 + $0xc6c] sm:$0xf0]  ;;  %4421 = vmatpush.bf16.msrb.mxu3 %v6135_v13  ;;  %v5812_v33 = vld [vmem:[%s8226_s5 + $0x770] sm:$0xf0]  ;;  %v8936_v13 = vpop.f32.mrf.mxu3  ;;  %v4133_v18 = vpop.f32.mrf.mxu0 }
 0x368   : > { %v5906_v46 = vld [vmem:[%s8226_s5 + $0x810] sm:$0xf]  ;;  %v6451_v49 = vor.u32 %v7058_v40, %v6450_v39  ;;  %4349 = vmatpush.bf16.msra.mxu1 %v6195_v48  ;;  %v6958_v35 = vld [vmem:[%s8226_s5 + $0x954] sm:$0xf]  ;;  %v5559_v39 = vor.u32 %v6830_v29, %v5556_v31  ;;  %v5815_v40 = vor.u32 %v6894_v32, %v5812_v33 }
 0x369   : > { %v6922_v47 = vld [vmem:[%s8226_s5 + $0x82c] sm:$0xf0]  ;;  %v6068_v36 = vld [vmem:[%s8226_s5 + $0x970] sm:$0xf0] }
 0x36a   : > { %v6162_v51 = vld [vmem:[%s8226_s5 + $0xa10] sm:$0xf]  ;;  %v5907_v62 = vor.u32 %v6922_v47, %v5906_v46  ;;  %4362 = vmatpush.bf16.msra.mxu2 %v6451_v49  ;;  %v5268_v43 = vld [vmem:[%s8226_s5 + $0x330] sm:$0xf0]  ;;  %v6071_v46 = vor.u32 %v6958_v35, %v6068_v36  ;;  %v4119_v36 = vadd.f32 %v8862_v27, %v8858_v23 }
 0x36b   : > { %v6986_v45 = vld [vmem:[%s8226_s5 + $0xa2c] sm:$0xf0]  ;;  %v6822_v44 = vld [vmem:[%s8226_s5 + $0x514] sm:$0xf]  ;;  %4422 = vmatpush.bf16.msrb.mxu3 %v6103_v30 }
 0x36c   : > { %v6418_v52 = vld [vmem:[%s8226_s5 + $0xc10] sm:$0xf]  ;;  %v6163_v1 = vor.u32 %v6986_v45, %v6162_v51  ;;  %4337 = vmatpush.bf16.msra.mxu0 %v5907_v62  ;;  %v5524_v47 = vld [vmem:[%s8226_s5 + $0x530] sm:$0xf0] }
 0x36d   : > { %v7050_v54 = vld [vmem:[%s8226_s5 + $0xc2c] sm:$0xf0]  ;;  %v6886_v48 = vld [vmem:[%s8226_s5 + $0x714] sm:$0xf] }
 0x36e   : > { %v6419_v3 = vor.u32 %v7050_v54, %v6418_v52  ;;  %4350 = vmatpush.bf16.msra.mxu1 %v6163_v1  ;;  %v5780_v49 = vld [vmem:[%s8226_s5 + $0x730] sm:$0xf0]  ;;  %v5271_v52 = vor.u32 %v6758_v14, %v5268_v43  ;;  %v5527_v54 = vor.u32 %v6822_v44, %v5524_v47 }
 0x36f   : > { %4338 = vmatmul.bf16.vlgmr.msra.gmra.mxu0 %v8391_v41  ;;  %v6950_v51 = vld [vmem:[%s8226_s5 + $0x914] sm:$0xf]  ;;  %v5783_v55 = vor.u32 %v6886_v48, %v5780_v49  ;;  %4423 = vmatpush.bf16.msrb.mxu3 %v6071_v46 }
 0x370   : > { %4363 = vmatpush.bf16.msra.mxu2 %v6419_v3  ;;  %4382 = vmatpush.bf16.msrb.mxu0 %v5367_v9  ;;  %v6036_v45 = vld [vmem:[%s8226_s5 + $0x930] sm:$0xf0] }
 0x371   : > { %4351 = vmatmul.bf16.vlgmr.msra.gmra.mxu1 %v8393_v42  ;;  %v6750_v56 = vld [vmem:[%s8226_s5 + $0x2d4] sm:$0xf]  ;;  %v6039_v24 = vor.u32 %v6950_v51, %v6036_v45  ;;  %v4172_v45 = vpop.f32.mrf.mxu3 }
 0x372   : > { %4395 = vmatpush.bf16.msrb.mxu1 %v5623_v10  ;;  %v5492_v60 = vld [vmem:[%s8226_s5 + $0x4f0] sm:$0xf0]  ;;  %v5239_v1 = vor.u32 %v6750_v56, %v5236_v57  ;;  %v8931_v10 = vpop.f32.mrf.mxu2  ;;  %v4132_v56 = vadd.f32 %v8916_v53, %v4119_v36 }
 0x373   : > { %4364 = vmatmul.bf16.vlgmr.msra.gmra.mxu2 %v8387_v38  ;;  %v6878_v62 = vld [vmem:[%s8226_s5 + $0x6d4] sm:$0xf]  ;;  %v5495_v3 = vor.u32 %v6814_v58, %v5492_v60  ;;  %4424 = vmatpush.bf16.msrb.mxu3 %v6039_v24  ;;  %v5114_v24 = vld [vmem:[%s8226_s5 + $0x1d8] sm:$0xf] }
 0x374   : > { %4408 = vmatpush.bf16.msrb.mxu2 %v5879_v34  ;;  %4383 = vmatpush.bf16.msrb.mxu0 %v5335_v20  ;;  %v5748_v63 = vld [vmem:[%s8226_s5 + $0x6f0] sm:$0xf0]  ;;  %v6723_v60 = vld [vmem:[%s8226_s5 + $0x1f4] sm:$0xf0] }
 0x375   : > { %v6942_v50 = vld [vmem:[%s8226_s5 + $0x8d4] sm:$0xf]  ;;  %v5751_v4 = vor.u32 %v6878_v62, %v5748_v63 }
 0x376   : > { %4396 = vmatpush.bf16.msrb.mxu1 %v5591_v25  ;;  %v6004_v0 = vld [vmem:[%s8226_s5 + $0x8f0] sm:$0xf0] }
 0x377   : > { %v6742_v6 = vld [vmem:[%s8226_s5 + $0x294] sm:$0xf]  ;;  %v6007_v34 = vor.u32 %v6942_v50, %v6004_v0  ;;  %v5370_v50 = vld [vmem:[%s8226_s5 + $0x3d8] sm:$0xf] }
 0x378   : > { %4409 = vmatpush.bf16.msrb.mxu2 %v5847_v26  ;;  %4384 = vmatpush.bf16.msrb.mxu0 %v5303_v37  ;;  %v5204_v8 = vld [vmem:[%s8226_s5 + $0x2b0] sm:$0xf0]  ;;  %v6787_v0 = vld [vmem:[%s8226_s5 + $0x3f4] sm:$0xf0] }
 0x379   : > { %v6806_v9 = vld [vmem:[%s8226_s5 + $0x494] sm:$0xf]  ;;  %v5207_v17 = vor.u32 %v6742_v6, %v5204_v8  ;;  %4425 = vmatpush.bf16.msrb.mxu3 %v6007_v34  ;;  %v4145_v34 = vadd.f32 %v8921_v59, %v4132_v56 }
 0x37a   : > { %4397 = vmatpush.bf16.msrb.mxu1 %v5559_v39  ;;  %v5460_v61 = vld [vmem:[%s8226_s5 + $0x4b0] sm:$0xf0]  ;;  %v4159_v23 = vpop.f32.mrf.mxu2 }
 0x37b   : > { %v6870_v11 = vld [vmem:[%s8226_s5 + $0x694] sm:$0xf]  ;;  %v5463_v19 = vor.u32 %v6806_v9, %v5460_v61  ;;  %v5371_v61 = vor.u32 %v6787_v0, %v5370_v50  ;;  %v1191_v23 = vld [vmem:[#allocation2 + $0x18] sm:$0xff] }
 0x37c   : > { %4410 = vmatpush.bf16.msrb.mxu2 %v5815_v40  ;;  %4385 = vmatpush.bf16.msrb.mxu0 %v5271_v52  ;;  %v5716_v12 = vld [vmem:[%s8226_s5 + $0x6b0] sm:$0xf0]  ;;  %v5242_v50 = vld [vmem:[%s8226_s5 + $0x2d8] sm:$0xf] }
 0x37d   : > { %v6934_v15 = vld [vmem:[%s8226_s5 + $0x894] sm:$0xf]  ;;  %v5719_v20 = vor.u32 %v6870_v11, %v5716_v12  ;;  %v5082_v12 = vld [vmem:[%s8226_s5 + $0x198] sm:$0xf] }
 0x37e   : > { %4398 = vmatpush.bf16.msrb.mxu1 %v5527_v54  ;;  %v5972_v16 = vld [vmem:[%s8226_s5 + $0x8b0] sm:$0xf0]  ;;  %v6755_v0 = vld [vmem:[%s8226_s5 + $0x2f4] sm:$0xf0] }
 0x37f   : > { %v6734_v25 = vld [vmem:[%s8226_s5 + $0x254] sm:$0xf]  ;;  %v5975_v29 = vor.u32 %v6934_v15, %v5972_v16  ;;  %v6715_v15 = vld [vmem:[%s8226_s5 + $0x1b4] sm:$0xf0] }
 0x380   : > { %4411 = vmatpush.bf16.msrb.mxu2 %v5783_v55  ;;  %4386 = vmatpush.bf16.msrb.mxu0 %v5239_v1  ;;  %v5172_v26 = vld [vmem:[%s8226_s5 + $0x270] sm:$0xf0]  ;;  %v5338_v16 = vld [vmem:[%s8226_s5 + $0x398] sm:$0xf] }
 0x381   : > { %v6798_v2 = vld [vmem:[%s8226_s5 + $0x454] sm:$0xf]  ;;  %v5175_v37 = vor.u32 %v6734_v25, %v5172_v26  ;;  %4426 = vmatpush.bf16.msrb.mxu3 %v5975_v29 }
 0x382   : > { %4399 = vmatpush.bf16.msrb.mxu1 %v5495_v3  ;;  %v5428_v30 = vld [vmem:[%s8226_s5 + $0x470] sm:$0xf0] }
 0x383   : > { %v6862_v31 = vld [vmem:[%s8226_s5 + $0x654] sm:$0xf]  ;;  %v5431_v14 = vor.u32 %v6798_v2, %v5428_v30  ;;  %v4158_v2 = vadd.f32 %v8931_v10, %v4145_v34  ;;  %v5050_v30 = vld [vmem:[%s8226_s5 + $0x158] sm:$0xf] }
 0x384   : > { %4412 = vmatpush.bf16.msrb.mxu2 %v5751_v4  ;;  %v5684_v32 = vld [vmem:[%s8226_s5 + $0x670] sm:$0xf0]  ;;  %4387 = vmatpush.bf16.msrb.mxu0 %v5207_v17  ;;  %v5115_v4 = vor.u32 %v6723_v60, %v5114_v24  ;;  %v6779_v17 = vld [vmem:[%s8226_s5 + $0x3b4] sm:$0xf0] }
 0x385   : > { %v6926_v33 = vld [vmem:[%s8226_s5 + $0x854] sm:$0xf]  ;;  %v5687_v43 = vor.u32 %v6862_v31, %v5684_v32  ;;  %v5339_v28 = vor.u32 %v6779_v17, %v5338_v16  ;;  %v6707_v31 = vld [vmem:[%s8226_s5 + $0x174] sm:$0xf0] }
 0x386   : > { %v5940_v35 = vld [vmem:[%s8226_s5 + $0x870] sm:$0xf0]  ;;  %4400 = vmatpush.bf16.msrb.mxu1 %v5463_v19  ;;  %v5083_v19 = vor.u32 %v6715_v15, %v5082_v12  ;;  %v5306_v32 = vld [vmem:[%s8226_s5 + $0x358] sm:$0xf]  ;;  %v5051_v36 = vor.u32 %v6707_v31, %v5050_v30  ;;  %v9014_v12 = vpop.f32.mrf.mxu2  ;;  %v9016_v15 = vpop.f32.mrf.mxu3 }
 0x387   : > { %v6726_v39 = vld [vmem:[%s8226_s5 + $0x214] sm:$0xf]  ;;  %v5943_v27 = vor.u32 %v6926_v33, %v5940_v35  ;;  %v6771_v33 = vld [vmem:[%s8226_s5 + $0x374] sm:$0xf0] }
 0x388   : > { %v5140_v40 = vld [vmem:[%s8226_s5 + $0x230] sm:$0xf0]  ;;  %4413 = vmatpush.bf16.msrb.mxu2 %v5719_v20  ;;  %4388 = vmatpush.bf16.msrb.mxu0 %v5175_v37  ;;  %v5210_v16 = vld [vmem:[%s8226_s5 + $0x298] sm:$0xf] }
 0x389   : > { %v6790_v44 = vld [vmem:[%s8226_s5 + $0x414] sm:$0xf]  ;;  %v5143_v57 = vor.u32 %v6726_v39, %v5140_v40  ;;  %4427 = vmatpush.bf16.msrb.mxu3 %v5943_v27  ;;  %v4183_v27 = vpop.f32.mrf.mxu0  ;;  %v6747_v17 = vld [vmem:[%s8226_s5 + $0x2b4] sm:$0xf0] }
 0x38a   : > { %v5396_v46 = vld [vmem:[%s8226_s5 + $0x430] sm:$0xf0]  ;;  %4401 = vmatpush.bf16.msrb.mxu1 %v5431_v14  ;;  %v4171_v14 = vadd.f32 %v8936_v13, %v4158_v2  ;;  %v4922_v31 = vld [vmem:[%s8226_s5 + $0x58] sm:$0xf] }
 0x38b   : > { %v6854_v47 = vld [vmem:[%s8226_s5 + $0x614] sm:$0xf]  ;;  %v5399_v62 = vor.u32 %v6790_v44, %v5396_v46  ;;  %v5018_v46 = vld [vmem:[%s8226_s5 + $0x118] sm:$0xf] }
 0x38c   : > { %v5652_v48 = vld [vmem:[%s8226_s5 + $0x630] sm:$0xf0]  ;;  %4414 = vmatpush.bf16.msrb.mxu2 %v5687_v43  ;;  %4389 = vmatpush.bf16.msrb.mxu0 %v5143_v57  ;;  %v5307_v43 = vor.u32 %v6771_v33, %v5306_v32  ;;  %v9001_v57 = vpop.f32.mrf.mxu1  ;;  %v6675_v32 = vld [vmem:[%s8226_s5 + $0x74] sm:$0xf0] }
 0x38d   : > { %v6918_v49 = vld [vmem:[%s8226_s5 + $0x814] sm:$0xf]  ;;  %v5655_v63 = vor.u32 %v6854_v47, %v5652_v48  ;;  %v6699_v47 = vld [vmem:[%s8226_s5 + $0x134] sm:$0xf0] }
 0x38e   : > { %v5908_v51 = vld [vmem:[%s8226_s5 + $0x830] sm:$0xf0]  ;;  %4402 = vmatpush.bf16.msrb.mxu1 %v5399_v62  ;;  %v5274_v48 = vld [vmem:[%s8226_s5 + $0x318] sm:$0xf] }
 0x38f   : > { %v7038_v52 = vld [vmem:[%s8226_s5 + $0xbd4] sm:$0xf]  ;;  %v5911_v53 = vor.u32 %v6918_v49, %v5908_v51  ;;  %4390 = vmatmul.bf16.vlgmr.msrb.gmra.mxu0 %v8335_v22  ;;  %v6763_v49 = vld [vmem:[%s8226_s5 + $0x334] sm:$0xf0]  ;;  %v4184_v51 = vadd.f32 %v4183_v27, %v4171_v14 }
 0x390   : > { %v6388_v54 = vld [vmem:[%s8226_s5 + $0xbf0] sm:$0xf0]  ;;  %4415 = vmatpush.bf16.msrb.mxu2 %v5655_v63  ;;  %v5275_v24 = vor.u32 %v6763_v49, %v5274_v48  ;;  %v4986_v62 = vld [vmem:[%s8226_s5 + $0xd8] sm:$0xf]  ;;  %v4211_v48 = vpop.f32.mrf.mxu2  ;;  %v4224_v49 = vpop.f32.mrf.mxu3 }
 0x391   : > { %v7102_v55 = vld [vmem:[%s8226_s5 + $0xdd4] sm:$0xf]  ;;  %v6391_v1 = vor.u32 %v7038_v52, %v6388_v54  ;;  %4428 = vmatpush.bf16.msrb.mxu3 %v5911_v53  ;;  %4403 = vmatmul.bf16.vlgmr.msrb.gmra.mxu1 %v8318_v5  ;;  %v5019_v52 = vor.u32 %v6699_v47, %v5018_v46  ;;  %v6691_v63 = vld [vmem:[%s8226_s5 + $0xf4] sm:$0xf0] }
 0x392   : > { %v6644_v58 = vld [vmem:[%s8226_s5 + $0xdf0] sm:$0xf0]  ;;  %v5178_v33 = vld [vmem:[%s8226_s5 + $0x258] sm:$0xf] }
 0x393   : > { %v6647_v3 = vor.u32 %v7102_v55, %v6644_v58  ;;  %v7030_v6 = vld [vmem:[%s8226_s5 + $0xb94] sm:$0xf]  ;;  %4434 = vmatpush.bf16.msra.mxu0 %v6391_v1  ;;  %4416 = vmatmul.bf16.vlgmr.msrb.gmra.mxu2 %v8321_v7  ;;  %v4644_v58 = vadd.f32 %v4184_v51, %v1191_v23  ;;  %v6667_v47 = vld [vmem:[%s8226_s5 + $0x34] sm:$0xf0] }
 0x394   : > { %v6356_v8 = vld [vmem:[%s8226_s5 + $0xbb0] sm:$0xf0]  ;;  %4460 = vmatpush.bf16.msra.mxu2 %v5115_v4  ;;  %4429 = vmatmul.bf16.vlgmr.msrb.gmra.mxu3 %v8391_v41  ;;  %v5146_v23 = vld [vmem:[%s8226_s5 + $0x218] sm:$0xf] }
 0x395   : > { %v7094_v9 = vld [vmem:[%s8226_s5 + $0xd94] sm:$0xf]  ;;  %v6359_v18 = vor.u32 %v7030_v6, %v6356_v8  ;;  %4447 = vmatpush.bf16.msra.mxu1 %v6647_v3  ;;  %4473 = vmatpush.bf16.msra.mxu3 %v5371_v61  ;;  %4652 = vst [vmem:[#allocation2 + $0x18] sm:$0xff] %v4644_v58  ;;  %v4987_v3 = vor.u32 %v6691_v63, %v4986_v62  ;;  %v4954_v61 = vld [vmem:[%s8226_s5 + $0x98] sm:$0xf] }
 0x396   : > { %v6612_v11 = vld [vmem:[%s8226_s5 + $0xdb0] sm:$0xf0]  ;;  %v6731_v27 = vld [vmem:[%s8226_s5 + $0x234] sm:$0xf0] }
 0x397   : > { %v6615_v59 = vor.u32 %v7094_v9, %v6612_v11  ;;  %v7022_v20 = vld [vmem:[%s8226_s5 + $0xb54] sm:$0xf]  ;;  %4435 = vmatpush.bf16.msra.mxu0 %v6359_v18  ;;  %v5243_v9 = vor.u32 %v6755_v0, %v5242_v50  ;;  %v6683_v11 = vld [vmem:[%s8226_s5 + $0xb4] sm:$0xf0]  ;;  %v4185_v18 = vpop.f32.mrf.mxu0  ;;  %v5147_v63 = vor.u32 %v6731_v27, %v5146_v23 }
 0x398   : > { %v6324_v25 = vld [vmem:[%s8226_s5 + $0xb70] sm:$0xf0]  ;;  %4461 = vmatpush.bf16.msra.mxu2 %v5083_v19  ;;  %v5626_v51 = vld [vmem:[%s8226_s5 + $0x5d8] sm:$0xf] }
 0x399   : > { %v7086_v26 = vld [vmem:[%s8226_s5 + $0xd54] sm:$0xf]  ;;  %v6327_v10 = vor.u32 %v7022_v20, %v6324_v25  ;;  %4448 = vmatpush.bf16.msra.mxu1 %v6615_v59  ;;  %4474 = vmatpush.bf16.msra.mxu3 %v5339_v28  ;;  %v4955_v20 = vor.u32 %v6683_v11, %v4954_v61  ;;  %v4198_v28 = vpop.f32.mrf.mxu1  ;;  %v7043_v62 = vld [vmem:[%s8226_s5 + $0xbf4] sm:$0xf0] }
 0x39a   : > { %v6580_v29 = vld [vmem:[%s8226_s5 + $0xd70] sm:$0xf0]  ;;  %v6362_v61 = vld [vmem:[%s8226_s5 + $0xb98] sm:$0xf] }
 0x39b   : > { %v6583_v35 = vor.u32 %v7086_v26, %v6580_v29  ;;  %v7014_v37 = vld [vmem:[%s8226_s5 + $0xb14] sm:$0xf]  ;;  %4436 = vmatpush.bf16.msra.mxu0 %v6327_v10  ;;  %v5211_v29 = vor.u32 %v6747_v17, %v5210_v16  ;;  %v6739_v10 = vld [vmem:[%s8226_s5 + $0x274] sm:$0xf0] }
 0x39c   : > { %v6292_v39 = vld [vmem:[%s8226_s5 + $0xb30] sm:$0xf0]  ;;  %4462 = vmatpush.bf16.msra.mxu2 %v5051_v36  ;;  %v5179_v46 = vor.u32 %v6739_v10, %v5178_v33  ;;  %v7035_v11 = vld [vmem:[%s8226_s5 + $0xbb4] sm:$0xf0] }
 0x39d   : > { %v7078_v40 = vld [vmem:[%s8226_s5 + $0xd14] sm:$0xf]  ;;  %v6295_v45 = vor.u32 %v7014_v37, %v6292_v39  ;;  %4449 = vmatpush.bf16.msra.mxu1 %v6583_v35  ;;  %4475 = vmatpush.bf16.msra.mxu3 %v5307_v43  ;;  %v6074_v28 = vld [vmem:[%s8226_s5 + $0x958] sm:$0xf] }
 0x39e   : > { %v6548_v44 = vld [vmem:[%s8226_s5 + $0xd30] sm:$0xf0]  ;;  %v5530_v10 = vld [vmem:[%s8226_s5 + $0x518] sm:$0xf] }
 0x39f   : > { %v6551_v13 = vor.u32 %v7078_v40, %v6548_v44  ;;  %v7006_v54 = vld [vmem:[%s8226_s5 + $0xad4] sm:$0xf]  ;;  %4437 = vmatpush.bf16.msra.mxu0 %v6295_v45  ;;  %v4923_v40 = vor.u32 %v6675_v32, %v4922_v31  ;;  %v4890_v44 = vld [vmem:[%s8226_s5 + $0x18] sm:$0xf] }
 0x3a0   : > { %v6260_v55 = vld [vmem:[%s8226_s5 + $0xaf0] sm:$0xf0]  ;;  %4463 = vmatpush.bf16.msra.mxu2 %v5019_v52  ;;  %v6851_v45 = vld [vmem:[%s8226_s5 + $0x5f4] sm:$0xf0] }
 0x3a1   : > { %v7070_v56 = vld [vmem:[%s8226_s5 + $0xcd4] sm:$0xf]  ;;  %v6263_v53 = vor.u32 %v7006_v54, %v6260_v55  ;;  %4450 = vmatpush.bf16.msra.mxu1 %v6551_v13  ;;  %4476 = vmatpush.bf16.msra.mxu3 %v5275_v24  ;;  %v5882_v13 = vld [vmem:[%s8226_s5 + $0x7d8] sm:$0xf]  ;;  %v4891_v24 = vor.u32 %v6667_v47, %v4890_v44  ;;  %v5627_v50 = vor.u32 %v6851_v45, %v5626_v51  ;;  %v4248_v45 = vpop.f32.mrf.mxu1 }
 0x3a2   : > { %v6516_v60 = vld [vmem:[%s8226_s5 + $0xcf0] sm:$0xf0]  ;;  %v6915_v54 = vld [vmem:[%s8226_s5 + $0x7f4] sm:$0xf0] }
 0x3a3   : > { %v6519_v1 = vor.u32 %v7070_v56, %v6516_v60  ;;  %v6998_v4 = vld [vmem:[%s8226_s5 + $0xa94] sm:$0xf]  ;;  %4438 = vmatpush.bf16.msra.mxu0 %v6263_v53  ;;  %v6138_v55 = vld [vmem:[%s8226_s5 + $0x9d8] sm:$0xf]  ;;  %v5883_v0 = vor.u32 %v6915_v54, %v5882_v13 }
 0x3a4   : > { %v6228_v6 = vld [vmem:[%s8226_s5 + $0xab0] sm:$0xf0]  ;;  %4464 = vmatpush.bf16.msra.mxu2 %v4987_v3  ;;  %v6979_v56 = vld [vmem:[%s8226_s5 + $0x9f4] sm:$0xf0] }
 0x3a5   : > { %v7062_v8 = vld [vmem:[%s8226_s5 + $0xc94] sm:$0xf]  ;;  %v6231_v59 = vor.u32 %v6998_v4, %v6228_v6  ;;  %4451 = vmatpush.bf16.msra.mxu1 %v6519_v1  ;;  %4477 = vmatpush.bf16.msra.mxu3 %v5243_v9  ;;  %v6394_v60 = vld [vmem:[%s8226_s5 + $0xbd8] sm:$0xf]  ;;  %v6139_v53 = vor.u32 %v6979_v56, %v6138_v55 }
 0x3a6   : > { %v6484_v34 = vld [vmem:[%s8226_s5 + $0xcb0] sm:$0xf0]  ;;  %v5594_v1 = vld [vmem:[%s8226_s5 + $0x598] sm:$0xf]  ;;  %v6395_v6 = vor.u32 %v7043_v62, %v6394_v60 }
 0x3a7   : > { %v6487_v19 = vor.u32 %v7062_v8, %v6484_v34  ;;  %v6990_v25 = vld [vmem:[%s8226_s5 + $0xa54] sm:$0xf]  ;;  %4439 = vmatpush.bf16.msra.mxu0 %v6231_v59  ;;  %v6843_v3 = vld [vmem:[%s8226_s5 + $0x5b4] sm:$0xf0]  ;;  %v4210_v59 = vadd.f32 %v9014_v12, %v9001_v57 }
 0x3a8   : > { %v6196_v26 = vld [vmem:[%s8226_s5 + $0xa70] sm:$0xf0]  ;;  %4465 = vmatpush.bf16.msra.mxu2 %v4955_v20  ;;  %v5850_v4 = vld [vmem:[%s8226_s5 + $0x798] sm:$0xf]  ;;  %v5595_v16 = vor.u32 %v6843_v3, %v5594_v1  ;;  %v4261_v1 = vpop.f32.mrf.mxu2 }
 0x3a9   : > { %v7054_v2 = vld [vmem:[%s8226_s5 + $0xc54] sm:$0xf]  ;;  %v6199_v35 = vor.u32 %v6990_v25, %v6196_v26  ;;  %4452 = vmatpush.bf16.msra.mxu1 %v6487_v19  ;;  %4478 = vmatpush.bf16.msra.mxu3 %v5211_v29  ;;  %v6907_v8 = vld [vmem:[%s8226_s5 + $0x7b4] sm:$0xf0]  ;;  %v6363_v26 = vor.u32 %v7035_v11, %v6362_v61  ;;  %v4223_v12 = vadd.f32 %v9016_v15, %v4210_v59 }
 0x3aa   : > { %v6452_v30 = vld [vmem:[%s8226_s5 + $0xc70] sm:$0xf0]  ;;  %v6106_v9 = vld [vmem:[%s8226_s5 + $0x998] sm:$0xf]  ;;  %v5851_v17 = vor.u32 %v6907_v8, %v5850_v4 }
 0x3ab   : > { %v6982_v36 = vld [vmem:[%s8226_s5 + $0xa14] sm:$0xf]  ;;  %v6455_v39 = vor.u32 %v7054_v2, %v6452_v30  ;;  %4440 = vmatpush.bf16.msra.mxu0 %v6199_v35  ;;  %v6971_v34 = vld [vmem:[%s8226_s5 + $0x9b4] sm:$0xf0] }
 0x3ac   : > { %v6164_v37 = vld [vmem:[%s8226_s5 + $0xa30] sm:$0xf0]  ;;  %4466 = vmatpush.bf16.msra.mxu2 %v4923_v40  ;;  %v6107_v18 = vor.u32 %v6971_v34, %v6106_v9  ;;  %v5562_v19 = vld [vmem:[%s8226_s5 + $0x558] sm:$0xf]  ;;  %v4274_v34 = vpop.f32.mrf.mxu3 }
 0x3ad   : > { %v7046_v14 = vld [vmem:[%s8226_s5 + $0xc14] sm:$0xf]  ;;  %v6167_v52 = vor.u32 %v6982_v36, %v6164_v37  ;;  %4453 = vmatpush.bf16.msra.mxu1 %v6455_v39  ;;  %4479 = vmatpush.bf16.msra.mxu3 %v5179_v46  ;;  %v6835_v20 = vld [vmem:[%s8226_s5 + $0x574] sm:$0xf0]  ;;  %v4235_v46 = vpop.f32.mrf.mxu0 }
 0x3ae   : > { %v6420_v43 = vld [vmem:[%s8226_s5 + $0xc30] sm:$0xf0]  ;;  %v5818_v25 = vld [vmem:[%s8226_s5 + $0x758] sm:$0xf]  ;;  %v5563_v57 = vor.u32 %v6835_v20, %v5562_v19  ;;  %v4236_v51 = vadd.f32 %v4235_v46, %v4223_v12 }
 0x3af   : > { %v6423_v58 = vor.u32 %v7046_v14, %v6420_v43  ;;  %4441 = vmatpush.bf16.msra.mxu0 %v6167_v52  ;;  %v6899_v2 = vld [vmem:[%s8226_s5 + $0x774] sm:$0xf0] }
 0x3b0   : > { %4467 = vmatpush.bf16.msra.mxu2 %v4891_v24  ;;  %v6963_v29 = vld [vmem:[%s8226_s5 + $0x974] sm:$0xf0]  ;;  %v5819_v32 = vor.u32 %v6899_v2, %v5818_v25  ;;  %v4249_v24 = vadd.f32 %v4248_v45, %v4236_v51  ;;  %v6719_v51 = vld [vmem:[%s8226_s5 + $0x1dc] sm:$0xf] }
 0x3b1   : > { %4454 = vmatpush.bf16.msra.mxu1 %v6423_v58  ;;  %4480 = vmatpush.bf16.msra.mxu3 %v5147_v63  ;;  %v6330_v30 = vld [vmem:[%s8226_s5 + $0xb58] sm:$0xf]  ;;  %v6075_v33 = vor.u32 %v6963_v29, %v6074_v28  ;;  %v4250_v28 = vpop.f32.mrf.mxu1 }
 0x3b2   : > { %4442 = vmatmul.bf16.vlgmr.msra.gmra.mxu0 %v8393_v42  ;;  %v7027_v31 = vld [vmem:[%s8226_s5 + $0xb74] sm:$0xf0]  ;;  %v4262_v9 = vadd.f32 %v4261_v1, %v4249_v24  ;;  %v5628_v24 = vld [vmem:[%s8226_s5 + $0x5f8] sm:$0xf0] }
 0x3b3   : > { %4486 = vmatpush.bf16.msrb.mxu0 %v5627_v50  ;;  %4468 = vmatmul.bf16.vlgmr.msra.gmra.mxu2 %v8332_v21  ;;  %v6827_v35 = vld [vmem:[%s8226_s5 + $0x534] sm:$0xf0]  ;;  %v6331_v37 = vor.u32 %v7027_v31, %v6330_v30  ;;  %v6711_v1 = vld [vmem:[%s8226_s5 + $0x19c] sm:$0xf] }
 0x3b4   : > { %4512 = vmatpush.bf16.msrb.mxu2 %v6139_v53  ;;  %4455 = vmatmul.bf16.vlgmr.msra.gmra.mxu1 %v8387_v38  ;;  %v5786_v36 = vld [vmem:[%s8226_s5 + $0x718] sm:$0xf]  ;;  %v5531_v15 = vor.u32 %v6827_v35, %v5530_v10  ;;  %v5564_v28 = vld [vmem:[%s8226_s5 + $0x578] sm:$0xf0] }
 0x3b5   : > { %4499 = vmatpush.bf16.msrb.mxu1 %v5883_v0  ;;  %4525 = vmatpush.bf16.msrb.mxu3 %v6395_v6  ;;  %v6891_v39 = vld [vmem:[%s8226_s5 + $0x734] sm:$0xf0]  ;;  %v4237_v59 = vpop.f32.mrf.mxu0 }
 0x3b6   : > { %4481 = vmatmul.bf16.vlgmr.msra.gmra.mxu3 %v8335_v22  ;;  %v6042_v40 = vld [vmem:[%s8226_s5 + $0x918] sm:$0xf]  ;;  %v5787_v47 = vor.u32 %v6891_v39, %v5786_v36  ;;  %v6703_v59 = vld [vmem:[%s8226_s5 + $0x15c] sm:$0xf] }
 0x3b7   : > { %4487 = vmatpush.bf16.msrb.mxu0 %v5595_v16  ;;  %v6955_v14 = vld [vmem:[%s8226_s5 + $0x934] sm:$0xf0]  ;;  %v1192_v16 = vld [vmem:[#allocation2 + $0x10] sm:$0xff] }
 0x3b8   : > { %4513 = vmatpush.bf16.msrb.mxu2 %v6107_v18  ;;  %v6298_v43 = vld [vmem:[%s8226_s5 + $0xb18] sm:$0xf]  ;;  %v6043_v23 = vor.u32 %v6955_v14, %v6042_v40  ;;  %v4275_v18 = vadd.f32 %v4274_v34, %v4262_v9  ;;  %v6839_v9 = vld [vmem:[%s8226_s5 + $0x59c] sm:$0xf] }
 0x3b9   : > { %4500 = vmatpush.bf16.msrb.mxu1 %v5851_v17  ;;  %4526 = vmatpush.bf16.msrb.mxu3 %v6363_v26  ;;  %v7019_v44 = vld [vmem:[%s8226_s5 + $0xb34] sm:$0xf0]  ;;  %v5596_v34 = vld [vmem:[%s8226_s5 + $0x5b8] sm:$0xf0] }
 0x3ba   : > { %v5498_v27 = vld [vmem:[%s8226_s5 + $0x4d8] sm:$0xf]  ;;  %v6299_v13 = vor.u32 %v7019_v44, %v6298_v43  ;;  %v4645_v30 = vadd.f32 %v4275_v18, %v1192_v16  ;;  %v4263_v44 = vpop.f32.mrf.mxu2 }
 0x3bb   : > { %4488 = vmatpush.bf16.msrb.mxu0 %v5563_v57  ;;  %v6819_v48 = vld [vmem:[%s8226_s5 + $0x4f4] sm:$0xf0] }
 0x3bc   : > { %4514 = vmatpush.bf16.msrb.mxu2 %v6075_v33  ;;  %v5754_v49 = vld [vmem:[%s8226_s5 + $0x6d8] sm:$0xf]  ;;  %v5499_v60 = vor.u32 %v6819_v48, %v5498_v27  ;;  %4653 = vst [vmem:[#allocation2 + $0x10] sm:$0xff] %v4645_v30  ;;  %v4276_v27 = vpop.f32.mrf.mxu3 }
 0x3bd   : > { %4501 = vmatpush.bf16.msrb.mxu1 %v5819_v32  ;;  %4527 = vmatpush.bf16.msrb.mxu3 %v6331_v37  ;;  %v6883_v52 = vld [vmem:[%s8226_s5 + $0x6f4] sm:$0xf0] }
 0x3be   : > { %v6010_v54 = vld [vmem:[%s8226_s5 + $0x8d8] sm:$0xf]  ;;  %v5755_v62 = vor.u32 %v6883_v52, %v5754_v49  ;;  %v6783_v52 = vld [vmem:[%s8226_s5 + $0x3dc] sm:$0xf] }
 0x3bf   : > { %v6947_v55 = vld [vmem:[%s8226_s5 + $0x8f4] sm:$0xf0]  ;;  %4489 = vmatpush.bf16.msrb.mxu0 %v5531_v15 }
 0x3c0   : > { %v6266_v56 = vld [vmem:[%s8226_s5 + $0xad8] sm:$0xf]  ;;  %4515 = vmatpush.bf16.msrb.mxu2 %v6043_v23  ;;  %v6011_v63 = vor.u32 %v6947_v55, %v6010_v54  ;;  %v5372_v54 = vld [vmem:[%s8226_s5 + $0x3f8] sm:$0xf0] }
 0x3c1   : > { %v7011_v58 = vld [vmem:[%s8226_s5 + $0xaf4] sm:$0xf0]  ;;  %4502 = vmatpush.bf16.msrb.mxu1 %v5787_v47  ;;  %4528 = vmatpush.bf16.msrb.mxu3 %v6299_v13  ;;  %v5116_v13 = vld [vmem:[%s8226_s5 + $0x1f8] sm:$0xf0] }
 0x3c2   : > { %v5466_v50 = vld [vmem:[%s8226_s5 + $0x498] sm:$0xf]  ;;  %v6267_v3 = vor.u32 %v7011_v58, %v6266_v56  ;;  %v6847_v58 = vld [vmem:[%s8226_s5 + $0x5dc] sm:$0xf] }
 0x3c3   : > { %v6811_v0 = vld [vmem:[%s8226_s5 + $0x4b4] sm:$0xf0]  ;;  %4490 = vmatpush.bf16.msrb.mxu0 %v5499_v60 }
 0x3c4   : > { %v5722_v53 = vld [vmem:[%s8226_s5 + $0x698] sm:$0xf]  ;;  %v5467_v17 = vor.u32 %v6811_v0, %v5466_v50  ;;  %4516 = vmatpush.bf16.msrb.mxu2 %v6011_v63  ;;  %v5119_v63 = vor.u32 %v6719_v51, %v5116_v13  ;;  %v5375_v50 = vor.u32 %v6783_v52, %v5372_v54  ;;  %v5244_v51 = vld [vmem:[%s8226_s5 + $0x2f8] sm:$0xf0] }
 0x3c5   : > { %v6875_v4 = vld [vmem:[%s8226_s5 + $0x6b4] sm:$0xf0]  ;;  %4503 = vmatpush.bf16.msrb.mxu1 %v5755_v62  ;;  %4529 = vmatpush.bf16.msrb.mxu3 %v6267_v3  ;;  %v5631_v3 = vor.u32 %v6847_v58, %v5628_v24  ;;  %v5500_v13 = vld [vmem:[%s8226_s5 + $0x4f8] sm:$0xf0] }
 0x3c6   : > { %v5978_v6 = vld [vmem:[%s8226_s5 + $0x898] sm:$0xf]  ;;  %v5723_v19 = vor.u32 %v6875_v4, %v5722_v53  ;;  %v5084_v4 = vld [vmem:[%s8226_s5 + $0x1b8] sm:$0xf0] }
 0x3c7   : > { %v6939_v8 = vld [vmem:[%s8226_s5 + $0x8b4] sm:$0xf0]  ;;  %4491 = vmatpush.bf16.msrb.mxu0 %v5467_v17  ;;  %v6679_v24 = vld [vmem:[%s8226_s5 + $0x9c] sm:$0xf] }
 0x3c8   : > { %v6234_v61 = vld [vmem:[%s8226_s5 + $0xa98] sm:$0xf]  ;;  %v5979_v20 = vor.u32 %v6939_v8, %v5978_v6  ;;  %v6775_v6 = vld [vmem:[%s8226_s5 + $0x39c] sm:$0xf] }
 0x3c9   : > { %v7003_v11 = vld [vmem:[%s8226_s5 + $0xab4] sm:$0xf0]  ;;  %4504 = vmatpush.bf16.msrb.mxu1 %v5723_v19  ;;  %v5340_v8 = vld [vmem:[%s8226_s5 + $0x3b8] sm:$0xf0]  ;;  %v5599_v19 = vor.u32 %v6839_v9, %v5596_v34 }
 0x3ca   : > { %v5434_v25 = vld [vmem:[%s8226_s5 + $0x458] sm:$0xf]  ;;  %v6235_v29 = vor.u32 %v7003_v11, %v6234_v61  ;;  %4517 = vmatpush.bf16.msrb.mxu2 %v5979_v20  ;;  %v5087_v11 = vor.u32 %v6711_v1, %v5084_v4  ;;  %v5343_v16 = vor.u32 %v6775_v6, %v5340_v8  ;;  %v5052_v20 = vld [vmem:[%s8226_s5 + $0x178] sm:$0xf0] }
 0x3cb   : > { %v6803_v26 = vld [vmem:[%s8226_s5 + $0x474] sm:$0xf0]  ;;  %v5055_v30 = vor.u32 %v6703_v59, %v5052_v20  ;;  %v6807_v1 = vld [vmem:[%s8226_s5 + $0x49c] sm:$0xf] }
 0x3cc   : > { %v5690_v2 = vld [vmem:[%s8226_s5 + $0x658] sm:$0xf]  ;;  %v5435_v10 = vor.u32 %v6803_v26, %v5434_v25  ;;  %4530 = vmatpush.bf16.msrb.mxu3 %v6235_v29  ;;  %v6767_v25 = vld [vmem:[%s8226_s5 + $0x35c] sm:$0xf] }
 0x3cd   : > { %v6867_v31 = vld [vmem:[%s8226_s5 + $0x674] sm:$0xf0]  ;;  %v5308_v26 = vld [vmem:[%s8226_s5 + $0x378] sm:$0xf0] }
 0x3ce   : > { %v5946_v57 = vld [vmem:[%s8226_s5 + $0x858] sm:$0xf]  ;;  %v5691_v37 = vor.u32 %v6867_v31, %v5690_v2  ;;  %4492 = vmatpush.bf16.msrb.mxu0 %v5435_v10  ;;  %v6831_v2 = vld [vmem:[%s8226_s5 + $0x55c] sm:$0xf]  ;;  %v5311_v31 = vor.u32 %v6767_v25, %v5308_v26 }
 0x3cf   : > { %v6931_v12 = vld [vmem:[%s8226_s5 + $0x874] sm:$0xf0]  ;;  %v5020_v10 = vld [vmem:[%s8226_s5 + $0x138] sm:$0xf0] }
 0x3d0   : > { %v6202_v32 = vld [vmem:[%s8226_s5 + $0xa58] sm:$0xf]  ;;  %v5947_v39 = vor.u32 %v6931_v12, %v5946_v57  ;;  %4505 = vmatpush.bf16.msrb.mxu1 %v5691_v37  ;;  %v6823_v37 = vld [vmem:[%s8226_s5 + $0x51c] sm:$0xf] }
 0x3d1   : > { %v6995_v33 = vld [vmem:[%s8226_s5 + $0xa74] sm:$0xf0]  ;;  %v6735_v59 = vld [vmem:[%s8226_s5 + $0x25c] sm:$0xf] }
 0x3d2   : > { %v5402_v35 = vld [vmem:[%s8226_s5 + $0x418] sm:$0xf]  ;;  %v6203_v15 = vor.u32 %v6995_v33, %v6202_v32  ;;  %4518 = vmatpush.bf16.msrb.mxu2 %v5947_v39  ;;  %v6695_v32 = vld [vmem:[%s8226_s5 + $0x11c] sm:$0xf]  ;;  %v5567_v33 = vor.u32 %v6831_v2, %v5564_v28 }
 0x3d3   : > { %v6795_v36 = vld [vmem:[%s8226_s5 + $0x434] sm:$0xf0]  ;;  %v5532_v39 = vld [vmem:[%s8226_s5 + $0x538] sm:$0xf0] }
 0x3d4   : > { %v5658_v40 = vld [vmem:[%s8226_s5 + $0x618] sm:$0xf]  ;;  %v5403_v45 = vor.u32 %v6795_v36, %v5402_v35  ;;  %4531 = vmatpush.bf16.msrb.mxu3 %v6203_v15  ;;  %v6759_v35 = vld [vmem:[%s8226_s5 + $0x31c] sm:$0xf]  ;;  %v5535_v27 = vor.u32 %v6823_v37, %v5532_v39 }
 0x3d5   : > { %v6859_v14 = vld [vmem:[%s8226_s5 + $0x634] sm:$0xf0]  ;;  %v5276_v36 = vld [vmem:[%s8226_s5 + $0x338] sm:$0xf0] }
 0x3d6   : > { %v5914_v43 = vld [vmem:[%s8226_s5 + $0x818] sm:$0xf]  ;;  %v5659_v55 = vor.u32 %v6859_v14, %v5658_v40  ;;  %4493 = vmatpush.bf16.msrb.mxu0 %v5403_v45  ;;  %v9143_v14 = vpop.f32.mrf.mxu0  ;;  %v5279_v44 = vor.u32 %v6759_v35, %v5276_v36  ;;  %v6815_v45 = vld [vmem:[%s8226_s5 + $0x4dc] sm:$0xf] }
 0x3d7   : > { %v6923_v46 = vld [vmem:[%s8226_s5 + $0x834] sm:$0xf0]  ;;  %v6799_v20 = vld [vmem:[%s8226_s5 + $0x45c] sm:$0xf] }
 0x3d8   : > { %v6170_v47 = vld [vmem:[%s8226_s5 + $0xa18] sm:$0xf]  ;;  %v5915_v56 = vor.u32 %v6923_v46, %v5914_v43  ;;  %4506 = vmatpush.bf16.msrb.mxu1 %v5659_v55  ;;  %v5023_v43 = vor.u32 %v6695_v32, %v5020_v10  ;;  %v5436_v25 = vld [vmem:[%s8226_s5 + $0x478] sm:$0xf0] }
 0x3d9   : > { %v6987_v23 = vld [vmem:[%s8226_s5 + $0xa34] sm:$0xf0]  ;;  %4494 = vmatmul.bf16.vlgmr.msrb.gmra.mxu0 %v8318_v5  ;;  %v5148_v10 = vld [vmem:[%s8226_s5 + $0x238] sm:$0xf0] }
 0x3da   : > { %v6650_v48 = vld [vmem:[%s8226_s5 + $0xdd8] sm:$0xf]  ;;  %v6171_v60 = vor.u32 %v6987_v23, %v6170_v47  ;;  %4519 = vmatpush.bf16.msrb.mxu2 %v5915_v56  ;;  %v6687_v47 = vld [vmem:[%s8226_s5 + $0xdc] sm:$0xf]  ;;  %v9148_v23 = vpop.f32.mrf.mxu1 }
 0x3db   : > { %v7107_v49 = vld [vmem:[%s8226_s5 + $0xdf4] sm:$0xf0]  ;;  %4507 = vmatmul.bf16.vlgmr.msrb.gmra.mxu1 %v8321_v7  ;;  %v6791_v35 = vld [vmem:[%s8226_s5 + $0x41c] sm:$0xf] }
 0x3dc   : > { %v6651_v62 = vor.u32 %v7107_v49, %v6650_v48  ;;  %v6618_v0 = vld [vmem:[%s8226_s5 + $0xd98] sm:$0xf]  ;;  %4532 = vmatpush.bf16.msrb.mxu3 %v6171_v60  ;;  %4551 = vmatpush.bf16.msra.mxu1 %v5119_v63  ;;  %v4988_v48 = vld [vmem:[%s8226_s5 + $0xf8] sm:$0xf0]  ;;  %v9158_v60 = vpop.f32.mrf.mxu2 }
 0x3dd   : > { %v7099_v53 = vld [vmem:[%s8226_s5 + $0xdb4] sm:$0xf0]  ;;  %4520 = vmatmul.bf16.vlgmr.msrb.gmra.mxu2 %v8391_v41  ;;  %v6751_v49 = vld [vmem:[%s8226_s5 + $0x2dc] sm:$0xf]  ;;  %v4991_v54 = vor.u32 %v6687_v47, %v4988_v48 }
 0x3de   : > { %4538 = vmatpush.bf16.msra.mxu0 %v6651_v62  ;;  %v6619_v61 = vor.u32 %v7099_v53, %v6618_v0  ;;  %4564 = vmatpush.bf16.msra.mxu2 %v5375_v50  ;;  %v6586_v17 = vld [vmem:[%s8226_s5 + $0xd58] sm:$0xf]  ;;  %v5247_v55 = vor.u32 %v6751_v49, %v5244_v51  ;;  %v5503_v62 = vor.u32 %v6815_v45, %v5500_v13  ;;  %v4956_v63 = vld [vmem:[%s8226_s5 + $0xb8] sm:$0xf0]  ;;  %v9163_v53 = vpop.f32.mrf.mxu3  ;;  %v4289_v6 = vpop.f32.mrf.mxu0 }
 0x3df   : > { %v7091_v18 = vld [vmem:[%s8226_s5 + $0xd74] sm:$0xf0]  ;;  %4533 = vmatmul.bf16.vlgmr.msrb.gmra.mxu3 %v8393_v42  ;;  %v6743_v50 = vld [vmem:[%s8226_s5 + $0x29c] sm:$0xf]  ;;  %v4959_v8 = vor.u32 %v6679_v24, %v4956_v63 }
 0x3e0   : > { %4577 = vmatpush.bf16.msra.mxu3 %v5631_v3  ;;  %v6587_v29 = vor.u32 %v7091_v18, %v6586_v17  ;;  %4552 = vmatpush.bf16.msra.mxu1 %v5087_v11  ;;  %v6554_v57 = vld [vmem:[%s8226_s5 + $0xd18] sm:$0xf]  ;;  %v5212_v0 = vld [vmem:[%s8226_s5 + $0x2b8] sm:$0xf0] }
 0x3e1   : > { %v7083_v12 = vld [vmem:[%s8226_s5 + $0xd34] sm:$0xf0]  ;;  %v5468_v3 = vld [vmem:[%s8226_s5 + $0x4b8] sm:$0xf0]  ;;  %v5215_v9 = vor.u32 %v6743_v50, %v5212_v0 }
 0x3e2   : > { %4539 = vmatpush.bf16.msra.mxu0 %v6619_v61  ;;  %4565 = vmatpush.bf16.msra.mxu2 %v5343_v16  ;;  %v6555_v40 = vor.u32 %v7083_v12, %v6554_v57  ;;  %v6522_v15 = vld [vmem:[%s8226_s5 + $0xcd8] sm:$0xf]  ;;  %v6671_v11 = vld [vmem:[%s8226_s5 + $0x5c] sm:$0xf]  ;;  %v4302_v16 = vpop.f32.mrf.mxu1  ;;  %v5471_v17 = vor.u32 %v6807_v1, %v5468_v3 }
 0x3e3   : > { %v7075_v46 = vld [vmem:[%s8226_s5 + $0xcf4] sm:$0xf0]  ;;  %v4924_v18 = vld [vmem:[%s8226_s5 + $0x78] sm:$0xf0] }
 0x3e4   : > { %4578 = vmatpush.bf16.msra.mxu3 %v5599_v19  ;;  %4553 = vmatpush.bf16.msra.mxu1 %v5055_v30  ;;  %v6523_v52 = vor.u32 %v7075_v46, %v6522_v15  ;;  %v6490_v56 = vld [vmem:[%s8226_s5 + $0xc98] sm:$0xf]  ;;  %v5180_v19 = vld [vmem:[%s8226_s5 + $0x278] sm:$0xf0]  ;;  %v4315_v32 = vpop.f32.mrf.mxu2 }
 0x3e5   : > { %v7067_v58 = vld [vmem:[%s8226_s5 + $0xcb4] sm:$0xf0]  ;;  %v5183_v30 = vor.u32 %v6735_v59, %v5180_v19  ;;  %v4892_v57 = vld [vmem:[%s8226_s5 + $0x38] sm:$0xf0] }
 0x3e6   : > { %4540 = vmatpush.bf16.msra.mxu0 %v6587_v29  ;;  %4566 = vmatpush.bf16.msra.mxu2 %v5311_v31  ;;  %v6491_v4 = vor.u32 %v7067_v58, %v6490_v56  ;;  %v6458_v34 = vld [vmem:[%s8226_s5 + $0xc58] sm:$0xf]  ;;  %v4927_v29 = vor.u32 %v6671_v11, %v4924_v18  ;;  %v6663_v31 = vld [vmem:[%s8226_s5 + $0x1c] sm:$0xf]  ;;  %v4328_v37 = vpop.f32.mrf.mxu3 }
 0x3e7   : > { %v7059_v61 = vld [vmem:[%s8226_s5 + $0xc74] sm:$0xf0]  ;;  %v6727_v12 = vld [vmem:[%s8226_s5 + $0x21c] sm:$0xf] }
 0x3e8   : > { %4579 = vmatpush.bf16.msra.mxu3 %v5567_v33  ;;  %4554 = vmatpush.bf16.msra.mxu1 %v5023_v43  ;;  %v6459_v26 = vor.u32 %v7059_v61, %v6458_v34  ;;  %v6426_v2 = vld [vmem:[%s8226_s5 + $0xc18] sm:$0xf]  ;;  %v5439_v33 = vor.u32 %v6799_v20, %v5436_v25  ;;  %v5404_v36 = vld [vmem:[%s8226_s5 + $0x438] sm:$0xf0]  ;;  %v5151_v48 = vor.u32 %v6727_v12, %v5148_v10 }
 0x3e9   : > { %v7051_v28 = vld [vmem:[%s8226_s5 + $0xc34] sm:$0xf0]  ;;  %v6911_v39 = vld [vmem:[%s8226_s5 + $0x7dc] sm:$0xf]  ;;  %v5407_v45 = vor.u32 %v6791_v35, %v5404_v36 }
 0x3ea   : > { %4541 = vmatpush.bf16.msra.mxu0 %v6555_v40  ;;  %4567 = vmatpush.bf16.msra.mxu2 %v5279_v44  ;;  %v5884_v40 = vld [vmem:[%s8226_s5 + $0x7f8] sm:$0xf0]  ;;  %v6427_v44 = vor.u32 %v7051_v28, %v6426_v2 }
 0x3eb   : > { %v6975_v43 = vld [vmem:[%s8226_s5 + $0x9dc] sm:$0xf]  ;;  %v5887_v13 = vor.u32 %v6911_v39, %v5884_v40 }
 0x3ec   : > { %4580 = vmatpush.bf16.msra.mxu3 %v5535_v27  ;;  %4555 = vmatpush.bf16.msra.mxu1 %v4991_v54  ;;  %v6140_v15 = vld [vmem:[%s8226_s5 + $0x9f8] sm:$0xf0]  ;;  %v4895_v27 = vor.u32 %v6663_v31, %v4892_v57  ;;  %v4339_v57 = vpop.f32.mrf.mxu0 }
 0x3ed   : > { %v7039_v46 = vld [vmem:[%s8226_s5 + $0xbdc] sm:$0xf] }
 0x3ee   : > { %4542 = vmatpush.bf16.msra.mxu0 %v6523_v52  ;;  %4568 = vmatpush.bf16.msra.mxu2 %v5247_v55  ;;  %v6396_v47 = vld [vmem:[%s8226_s5 + $0xbf8] sm:$0xf0]  ;;  %v6143_v52 = vor.u32 %v6975_v43, %v6140_v15  ;;  %v4301_v55 = vadd.f32 %v9148_v23, %v9143_v14  ;;  %v4352_v12 = vpop.f32.mrf.mxu1 }
 0x3ef   : > { %v7103_v49 = vld [vmem:[%s8226_s5 + $0xddc] sm:$0xf]  ;;  %v6399_v54 = vor.u32 %v7039_v46, %v6396_v47 }
 0x3f0   : > { %4581 = vmatpush.bf16.msra.mxu3 %v5503_v62  ;;  %4556 = vmatpush.bf16.msra.mxu1 %v4959_v8  ;;  %v6652_v51 = vld [vmem:[%s8226_s5 + $0xdf8] sm:$0xf0]  ;;  %v4314_v6 = vadd.f32 %v9158_v60, %v4301_v55 }
 0x3f1   : > { %v6903_v56 = vld [vmem:[%s8226_s5 + $0x79c] sm:$0xf]  ;;  %v6655_v62 = vor.u32 %v7103_v49, %v6652_v51 }
 0x3f2   : > { %4543 = vmatpush.bf16.msra.mxu0 %v6491_v4  ;;  %4569 = vmatpush.bf16.msra.mxu2 %v5215_v9  ;;  %v5852_v58 = vld [vmem:[%s8226_s5 + $0x7b8] sm:$0xf0]  ;;  %v4327_v19 = vadd.f32 %v9163_v53, %v4314_v6 }
 0x3f3   : > { %v6967_v24 = vld [vmem:[%s8226_s5 + $0x99c] sm:$0xf]  ;;  %v5855_v14 = vor.u32 %v6903_v56, %v5852_v58 }
 0x3f4   : > { %4582 = vmatpush.bf16.msra.mxu3 %v5471_v17  ;;  %4557 = vmatpush.bf16.msra.mxu1 %v4927_v29  ;;  %v6108_v63 = vld [vmem:[%s8226_s5 + $0x9b8] sm:$0xf0]  ;;  %v4340_v37 = vadd.f32 %v4339_v57, %v4327_v19 }
 0x3f5   : > { %v7031_v50 = vld [vmem:[%s8226_s5 + $0xb9c] sm:$0xf]  ;;  %v6111_v23 = vor.u32 %v6967_v24, %v6108_v63 }
 0x3f6   : > { %4544 = vmatpush.bf16.msra.mxu0 %v6459_v26  ;;  %4570 = vmatpush.bf16.msra.mxu2 %v5183_v30  ;;  %v6364_v0 = vld [vmem:[%s8226_s5 + $0xbb8] sm:$0xf0]  ;;  %v4353_v47 = vadd.f32 %v4352_v12, %v4340_v37 }
 0x3f7   : > { %v7095_v1 = vld [vmem:[%s8226_s5 + $0xd9c] sm:$0xf]  ;;  %v6367_v4 = vor.u32 %v7031_v50, %v6364_v0  ;;  %v9239_v0 = vpop.f32.mrf.mxu3 }
 0x3f8   : > { %4583 = vmatpush.bf16.msra.mxu3 %v5439_v33  ;;  %4558 = vmatpush.bf16.msra.mxu1 %v4895_v27  ;;  %v6620_v3 = vld [vmem:[%s8226_s5 + $0xdb8] sm:$0xf0] }
 0x3f9   : > { %v6895_v8 = vld [vmem:[%s8226_s5 + $0x75c] sm:$0xf]  ;;  %v6623_v61 = vor.u32 %v7095_v1, %v6620_v3 }
 0x3fa   : > { %4545 = vmatpush.bf16.msra.mxu0 %v6427_v44  ;;  %4571 = vmatpush.bf16.msra.mxu2 %v5151_v48  ;;  %v5820_v9 = vld [vmem:[%s8226_s5 + $0x778] sm:$0xf0] }
 0x3fb   : > { %v6959_v34 = vld [vmem:[%s8226_s5 + $0x95c] sm:$0xf]  ;;  %v5823_v59 = vor.u32 %v6895_v8, %v5820_v9  ;;  %4559 = vmatmul.bf16.vlgmr.msra.gmra.mxu1 %v8332_v21 }
 0x3fc   : > { %4584 = vmatpush.bf16.msra.mxu3 %v5407_v45  ;;  %4603 = vmatpush.bf16.msrb.mxu1 %v6143_v52  ;;  %v6076_v11 = vld [vmem:[%s8226_s5 + $0x978] sm:$0xf0]  ;;  %v1193_v52 = vld [vmem:[#allocation2 + $0x8] sm:$0xff] }
 0x3fd   : > { %4546 = vmatmul.bf16.vlgmr.msra.gmra.mxu0 %v8387_v38  ;;  %v7023_v16 = vld [vmem:[%s8226_s5 + $0xb5c] sm:$0xf]  ;;  %4572 = vmatmul.bf16.vlgmr.msra.gmra.mxu2 %v8335_v22  ;;  %v6079_v20 = vor.u32 %v6959_v34, %v6076_v11 }
 0x3fe   : > { %4590 = vmatpush.bf16.msrb.mxu0 %v5887_v13  ;;  %4616 = vmatpush.bf16.msrb.mxu2 %v6399_v54  ;;  %v6332_v17 = vld [vmem:[%s8226_s5 + $0xb78] sm:$0xf0]  ;;  %v4365_v54 = vpop.f32.mrf.mxu2 }
 0x3ff   : > { %4585 = vmatmul.bf16.vlgmr.msra.gmra.mxu3 %v8318_v5  ;;  %v7087_v18 = vld [vmem:[%s8226_s5 + $0xd5c] sm:$0xf]  ;;  %v6335_v25 = vor.u32 %v7023_v16, %v6332_v17 }
 0x400   : > { %4629 = vmatpush.bf16.msrb.mxu3 %v6655_v62  ;;  %v6588_v60 = vld [vmem:[%s8226_s5 + $0xd78] sm:$0xf0]  ;;  %4604 = vmatpush.bf16.msrb.mxu1 %v6111_v23  ;;  %v4366_v62 = vadd.f32 %v4365_v54, %v4353_v47  ;;  %v4341_v23 = vpop.f32.mrf.mxu0 }
 0x401   : > { %v6887_v22 = vld [vmem:[%s8226_s5 + $0x71c] sm:$0xf]  ;;  %v6591_v2 = vor.u32 %v7087_v18, %v6588_v60 }
 0x402   : > { %4591 = vmatpush.bf16.msrb.mxu0 %v5855_v14  ;;  %4617 = vmatpush.bf16.msrb.mxu2 %v6367_v4  ;;  %v5788_v26 = vld [vmem:[%s8226_s5 + $0x738] sm:$0xf0]  ;;  %v4646_v3 = vadd.f32 %v4366_v62, %v1193_v52  ;;  %v4354_v4 = vpop.f32.mrf.mxu1 }
 0x403   : > { %v6951_v5 = vld [vmem:[%s8226_s5 + $0x91c] sm:$0xf]  ;;  %v5791_v53 = vor.u32 %v6887_v22, %v5788_v26 }
 0x404   : > { %4630 = vmatpush.bf16.msrb.mxu3 %v6623_v61  ;;  %v6044_v28 = vld [vmem:[%s8226_s5 + $0x938] sm:$0xf0]  ;;  %4605 = vmatpush.bf16.msrb.mxu1 %v6079_v20  ;;  %4654 = vst [vmem:[#allocation2 + $0x8] sm:$0xff] %v4646_v3 }
 0x405   : > { %v7015_v29 = vld [vmem:[%s8226_s5 + $0xb1c] sm:$0xf]  ;;  %v6047_v32 = vor.u32 %v6951_v5, %v6044_v28 }
 0x406   : > { %v6300_v30 = vld [vmem:[%s8226_s5 + $0xb38] sm:$0xf0]  ;;  %4592 = vmatpush.bf16.msrb.mxu0 %v5823_v59  ;;  %4618 = vmatpush.bf16.msrb.mxu2 %v6335_v25  ;;  %v4367_v5 = vpop.f32.mrf.mxu2 }
 0x407   : > { %v7079_v31 = vld [vmem:[%s8226_s5 + $0xd1c] sm:$0xf]  ;;  %v6303_v33 = vor.u32 %v7015_v29, %v6300_v30 }
 0x408   : > { %v6556_v21 = vld [vmem:[%s8226_s5 + $0xd38] sm:$0xf0]  ;;  %4631 = vmatpush.bf16.msrb.mxu3 %v6591_v2  ;;  %4606 = vmatpush.bf16.msrb.mxu1 %v6047_v32 }
 0x409   : > { %v6879_v10 = vld [vmem:[%s8226_s5 + $0x6dc] sm:$0xf]  ;;  %v6559_v39 = vor.u32 %v7079_v31, %v6556_v21 }
 0x40a   : > { %v5756_v35 = vld [vmem:[%s8226_s5 + $0x6f8] sm:$0xf0]  ;;  %4593 = vmatpush.bf16.msrb.mxu0 %v5791_v53  ;;  %4619 = vmatpush.bf16.msrb.mxu2 %v6303_v33  ;;  %v4380_v53 = vpop.f32.mrf.mxu3 }
 0x40b   : > { %v6943_v36 = vld [vmem:[%s8226_s5 + $0x8dc] sm:$0xf]  ;;  %v5759_v27 = vor.u32 %v6879_v10, %v5756_v35 }
 0x40c   : > { %v6012_v40 = vld [vmem:[%s8226_s5 + $0x8f8] sm:$0xf0]  ;;  %4632 = vmatpush.bf16.msrb.mxu3 %v6559_v39  ;;  %v4391_v10 = vpop.f32.mrf.mxu0 }
 0x40d   : > { %v7007_v43 = vld [vmem:[%s8226_s5 + $0xadc] sm:$0xf]  ;;  %v6015_v49 = vor.u32 %v6943_v36, %v6012_v40 }
 0x40e   : > { %v6268_v44 = vld [vmem:[%s8226_s5 + $0xaf8] sm:$0xf0]  ;;  %4594 = vmatpush.bf16.msrb.mxu0 %v5759_v27  ;;  %v4404_v35 = vpop.f32.mrf.mxu1 }
 0x40f   : > { %v7071_v15 = vld [vmem:[%s8226_s5 + $0xcdc] sm:$0xf]  ;;  %v6271_v51 = vor.u32 %v7007_v43, %v6268_v44  ;;  %4607 = vmatpush.bf16.msrb.mxu1 %v6015_v49  ;;  %v1194_v49 = vld [vmem:[#allocation2 + $0x20] sm:$0xff] }
 0x410   : > { %v6524_v46 = vld [vmem:[%s8226_s5 + $0xcf8] sm:$0xf0] }
 0x411   : > { %v6871_v48 = vld [vmem:[%s8226_s5 + $0x69c] sm:$0xf]  ;;  %v6527_v55 = vor.u32 %v7071_v15, %v6524_v46  ;;  %4620 = vmatpush.bf16.msrb.mxu2 %v6271_v51  ;;  %v4392_v15 = vadd.f32 %v4391_v10, %v9239_v0 }
 0x412   : > { %v5724_v45 = vld [vmem:[%s8226_s5 + $0x6b8] sm:$0xf0] }
 0x413   : > { %v6935_v13 = vld [vmem:[%s8226_s5 + $0x89c] sm:$0xf]  ;;  %v5727_v1 = vor.u32 %v6871_v48, %v5724_v45  ;;  %4633 = vmatpush.bf16.msrb.mxu3 %v6527_v55  ;;  %v4405_v46 = vadd.f32 %v4404_v35, %v4392_v15 }
 0x414   : > { %v5980_v56 = vld [vmem:[%s8226_s5 + $0x8b8] sm:$0xf0]  ;;  %v4393_v39 = vpop.f32.mrf.mxu0 }
 0x415   : > { %v6999_v58 = vld [vmem:[%s8226_s5 + $0xa9c] sm:$0xf]  ;;  %v5983_v6 = vor.u32 %v6935_v13, %v5980_v56  ;;  %4595 = vmatpush.bf16.msrb.mxu0 %v5727_v1 }
 0x416   : > { %v6236_v24 = vld [vmem:[%s8226_s5 + $0xab8] sm:$0xf0]  ;;  %v4417_v36 = vpop.f32.mrf.mxu2  ;;  %v4406_v40 = vpop.f32.mrf.mxu1 }
 0x417   : > { %v7063_v63 = vld [vmem:[%s8226_s5 + $0xc9c] sm:$0xf]  ;;  %v6239_v8 = vor.u32 %v6999_v58, %v6236_v24  ;;  %4608 = vmatpush.bf16.msrb.mxu1 %v5983_v6  ;;  %v4430_v37 = vpop.f32.mrf.mxu3  ;;  %v4418_v47 = vadd.f32 %v4417_v36, %v4405_v46 }
 0x418   : > { %v6492_v50 = vld [vmem:[%s8226_s5 + $0xcb8] sm:$0xf0] }
 0x419   : > { %v6863_v14 = vld [vmem:[%s8226_s5 + $0x65c] sm:$0xf]  ;;  %v6495_v11 = vor.u32 %v7063_v63, %v6492_v50  ;;  %4621 = vmatpush.bf16.msrb.mxu2 %v6239_v8  ;;  %v4431_v27 = vadd.f32 %v4430_v37, %v4418_v47  ;;  %v1195_v8 = vld [vmem:[#allocation2 + $0x28] sm:$0xff] }
 0x41a   : > { %v5692_v9 = vld [vmem:[%s8226_s5 + $0x678] sm:$0xf0] }
 0x41b   : > { %v6927_v34 = vld [vmem:[%s8226_s5 + $0x85c] sm:$0xf]  ;;  %v5695_v59 = vor.u32 %v6863_v14, %v5692_v9  ;;  %4634 = vmatpush.bf16.msrb.mxu3 %v6495_v11 }
 0x41c   : > { %v5948_v61 = vld [vmem:[%s8226_s5 + $0x878] sm:$0xf0] }
 0x41d   : > { %v6991_v16 = vld [vmem:[%s8226_s5 + $0xa5c] sm:$0xf]  ;;  %v5951_v19 = vor.u32 %v6927_v34, %v5948_v61  ;;  %4596 = vmatpush.bf16.msrb.mxu0 %v5695_v59 }
 0x41e   : > { %v6204_v17 = vld [vmem:[%s8226_s5 + $0xa78] sm:$0xf0]  ;;  %v4419_v43 = vpop.f32.mrf.mxu2 }
 0x41f   : > { %v7055_v18 = vld [vmem:[%s8226_s5 + $0xc5c] sm:$0xf]  ;;  %v6207_v20 = vor.u32 %v6991_v16, %v6204_v17  ;;  %4609 = vmatpush.bf16.msrb.mxu1 %v5951_v19  ;;  %v4432_v44 = vpop.f32.mrf.mxu3 }
 0x420   : > { %v6460_v60 = vld [vmem:[%s8226_s5 + $0xc78] sm:$0xf0] }
 0x421   : > { %v6855_v25 = vld [vmem:[%s8226_s5 + $0x61c] sm:$0xf]  ;;  %v6463_v2 = vor.u32 %v7055_v18, %v6460_v60  ;;  %4622 = vmatpush.bf16.msrb.mxu2 %v6207_v20 }
 0x422   : > { %v5660_v22 = vld [vmem:[%s8226_s5 + $0x638] sm:$0xf0] }
 0x423   : > { %v6919_v26 = vld [vmem:[%s8226_s5 + $0x81c] sm:$0xf]  ;;  %v5663_v57 = vor.u32 %v6855_v25, %v5660_v22  ;;  %4635 = vmatpush.bf16.msrb.mxu3 %v6463_v2 }
 0x424   : > { %v5916_v28 = vld [vmem:[%s8226_s5 + $0x838] sm:$0xf0] }
 0x425   : > { %v6983_v29 = vld [vmem:[%s8226_s5 + $0xa1c] sm:$0xf]  ;;  %v5919_v12 = vor.u32 %v6919_v26, %v5916_v28  ;;  %4597 = vmatpush.bf16.msrb.mxu0 %v5663_v57 }
 0x426   : > { %v6172_v30 = vld [vmem:[%s8226_s5 + $0xa38] sm:$0xf0] }
 0x427   : > { %v7047_v31 = vld [vmem:[%s8226_s5 + $0xc1c] sm:$0xf]  ;;  %v6175_v32 = vor.u32 %v6983_v29, %v6172_v30  ;;  %4610 = vmatpush.bf16.msrb.mxu1 %v5919_v12 }
 0x428   : > { %v6428_v21 = vld [vmem:[%s8226_s5 + $0xc38] sm:$0xf0]  ;;  %4598 = vmatmul.bf16.vlgmr.msrb.gmra.mxu0 %v8321_v7 }
 0x429   : > { %v6431_v33 = vor.u32 %v7047_v31, %v6428_v21  ;;  %4623 = vmatpush.bf16.msrb.mxu2 %v6175_v32  ;;  %v1196_v21 = vld [vmem:[#allocation2 + $0x38] sm:$0xff] }
 0x42a   : > { %4611 = vmatmul.bf16.vlgmr.msrb.gmra.mxu1 %v8391_v41 }
 0x42b   : > { %4636 = vmatpush.bf16.msrb.mxu3 %v6431_v33 }
 0x42c   : > { %4624 = vmatmul.bf16.vlgmr.msrb.gmra.mxu2 %v8393_v42 }
 0x42e   : > { %4637 = vmatmul.bf16.vlgmr.msrb.gmra.mxu3 %v8387_v38 }
 0x42f   : > { %v4443_v7 = vpop.f32.mrf.mxu0 }
 0x430   : > { %v4444_v48 = vadd.f32 %v4443_v7, %v4431_v27 }
 0x431   : > { %v4456_v41 = vpop.f32.mrf.mxu1 }
 0x432   : > { %v4457_v42 = vadd.f32 %v4456_v41, %v4444_v48 }
 0x434   : > { %v4647_v51 = vadd.f32 %v4457_v42, %v1194_v49 }
 0x436   : > { %4655 = vst [vmem:[#allocation2 + $0x20] sm:$0xff] %v4647_v51  ;;  %v4469_v38 = vpop.f32.mrf.mxu2 }
 0x437   : > { %v4445_v13 = vpop.f32.mrf.mxu0 }
 0x439   : > { %v4482_v45 = vpop.f32.mrf.mxu3  ;;  %v4458_v52 = vpop.f32.mrf.mxu1 }
 0x43a   : > { %v4483_v0 = vadd.f32 %v4482_v45, %v4469_v38 }
 0x43e   : > { %v4471_v54 = vpop.f32.mrf.mxu2 }
 0x441   : > { %v4484_v55 = vpop.f32.mrf.mxu3 }
 0x456   : > { %v4495_v56 = vpop.f32.mrf.mxu0 }
 0x457   : > { %v4496_v14 = vadd.f32 %v4495_v56, %v4483_v0 }
 0x458   : > { %v4508_v58 = vpop.f32.mrf.mxu1 }
 0x459   : > { %v4509_v23 = vadd.f32 %v4508_v58, %v4496_v14 }
 0x45e   : > { %v4497_v63 = vpop.f32.mrf.mxu0 }
 0x460   : > { %v4521_v24 = vpop.f32.mrf.mxu2  ;;  %v4510_v50 = vpop.f32.mrf.mxu1 }
 0x461   : > { %v4522_v4 = vadd.f32 %v4521_v24, %v4509_v23 }
 0x462   : > { %v4534_v62 = vpop.f32.mrf.mxu3 }
 0x463   : > { %v4535_v6 = vadd.f32 %v4534_v62, %v4522_v4 }
 0x468   : > { %v4523_v1 = vpop.f32.mrf.mxu2 }
 0x46a   : > { %v4536_v3 = vpop.f32.mrf.mxu3 }
 0x478   : > { %v4560_v61 = vpop.f32.mrf.mxu1 }
 0x47a   : > { %v4547_v9 = vpop.f32.mrf.mxu0 }
 0x47b   : > { %v4548_v34 = vadd.f32 %v4547_v9, %v4535_v6 }
 0x47d   : > { %v4648_v11 = vadd.f32 %v4548_v34, %v1195_v8 }
 0x47f   : > { %4656 = vst [vmem:[#allocation2 + $0x28] sm:$0xff] %v4648_v11 }
 0x480   : > { %v4573_v16 = vpop.f32.mrf.mxu2  ;;  %v4562_v60 = vpop.f32.mrf.mxu1 }
 0x481   : > { %v4574_v20 = vadd.f32 %v4573_v16, %v4560_v61 }
 0x482   : > { %v4586_v17 = vpop.f32.mrf.mxu3  ;;  %v4549_v18 = vpop.f32.mrf.mxu0 }
 0x483   : > { %v4587_v25 = vadd.f32 %v4586_v17, %v4574_v20 }
 0x488   : > { %v4575_v59 = vpop.f32.mrf.mxu2 }
 0x48a   : > { %v4588_v19 = vpop.f32.mrf.mxu3 }
 0x4a5   : > { %v4599_v22 = vpop.f32.mrf.mxu0 }
 0x4a6   : > { %v4600_v5 = vadd.f32 %v4599_v22, %v4587_v25 }
 0x4a7   : > { %v4612_v26 = vpop.f32.mrf.mxu1 }
 0x4a8   : > { %v4613_v2 = vadd.f32 %v4612_v26, %v4600_v5 }
 0x4ad   : > { %v4601_v31 = vpop.f32.mrf.mxu0 }
 0x4af   : > { %v4625_v28 = vpop.f32.mrf.mxu2  ;;  %v4614_v53 = vpop.f32.mrf.mxu1 }
 0x4b0   : > { %v4626_v29 = vadd.f32 %v4625_v28, %v4613_v2 }
 0x4b1   : > { %v4638_v30 = vpop.f32.mrf.mxu3 }
 0x4b2   : > { %v4639_v57 = vadd.f32 %v4638_v30, %v4626_v29 }
 0x4b4   : > { %v4649_v12 = vadd.f32 %v4639_v57, %v1196_v21 }
 0x4b5   : > { %4661 = sbr.rel (%p6656_p13) target bundleno = 1226 (0x4ca), region = 63 }
 0x4b6   : > { %4657 = vst [vmem:[#allocation2 + $0x38] sm:$0xff] %v4649_v12 }
 0x4b7   : > { %v4627_v32 = vpop.f32.mrf.mxu2 }
 0x4b9   : > { %v4640_v33 = vpop.f32.mrf.mxu3 }
 0x4ba   : > { %v4662_v10 = vld [vmem:[#allocation2 + $0x30] sm:$0xff]  ;;  %v4670_v35 = vld [vmem:[%s1165_s12] sm:$0xff]  ;;  %v4664_v40 = vld [vmem:[#allocation2 + $0x18] sm:$0xff] }
 0x4bb   : > { %v4663_v36 = vld [vmem:[#allocation2] sm:$0xff]  ;;  %v4672_v37 = vperm.slane %v4670_v35, 0  ;;  %v4673_v39 = vperm.slane %v4670_v35, 1  ;;  %v4674_v43 = vperm.slane %v4670_v35, 2  ;;  %v4665_v44 = vld [vmem:[#allocation2 + $0x10] sm:$0xff]  ;;  %v4675_v15 = vperm.slane %v4670_v35, 3 }
 0x4bc   : > { %v4666_v46 = vld [vmem:[#allocation2 + $0x8] sm:$0xff]  ;;  %v4676_v47 = vperm.slane %v4670_v35, 4  ;;  %v4667_v27 = vld [vmem:[#allocation2 + $0x20] sm:$0xff]  ;;  %v4677_v7 = vperm.slane %v4670_v35, 5  ;;  %v4678_v41 = vperm.slane %v4670_v35, 6  ;;  %v4679_v55 = vperm.slane %v4670_v35, 7 }
 0x4bd   : > { %v4668_v48 = vld [vmem:[#allocation2 + $0x28] sm:$0xff]  ;;  %v4688_v49 = vadd.f32 %v4672_v37, %v4662_v10  ;;  %v4689_v42 = vadd.f32 %v4673_v39, %v4663_v36  ;;  %v4690_v51 = vadd.f32 %v4674_v43, %v4664_v40  ;;  %v4691_v38 = vadd.f32 %v4675_v15, %v4665_v44  ;;  %v4669_v54 = vld [vmem:[#allocation2 + $0x38] sm:$0xff] }
 0x4be   : > { %v4692_v45 = vadd.f32 %v4676_v47, %v4666_v46  ;;  %v4693_v13 = vadd.f32 %v4677_v7, %v4667_v27  ;;  %v4694_v52 = vadd.f32 %v4678_v41, %v4668_v48  ;;  %v4695_v6 = vadd.f32 %v4679_v55, %v4669_v54 }
 0x4bf   : > { %vm4696_vm0 = vcmp.ge.f32.partialorder %v4688_v49, 0.0  ;;  %v4704_v56 = vmul.f32 0.01, %v4688_v49  ;;  %vm4697_vm1 = vcmp.ge.f32.partialorder %v4689_v42, 0.0  ;;  %v4705_v58 = vmul.f32 0.01, %v4689_v42 }
 0x4c0   : > { %vm4698_vm2 = vcmp.ge.f32.partialorder %v4690_v51, 0.0  ;;  %v4706_v24 = vmul.f32 0.01, %v4690_v51  ;;  %vm4699_vm3 = vcmp.ge.f32.partialorder %v4691_v38, 0.0  ;;  %v4707_v62 = vmul.f32 0.01, %v4691_v38 }
 0x4c1   : > { %v4712_v63 = vsel %vm4696_vm0, %v4688_v49, %v4704_v56  ;;  %v4713_v50 = vsel %vm4697_vm1, %v4689_v42, %v4705_v58  ;;  %vm4700_vm4 = vcmp.ge.f32.partialorder %v4692_v45, 0.0  ;;  %v4708_v0 = vmul.f32 0.01, %v4692_v45 }
 0x4c2   : > { %4720 = vst [vmem:[%s8224_s4] sm:$0xff] %v4712_v63  ;;  %v4714_v1 = vsel %vm4698_vm2, %v4690_v51, %v4706_v24  ;;  %v4715_v3 = vsel %vm4699_vm3, %v4691_v38, %v4707_v62  ;;  %vm4701_vm5 = vcmp.ge.f32.partialorder %v4693_v13, 0.0  ;;  %v4709_v14 = vmul.f32 0.01, %v4693_v13 }
 0x4c3   : > { %4721 = vst [vmem:[%s8224_s4 + $0x8] sm:$0xff] %v4713_v50  ;;  %v4716_v23 = vsel %vm4700_vm4, %v4692_v45, %v4708_v0  ;;  %vm4702_vm6 = vcmp.ge.f32.partialorder %v4694_v52, 0.0  ;;  %v4710_v4 = vmul.f32 0.01, %v4694_v52  ;;  %vm4703_vm7 = vcmp.ge.f32.partialorder %v4695_v6, 0.0 }
 0x4c4   : > { %4722 = vst [vmem:[%s8224_s4 + $0x10] sm:$0xff] %v4714_v1  ;;  %v4717_v8 = vsel %vm4701_vm5, %v4693_v13, %v4709_v14  ;;  %v4711_v34 = vmul.f32 0.01, %v4695_v6 }
 0x4c5   : > { %4723 = vst [vmem:[%s8224_s4 + $0x18] sm:$0xff] %v4715_v3  ;;  %v4718_v9 = vsel %vm4702_vm6, %v4694_v52, %v4710_v4 }
 0x4c6   : > { %4724 = vst [vmem:[%s8224_s4 + $0x20] sm:$0xff] %v4716_v23  ;;  %v4719_v61 = vsel %vm4703_vm7, %v4695_v6, %v4711_v34 }
 0x4c7   : > { %4725 = vst [vmem:[%s8224_s4 + $0x28] sm:$0xff] %v4717_v8 }
 0x4c8   : > { %4726 = vst [vmem:[%s8224_s4 + $0x30] sm:$0xff] %v4718_v9 }
 0x4c9   : > { %4727 = vst [vmem:[%s8224_s4 + $0x38] sm:$0xff] %v4719_v61 }
 0x4ca PF: > { %s13_s18 = sadd.s32 1, %s7221_s18   ;;  %s9301_s12 = smov %s7201_s13 }
 0x4cb   : > { %p10_p0 = scmp.ge.s32.totalorder %s13_s18, 22   ;;  %s9302_s13 = smov %s7295_s25 }
 0x4cc   : > { %s9303_s14 = smov %s7213_s16  ;;  %s9304_s15 = smov %s7217_s17 }
 0x4cd   : > { %s9305_s16 = smov %s9308_s19  ;;  %s9306_s17 = smov %s9312_s20 }
 0x4ce   :  { %12 = sbr.rel (!%p10_p0) target bundleno = 4 (0x4), region = 104 }

</bundles_post_ra>
